<compile_context>
chip_gen: v6e
topology: v6e:2x2x1
jax: 0.10.0
libtpu: 0.0.40
codegen_flags: <defaults>
</compile_context>

<pallas_src>
import jax
import jax.numpy as jnp
from jax.experimental import pallas as pl
from jax.experimental.pallas import tpu as pltpu

# ---- model hyperparameters implied by the module ----
BATCH = 2
SEQ = 60          # fc1 expects 64*60 flattened features -> time length is 60
IN_CH = 12
C1 = 32
C2 = 64
KSIZE = 3         # conv1/conv2: kernel_size=3, padding=1 ('same')
SPATIAL_K = 7     # CBAM spatial attention: kernel_size=7, padding=3
REDUCTION = 16
FC1_DIM = 128
OUT_DIM = 2

_VMEM = pl.BlockSpec(memory_space=pltpu.MemorySpace.VMEM)


# ------------------------- in-kernel helpers (operate on values) -------------------------

def _sigmoid(a):
    # EUP exp + approx reciprocal (EUP slot) instead of a VALU divide.
    return pl.reciprocal(1.0 + jnp.exp(-a), approx=True)


def _time_shift(x, shift):
    """(T, C) -> (T, C) with result[t] = x[t - shift], zeros shifted in.

    Realised as a constant 0/1 shift-matrix matmul (exact), which avoids unaligned
    sublane concatenates / rolls / scratch partial-stores.  The (T, T) matmul is tiny.
    """
    n = x.shape[0]
    r = jax.lax.broadcasted_iota(jnp.int32, (n, n), 0)
    c = jax.lax.broadcasted_iota(jnp.int32, (n, n), 1)
    m = (c == r - shift).astype(x.dtype)
    return jnp.dot(m, x, preferred_element_type=jnp.float32)


def _conv1d_same(x, w_packed, bias, k, cout):
    """'same' Conv1d along time.

    x: (T, cin) f32.  w_packed: (cin, k*cout) bf16 where column block j is W_j^T
    (torch weight[:, :, j].T).  Single lane-packed matmul, then per-tap time shifts.
    """
    y = jnp.dot(x.astype(jnp.bfloat16), w_packed,
                preferred_element_type=jnp.float32)            # (T, k*cout)
    half = (k - 1) // 2
    out = bias + y[:, half * cout:(half + 1) * cout]           # center tap, shift 0
    for j in range(k):
        if j != half:
            out = out + _time_shift(y[:, j * cout:(j + 1) * cout], half - j)
    return out


def _channel_attn(v, w1, w2):
    """CBAM channel attention: shared bias-free MLP over avg & max time pools."""
    avg = jnp.mean(v, axis=0, keepdims=True)                   # (1, C)
    mx = jnp.max(v, axis=0, keepdims=True)                     # (1, C)

    def mlp(u):
        h = jnp.maximum(jnp.dot(u, w1, preferred_element_type=jnp.float32), 0.0)
        return jnp.dot(h, w2, preferred_element_type=jnp.float32)

    gate = _sigmoid(mlp(avg) + mlp(mx))                        # (1, C)
    return v * gate


def _spatial_attn(v, w):
    """CBAM spatial attention: k=7 'same' conv over the [avg, max] channel maps.

    w: (2, SPATIAL_K) with w[c, j] = torch_weight[0, c, j]  (c: 0=avg, 1=max).
    """
    avg = jnp.mean(v, axis=1, keepdims=True)                   # (T, 1)
    mx = jnp.max(v, axis=1, keepdims=True)                     # (T, 1)
    s = jnp.concatenate([avg, mx], axis=1)                     # (T, 2)
    q = jnp.dot(s, w, preferred_element_type=jnp.float32)      # (T, SPATIAL_K)
    half = (SPATIAL_K - 1) // 2
    logit = q[:, half:half + 1]                                # center tap
    for j in range(SPATIAL_K):
        if j != half:
            logit = logit + _time_shift(q[:, j:j + 1], half - j)
    return v * _sigmoid(logit)                                 # (T, 1) gate broadcast over lanes


# ------------------------- kernels -------------------------

def cnn_cbam_kernel(x_ref, w1_ref, b1_ref, ca1w1_ref, ca1w2_ref, sa1_ref,
                    w2_ref, b2_ref, ca2w1_ref, ca2w2_ref, sa2_ref, o_ref):
    """Fused conv1+relu+CBAM1+conv2+relu+CBAM2; activations never leave VMEM."""
    B = x_ref.shape[0]
    for b in range(B):                                         # B=2, unrolled
        xb = x_ref[b]                                          # (T, IN_CH) f32
        h = jnp.maximum(_conv1d_same(xb, w1_ref[...], b1_ref[...], KSIZE, C1), 0.0)
        h = _channel_attn(h, ca1w1_ref[...], ca1w2_ref[...])
        h = _spatial_attn(h, sa1_ref[...])

        g = jnp.maximum(_conv1d_same(h, w2_ref[...], b2_ref[...], KSIZE, C2), 0.0)
        g = _channel_attn(g, ca2w1_ref[...], ca2w2_ref[...])
        g = _spatial_attn(g, sa2_ref[...])

        o_ref[b] = g                                           # (T, C2)


def head_kernel(x_ref, w1_ref, b1_ref, w2_ref, b2_ref, o_ref):
    """fc1 -> relu -> fc2 on the flattened CNN output."""
    h = jnp.dot(x_ref[...].astype(jnp.bfloat16), w1_ref[...],
                preferred_element_type=jnp.float32) + b1_ref[...]
    h = jnp.maximum(h, 0.0)
    o_ref[...] = jnp.dot(h.astype(jnp.bfloat16), w2_ref[...],
                         preferred_element_type=jnp.float32) + b2_ref[...]


# ------------------------- parameters -------------------------

def init_params(key):
    ks = iter(jax.random.split(key, 16))

    def w(shape, scale=0.1):
        return (scale * jax.random.normal(next(ks), shape)).astype(jnp.float32)

    def pack_conv(w_torch):
        # torch Conv1d weight (Cout, Cin, K) -> lane-packed (Cin, K*Cout); block j = W_j^T
        cout, cin, k = w_torch.shape
        return jnp.transpose(w_torch, (1, 2, 0)).reshape(cin, k * cout)

    p = {}
    # conv1 / conv2 (weight_norm-free plain Conv1d weights)
    p['w1'] = pack_conv(w((C1, IN_CH, KSIZE))).astype(jnp.bfloat16)
    p['b1'] = w((1, C1))
    p['w2'] = pack_conv(w((C2, C1, KSIZE))).astype(jnp.bfloat16)
    p['b2'] = w((1, C2))
    # CBAM1 (reduction=16 -> hidden 2), CBAM2 (hidden 4)
    p['ca1w1'] = w((C1, C1 // REDUCTION))
    p['ca1w2'] = w((C1 // REDUCTION, C1))
    p['sa1'] = w((1, 2, SPATIAL_K))[0]          # (2, 7) == torch weight[0]
    p['ca2w1'] = w((C2, C2 // REDUCTION))
    p['ca2w2'] = w((C2 // REDUCTION, C2))
    p['sa2'] = w((1, 2, SPATIAL_K))[0]
    # head: torch fc1 weight is (128, C2*T) acting on the NCT flatten (index c*T + t).
    # Reorder rows to (t*C2 + c) so the kernel consumes the (B, T, C) activation with a
    # free trailing-dim reshape instead of an XLA transpose.
    fc1_torch = w((FC1_DIM, C2 * SEQ), scale=0.02)
    p['fc1w'] = (fc1_torch.T.reshape(C2, SEQ, FC1_DIM)
                 .transpose(1, 0, 2).reshape(SEQ * C2, FC1_DIM)).astype(jnp.bfloat16)
    p['fc1b'] = w((1, FC1_DIM))
    p['fc2w'] = w((FC1_DIM, OUT_DIM)).astype(jnp.bfloat16)
    p['fc2b'] = w((1, OUT_DIM))
    return p


# ------------------------- forward -------------------------

def forward(params, x):
    B, T, _ = x.shape

    y = pl.pallas_call(
        cnn_cbam_kernel,
        out_shape=jax.ShapeDtypeStruct((B, T, C2), jnp.float32),
        in_specs=[_VMEM] * 11,
        out_specs=_VMEM,
    )(x, params['w1'], params['b1'], params['ca1w1'], params['ca1w2'], params['sa1'],
      params['w2'], params['b2'], params['ca2w1'], params['ca2w2'], params['sa2'])

    # torch's x.view(B, -1) flattens in (C, T) order; fc1w rows were permuted at init,
    # so this trailing-dim collapse (a free reshape, no transpose) is equivalent.
    flat = y.reshape(B, T * C2)

    out = pl.pallas_call(
        head_kernel,
        out_shape=jax.ShapeDtypeStruct((B, OUT_DIM), jnp.float32),
        in_specs=[_VMEM] * 5,
        out_specs=_VMEM,
    )(flat, params['fc1w'], params['fc1b'], params['fc2w'], params['fc2b'])
    return out


if __name__ == "__main__":
    key = jax.random.PRNGKey(0)
    pkey, xkey = jax.random.split(key)
    params = init_params(pkey)
    x = jax.random.normal(xkey, (BATCH, SEQ, IN_CH), dtype=jnp.float32)

    out = jax.jit(forward)(params, x)
    out = jax.block_until_ready(out)
    assert out.shape == (BATCH, OUT_DIM)
    print("KERNEL_OK")
</pallas_src>

<mosaic_0001>
module attributes {stable_mosaic.version = 11 : i64} {
  func.func @cnn_cbam_kernel(%arg0: memref<2x60x12xf32, #tpu.memory_space<vmem>>, %arg1: memref<12x96xbf16, #tpu.memory_space<vmem>>, %arg2: memref<1x32xf32, #tpu.memory_space<vmem>>, %arg3: memref<32x2xf32, #tpu.memory_space<vmem>>, %arg4: memref<2x32xf32, #tpu.memory_space<vmem>>, %arg5: memref<2x7xf32, #tpu.memory_space<vmem>>, %arg6: memref<32x192xbf16, #tpu.memory_space<vmem>>, %arg7: memref<1x64xf32, #tpu.memory_space<vmem>>, %arg8: memref<64x4xf32, #tpu.memory_space<vmem>>, %arg9: memref<4x64xf32, #tpu.memory_space<vmem>>, %arg10: memref<2x7xf32, #tpu.memory_space<vmem>>, %arg11: memref<2x60x64xf32, #tpu.memory_space<vmem>>) attributes {dimension_semantics = [], scalar_prefetch = 0 : i64, scratch_operands = 0 : i64, tpu.core_type = #tpu.core_type<tc>} {
    %c0 = arith.constant 0 : index
    %c0_0 = arith.constant 0 : index
    %c0_1 = arith.constant 0 : index
    %0 = vector.load %arg0[%c0, %c0_0, %c0_1] : memref<2x60x12xf32, #tpu.memory_space<vmem>>, vector<1x60x12xf32>
    %1 = vector.shape_cast %0 : vector<1x60x12xf32> to vector<60x12xf32>
    %c0_2 = arith.constant 0 : index
    %c0_3 = arith.constant 0 : index
    %2 = vector.load %arg1[%c0_2, %c0_3] : memref<12x96xbf16, #tpu.memory_space<vmem>>, vector<12x96xbf16>
    %c0_4 = arith.constant 0 : index
    %c0_5 = arith.constant 0 : index
    %3 = vector.load %arg2[%c0_4, %c0_5] : memref<1x32xf32, #tpu.memory_space<vmem>>, vector<1x32xf32>
    %4 = arith.truncf %1 : vector<60x12xf32> to vector<60x12xbf16>
    %cst = arith.constant dense<0.000000e+00> : vector<60x96xf32>
    %5 = tpu.matmul %4, %2, %cst {dimension_numbers = #tpu.dot_dimension_numbers<[1], [0], [0], [1], [0, 0, 1, 1], [], []>} : vector<60x12xbf16>, vector<12x96xbf16>, vector<60x96xf32> -> vector<60x96xf32>
    %6 = vector.extract_strided_slice %5 {offsets = [0, 32], sizes = [60, 32], strides = [1, 1]} : vector<60x96xf32> to vector<60x32xf32>
    %7 = vector.broadcast %3 : vector<1x32xf32> to vector<60x32xf32>
    %8 = arith.addf %7, %6 : vector<60x32xf32>
    %9 = vector.extract_strided_slice %5 {offsets = [0, 0], sizes = [60, 32], strides = [1, 1]} : vector<60x96xf32> to vector<60x32xf32>
    %10 = tpu.iota {dimensions = array<i32: 0>} : vector<60x60xi32>
    %11 = tpu.iota {dimensions = array<i32: 1>} : vector<60x60xi32>
    %c1_i32 = arith.constant 1 : i32
    %12 = vector.broadcast %c1_i32 : i32 to vector<60x60xi32>
    %13 = arith.subi %10, %12 : vector<60x60xi32>
    %14 = arith.cmpi eq, %11, %13 : vector<60x60xi32>
    %15 = arith.extui %14 : vector<60x60xi1> to vector<60x60xi32>
    %16 = arith.sitofp %15 : vector<60x60xi32> to vector<60x60xf32>
    %cst_6 = arith.constant dense<0.000000e+00> : vector<60x32xf32>
    %17 = tpu.matmul %16, %9, %cst_6 {dimension_numbers = #tpu.dot_dimension_numbers<[1], [0], [0], [1], [0, 0, 1, 1], [], []>} : vector<60x60xf32>, vector<60x32xf32>, vector<60x32xf32> -> vector<60x32xf32>
    %18 = arith.addf %8, %17 : vector<60x32xf32>
    %19 = vector.extract_strided_slice %5 {offsets = [0, 64], sizes = [60, 32], strides = [1, 1]} : vector<60x96xf32> to vector<60x32xf32>
    %20 = tpu.iota {dimensions = array<i32: 0>} : vector<60x60xi32>
    %21 = tpu.iota {dimensions = array<i32: 1>} : vector<60x60xi32>
    %c-1_i32 = arith.constant -1 : i32
    %22 = vector.broadcast %c-1_i32 : i32 to vector<60x60xi32>
    %23 = arith.subi %20, %22 : vector<60x60xi32>
    %24 = arith.cmpi eq, %21, %23 : vector<60x60xi32>
    %25 = arith.extui %24 : vector<60x60xi1> to vector<60x60xi32>
    %26 = arith.sitofp %25 : vector<60x60xi32> to vector<60x60xf32>
    %cst_7 = arith.constant dense<0.000000e+00> : vector<60x32xf32>
    %27 = tpu.matmul %26, %19, %cst_7 {dimension_numbers = #tpu.dot_dimension_numbers<[1], [0], [0], [1], [0, 0, 1, 1], [], []>} : vector<60x60xf32>, vector<60x32xf32>, vector<60x32xf32> -> vector<60x32xf32>
    %28 = arith.addf %18, %27 : vector<60x32xf32>
    %cst_8 = arith.constant 0.000000e+00 : f32
    %29 = vector.broadcast %cst_8 : f32 to vector<60x32xf32>
    %30 = arith.maximumf %28, %29 : vector<60x32xf32>
    %c0_9 = arith.constant 0 : index
    %c0_10 = arith.constant 0 : index
    %31 = vector.load %arg3[%c0_9, %c0_10] : memref<32x2xf32, #tpu.memory_space<vmem>>, vector<32x2xf32>
    %c0_11 = arith.constant 0 : index
    %c0_12 = arith.constant 0 : index
    %32 = vector.load %arg4[%c0_11, %c0_12] : memref<2x32xf32, #tpu.memory_space<vmem>>, vector<2x32xf32>
    %cst_13 = arith.constant dense<0.000000e+00> : vector<32xf32>
    %33 = vector.multi_reduction <add>, %30, %cst_13 [0] : vector<60x32xf32> to vector<32xf32>
    %34 = vector.shape_cast %33 : vector<32xf32> to vector<1x32xf32>
    %cst_14 = arith.constant 6.000000e+01 : f32
    %35 = vector.broadcast %cst_14 : f32 to vector<1x32xf32>
    %36 = arith.divf %34, %35 : vector<1x32xf32>
    %cst_15 = arith.constant dense<0xFF800000> : vector<32xf32>
    %37 = vector.multi_reduction <maximumf>, %30, %cst_15 [0] : vector<60x32xf32> to vector<32xf32>
    %38 = vector.shape_cast %37 : vector<32xf32> to vector<1x32xf32>
    %cst_16 = arith.constant dense<0.000000e+00> : vector<1x2xf32>
    %39 = tpu.matmul %36, %31, %cst_16 {dimension_numbers = #tpu.dot_dimension_numbers<[1], [0], [0], [1], [0, 0, 1, 1], [], []>} : vector<1x32xf32>, vector<32x2xf32>, vector<1x2xf32> -> vector<1x2xf32>
    %cst_17 = arith.constant 0.000000e+00 : f32
    %40 = vector.broadcast %cst_17 : f32 to vector<1x2xf32>
    %41 = arith.maximumf %39, %40 : vector<1x2xf32>
    %cst_18 = arith.constant dense<0.000000e+00> : vector<1x32xf32>
    %42 = tpu.matmul %41, %32, %cst_18 {dimension_numbers = #tpu.dot_dimension_numbers<[1], [0], [0], [1], [0, 0, 1, 1], [], []>} : vector<1x2xf32>, vector<2x32xf32>, vector<1x32xf32> -> vector<1x32xf32>
    %cst_19 = arith.constant dense<0.000000e+00> : vector<1x2xf32>
    %43 = tpu.matmul %38, %31, %cst_19 {dimension_numbers = #tpu.dot_dimension_numbers<[1], [0], [0], [1], [0, 0, 1, 1], [], []>} : vector<1x32xf32>, vector<32x2xf32>, vector<1x2xf32> -> vector<1x2xf32>
    %cst_20 = arith.constant 0.000000e+00 : f32
    %44 = vector.broadcast %cst_20 : f32 to vector<1x2xf32>
    %45 = arith.maximumf %43, %44 : vector<1x2xf32>
    %cst_21 = arith.constant dense<0.000000e+00> : vector<1x32xf32>
    %46 = tpu.matmul %45, %32, %cst_21 {dimension_numbers = #tpu.dot_dimension_numbers<[1], [0], [0], [1], [0, 0, 1, 1], [], []>} : vector<1x2xf32>, vector<2x32xf32>, vector<1x32xf32> -> vector<1x32xf32>
    %47 = arith.addf %42, %46 : vector<1x32xf32>
    %cst_22 = arith.constant 0.000000e+00 : f32
    %48 = vector.broadcast %cst_22 : f32 to vector<1x32xf32>
    %49 = arith.subf %48, %47 : vector<1x32xf32>
    %50 = math.exp %49 : vector<1x32xf32>
    %cst_23 = arith.constant 1.000000e+00 : f32
    %51 = vector.broadcast %cst_23 : f32 to vector<1x32xf32>
    %52 = arith.addf %51, %50 : vector<1x32xf32>
    %53 = tpu.reciprocal %52 {approx = true} : vector<1x32xf32> -> vector<1x32xf32>
    %54 = vector.broadcast %53 : vector<1x32xf32> to vector<60x32xf32>
    %55 = arith.mulf %30, %54 : vector<60x32xf32>
    %c0_24 = arith.constant 0 : index
    %c0_25 = arith.constant 0 : index
    %56 = vector.load %arg5[%c0_24, %c0_25] : memref<2x7xf32, #tpu.memory_space<vmem>>, vector<2x7xf32>
    %cst_26 = arith.constant dense<0.000000e+00> : vector<60xf32>
    %57 = vector.multi_reduction <add>, %55, %cst_26 [1] : vector<60x32xf32> to vector<60xf32>
    %58 = vector.shape_cast %57 : vector<60xf32> to vector<60x1xf32>
    %cst_27 = arith.constant 3.200000e+01 : f32
    %59 = vector.broadcast %cst_27 : f32 to vector<60x1xf32>
    %60 = arith.divf %58, %59 : vector<60x1xf32>
    %cst_28 = arith.constant dense<0xFF800000> : vector<60xf32>
    %61 = vector.multi_reduction <maximumf>, %55, %cst_28 [1] : vector<60x32xf32> to vector<60xf32>
    %62 = vector.shape_cast %61 : vector<60xf32> to vector<60x1xf32>
    %63 = tpu.concatenate %60, %62 in 1 : vector<60x1xf32>, vector<60x1xf32> -> vector<60x2xf32>
    %cst_29 = arith.constant dense<0.000000e+00> : vector<60x7xf32>
    %64 = tpu.matmul %63, %56, %cst_29 {dimension_numbers = #tpu.dot_dimension_numbers<[1], [0], [0], [1], [0, 0, 1, 1], [], []>} : vector<60x2xf32>, vector<2x7xf32>, vector<60x7xf32> -> vector<60x7xf32>
    %65 = vector.extract_strided_slice %64 {offsets = [0, 3], sizes = [60, 1], strides = [1, 1]} : vector<60x7xf32> to vector<60x1xf32>
    %66 = vector.extract_strided_slice %64 {offsets = [0, 0], sizes = [60, 1], strides = [1, 1]} : vector<60x7xf32> to vector<60x1xf32>
    %67 = tpu.iota {dimensions = array<i32: 0>} : vector<60x60xi32>
    %68 = tpu.iota {dimensions = array<i32: 1>} : vector<60x60xi32>
    %c3_i32 = arith.constant 3 : i32
    %69 = vector.broadcast %c3_i32 : i32 to vector<60x60xi32>
    %70 = arith.subi %67, %69 : vector<60x60xi32>
    %71 = arith.cmpi eq, %68, %70 : vector<60x60xi32>
    %72 = arith.extui %71 : vector<60x60xi1> to vector<60x60xi32>
    %73 = arith.sitofp %72 : vector<60x60xi32> to vector<60x60xf32>
    %cst_30 = arith.constant dense<0.000000e+00> : vector<60x1xf32>
    %74 = tpu.matmul %73, %66, %cst_30 {dimension_numbers = #tpu.dot_dimension_numbers<[1], [0], [0], [1], [0, 0, 1, 1], [], []>} : vector<60x60xf32>, vector<60x1xf32>, vector<60x1xf32> -> vector<60x1xf32>
    %75 = arith.addf %65, %74 : vector<60x1xf32>
    %76 = vector.extract_strided_slice %64 {offsets = [0, 1], sizes = [60, 1], strides = [1, 1]} : vector<60x7xf32> to vector<60x1xf32>
    %77 = tpu.iota {dimensions = array<i32: 0>} : vector<60x60xi32>
    %78 = tpu.iota {dimensions = array<i32: 1>} : vector<60x60xi32>
    %c2_i32 = arith.constant 2 : i32
    %79 = vector.broadcast %c2_i32 : i32 to vector<60x60xi32>
    %80 = arith.subi %77, %79 : vector<60x60xi32>
    %81 = arith.cmpi eq, %78, %80 : vector<60x60xi32>
    %82 = arith.extui %81 : vector<60x60xi1> to vector<60x60xi32>
    %83 = arith.sitofp %82 : vector<60x60xi32> to vector<60x60xf32>
    %cst_31 = arith.constant dense<0.000000e+00> : vector<60x1xf32>
    %84 = tpu.matmul %83, %76, %cst_31 {dimension_numbers = #tpu.dot_dimension_numbers<[1], [0], [0], [1], [0, 0, 1, 1], [], []>} : vector<60x60xf32>, vector<60x1xf32>, vector<60x1xf32> -> vector<60x1xf32>
    %85 = arith.addf %75, %84 : vector<60x1xf32>
    %86 = vector.extract_strided_slice %64 {offsets = [0, 2], sizes = [60, 1], strides = [1, 1]} : vector<60x7xf32> to vector<60x1xf32>
    %87 = tpu.iota {dimensions = array<i32: 0>} : vector<60x60xi32>
    %88 = tpu.iota {dimensions = array<i32: 1>} : vector<60x60xi32>
    %c1_i32_32 = arith.constant 1 : i32
    %89 = vector.broadcast %c1_i32_32 : i32 to vector<60x60xi32>
    %90 = arith.subi %87, %89 : vector<60x60xi32>
    %91 = arith.cmpi eq, %88, %90 : vector<60x60xi32>
    %92 = arith.extui %91 : vector<60x60xi1> to vector<60x60xi32>
    %93 = arith.sitofp %92 : vector<60x60xi32> to vector<60x60xf32>
    %cst_33 = arith.constant dense<0.000000e+00> : vector<60x1xf32>
    %94 = tpu.matmul %93, %86, %cst_33 {dimension_numbers = #tpu.dot_dimension_numbers<[1], [0], [0], [1], [0, 0, 1, 1], [], []>} : vector<60x60xf32>, vector<60x1xf32>, vector<60x1xf32> -> vector<60x1xf32>
    %95 = arith.addf %85, %94 : vector<60x1xf32>
    %96 = vector.extract_strided_slice %64 {offsets = [0, 4], sizes = [60, 1], strides = [1, 1]} : vector<60x7xf32> to vector<60x1xf32>
    %97 = tpu.iota {dimensions = array<i32: 0>} : vector<60x60xi32>
    %98 = tpu.iota {dimensions = array<i32: 1>} : vector<60x60xi32>
    %c-1_i32_34 = arith.constant -1 : i32
    %99 = vector.broadcast %c-1_i32_34 : i32 to vector<60x60xi32>
    %100 = arith.subi %97, %99 : vector<60x60xi32>
    %101 = arith.cmpi eq, %98, %100 : vector<60x60xi32>
    %102 = arith.extui %101 : vector<60x60xi1> to vector<60x60xi32>
    %103 = arith.sitofp %102 : vector<60x60xi32> to vector<60x60xf32>
    %cst_35 = arith.constant dense<0.000000e+00> : vector<60x1xf32>
    %104 = tpu.matmul %103, %96, %cst_35 {dimension_numbers = #tpu.dot_dimension_numbers<[1], [0], [0], [1], [0, 0, 1, 1], [], []>} : vector<60x60xf32>, vector<60x1xf32>, vector<60x1xf32> -> vector<60x1xf32>
    %105 = arith.addf %95, %104 : vector<60x1xf32>
    %106 = vector.extract_strided_slice %64 {offsets = [0, 5], sizes = [60, 1], strides = [1, 1]} : vector<60x7xf32> to vector<60x1xf32>
    %107 = tpu.iota {dimensions = array<i32: 0>} : vector<60x60xi32>
    %108 = tpu.iota {dimensions = array<i32: 1>} : vector<60x60xi32>
    %c-2_i32 = arith.constant -2 : i32
    %109 = vector.broadcast %c-2_i32 : i32 to vector<60x60xi32>
    %110 = arith.subi %107, %109 : vector<60x60xi32>
    %111 = arith.cmpi eq, %108, %110 : vector<60x60xi32>
    %112 = arith.extui %111 : vector<60x60xi1> to vector<60x60xi32>
    %113 = arith.sitofp %112 : vector<60x60xi32> to vector<60x60xf32>
    %cst_36 = arith.constant dense<0.000000e+00> : vector<60x1xf32>
    %114 = tpu.matmul %113, %106, %cst_36 {dimension_numbers = #tpu.dot_dimension_numbers<[1], [0], [0], [1], [0, 0, 1, 1], [], []>} : vector<60x60xf32>, vector<60x1xf32>, vector<60x1xf32> -> vector<60x1xf32>
    %115 = arith.addf %105, %114 : vector<60x1xf32>
    %116 = vector.extract_strided_slice %64 {offsets = [0, 6], sizes = [60, 1], strides = [1, 1]} : vector<60x7xf32> to vector<60x1xf32>
    %117 = tpu.iota {dimensions = array<i32: 0>} : vector<60x60xi32>
    %118 = tpu.iota {dimensions = array<i32: 1>} : vector<60x60xi32>
    %c-3_i32 = arith.constant -3 : i32
    %119 = vector.broadcast %c-3_i32 : i32 to vector<60x60xi32>
    %120 = arith.subi %117, %119 : vector<60x60xi32>
    %121 = arith.cmpi eq, %118, %120 : vector<60x60xi32>
    %122 = arith.extui %121 : vector<60x60xi1> to vector<60x60xi32>
    %123 = arith.sitofp %122 : vector<60x60xi32> to vector<60x60xf32>
    %cst_37 = arith.constant dense<0.000000e+00> : vector<60x1xf32>
    %124 = tpu.matmul %123, %116, %cst_37 {dimension_numbers = #tpu.dot_dimension_numbers<[1], [0], [0], [1], [0, 0, 1, 1], [], []>} : vector<60x60xf32>, vector<60x1xf32>, vector<60x1xf32> -> vector<60x1xf32>
    %125 = arith.addf %115, %124 : vector<60x1xf32>
    %cst_38 = arith.constant 0.000000e+00 : f32
    %126 = vector.broadcast %cst_38 : f32 to vector<60x1xf32>
    %127 = arith.subf %126, %125 : vector<60x1xf32>
    %128 = math.exp %127 : vector<60x1xf32>
    %cst_39 = arith.constant 1.000000e+00 : f32
    %129 = vector.broadcast %cst_39 : f32 to vector<60x1xf32>
    %130 = arith.addf %129, %128 : vector<60x1xf32>
    %131 = tpu.reciprocal %130 {approx = true} : vector<60x1xf32> -> vector<60x1xf32>
    %132 = vector.broadcast %131 : vector<60x1xf32> to vector<60x32xf32>
    %133 = arith.mulf %55, %132 : vector<60x32xf32>
    %c0_40 = arith.constant 0 : index
    %c0_41 = arith.constant 0 : index
    %134 = vector.load %arg6[%c0_40, %c0_41] : memref<32x192xbf16, #tpu.memory_space<vmem>>, vector<32x192xbf16>
    %c0_42 = arith.constant 0 : index
    %c0_43 = arith.constant 0 : index
    %135 = vector.load %arg7[%c0_42, %c0_43] : memref<1x64xf32, #tpu.memory_space<vmem>>, vector<1x64xf32>
    %136 = arith.truncf %133 : vector<60x32xf32> to vector<60x32xbf16>
    %cst_44 = arith.constant dense<0.000000e+00> : vector<60x192xf32>
    %137 = tpu.matmul %136, %134, %cst_44 {dimension_numbers = #tpu.dot_dimension_numbers<[1], [0], [0], [1], [0, 0, 1, 1], [], []>} : vector<60x32xbf16>, vector<32x192xbf16>, vector<60x192xf32> -> vector<60x192xf32>
    %138 = vector.extract_strided_slice %137 {offsets = [0, 64], sizes = [60, 64], strides = [1, 1]} : vector<60x192xf32> to vector<60x64xf32>
    %139 = vector.broadcast %135 : vector<1x64xf32> to vector<60x64xf32>
    %140 = arith.addf %139, %138 : vector<60x64xf32>
    %141 = vector.extract_strided_slice %137 {offsets = [0, 0], sizes = [60, 64], strides = [1, 1]} : vector<60x192xf32> to vector<60x64xf32>
    %142 = tpu.iota {dimensions = array<i32: 0>} : vector<60x60xi32>
    %143 = tpu.iota {dimensions = array<i32: 1>} : vector<60x60xi32>
    %c1_i32_45 = arith.constant 1 : i32
    %144 = vector.broadcast %c1_i32_45 : i32 to vector<60x60xi32>
    %145 = arith.subi %142, %144 : vector<60x60xi32>
    %146 = arith.cmpi eq, %143, %145 : vector<60x60xi32>
    %147 = arith.extui %146 : vector<60x60xi1> to vector<60x60xi32>
    %148 = arith.sitofp %147 : vector<60x60xi32> to vector<60x60xf32>
    %cst_46 = arith.constant dense<0.000000e+00> : vector<60x64xf32>
    %149 = tpu.matmul %148, %141, %cst_46 {dimension_numbers = #tpu.dot_dimension_numbers<[1], [0], [0], [1], [0, 0, 1, 1], [], []>} : vector<60x60xf32>, vector<60x64xf32>, vector<60x64xf32> -> vector<60x64xf32>
    %150 = arith.addf %140, %149 : vector<60x64xf32>
    %151 = vector.extract_strided_slice %137 {offsets = [0, 128], sizes = [60, 64], strides = [1, 1]} : vector<60x192xf32> to vector<60x64xf32>
    %152 = tpu.iota {dimensions = array<i32: 0>} : vector<60x60xi32>
    %153 = tpu.iota {dimensions = array<i32: 1>} : vector<60x60xi32>
    %c-1_i32_47 = arith.constant -1 : i32
    %154 = vector.broadcast %c-1_i32_47 : i32 to vector<60x60xi32>
    %155 = arith.subi %152, %154 : vector<60x60xi32>
    %156 = arith.cmpi eq, %153, %155 : vector<60x60xi32>
    %157 = arith.extui %156 : vector<60x60xi1> to vector<60x60xi32>
    %158 = arith.sitofp %157 : vector<60x60xi32> to vector<60x60xf32>
    %cst_48 = arith.constant dense<0.000000e+00> : vector<60x64xf32>
    %159 = tpu.matmul %158, %151, %cst_48 {dimension_numbers = #tpu.dot_dimension_numbers<[1], [0], [0], [1], [0, 0, 1, 1], [], []>} : vector<60x60xf32>, vector<60x64xf32>, vector<60x64xf32> -> vector<60x64xf32>
    %160 = arith.addf %150, %159 : vector<60x64xf32>
    %cst_49 = arith.constant 0.000000e+00 : f32
    %161 = vector.broadcast %cst_49 : f32 to vector<60x64xf32>
    %162 = arith.maximumf %160, %161 : vector<60x64xf32>
    %c0_50 = arith.constant 0 : index
    %c0_51 = arith.constant 0 : index
    %163 = vector.load %arg8[%c0_50, %c0_51] : memref<64x4xf32, #tpu.memory_space<vmem>>, vector<64x4xf32>
    %c0_52 = arith.constant 0 : index
    %c0_53 = arith.constant 0 : index
    %164 = vector.load %arg9[%c0_52, %c0_53] : memref<4x64xf32, #tpu.memory_space<vmem>>, vector<4x64xf32>
    %cst_54 = arith.constant dense<0.000000e+00> : vector<64xf32>
    %165 = vector.multi_reduction <add>, %162, %cst_54 [0] : vector<60x64xf32> to vector<64xf32>
    %166 = vector.shape_cast %165 : vector<64xf32> to vector<1x64xf32>
    %cst_55 = arith.constant 6.000000e+01 : f32
    %167 = vector.broadcast %cst_55 : f32 to vector<1x64xf32>
    %168 = arith.divf %166, %167 : vector<1x64xf32>
    %cst_56 = arith.constant dense<0xFF800000> : vector<64xf32>
    %169 = vector.multi_reduction <maximumf>, %162, %cst_56 [0] : vector<60x64xf32> to vector<64xf32>
    %170 = vector.shape_cast %169 : vector<64xf32> to vector<1x64xf32>
    %cst_57 = arith.constant dense<0.000000e+00> : vector<1x4xf32>
    %171 = tpu.matmul %168, %163, %cst_57 {dimension_numbers = #tpu.dot_dimension_numbers<[1], [0], [0], [1], [0, 0, 1, 1], [], []>} : vector<1x64xf32>, vector<64x4xf32>, vector<1x4xf32> -> vector<1x4xf32>
    %cst_58 = arith.constant 0.000000e+00 : f32
    %172 = vector.broadcast %cst_58 : f32 to vector<1x4xf32>
    %173 = arith.maximumf %171, %172 : vector<1x4xf32>
    %cst_59 = arith.constant dense<0.000000e+00> : vector<1x64xf32>
    %174 = tpu.matmul %173, %164, %cst_59 {dimension_numbers = #tpu.dot_dimension_numbers<[1], [0], [0], [1], [0, 0, 1, 1], [], []>} : vector<1x4xf32>, vector<4x64xf32>, vector<1x64xf32> -> vector<1x64xf32>
    %cst_60 = arith.constant dense<0.000000e+00> : vector<1x4xf32>
    %175 = tpu.matmul %170, %163, %cst_60 {dimension_numbers = #tpu.dot_dimension_numbers<[1], [0], [0], [1], [0, 0, 1, 1], [], []>} : vector<1x64xf32>, vector<64x4xf32>, vector<1x4xf32> -> vector<1x4xf32>
    %cst_61 = arith.constant 0.000000e+00 : f32
    %176 = vector.broadcast %cst_61 : f32 to vector<1x4xf32>
    %177 = arith.maximumf %175, %176 : vector<1x4xf32>
    %cst_62 = arith.constant dense<0.000000e+00> : vector<1x64xf32>
    %178 = tpu.matmul %177, %164, %cst_62 {dimension_numbers = #tpu.dot_dimension_numbers<[1], [0], [0], [1], [0, 0, 1, 1], [], []>} : vector<1x4xf32>, vector<4x64xf32>, vector<1x64xf32> -> vector<1x64xf32>
    %179 = arith.addf %174, %178 : vector<1x64xf32>
    %cst_63 = arith.constant 0.000000e+00 : f32
    %180 = vector.broadcast %cst_63 : f32 to vector<1x64xf32>
    %181 = arith.subf %180, %179 : vector<1x64xf32>
    %182 = math.exp %181 : vector<1x64xf32>
    %cst_64 = arith.constant 1.000000e+00 : f32
    %183 = vector.broadcast %cst_64 : f32 to vector<1x64xf32>
    %184 = arith.addf %183, %182 : vector<1x64xf32>
    %185 = tpu.reciprocal %184 {approx = true} : vector<1x64xf32> -> vector<1x64xf32>
    %186 = vector.broadcast %185 : vector<1x64xf32> to vector<60x64xf32>
    %187 = arith.mulf %162, %186 : vector<60x64xf32>
    %c0_65 = arith.constant 0 : index
    %c0_66 = arith.constant 0 : index
    %188 = vector.load %arg10[%c0_65, %c0_66] : memref<2x7xf32, #tpu.memory_space<vmem>>, vector<2x7xf32>
    %cst_67 = arith.constant dense<0.000000e+00> : vector<60xf32>
    %189 = vector.multi_reduction <add>, %187, %cst_67 [1] : vector<60x64xf32> to vector<60xf32>
    %190 = vector.shape_cast %189 : vector<60xf32> to vector<60x1xf32>
    %cst_68 = arith.constant 6.400000e+01 : f32
    %191 = vector.broadcast %cst_68 : f32 to vector<60x1xf32>
    %192 = arith.divf %190, %191 : vector<60x1xf32>
    %cst_69 = arith.constant dense<0xFF800000> : vector<60xf32>
    %193 = vector.multi_reduction <maximumf>, %187, %cst_69 [1] : vector<60x64xf32> to vector<60xf32>
    %194 = vector.shape_cast %193 : vector<60xf32> to vector<60x1xf32>
    %195 = tpu.concatenate %192, %194 in 1 : vector<60x1xf32>, vector<60x1xf32> -> vector<60x2xf32>
    %cst_70 = arith.constant dense<0.000000e+00> : vector<60x7xf32>
    %196 = tpu.matmul %195, %188, %cst_70 {dimension_numbers = #tpu.dot_dimension_numbers<[1], [0], [0], [1], [0, 0, 1, 1], [], []>} : vector<60x2xf32>, vector<2x7xf32>, vector<60x7xf32> -> vector<60x7xf32>
    %197 = vector.extract_strided_slice %196 {offsets = [0, 3], sizes = [60, 1], strides = [1, 1]} : vector<60x7xf32> to vector<60x1xf32>
    %198 = vector.extract_strided_slice %196 {offsets = [0, 0], sizes = [60, 1], strides = [1, 1]} : vector<60x7xf32> to vector<60x1xf32>
    %199 = tpu.iota {dimensions = array<i32: 0>} : vector<60x60xi32>
    %200 = tpu.iota {dimensions = array<i32: 1>} : vector<60x60xi32>
    %c3_i32_71 = arith.constant 3 : i32
    %201 = vector.broadcast %c3_i32_71 : i32 to vector<60x60xi32>
    %202 = arith.subi %199, %201 : vector<60x60xi32>
    %203 = arith.cmpi eq, %200, %202 : vector<60x60xi32>
    %204 = arith.extui %203 : vector<60x60xi1> to vector<60x60xi32>
    %205 = arith.sitofp %204 : vector<60x60xi32> to vector<60x60xf32>
    %cst_72 = arith.constant dense<0.000000e+00> : vector<60x1xf32>
    %206 = tpu.matmul %205, %198, %cst_72 {dimension_numbers = #tpu.dot_dimension_numbers<[1], [0], [0], [1], [0, 0, 1, 1], [], []>} : vector<60x60xf32>, vector<60x1xf32>, vector<60x1xf32> -> vector<60x1xf32>
    %207 = arith.addf %197, %206 : vector<60x1xf32>
    %208 = vector.extract_strided_slice %196 {offsets = [0, 1], sizes = [60, 1], strides = [1, 1]} : vector<60x7xf32> to vector<60x1xf32>
    %209 = tpu.iota {dimensions = array<i32: 0>} : vector<60x60xi32>
    %210 = tpu.iota {dimensions = array<i32: 1>} : vector<60x60xi32>
    %c2_i32_73 = arith.constant 2 : i32
    %211 = vector.broadcast %c2_i32_73 : i32 to vector<60x60xi32>
    %212 = arith.subi %209, %211 : vector<60x60xi32>
    %213 = arith.cmpi eq, %210, %212 : vector<60x60xi32>
    %214 = arith.extui %213 : vector<60x60xi1> to vector<60x60xi32>
    %215 = arith.sitofp %214 : vector<60x60xi32> to vector<60x60xf32>
    %cst_74 = arith.constant dense<0.000000e+00> : vector<60x1xf32>
    %216 = tpu.matmul %215, %208, %cst_74 {dimension_numbers = #tpu.dot_dimension_numbers<[1], [0], [0], [1], [0, 0, 1, 1], [], []>} : vector<60x60xf32>, vector<60x1xf32>, vector<60x1xf32> -> vector<60x1xf32>
    %217 = arith.addf %207, %216 : vector<60x1xf32>
    %218 = vector.extract_strided_slice %196 {offsets = [0, 2], sizes = [60, 1], strides = [1, 1]} : vector<60x7xf32> to vector<60x1xf32>
    %219 = tpu.iota {dimensions = array<i32: 0>} : vector<60x60xi32>
    %220 = tpu.iota {dimensions = array<i32: 1>} : vector<60x60xi32>
    %c1_i32_75 = arith.constant 1 : i32
    %221 = vector.broadcast %c1_i32_75 : i32 to vector<60x60xi32>
    %222 = arith.subi %219, %221 : vector<60x60xi32>
    %223 = arith.cmpi eq, %220, %222 : vector<60x60xi32>
    %224 = arith.extui %223 : vector<60x60xi1> to vector<60x60xi32>
    %225 = arith.sitofp %224 : vector<60x60xi32> to vector<60x60xf32>
    %cst_76 = arith.constant dense<0.000000e+00> : vector<60x1xf32>
    %226 = tpu.matmul %225, %218, %cst_76 {dimension_numbers = #tpu.dot_dimension_numbers<[1], [0], [0], [1], [0, 0, 1, 1], [], []>} : vector<60x60xf32>, vector<60x1xf32>, vector<60x1xf32> -> vector<60x1xf32>
    %227 = arith.addf %217, %226 : vector<60x1xf32>
    %228 = vector.extract_strided_slice %196 {offsets = [0, 4], sizes = [60, 1], strides = [1, 1]} : vector<60x7xf32> to vector<60x1xf32>
    %229 = tpu.iota {dimensions = array<i32: 0>} : vector<60x60xi32>
    %230 = tpu.iota {dimensions = array<i32: 1>} : vector<60x60xi32>
    %c-1_i32_77 = arith.constant -1 : i32
    %231 = vector.broadcast %c-1_i32_77 : i32 to vector<60x60xi32>
    %232 = arith.subi %229, %231 : vector<60x60xi32>
    %233 = arith.cmpi eq, %230, %232 : vector<60x60xi32>
    %234 = arith.extui %233 : vector<60x60xi1> to vector<60x60xi32>
    %235 = arith.sitofp %234 : vector<60x60xi32> to vector<60x60xf32>
    %cst_78 = arith.constant dense<0.000000e+00> : vector<60x1xf32>
    %236 = tpu.matmul %235, %228, %cst_78 {dimension_numbers = #tpu.dot_dimension_numbers<[1], [0], [0], [1], [0, 0, 1, 1], [], []>} : vector<60x60xf32>, vector<60x1xf32>, vector<60x1xf32> -> vector<60x1xf32>
    %237 = arith.addf %227, %236 : vector<60x1xf32>
    %238 = vector.extract_strided_slice %196 {offsets = [0, 5], sizes = [60, 1], strides = [1, 1]} : vector<60x7xf32> to vector<60x1xf32>
    %239 = tpu.iota {dimensions = array<i32: 0>} : vector<60x60xi32>
    %240 = tpu.iota {dimensions = array<i32: 1>} : vector<60x60xi32>
    %c-2_i32_79 = arith.constant -2 : i32
    %241 = vector.broadcast %c-2_i32_79 : i32 to vector<60x60xi32>
    %242 = arith.subi %239, %241 : vector<60x60xi32>
    %243 = arith.cmpi eq, %240, %242 : vector<60x60xi32>
    %244 = arith.extui %243 : vector<60x60xi1> to vector<60x60xi32>
    %245 = arith.sitofp %244 : vector<60x60xi32> to vector<60x60xf32>
    %cst_80 = arith.constant dense<0.000000e+00> : vector<60x1xf32>
    %246 = tpu.matmul %245, %238, %cst_80 {dimension_numbers = #tpu.dot_dimension_numbers<[1], [0], [0], [1], [0, 0, 1, 1], [], []>} : vector<60x60xf32>, vector<60x1xf32>, vector<60x1xf32> -> vector<60x1xf32>
    %247 = arith.addf %237, %246 : vector<60x1xf32>
    %248 = vector.extract_strided_slice %196 {offsets = [0, 6], sizes = [60, 1], strides = [1, 1]} : vector<60x7xf32> to vector<60x1xf32>
    %249 = tpu.iota {dimensions = array<i32: 0>} : vector<60x60xi32>
    %250 = tpu.iota {dimensions = array<i32: 1>} : vector<60x60xi32>
    %c-3_i32_81 = arith.constant -3 : i32
    %251 = vector.broadcast %c-3_i32_81 : i32 to vector<60x60xi32>
    %252 = arith.subi %249, %251 : vector<60x60xi32>
    %253 = arith.cmpi eq, %250, %252 : vector<60x60xi32>
    %254 = arith.extui %253 : vector<60x60xi1> to vector<60x60xi32>
    %255 = arith.sitofp %254 : vector<60x60xi32> to vector<60x60xf32>
    %cst_82 = arith.constant dense<0.000000e+00> : vector<60x1xf32>
    %256 = tpu.matmul %255, %248, %cst_82 {dimension_numbers = #tpu.dot_dimension_numbers<[1], [0], [0], [1], [0, 0, 1, 1], [], []>} : vector<60x60xf32>, vector<60x1xf32>, vector<60x1xf32> -> vector<60x1xf32>
    %257 = arith.addf %247, %256 : vector<60x1xf32>
    %cst_83 = arith.constant 0.000000e+00 : f32
    %258 = vector.broadcast %cst_83 : f32 to vector<60x1xf32>
    %259 = arith.subf %258, %257 : vector<60x1xf32>
    %260 = math.exp %259 : vector<60x1xf32>
    %cst_84 = arith.constant 1.000000e+00 : f32
    %261 = vector.broadcast %cst_84 : f32 to vector<60x1xf32>
    %262 = arith.addf %261, %260 : vector<60x1xf32>
    %263 = tpu.reciprocal %262 {approx = true} : vector<60x1xf32> -> vector<60x1xf32>
    %264 = vector.broadcast %263 : vector<60x1xf32> to vector<60x64xf32>
    %265 = arith.mulf %187, %264 : vector<60x64xf32>
    %c0_85 = arith.constant 0 : index
    %c0_86 = arith.constant 0 : index
    %c0_87 = arith.constant 0 : index
    %266 = vector.load %arg11[%c0_85, %c0_86, %c0_87] : memref<2x60x64xf32, #tpu.memory_space<vmem>>, vector<1x60x64xf32>
    %267 = vector.shape_cast %266 : vector<1x60x64xf32> to vector<60x64xf32>
    %268 = vector.shape_cast %265 : vector<60x64xf32> to vector<1x60x64xf32>
    tpu.vector_store %arg11[%c0_85, %c0_86, %c0_87], %268 {strides = array<i32>} : memref<2x60x64xf32, #tpu.memory_space<vmem>>, vector<1x60x64xf32>,
    %c1 = arith.constant 1 : index
    %c0_88 = arith.constant 0 : index
    %c0_89 = arith.constant 0 : index
    %269 = vector.load %arg0[%c1, %c0_88, %c0_89] : memref<2x60x12xf32, #tpu.memory_space<vmem>>, vector<1x60x12xf32>
    %270 = vector.shape_cast %269 : vector<1x60x12xf32> to vector<60x12xf32>
    %c0_90 = arith.constant 0 : index
    %c0_91 = arith.constant 0 : index
    %271 = vector.load %arg1[%c0_90, %c0_91] : memref<12x96xbf16, #tpu.memory_space<vmem>>, vector<12x96xbf16>
    %c0_92 = arith.constant 0 : index
    %c0_93 = arith.constant 0 : index
    %272 = vector.load %arg2[%c0_92, %c0_93] : memref<1x32xf32, #tpu.memory_space<vmem>>, vector<1x32xf32>
    %273 = arith.truncf %270 : vector<60x12xf32> to vector<60x12xbf16>
    %cst_94 = arith.constant dense<0.000000e+00> : vector<60x96xf32>
    %274 = tpu.matmul %273, %271, %cst_94 {dimension_numbers = #tpu.dot_dimension_numbers<[1], [0], [0], [1], [0, 0, 1, 1], [], []>} : vector<60x12xbf16>, vector<12x96xbf16>, vector<60x96xf32> -> vector<60x96xf32>
    %275 = vector.extract_strided_slice %274 {offsets = [0, 32], sizes = [60, 32], strides = [1, 1]} : vector<60x96xf32> to vector<60x32xf32>
    %276 = vector.broadcast %272 : vector<1x32xf32> to vector<60x32xf32>
    %277 = arith.addf %276, %275 : vector<60x32xf32>
    %278 = vector.extract_strided_slice %274 {offsets = [0, 0], sizes = [60, 32], strides = [1, 1]} : vector<60x96xf32> to vector<60x32xf32>
    %279 = tpu.iota {dimensions = array<i32: 0>} : vector<60x60xi32>
    %280 = tpu.iota {dimensions = array<i32: 1>} : vector<60x60xi32>
    %c1_i32_95 = arith.constant 1 : i32
    %281 = vector.broadcast %c1_i32_95 : i32 to vector<60x60xi32>
    %282 = arith.subi %279, %281 : vector<60x60xi32>
    %283 = arith.cmpi eq, %280, %282 : vector<60x60xi32>
    %284 = arith.extui %283 : vector<60x60xi1> to vector<60x60xi32>
    %285 = arith.sitofp %284 : vector<60x60xi32> to vector<60x60xf32>
    %cst_96 = arith.constant dense<0.000000e+00> : vector<60x32xf32>
    %286 = tpu.matmul %285, %278, %cst_96 {dimension_numbers = #tpu.dot_dimension_numbers<[1], [0], [0], [1], [0, 0, 1, 1], [], []>} : vector<60x60xf32>, vector<60x32xf32>, vector<60x32xf32> -> vector<60x32xf32>
    %287 = arith.addf %277, %286 : vector<60x32xf32>
    %288 = vector.extract_strided_slice %274 {offsets = [0, 64], sizes = [60, 32], strides = [1, 1]} : vector<60x96xf32> to vector<60x32xf32>
    %289 = tpu.iota {dimensions = array<i32: 0>} : vector<60x60xi32>
    %290 = tpu.iota {dimensions = array<i32: 1>} : vector<60x60xi32>
    %c-1_i32_97 = arith.constant -1 : i32
    %291 = vector.broadcast %c-1_i32_97 : i32 to vector<60x60xi32>
    %292 = arith.subi %289, %291 : vector<60x60xi32>
    %293 = arith.cmpi eq, %290, %292 : vector<60x60xi32>
    %294 = arith.extui %293 : vector<60x60xi1> to vector<60x60xi32>
    %295 = arith.sitofp %294 : vector<60x60xi32> to vector<60x60xf32>
    %cst_98 = arith.constant dense<0.000000e+00> : vector<60x32xf32>
    %296 = tpu.matmul %295, %288, %cst_98 {dimension_numbers = #tpu.dot_dimension_numbers<[1], [0], [0], [1], [0, 0, 1, 1], [], []>} : vector<60x60xf32>, vector<60x32xf32>, vector<60x32xf32> -> vector<60x32xf32>
    %297 = arith.addf %287, %296 : vector<60x32xf32>
    %cst_99 = arith.constant 0.000000e+00 : f32
    %298 = vector.broadcast %cst_99 : f32 to vector<60x32xf32>
    %299 = arith.maximumf %297, %298 : vector<60x32xf32>
    %c0_100 = arith.constant 0 : index
    %c0_101 = arith.constant 0 : index
    %300 = vector.load %arg3[%c0_100, %c0_101] : memref<32x2xf32, #tpu.memory_space<vmem>>, vector<32x2xf32>
    %c0_102 = arith.constant 0 : index
    %c0_103 = arith.constant 0 : index
    %301 = vector.load %arg4[%c0_102, %c0_103] : memref<2x32xf32, #tpu.memory_space<vmem>>, vector<2x32xf32>
    %cst_104 = arith.constant dense<0.000000e+00> : vector<32xf32>
    %302 = vector.multi_reduction <add>, %299, %cst_104 [0] : vector<60x32xf32> to vector<32xf32>
    %303 = vector.shape_cast %302 : vector<32xf32> to vector<1x32xf32>
    %cst_105 = arith.constant 6.000000e+01 : f32
    %304 = vector.broadcast %cst_105 : f32 to vector<1x32xf32>
    %305 = arith.divf %303, %304 : vector<1x32xf32>
    %cst_106 = arith.constant dense<0xFF800000> : vector<32xf32>
    %306 = vector.multi_reduction <maximumf>, %299, %cst_106 [0] : vector<60x32xf32> to vector<32xf32>
    %307 = vector.shape_cast %306 : vector<32xf32> to vector<1x32xf32>
    %cst_107 = arith.constant dense<0.000000e+00> : vector<1x2xf32>
    %308 = tpu.matmul %305, %300, %cst_107 {dimension_numbers = #tpu.dot_dimension_numbers<[1], [0], [0], [1], [0, 0, 1, 1], [], []>} : vector<1x32xf32>, vector<32x2xf32>, vector<1x2xf32> -> vector<1x2xf32>
    %cst_108 = arith.constant 0.000000e+00 : f32
    %309 = vector.broadcast %cst_108 : f32 to vector<1x2xf32>
    %310 = arith.maximumf %308, %309 : vector<1x2xf32>
    %cst_109 = arith.constant dense<0.000000e+00> : vector<1x32xf32>
    %311 = tpu.matmul %310, %301, %cst_109 {dimension_numbers = #tpu.dot_dimension_numbers<[1], [0], [0], [1], [0, 0, 1, 1], [], []>} : vector<1x2xf32>, vector<2x32xf32>, vector<1x32xf32> -> vector<1x32xf32>
    %cst_110 = arith.constant dense<0.000000e+00> : vector<1x2xf32>
    %312 = tpu.matmul %307, %300, %cst_110 {dimension_numbers = #tpu.dot_dimension_numbers<[1], [0], [0], [1], [0, 0, 1, 1], [], []>} : vector<1x32xf32>, vector<32x2xf32>, vector<1x2xf32> -> vector<1x2xf32>
    %cst_111 = arith.constant 0.000000e+00 : f32
    %313 = vector.broadcast %cst_111 : f32 to vector<1x2xf32>
    %314 = arith.maximumf %312, %313 : vector<1x2xf32>
    %cst_112 = arith.constant dense<0.000000e+00> : vector<1x32xf32>
    %315 = tpu.matmul %314, %301, %cst_112 {dimension_numbers = #tpu.dot_dimension_numbers<[1], [0], [0], [1], [0, 0, 1, 1], [], []>} : vector<1x2xf32>, vector<2x32xf32>, vector<1x32xf32> -> vector<1x32xf32>
    %316 = arith.addf %311, %315 : vector<1x32xf32>
    %cst_113 = arith.constant 0.000000e+00 : f32
    %317 = vector.broadcast %cst_113 : f32 to vector<1x32xf32>
    %318 = arith.subf %317, %316 : vector<1x32xf32>
    %319 = math.exp %318 : vector<1x32xf32>
    %cst_114 = arith.constant 1.000000e+00 : f32
    %320 = vector.broadcast %cst_114 : f32 to vector<1x32xf32>
    %321 = arith.addf %320, %319 : vector<1x32xf32>
    %322 = tpu.reciprocal %321 {approx = true} : vector<1x32xf32> -> vector<1x32xf32>
    %323 = vector.broadcast %322 : vector<1x32xf32> to vector<60x32xf32>
    %324 = arith.mulf %299, %323 : vector<60x32xf32>
    %c0_115 = arith.constant 0 : index
    %c0_116 = arith.constant 0 : index
    %325 = vector.load %arg5[%c0_115, %c0_116] : memref<2x7xf32, #tpu.memory_space<vmem>>, vector<2x7xf32>
    %cst_117 = arith.constant dense<0.000000e+00> : vector<60xf32>
    %326 = vector.multi_reduction <add>, %324, %cst_117 [1] : vector<60x32xf32> to vector<60xf32>
    %327 = vector.shape_cast %326 : vector<60xf32> to vector<60x1xf32>
    %cst_118 = arith.constant 3.200000e+01 : f32
    %328 = vector.broadcast %cst_118 : f32 to vector<60x1xf32>
    %329 = arith.divf %327, %328 : vector<60x1xf32>
    %cst_119 = arith.constant dense<0xFF800000> : vector<60xf32>
    %330 = vector.multi_reduction <maximumf>, %324, %cst_119 [1] : vector<60x32xf32> to vector<60xf32>
    %331 = vector.shape_cast %330 : vector<60xf32> to vector<60x1xf32>
    %332 = tpu.concatenate %329, %331 in 1 : vector<60x1xf32>, vector<60x1xf32> -> vector<60x2xf32>
    %cst_120 = arith.constant dense<0.000000e+00> : vector<60x7xf32>
    %333 = tpu.matmul %332, %325, %cst_120 {dimension_numbers = #tpu.dot_dimension_numbers<[1], [0], [0], [1], [0, 0, 1, 1], [], []>} : vector<60x2xf32>, vector<2x7xf32>, vector<60x7xf32> -> vector<60x7xf32>
    %334 = vector.extract_strided_slice %333 {offsets = [0, 3], sizes = [60, 1], strides = [1, 1]} : vector<60x7xf32> to vector<60x1xf32>
    %335 = vector.extract_strided_slice %333 {offsets = [0, 0], sizes = [60, 1], strides = [1, 1]} : vector<60x7xf32> to vector<60x1xf32>
    %336 = tpu.iota {dimensions = array<i32: 0>} : vector<60x60xi32>
    %337 = tpu.iota {dimensions = array<i32: 1>} : vector<60x60xi32>
    %c3_i32_121 = arith.constant 3 : i32
    %338 = vector.broadcast %c3_i32_121 : i32 to vector<60x60xi32>
    %339 = arith.subi %336, %338 : vector<60x60xi32>
    %340 = arith.cmpi eq, %337, %339 : vector<60x60xi32>
    %341 = arith.extui %340 : vector<60x60xi1> to vector<60x60xi32>
    %342 = arith.sitofp %341 : vector<60x60xi32> to vector<60x60xf32>
    %cst_122 = arith.constant dense<0.000000e+00> : vector<60x1xf32>
    %343 = tpu.matmul %342, %335, %cst_122 {dimension_numbers = #tpu.dot_dimension_numbers<[1], [0], [0], [1], [0, 0, 1, 1], [], []>} : vector<60x60xf32>, vector<60x1xf32>, vector<60x1xf32> -> vector<60x1xf32>
    %344 = arith.addf %334, %343 : vector<60x1xf32>
    %345 = vector.extract_strided_slice %333 {offsets = [0, 1], sizes = [60, 1], strides = [1, 1]} : vector<60x7xf32> to vector<60x1xf32>
    %346 = tpu.iota {dimensions = array<i32: 0>} : vector<60x60xi32>
    %347 = tpu.iota {dimensions = array<i32: 1>} : vector<60x60xi32>
    %c2_i32_123 = arith.constant 2 : i32
    %348 = vector.broadcast %c2_i32_123 : i32 to vector<60x60xi32>
    %349 = arith.subi %346, %348 : vector<60x60xi32>
    %350 = arith.cmpi eq, %347, %349 : vector<60x60xi32>
    %351 = arith.extui %350 : vector<60x60xi1> to vector<60x60xi32>
    %352 = arith.sitofp %351 : vector<60x60xi32> to vector<60x60xf32>
    %cst_124 = arith.constant dense<0.000000e+00> : vector<60x1xf32>
    %353 = tpu.matmul %352, %345, %cst_124 {dimension_numbers = #tpu.dot_dimension_numbers<[1], [0], [0], [1], [0, 0, 1, 1], [], []>} : vector<60x60xf32>, vector<60x1xf32>, vector<60x1xf32> -> vector<60x1xf32>
    %354 = arith.addf %344, %353 : vector<60x1xf32>
    %355 = vector.extract_strided_slice %333 {offsets = [0, 2], sizes = [60, 1], strides = [1, 1]} : vector<60x7xf32> to vector<60x1xf32>
    %356 = tpu.iota {dimensions = array<i32: 0>} : vector<60x60xi32>
    %357 = tpu.iota {dimensions = array<i32: 1>} : vector<60x60xi32>
    %c1_i32_125 = arith.constant 1 : i32
    %358 = vector.broadcast %c1_i32_125 : i32 to vector<60x60xi32>
    %359 = arith.subi %356, %358 : vector<60x60xi32>
    %360 = arith.cmpi eq, %357, %359 : vector<60x60xi32>
    %361 = arith.extui %360 : vector<60x60xi1> to vector<60x60xi32>
    %362 = arith.sitofp %361 : vector<60x60xi32> to vector<60x60xf32>
    %cst_126 = arith.constant dense<0.000000e+00> : vector<60x1xf32>
    %363 = tpu.matmul %362, %355, %cst_126 {dimension_numbers = #tpu.dot_dimension_numbers<[1], [0], [0], [1], [0, 0, 1, 1], [], []>} : vector<60x60xf32>, vector<60x1xf32>, vector<60x1xf32> -> vector<60x1xf32>
    %364 = arith.addf %354, %363 : vector<60x1xf32>
    %365 = vector.extract_strided_slice %333 {offsets = [0, 4], sizes = [60, 1], strides = [1, 1]} : vector<60x7xf32> to vector<60x1xf32>
    %366 = tpu.iota {dimensions = array<i32: 0>} : vector<60x60xi32>
    %367 = tpu.iota {dimensions = array<i32: 1>} : vector<60x60xi32>
    %c-1_i32_127 = arith.constant -1 : i32
    %368 = vector.broadcast %c-1_i32_127 : i32 to vector<60x60xi32>
    %369 = arith.subi %366, %368 : vector<60x60xi32>
    %370 = arith.cmpi eq, %367, %369 : vector<60x60xi32>
    %371 = arith.extui %370 : vector<60x60xi1> to vector<60x60xi32>
    %372 = arith.sitofp %371 : vector<60x60xi32> to vector<60x60xf32>
    %cst_128 = arith.constant dense<0.000000e+00> : vector<60x1xf32>
    %373 = tpu.matmul %372, %365, %cst_128 {dimension_numbers = #tpu.dot_dimension_numbers<[1], [0], [0], [1], [0, 0, 1, 1], [], []>} : vector<60x60xf32>, vector<60x1xf32>, vector<60x1xf32> -> vector<60x1xf32>
    %374 = arith.addf %364, %373 : vector<60x1xf32>
    %375 = vector.extract_strided_slice %333 {offsets = [0, 5], sizes = [60, 1], strides = [1, 1]} : vector<60x7xf32> to vector<60x1xf32>
    %376 = tpu.iota {dimensions = array<i32: 0>} : vector<60x60xi32>
    %377 = tpu.iota {dimensions = array<i32: 1>} : vector<60x60xi32>
    %c-2_i32_129 = arith.constant -2 : i32
    %378 = vector.broadcast %c-2_i32_129 : i32 to vector<60x60xi32>
    %379 = arith.subi %376, %378 : vector<60x60xi32>
    %380 = arith.cmpi eq, %377, %379 : vector<60x60xi32>
    %381 = arith.extui %380 : vector<60x60xi1> to vector<60x60xi32>
    %382 = arith.sitofp %381 : vector<60x60xi32> to vector<60x60xf32>
    %cst_130 = arith.constant dense<0.000000e+00> : vector<60x1xf32>
    %383 = tpu.matmul %382, %375, %cst_130 {dimension_numbers = #tpu.dot_dimension_numbers<[1], [0], [0], [1], [0, 0, 1, 1], [], []>} : vector<60x60xf32>, vector<60x1xf32>, vector<60x1xf32> -> vector<60x1xf32>
    %384 = arith.addf %374, %383 : vector<60x1xf32>
    %385 = vector.extract_strided_slice %333 {offsets = [0, 6], sizes = [60, 1], strides = [1, 1]} : vector<60x7xf32> to vector<60x1xf32>
    %386 = tpu.iota {dimensions = array<i32: 0>} : vector<60x60xi32>
    %387 = tpu.iota {dimensions = array<i32: 1>} : vector<60x60xi32>
    %c-3_i32_131 = arith.constant -3 : i32
    %388 = vector.broadcast %c-3_i32_131 : i32 to vector<60x60xi32>
    %389 = arith.subi %386, %388 : vector<60x60xi32>
    %390 = arith.cmpi eq, %387, %389 : vector<60x60xi32>
    %391 = arith.extui %390 : vector<60x60xi1> to vector<60x60xi32>
    %392 = arith.sitofp %391 : vector<60x60xi32> to vector<60x60xf32>
    %cst_132 = arith.constant dense<0.000000e+00> : vector<60x1xf32>
    %393 = tpu.matmul %392, %385, %cst_132 {dimension_numbers = #tpu.dot_dimension_numbers<[1], [0], [0], [1], [0, 0, 1, 1], [], []>} : vector<60x60xf32>, vector<60x1xf32>, vector<60x1xf32> -> vector<60x1xf32>
    %394 = arith.addf %384, %393 : vector<60x1xf32>
    %cst_133 = arith.constant 0.000000e+00 : f32
    %395 = vector.broadcast %cst_133 : f32 to vector<60x1xf32>
    %396 = arith.subf %395, %394 : vector<60x1xf32>
    %397 = math.exp %396 : vector<60x1xf32>
    %cst_134 = arith.constant 1.000000e+00 : f32
    %398 = vector.broadcast %cst_134 : f32 to vector<60x1xf32>
    %399 = arith.addf %398, %397 : vector<60x1xf32>
    %400 = tpu.reciprocal %399 {approx = true} : vector<60x1xf32> -> vector<60x1xf32>
    %401 = vector.broadcast %400 : vector<60x1xf32> to vector<60x32xf32>
    %402 = arith.mulf %324, %401 : vector<60x32xf32>
    %c0_135 = arith.constant 0 : index
    %c0_136 = arith.constant 0 : index
    %403 = vector.load %arg6[%c0_135, %c0_136] : memref<32x192xbf16, #tpu.memory_space<vmem>>, vector<32x192xbf16>
    %c0_137 = arith.constant 0 : index
    %c0_138 = arith.constant 0 : index
    %404 = vector.load %arg7[%c0_137, %c0_138] : memref<1x64xf32, #tpu.memory_space<vmem>>, vector<1x64xf32>
    %405 = arith.truncf %402 : vector<60x32xf32> to vector<60x32xbf16>
    %cst_139 = arith.constant dense<0.000000e+00> : vector<60x192xf32>
    %406 = tpu.matmul %405, %403, %cst_139 {dimension_numbers = #tpu.dot_dimension_numbers<[1], [0], [0], [1], [0, 0, 1, 1], [], []>} : vector<60x32xbf16>, vector<32x192xbf16>, vector<60x192xf32> -> vector<60x192xf32>
    %407 = vector.extract_strided_slice %406 {offsets = [0, 64], sizes = [60, 64], strides = [1, 1]} : vector<60x192xf32> to vector<60x64xf32>
    %408 = vector.broadcast %404 : vector<1x64xf32> to vector<60x64xf32>
    %409 = arith.addf %408, %407 : vector<60x64xf32>
    %410 = vector.extract_strided_slice %406 {offsets = [0, 0], sizes = [60, 64], strides = [1, 1]} : vector<60x192xf32> to vector<60x64xf32>
    %411 = tpu.iota {dimensions = array<i32: 0>} : vector<60x60xi32>
    %412 = tpu.iota {dimensions = array<i32: 1>} : vector<60x60xi32>
    %c1_i32_140 = arith.constant 1 : i32
    %413 = vector.broadcast %c1_i32_140 : i32 to vector<60x60xi32>
    %414 = arith.subi %411, %413 : vector<60x60xi32>
    %415 = arith.cmpi eq, %412, %414 : vector<60x60xi32>
    %416 = arith.extui %415 : vector<60x60xi1> to vector<60x60xi32>
    %417 = arith.sitofp %416 : vector<60x60xi32> to vector<60x60xf32>
    %cst_141 = arith.constant dense<0.000000e+00> : vector<60x64xf32>
    %418 = tpu.matmul %417, %410, %cst_141 {dimension_numbers = #tpu.dot_dimension_numbers<[1], [0], [0], [1], [0, 0, 1, 1], [], []>} : vector<60x60xf32>, vector<60x64xf32>, vector<60x64xf32> -> vector<60x64xf32>
    %419 = arith.addf %409, %418 : vector<60x64xf32>
    %420 = vector.extract_strided_slice %406 {offsets = [0, 128], sizes = [60, 64], strides = [1, 1]} : vector<60x192xf32> to vector<60x64xf32>
    %421 = tpu.iota {dimensions = array<i32: 0>} : vector<60x60xi32>
    %422 = tpu.iota {dimensions = array<i32: 1>} : vector<60x60xi32>
    %c-1_i32_142 = arith.constant -1 : i32
    %423 = vector.broadcast %c-1_i32_142 : i32 to vector<60x60xi32>
    %424 = arith.subi %421, %423 : vector<60x60xi32>
    %425 = arith.cmpi eq, %422, %424 : vector<60x60xi32>
    %426 = arith.extui %425 : vector<60x60xi1> to vector<60x60xi32>
    %427 = arith.sitofp %426 : vector<60x60xi32> to vector<60x60xf32>
    %cst_143 = arith.constant dense<0.000000e+00> : vector<60x64xf32>
    %428 = tpu.matmul %427, %420, %cst_143 {dimension_numbers = #tpu.dot_dimension_numbers<[1], [0], [0], [1], [0, 0, 1, 1], [], []>} : vector<60x60xf32>, vector<60x64xf32>, vector<60x64xf32> -> vector<60x64xf32>
    %429 = arith.addf %419, %428 : vector<60x64xf32>
    %cst_144 = arith.constant 0.000000e+00 : f32
    %430 = vector.broadcast %cst_144 : f32 to vector<60x64xf32>
    %431 = arith.maximumf %429, %430 : vector<60x64xf32>
    %c0_145 = arith.constant 0 : index
    %c0_146 = arith.constant 0 : index
    %432 = vector.load %arg8[%c0_145, %c0_146] : memref<64x4xf32, #tpu.memory_space<vmem>>, vector<64x4xf32>
    %c0_147 = arith.constant 0 : index
    %c0_148 = arith.constant 0 : index
    %433 = vector.load %arg9[%c0_147, %c0_148] : memref<4x64xf32, #tpu.memory_space<vmem>>, vector<4x64xf32>
    %cst_149 = arith.constant dense<0.000000e+00> : vector<64xf32>
    %434 = vector.multi_reduction <add>, %431, %cst_149 [0] : vector<60x64xf32> to vector<64xf32>
    %435 = vector.shape_cast %434 : vector<64xf32> to vector<1x64xf32>
    %cst_150 = arith.constant 6.000000e+01 : f32
    %436 = vector.broadcast %cst_150 : f32 to vector<1x64xf32>
    %437 = arith.divf %435, %436 : vector<1x64xf32>
    %cst_151 = arith.constant dense<0xFF800000> : vector<64xf32>
    %438 = vector.multi_reduction <maximumf>, %431, %cst_151 [0] : vector<60x64xf32> to vector<64xf32>
    %439 = vector.shape_cast %438 : vector<64xf32> to vector<1x64xf32>
    %cst_152 = arith.constant dense<0.000000e+00> : vector<1x4xf32>
    %440 = tpu.matmul %437, %432, %cst_152 {dimension_numbers = #tpu.dot_dimension_numbers<[1], [0], [0], [1], [0, 0, 1, 1], [], []>} : vector<1x64xf32>, vector<64x4xf32>, vector<1x4xf32> -> vector<1x4xf32>
    %cst_153 = arith.constant 0.000000e+00 : f32
    %441 = vector.broadcast %cst_153 : f32 to vector<1x4xf32>
    %442 = arith.maximumf %440, %441 : vector<1x4xf32>
    %cst_154 = arith.constant dense<0.000000e+00> : vector<1x64xf32>
    %443 = tpu.matmul %442, %433, %cst_154 {dimension_numbers = #tpu.dot_dimension_numbers<[1], [0], [0], [1], [0, 0, 1, 1], [], []>} : vector<1x4xf32>, vector<4x64xf32>, vector<1x64xf32> -> vector<1x64xf32>
    %cst_155 = arith.constant dense<0.000000e+00> : vector<1x4xf32>
    %444 = tpu.matmul %439, %432, %cst_155 {dimension_numbers = #tpu.dot_dimension_numbers<[1], [0], [0], [1], [0, 0, 1, 1], [], []>} : vector<1x64xf32>, vector<64x4xf32>, vector<1x4xf32> -> vector<1x4xf32>
    %cst_156 = arith.constant 0.000000e+00 : f32
    %445 = vector.broadcast %cst_156 : f32 to vector<1x4xf32>
    %446 = arith.maximumf %444, %445 : vector<1x4xf32>
    %cst_157 = arith.constant dense<0.000000e+00> : vector<1x64xf32>
    %447 = tpu.matmul %446, %433, %cst_157 {dimension_numbers = #tpu.dot_dimension_numbers<[1], [0], [0], [1], [0, 0, 1, 1], [], []>} : vector<1x4xf32>, vector<4x64xf32>, vector<1x64xf32> -> vector<1x64xf32>
    %448 = arith.addf %443, %447 : vector<1x64xf32>
    %cst_158 = arith.constant 0.000000e+00 : f32
    %449 = vector.broadcast %cst_158 : f32 to vector<1x64xf32>
    %450 = arith.subf %449, %448 : vector<1x64xf32>
    %451 = math.exp %450 : vector<1x64xf32>
    %cst_159 = arith.constant 1.000000e+00 : f32
    %452 = vector.broadcast %cst_159 : f32 to vector<1x64xf32>
    %453 = arith.addf %452, %451 : vector<1x64xf32>
    %454 = tpu.reciprocal %453 {approx = true} : vector<1x64xf32> -> vector<1x64xf32>
    %455 = vector.broadcast %454 : vector<1x64xf32> to vector<60x64xf32>
    %456 = arith.mulf %431, %455 : vector<60x64xf32>
    %c0_160 = arith.constant 0 : index
    %c0_161 = arith.constant 0 : index
    %457 = vector.load %arg10[%c0_160, %c0_161] : memref<2x7xf32, #tpu.memory_space<vmem>>, vector<2x7xf32>
    %cst_162 = arith.constant dense<0.000000e+00> : vector<60xf32>
    %458 = vector.multi_reduction <add>, %456, %cst_162 [1] : vector<60x64xf32> to vector<60xf32>
    %459 = vector.shape_cast %458 : vector<60xf32> to vector<60x1xf32>
    %cst_163 = arith.constant 6.400000e+01 : f32
    %460 = vector.broadcast %cst_163 : f32 to vector<60x1xf32>
    %461 = arith.divf %459, %460 : vector<60x1xf32>
    %cst_164 = arith.constant dense<0xFF800000> : vector<60xf32>
    %462 = vector.multi_reduction <maximumf>, %456, %cst_164 [1] : vector<60x64xf32> to vector<60xf32>
    %463 = vector.shape_cast %462 : vector<60xf32> to vector<60x1xf32>
    %464 = tpu.concatenate %461, %463 in 1 : vector<60x1xf32>, vector<60x1xf32> -> vector<60x2xf32>
    %cst_165 = arith.constant dense<0.000000e+00> : vector<60x7xf32>
    %465 = tpu.matmul %464, %457, %cst_165 {dimension_numbers = #tpu.dot_dimension_numbers<[1], [0], [0], [1], [0, 0, 1, 1], [], []>} : vector<60x2xf32>, vector<2x7xf32>, vector<60x7xf32> -> vector<60x7xf32>
    %466 = vector.extract_strided_slice %465 {offsets = [0, 3], sizes = [60, 1], strides = [1, 1]} : vector<60x7xf32> to vector<60x1xf32>
    %467 = vector.extract_strided_slice %465 {offsets = [0, 0], sizes = [60, 1], strides = [1, 1]} : vector<60x7xf32> to vector<60x1xf32>
    %468 = tpu.iota {dimensions = array<i32: 0>} : vector<60x60xi32>
    %469 = tpu.iota {dimensions = array<i32: 1>} : vector<60x60xi32>
    %c3_i32_166 = arith.constant 3 : i32
    %470 = vector.broadcast %c3_i32_166 : i32 to vector<60x60xi32>
    %471 = arith.subi %468, %470 : vector<60x60xi32>
    %472 = arith.cmpi eq, %469, %471 : vector<60x60xi32>
    %473 = arith.extui %472 : vector<60x60xi1> to vector<60x60xi32>
    %474 = arith.sitofp %473 : vector<60x60xi32> to vector<60x60xf32>
    %cst_167 = arith.constant dense<0.000000e+00> : vector<60x1xf32>
    %475 = tpu.matmul %474, %467, %cst_167 {dimension_numbers = #tpu.dot_dimension_numbers<[1], [0], [0], [1], [0, 0, 1, 1], [], []>} : vector<60x60xf32>, vector<60x1xf32>, vector<60x1xf32> -> vector<60x1xf32>
    %476 = arith.addf %466, %475 : vector<60x1xf32>
    %477 = vector.extract_strided_slice %465 {offsets = [0, 1], sizes = [60, 1], strides = [1, 1]} : vector<60x7xf32> to vector<60x1xf32>
    %478 = tpu.iota {dimensions = array<i32: 0>} : vector<60x60xi32>
    %479 = tpu.iota {dimensions = array<i32: 1>} : vector<60x60xi32>
    %c2_i32_168 = arith.constant 2 : i32
    %480 = vector.broadcast %c2_i32_168 : i32 to vector<60x60xi32>
    %481 = arith.subi %478, %480 : vector<60x60xi32>
    %482 = arith.cmpi eq, %479, %481 : vector<60x60xi32>
    %483 = arith.extui %482 : vector<60x60xi1> to vector<60x60xi32>
    %484 = arith.sitofp %483 : vector<60x60xi32> to vector<60x60xf32>
    %cst_169 = arith.constant dense<0.000000e+00> : vector<60x1xf32>
    %485 = tpu.matmul %484, %477, %cst_169 {dimension_numbers = #tpu.dot_dimension_numbers<[1], [0], [0], [1], [0, 0, 1, 1], [], []>} : vector<60x60xf32>, vector<60x1xf32>, vector<60x1xf32> -> vector<60x1xf32>
    %486 = arith.addf %476, %485 : vector<60x1xf32>
    %487 = vector.extract_strided_slice %465 {offsets = [0, 2], sizes = [60, 1], strides = [1, 1]} : vector<60x7xf32> to vector<60x1xf32>
    %488 = tpu.iota {dimensions = array<i32: 0>} : vector<60x60xi32>
    %489 = tpu.iota {dimensions = array<i32: 1>} : vector<60x60xi32>
    %c1_i32_170 = arith.constant 1 : i32
    %490 = vector.broadcast %c1_i32_170 : i32 to vector<60x60xi32>
    %491 = arith.subi %488, %490 : vector<60x60xi32>
    %492 = arith.cmpi eq, %489, %491 : vector<60x60xi32>
    %493 = arith.extui %492 : vector<60x60xi1> to vector<60x60xi32>
    %494 = arith.sitofp %493 : vector<60x60xi32> to vector<60x60xf32>
    %cst_171 = arith.constant dense<0.000000e+00> : vector<60x1xf32>
    %495 = tpu.matmul %494, %487, %cst_171 {dimension_numbers = #tpu.dot_dimension_numbers<[1], [0], [0], [1], [0, 0, 1, 1], [], []>} : vector<60x60xf32>, vector<60x1xf32>, vector<60x1xf32> -> vector<60x1xf32>
    %496 = arith.addf %486, %495 : vector<60x1xf32>
    %497 = vector.extract_strided_slice %465 {offsets = [0, 4], sizes = [60, 1], strides = [1, 1]} : vector<60x7xf32> to vector<60x1xf32>
    %498 = tpu.iota {dimensions = array<i32: 0>} : vector<60x60xi32>
    %499 = tpu.iota {dimensions = array<i32: 1>} : vector<60x60xi32>
    %c-1_i32_172 = arith.constant -1 : i32
    %500 = vector.broadcast %c-1_i32_172 : i32 to vector<60x60xi32>
    %501 = arith.subi %498, %500 : vector<60x60xi32>
    %502 = arith.cmpi eq, %499, %501 : vector<60x60xi32>
    %503 = arith.extui %502 : vector<60x60xi1> to vector<60x60xi32>
    %504 = arith.sitofp %503 : vector<60x60xi32> to vector<60x60xf32>
    %cst_173 = arith.constant dense<0.000000e+00> : vector<60x1xf32>
    %505 = tpu.matmul %504, %497, %cst_173 {dimension_numbers = #tpu.dot_dimension_numbers<[1], [0], [0], [1], [0, 0, 1, 1], [], []>} : vector<60x60xf32>, vector<60x1xf32>, vector<60x1xf32> -> vector<60x1xf32>
    %506 = arith.addf %496, %505 : vector<60x1xf32>
    %507 = vector.extract_strided_slice %465 {offsets = [0, 5], sizes = [60, 1], strides = [1, 1]} : vector<60x7xf32> to vector<60x1xf32>
    %508 = tpu.iota {dimensions = array<i32: 0>} : vector<60x60xi32>
    %509 = tpu.iota {dimensions = array<i32: 1>} : vector<60x60xi32>
    %c-2_i32_174 = arith.constant -2 : i32
    %510 = vector.broadcast %c-2_i32_174 : i32 to vector<60x60xi32>
    %511 = arith.subi %508, %510 : vector<60x60xi32>
    %512 = arith.cmpi eq, %509, %511 : vector<60x60xi32>
    %513 = arith.extui %512 : vector<60x60xi1> to vector<60x60xi32>
    %514 = arith.sitofp %513 : vector<60x60xi32> to vector<60x60xf32>
    %cst_175 = arith.constant dense<0.000000e+00> : vector<60x1xf32>
    %515 = tpu.matmul %514, %507, %cst_175 {dimension_numbers = #tpu.dot_dimension_numbers<[1], [0], [0], [1], [0, 0, 1, 1], [], []>} : vector<60x60xf32>, vector<60x1xf32>, vector<60x1xf32> -> vector<60x1xf32>
    %516 = arith.addf %506, %515 : vector<60x1xf32>
    %517 = vector.extract_strided_slice %465 {offsets = [0, 6], sizes = [60, 1], strides = [1, 1]} : vector<60x7xf32> to vector<60x1xf32>
    %518 = tpu.iota {dimensions = array<i32: 0>} : vector<60x60xi32>
    %519 = tpu.iota {dimensions = array<i32: 1>} : vector<60x60xi32>
    %c-3_i32_176 = arith.constant -3 : i32
    %520 = vector.broadcast %c-3_i32_176 : i32 to vector<60x60xi32>
    %521 = arith.subi %518, %520 : vector<60x60xi32>
    %522 = arith.cmpi eq, %519, %521 : vector<60x60xi32>
    %523 = arith.extui %522 : vector<60x60xi1> to vector<60x60xi32>
    %524 = arith.sitofp %523 : vector<60x60xi32> to vector<60x60xf32>
    %cst_177 = arith.constant dense<0.000000e+00> : vector<60x1xf32>
    %525 = tpu.matmul %524, %517, %cst_177 {dimension_numbers = #tpu.dot_dimension_numbers<[1], [0], [0], [1], [0, 0, 1, 1], [], []>} : vector<60x60xf32>, vector<60x1xf32>, vector<60x1xf32> -> vector<60x1xf32>
    %526 = arith.addf %516, %525 : vector<60x1xf32>
    %cst_178 = arith.constant 0.000000e+00 : f32
    %527 = vector.broadcast %cst_178 : f32 to vector<60x1xf32>
    %528 = arith.subf %527, %526 : vector<60x1xf32>
    %529 = math.exp %528 : vector<60x1xf32>
    %cst_179 = arith.constant 1.000000e+00 : f32
    %530 = vector.broadcast %cst_179 : f32 to vector<60x1xf32>
    %531 = arith.addf %530, %529 : vector<60x1xf32>
    %532 = tpu.reciprocal %531 {approx = true} : vector<60x1xf32> -> vector<60x1xf32>
    %533 = vector.broadcast %532 : vector<60x1xf32> to vector<60x64xf32>
    %534 = arith.mulf %456, %533 : vector<60x64xf32>
    %c1_180 = arith.constant 1 : index
    %c0_181 = arith.constant 0 : index
    %c0_182 = arith.constant 0 : index
    %535 = vector.load %arg11[%c1_180, %c0_181, %c0_182] : memref<2x60x64xf32, #tpu.memory_space<vmem>>, vector<1x60x64xf32>
    %536 = vector.shape_cast %535 : vector<1x60x64xf32> to vector<60x64xf32>
    %537 = vector.shape_cast %534 : vector<60x64xf32> to vector<1x60x64xf32>
    tpu.vector_store %arg11[%c1_180, %c0_181, %c0_182], %537 {strides = array<i32>} : memref<2x60x64xf32, #tpu.memory_space<vmem>>, vector<1x60x64xf32>,
    return
  }
}

module attributes {stable_mosaic.version = 11 : i64} {
  func.func @head_kernel(%arg0: memref<2x3840xf32, #tpu.memory_space<vmem>>, %arg1: memref<3840x128xbf16, #tpu.memory_space<vmem>>, %arg2: memref<1x128xf32, #tpu.memory_space<vmem>>, %arg3: memref<128x2xbf16, #tpu.memory_space<vmem>>, %arg4: memref<1x2xf32, #tpu.memory_space<vmem>>, %arg5: memref<2x2xf32, #tpu.memory_space<vmem>>) attributes {dimension_semantics = [], scalar_prefetch = 0 : i64, scratch_operands = 0 : i64, tpu.core_type = #tpu.core_type<tc>} {
    %c0 = arith.constant 0 : index
    %c0_0 = arith.constant 0 : index
    %0 = vector.load %arg0[%c0, %c0_0] : memref<2x3840xf32, #tpu.memory_space<vmem>>, vector<2x3840xf32>
    %1 = arith.truncf %0 : vector<2x3840xf32> to vector<2x3840xbf16>
    %c0_1 = arith.constant 0 : index
    %c0_2 = arith.constant 0 : index
    %2 = vector.load %arg1[%c0_1, %c0_2] : memref<3840x128xbf16, #tpu.memory_space<vmem>>, vector<3840x128xbf16>
    %cst = arith.constant dense<0.000000e+00> : vector<2x128xf32>
    %3 = tpu.matmul %1, %2, %cst {dimension_numbers = #tpu.dot_dimension_numbers<[1], [0], [0], [1], [0, 0, 1, 1], [], []>} : vector<2x3840xbf16>, vector<3840x128xbf16>, vector<2x128xf32> -> vector<2x128xf32>
    %c0_3 = arith.constant 0 : index
    %c0_4 = arith.constant 0 : index
    %4 = vector.load %arg2[%c0_3, %c0_4] : memref<1x128xf32, #tpu.memory_space<vmem>>, vector<1x128xf32>
    %5 = vector.broadcast %4 : vector<1x128xf32> to vector<2x128xf32>
    %6 = arith.addf %3, %5 : vector<2x128xf32>
    %cst_5 = arith.constant 0.000000e+00 : f32
    %7 = vector.broadcast %cst_5 : f32 to vector<2x128xf32>
    %8 = arith.maximumf %6, %7 : vector<2x128xf32>
    %9 = arith.truncf %8 : vector<2x128xf32> to vector<2x128xbf16>
    %c0_6 = arith.constant 0 : index
    %c0_7 = arith.constant 0 : index
    %10 = vector.load %arg3[%c0_6, %c0_7] : memref<128x2xbf16, #tpu.memory_space<vmem>>, vector<128x2xbf16>
    %cst_8 = arith.constant dense<0.000000e+00> : vector<2x2xf32>
    %11 = tpu.matmul %9, %10, %cst_8 {dimension_numbers = #tpu.dot_dimension_numbers<[1], [0], [0], [1], [0, 0, 1, 1], [], []>} : vector<2x128xbf16>, vector<128x2xbf16>, vector<2x2xf32> -> vector<2x2xf32>
    %c0_9 = arith.constant 0 : index
    %c0_10 = arith.constant 0 : index
    %12 = vector.load %arg4[%c0_9, %c0_10] : memref<1x2xf32, #tpu.memory_space<vmem>>, vector<1x2xf32>
    %13 = vector.broadcast %12 : vector<1x2xf32> to vector<2x2xf32>
    %14 = arith.addf %11, %13 : vector<2x2xf32>
    %c0_11 = arith.constant 0 : index
    %c0_12 = arith.constant 0 : index
    %15 = vector.load %arg5[%c0_11, %c0_12] : memref<2x2xf32, #tpu.memory_space<vmem>>, vector<2x2xf32>
    tpu.vector_store %arg5[%c0_11, %c0_12], %14 {strides = array<i32>} : memref<2x2xf32, #tpu.memory_space<vmem>>, vector<2x2xf32>,
    return
  }
}

</mosaic_0001>

<bundles_post_ra>
// kernel: forward.3
= control target key start
LH: loop header
LB: loop body
LE: loop exit
PB: predicated region body
PF: predicated region fallthrough
CT: control target
= control target key end

     0   :  { %10 = vsyncpa [#allocation3], 0  ;;  %s3925_s0 = inlined_call_operand.vmem [shape: f32[2,3840], index: 0, kind: input, shape index: {}]   ;;  %s3926_s1 = inlined_call_operand.hbm [shape: bf16[3840,128], index: 1, kind: input, shape index: {}]   ;;  %s3927_s2 = inlined_call_operand.vmem [shape: f32[1,128], index: 2, kind: input, shape index: {}]   ;;  %s3928_s3 = inlined_call_operand.vmem [shape: bf16[128,2], index: 3, kind: input, shape index: {}]   ;;  %s3929_s4 = inlined_call_operand.vmem [shape: f32[1,2], index: 4, kind: input, shape index: {}]   ;;  %s3930_s5 = inlined_call_operand.hbm [shape: f32[2,2], index: 5, kind: output, shape index: {}]  }
   0x1   :  { %11 = vsyncpa [#allocation4], 0  ;;  %s3812_s18 = smov [#allocation2]  }
   0x2   :  { %s19_s19 = sshll.u32 %s3812_s18, 4  ;;  %s20_s19 = int_to_ptr.vmem [resolvable:$true] %s19_s19 }
   0x3   :  { %s3776_s20 = scalar_lea.vmem %s20_s19, 30720  ;;  %p3781_p1 = scmp.lt.s32.totalorder %s20_s19, %s20_s19 }
   0x4   :  { %p3777_p0 = scmp.ne.s32.totalorder %s20_s19, %s3776_s20  ;;  %p3782_p2 = scmp.lt.s32.totalorder %s3776_s20, %s3776_s20 }
   0x6   :  { %p3783_p3 = por %p3782_p2, %p3781_p1 }
   0x8   :  { %p3784_p4 = pnand %p3783_p3, %p3777_p0 }
   0xa   :  { %3787 = shalt.err (!%p3784_p4)
}
   0xb   :  { %s3813_s21 = smov 64   ;;  %s3814_s22 = smov 4  }
   0xc   :  { %25 = dma.hbm_to_vmem [thread:$0]  %s3926_s1, 30720, %s20_s19, [#allocation3], %s3813_s21, %s3813_s21, %s3814_s22  }
   0xd   :  { %3808 = dma.done.wait [#allocation3], 30720  }
   0xe   :  { %3809 = vsyncadd [#allocation3], 4294936576  ;;  %v3513_v0 = vld [vmem:[#allocation2 + $0x78] sm:$0xff]   ;;  %v3517_v4 = vld [vmem:[#allocation2 + $0x70] sm:$0xff]   ;;  %v3815_v21 = vmov 1983009808   ;;  %v56_v23 = vlaneseq }
   0xf   :  { %v3514_v1 = vld [vmem:[#allocation2 + $0x38] sm:$0xff]   ;;  %3147 = vmatprep.subr.bf16.mxu0 %v3513_v0  ;;  %v3518_v5 = vld [vmem:[#allocation2 + $0x30] sm:$0xff]   ;;  %v3521_v8 = vld [vmem:[#allocation2 + $0x68] sm:$0xff]   ;;  %v54_v22 = vunpack.c.l.s4 %v3815_v21  ;;  %vm3817_vm0 = vmmov 0   ;;  %s3818_s6 = smov [#allocation5]   ;;  %vm2879_vm1 = vcmask 9216  }
  0x10   :  { %v3515_v2 = vld [vmem:[#allocation2 + $0xf8] sm:$0xff]   ;;  %3148 = vmatpush3.bf16.msra.mxu0 %v3514_v1  ;;  %v3519_v6 = vld [vmem:[#allocation2 + $0xf0] sm:$0xff]   ;;  %v3522_v9 = vld [vmem:[#allocation2 + $0x28] sm:$0xff]   ;;  %v57_v29 = vshrl.u32 %v56_v23, 7  ;;  %s2887_s7 = sshll.u32 %s3818_s6, 4  ;;  %s2888_s7 = int_to_ptr.vmem [resolvable:$true] %s2887_s7 }
  0x11   :  { %v3516_v3 = vld [vmem:[#allocation2 + $0xb8] sm:$0xff]   ;;  %3169 = vmatprep.subr.bf16.mxu1 %v3515_v2  ;;  %3149 = vmatprep.subr.bf16.mxu0 %v3517_v4  ;;  %v3520_v7 = vld [vmem:[#allocation2 + $0xb0] sm:$0xff]   ;;  %v3523_v10 = vld [vmem:[#allocation2 + $0xe8] sm:$0xff]   ;;  %v55_v28 = vunpack.c.0.s8 %v54_v22  ;;  %s3788_s8 = scalar_lea.vmem %s2888_s7, 32  ;;  %p3793_p6 = scmp.lt.s32.totalorder %s2888_s7, %s2888_s7 }
  0x12   :  { %3170 = vmatpush3.bf16.msra.mxu1 %v3516_v3  ;;  %v3524_v11 = vld [vmem:[#allocation2 + $0xa8] sm:$0xff]   ;;  %v3525_v12 = vld [vmem:[#allocation2 + $0x60] sm:$0xff]   ;;  %v3529_v16 = vld [vmem:[#allocation2 + $0x58] sm:$0xff]   ;;  %p3789_p5 = scmp.ne.s32.totalorder %s2888_s7, %s3788_s8  ;;  %p3794_p7 = scmp.lt.s32.totalorder %s3788_s8, %s3788_s8 }
  0x13   :  { %3171 = vmatprep.subr.bf16.mxu1 %v3519_v6  ;;  %v3526_v13 = vld [vmem:[#allocation2 + $0x20] sm:$0xff]   ;;  %v3530_v17 = vld [vmem:[#allocation2 + $0x18] sm:$0xff]   ;;  %v3533_v20 = vld [vmem:[#allocation2 + $0x50] sm:$0xff]   ;;  %v3852_v34 = vsub.s32 %v55_v28, %v57_v29 }
  0x14   :  { %3150 = vmatpush3.bf16.msra.mxu0 %v3518_v5  ;;  %v3527_v14 = vld [vmem:[#allocation2 + $0xe0] sm:$0xff]   ;;  %v3531_v18 = vld [vmem:[#allocation2 + $0xd8] sm:$0xff]   ;;  %v3534_v24 = vld [vmem:[#allocation2 + $0x10] sm:$0xff]   ;;  %p3795_p8 = por %p3794_p7, %p3793_p6 }
  0x15   :  { %3151 = vmatprep.subr.bf16.mxu0 %v3521_v8  ;;  %v3528_v15 = vld [vmem:[#allocation2 + $0xa0] sm:$0xff]   ;;  %v3532_v19 = vld [vmem:[#allocation2 + $0x98] sm:$0xff]   ;;  %v3535_v25 = vld [vmem:[#allocation2 + $0xd0] sm:$0xff]  }
  0x16   :  { %3172 = vmatpush3.bf16.msra.mxu1 %v3520_v7  ;;  %v3536_v26 = vld [vmem:[#allocation2 + $0x90] sm:$0xff]   ;;  %v3537_v27 = vld [vmem:[#allocation2 + $0x48] sm:$0xff]   ;;  %v3541_v33 = vld [vmem:[#allocation2 + $0x40] sm:$0xff]   ;;  %p3796_p9 = pnand %p3795_p8, %p3789_p5 }
  0x17   :  { %3173 = vmatprep.subr.bf16.mxu1 %v3523_v10  ;;  %v3538_v30 = vld [vmem:[#allocation2 + $0x8] sm:$0xff]   ;;  %v3542_v35 = vld [vmem:[#allocation2] sm:$0xff]   ;;  %v3545_v41 = vld [vmem:[#allocation2 + $0x178] sm:$0xff]  }
  0x18   :  { %3152 = vmatpush3.bf16.msra.mxu0 %v3522_v9  ;;  %v3539_v31 = vld [vmem:[#allocation2 + $0xc8] sm:$0xff]   ;;  %v3543_v36 = vld [vmem:[#allocation2 + $0xc0] sm:$0xff]   ;;  %v3547_v44 = vld [vmem:[#allocation2 + $0x138] sm:$0xff]  }
  0x19   :  { %3153 = vmatprep.subr.bf16.mxu0 %v3525_v12  ;;  %v3540_v32 = vld [vmem:[#allocation2 + $0x88] sm:$0xff]   ;;  %v36_v37 = vld [vmem:[%s3925_s0] sm:$0xff]  ;;  %v3548_v46 = vld [vmem:[#allocation2 + $0x1f8] sm:$0xff]  }
  0x1a   :  { %3174 = vmatpush3.bf16.msra.mxu1 %v3524_v11  ;;  %v59_v38 = vrot.slane %v36_v37, %v3852_v34  ;;  %v3544_v39 = vld [vmem:[#allocation2 + $0x80] sm:$0xff]   ;;  %v52_v40 = vcombine.high %v36_v37, %v36_v37  ;;  %v3549_v49 = vld [vmem:[#allocation2 + $0x1b8] sm:$0xff]   ;;  %v3550_v51 = vld [vmem:[#allocation2 + $0x170] sm:$0xff]  }
  0x1b   :  { %3175 = vmatprep.subr.bf16.mxu1 %v3527_v14  ;;  %v3551_v53 = vld [vmem:[#allocation2 + $0x130] sm:$0xff]   ;;  %v3554_v56 = vld [vmem:[#allocation2 + $0x168] sm:$0xff]   ;;  %v3558_v60 = vld [vmem:[#allocation2 + $0x160] sm:$0xff]  }
  0x1c   :  { %3154 = vmatpush3.bf16.msra.mxu0 %v3526_v13  ;;  %v67_v42 = vcombine.high %v59_v38, %v59_v38  ;;  %v66_v43 = vrot.slane %v52_v40, %v3852_v34  ;;  %v209_v45 = vpack.c.bf16 %v59_v38, %v59_v38  ;;  %v3552_v54 = vld [vmem:[#allocation2 + $0x1f0] sm:$0xff]   ;;  %v3555_v57 = vld [vmem:[#allocation2 + $0x128] sm:$0xff]   ;;  %v3559_v61 = vld [vmem:[#allocation2 + $0x120] sm:$0xff]  }
  0x1d   :  { %3155 = vmatprep.subr.bf16.mxu0 %v3529_v16  ;;  %v3553_v55 = vld [vmem:[#allocation2 + $0x1b0] sm:$0xff]   ;;  %v3556_v58 = vld [vmem:[#allocation2 + $0x1e8] sm:$0xff]   ;;  %v3560_v62 = vld [vmem:[#allocation2 + $0x1e0] sm:$0xff]  }
  0x1e   :  { %3176 = vmatpush3.bf16.msra.mxu1 %v3528_v15  ;;  %v210_v47 = vpack.c.bf16 %v67_v42, %v67_v42  ;;  %v68_v48 = vcombine.high %v66_v43, %v66_v43  ;;  %v211_v50 = vpack.c.bf16 %v66_v43, %v66_v43  ;;  %v3557_v59 = vld [vmem:[#allocation2 + $0x1a8] sm:$0xff]   ;;  %v3561_v63 = vld [vmem:[#allocation2 + $0x1a0] sm:$0xff]   ;;  %v3562_v0 = vld [vmem:[#allocation2 + $0x158] sm:$0xff]  }
  0x1f   :  { %3177 = vmatprep.subr.bf16.mxu1 %v3531_v18  ;;  %v3563_v1 = vld [vmem:[#allocation2 + $0x118] sm:$0xff]   ;;  %v3566_v4 = vld [vmem:[#allocation2 + $0x150] sm:$0xff]   ;;  %v3570_v8 = vld [vmem:[#allocation2 + $0x148] sm:$0xff]  }
  0x20   :  { %3156 = vmatpush3.bf16.msra.mxu0 %v3530_v17  ;;  %2198 = vmatprep.mubr.bf16.mxu0 %v210_v47  ;;  %v212_v52 = vpack.c.bf16 %v68_v48, %v68_v48  ;;  %v3564_v2 = vld [vmem:[#allocation2 + $0x1d8] sm:$0xff]   ;;  %v3567_v5 = vld [vmem:[#allocation2 + $0x110] sm:$0xff]   ;;  %v3571_v9 = vld [vmem:[#allocation2 + $0x108] sm:$0xff]  }
  0x21   :  { %3157 = vmatprep.subr.bf16.mxu0 %v3533_v20  ;;  %v3565_v3 = vld [vmem:[#allocation2 + $0x198] sm:$0xff]   ;;  %v3568_v6 = vld [vmem:[#allocation2 + $0x1d0] sm:$0xff]   ;;  %v3572_v10 = vld [vmem:[#allocation2 + $0x1c8] sm:$0xff]  }
  0x22   :  { %3178 = vmatpush3.bf16.msra.mxu1 %v3532_v19  ;;  %2238 = vmatprep.mubr.bf16.mxu1 %v212_v52  ;;  %v3569_v7 = vld [vmem:[#allocation2 + $0x190] sm:$0xff]   ;;  %v3573_v11 = vld [vmem:[#allocation2 + $0x188] sm:$0xff]   ;;  %v3574_v12 = vld [vmem:[#allocation2 + $0x140] sm:$0xff]  }
  0x23   :  { %3179 = vmatprep.subr.bf16.mxu1 %v3535_v25  ;;  %v3575_v13 = vld [vmem:[#allocation2 + $0x100] sm:$0xff]   ;;  %v37_v15 = vld [vmem:[%s3925_s0 + $0x8] sm:$0xff]  ;;  %v3578_v19 = vld [vmem:[#allocation2 + $0x278] sm:$0xff]  }
  0x24   :  { %3158 = vmatpush3.bf16.msra.mxu0 %v3534_v24  ;;  %v3576_v14 = vld [vmem:[#allocation2 + $0x1c0] sm:$0xff]   ;;  %v76_v16 = vrot.slane %v37_v15, %v3852_v34  ;;  %v69_v18 = vcombine.high %v37_v15, %v37_v15  ;;  %v3580_v22 = vld [vmem:[#allocation2 + $0x238] sm:$0xff]   ;;  %v3583_v29 = vld [vmem:[#allocation2 + $0x270] sm:$0xff]  }
  0x25   :  { %3159 = vmatprep.subr.bf16.mxu0 %v3537_v27  ;;  %v3577_v17 = vld [vmem:[#allocation2 + $0x180] sm:$0xff]   ;;  %v3581_v24 = vld [vmem:[#allocation2 + $0x2f8] sm:$0xff]   ;;  %v3589_v37 = vld [vmem:[#allocation2 + $0x2e8] sm:$0xff]  }
  0x26   :  { %3180 = vmatpush3.bf16.msra.mxu1 %v3536_v26  ;;  %v84_v20 = vcombine.high %v76_v16, %v76_v16  ;;  %v83_v21 = vrot.slane %v69_v18, %v3852_v34  ;;  %v213_v23 = vpack.c.bf16 %v76_v16, %v76_v16  ;;  %v3582_v27 = vld [vmem:[#allocation2 + $0x2b8] sm:$0xff]   ;;  %v3590_v38 = vld [vmem:[#allocation2 + $0x2a8] sm:$0xff]   ;;  %v3592_v40 = vld [vmem:[#allocation2 + $0x220] sm:$0xff]  }
  0x27   :  { %3181 = vmatprep.subr.bf16.mxu1 %v3539_v31  ;;  %v3584_v31 = vld [vmem:[#allocation2 + $0x230] sm:$0xff]   ;;  %v3594_v42 = vld [vmem:[#allocation2 + $0x2a0] sm:$0xff]   ;;  %v3595_v43 = vld [vmem:[#allocation2 + $0x258] sm:$0xff]  }
  0x28   :  { %3160 = vmatpush3.bf16.msra.mxu0 %v3538_v30  ;;  %v214_v25 = vpack.c.bf16 %v84_v20, %v84_v20  ;;  %v85_v26 = vcombine.high %v83_v21, %v83_v21  ;;  %v215_v28 = vpack.c.bf16 %v83_v21, %v83_v21  ;;  %v3599_v47 = vld [vmem:[#allocation2 + $0x250] sm:$0xff]   ;;  %v3604_v52 = vld [vmem:[#allocation2 + $0x208] sm:$0xff]   ;;  %v3625_v18 = vld [vmem:[#allocation2 + $0x320] sm:$0xff]  }
  0x29   :  { %3161 = vmatprep.subr.bf16.mxu0 %v3541_v33  ;;  %v3586_v33 = vld [vmem:[#allocation2 + $0x2b0] sm:$0xff]   ;;  %v3622_v15 = vld [vmem:[#allocation2 + $0x3e8] sm:$0xff]   ;;  %v3627_v20 = vld [vmem:[#allocation2 + $0x3a0] sm:$0xff]  }
  0x2a   :  { %3182 = vmatpush3.bf16.msra.mxu1 %v3540_v32  ;;  %v216_v30 = vpack.c.bf16 %v85_v26, %v85_v26  ;;  %v3585_v32 = vld [vmem:[#allocation2 + $0x2f0] sm:$0xff]   ;;  %v3623_v16 = vld [vmem:[#allocation2 + $0x3a8] sm:$0xff]   ;;  %v3628_v21 = vld [vmem:[#allocation2 + $0x358] sm:$0xff]  }
  0x2b   :  { %3183 = vmatprep.subr.bf16.mxu1 %v3543_v36  ;;  %v3588_v36 = vld [vmem:[#allocation2 + $0x228] sm:$0xff]   ;;  %v3600_v48 = vld [vmem:[#allocation2 + $0x210] sm:$0xff]  }
  0x2c   :  { %3162 = vmatpush3.bf16.msra.mxu0 %v3542_v35  ;;  %v3587_v35 = vld [vmem:[#allocation2 + $0x268] sm:$0xff]   ;;  %v3633_v26 = vld [vmem:[#allocation2 + $0x310] sm:$0xff]  }
  0x2d   :  { %3191 = vmatprep.subr.bf16.mxu0 %v3545_v41  ;;  %v3593_v41 = vld [vmem:[#allocation2 + $0x2e0] sm:$0xff]  }
  0x2e   :  { %3184 = vmatpush3.bf16.msra.mxu1 %v3544_v39  ;;  %v3591_v39 = vld [vmem:[#allocation2 + $0x260] sm:$0xff]  }
  0x2f   :  { %3213 = vmatprep.subr.bf16.mxu1 %v3548_v46  ;;  %2199 = vmatmul.mubr.bf16.vlgmr.msra.gmra.mxu0 %v209_v45  ;;  %v3597_v45 = vld [vmem:[#allocation2 + $0x2d8] sm:$0xff]  }
  0x30   :  { %3192 = vmatpush3.bf16.msra.mxu0 %v3547_v44  ;;  %2278 = vmatprep.mubr.bf16.mxu0 %v214_v25  ;;  %v3596_v44 = vld [vmem:[#allocation2 + $0x218] sm:$0xff]   ;;  %v3632_v25 = vld [vmem:[#allocation2 + $0x350] sm:$0xff]  }
  0x31   :  { %2239 = vmatmul.mubr.bf16.vlgmr.msra.gmra.mxu1 %v211_v50  ;;  %3193 = vmatprep.subr.bf16.mxu0 %v3550_v51  ;;  %v3598_v46 = vld [vmem:[#allocation2 + $0x298] sm:$0xff]   ;;  %v3602_v50 = vld [vmem:[#allocation2 + $0x290] sm:$0xff]   ;;  %v3603_v51 = vld [vmem:[#allocation2 + $0x248] sm:$0xff]  }
  0x32   :  { %3214 = vmatpush3.bf16.msra.mxu1 %v3549_v49  ;;  %2318 = vmatprep.mubr.bf16.mxu1 %v216_v30  ;;  %v3601_v49 = vld [vmem:[#allocation2 + $0x2d0] sm:$0xff]   ;;  %v3637_v30 = vld [vmem:[#allocation2 + $0x308] sm:$0xff]  }
  0x33   :  { %3215 = vmatprep.subr.bf16.mxu1 %v3552_v54  ;;  %v3606_v54 = vld [vmem:[#allocation2 + $0x288] sm:$0xff]  }
  0x34   :  { %3194 = vmatpush3.bf16.msra.mxu0 %v3551_v53  ;;  %v3605_v53 = vld [vmem:[#allocation2 + $0x2c8] sm:$0xff]  }
  0x35   :  { %3195 = vmatprep.subr.bf16.mxu0 %v3554_v56  ;;  %v3608_v56 = vld [vmem:[#allocation2 + $0x200] sm:$0xff]  }
  0x36   :  { %3216 = vmatpush3.bf16.msra.mxu1 %v3553_v55  ;;  %v3607_v55 = vld [vmem:[#allocation2 + $0x240] sm:$0xff]  }
  0x37   :  { %3217 = vmatprep.subr.bf16.mxu1 %v3556_v58  ;;  %v38_v58 = vld [vmem:[%s3925_s0 + $0x10] sm:$0xff] }
  0x38   :  { %3196 = vmatpush3.bf16.msra.mxu0 %v3555_v57  ;;  %v3609_v57 = vld [vmem:[#allocation2 + $0x2c0] sm:$0xff]  }
  0x39   :  { %3197 = vmatprep.subr.bf16.mxu0 %v3558_v60  ;;  %v3610_v60 = vld [vmem:[#allocation2 + $0x280] sm:$0xff]  }
  0x3a   :  { %3218 = vmatpush3.bf16.msra.mxu1 %v3557_v59  ;;  %v93_v59 = vrot.slane %v38_v58, %v3852_v34 }
  0x3b   :  { %3219 = vmatprep.subr.bf16.mxu1 %v3560_v62  ;;  %v3611_v62 = vld [vmem:[#allocation2 + $0x378] sm:$0xff]  }
  0x3c   :  { %3198 = vmatpush3.bf16.msra.mxu0 %v3559_v61  ;;  %v86_v61 = vcombine.high %v38_v58, %v38_v58  ;;  %v3655_v58 = vld [vmem:[#allocation2 + $0x4e8] sm:$0xff]  }
  0x3d   :  { %3199 = vmatprep.subr.bf16.mxu0 %v3562_v0 }
  0x3e   :  { %3220 = vmatpush3.bf16.msra.mxu1 %v3561_v63  ;;  %v101_v63 = vcombine.high %v93_v59, %v93_v59  ;;  %v100_v0 = vrot.slane %v86_v61, %v3852_v34  ;;  %v3658_v61 = vld [vmem:[#allocation2 + $0x420] sm:$0xff]  }
  0x3f   :  { %3221 = vmatprep.subr.bf16.mxu1 %v3564_v2  ;;  %v217_v2 = vpack.c.bf16 %v93_v59, %v93_v59  ;;  %v3656_v59 = vld [vmem:[#allocation2 + $0x4a8] sm:$0xff]  }
  0x40   :  { %3200 = vmatpush3.bf16.msra.mxu0 %v3563_v1  ;;  %v3613_v1 = vld [vmem:[#allocation2 + $0x338] sm:$0xff]  }
  0x41   :  { %3201 = vmatprep.subr.bf16.mxu0 %v3566_v4  ;;  %v218_v4 = vpack.c.bf16 %v101_v63, %v101_v63  ;;  %v3660_v63 = vld [vmem:[#allocation2 + $0x4a0] sm:$0xff]  }
  0x42   :  { %3222 = vmatpush3.bf16.msra.mxu1 %v3565_v3  ;;  %v3614_v3 = vld [vmem:[#allocation2 + $0x3f8] sm:$0xff]  }
  0x43   :  { %3223 = vmatprep.subr.bf16.mxu1 %v3568_v6  ;;  %v3615_v6 = vld [vmem:[#allocation2 + $0x3b8] sm:$0xff]  }
  0x44   :  { %3202 = vmatpush3.bf16.msra.mxu0 %v3567_v5  ;;  %v102_v5 = vcombine.high %v100_v0, %v100_v0 }
  0x45   :  { %3203 = vmatprep.subr.bf16.mxu0 %v3570_v8  ;;  %v3616_v8 = vld [vmem:[#allocation2 + $0x370] sm:$0xff]  }
  0x46   :  { %3224 = vmatpush3.bf16.msra.mxu1 %v3569_v7  ;;  %v219_v7 = vpack.c.bf16 %v100_v0, %v100_v0  ;;  %v3661_v0 = vld [vmem:[#allocation2 + $0x458] sm:$0xff]  }
  0x47   :  { %3225 = vmatprep.subr.bf16.mxu1 %v3572_v10  ;;  %v3617_v10 = vld [vmem:[#allocation2 + $0x330] sm:$0xff]  }
  0x48   :  { %3204 = vmatpush3.bf16.msra.mxu0 %v3571_v9  ;;  %v220_v9 = vpack.c.bf16 %v102_v5, %v102_v5  ;;  %v3666_v5 = vld [vmem:[#allocation2 + $0x410] sm:$0xff]  }
  0x49   :  { %3205 = vmatprep.subr.bf16.mxu0 %v3574_v12  ;;  %v3619_v12 = vld [vmem:[#allocation2 + $0x3b0] sm:$0xff]  }
  0x4a   :  { %3226 = vmatpush3.bf16.msra.mxu1 %v3573_v11  ;;  %v3618_v11 = vld [vmem:[#allocation2 + $0x3f0] sm:$0xff]  }
  0x4b   :  { %3227 = vmatprep.subr.bf16.mxu1 %v3576_v14  ;;  %v3621_v14 = vld [vmem:[#allocation2 + $0x328] sm:$0xff]  }
  0x4c   :  { %3206 = vmatpush3.bf16.msra.mxu0 %v3575_v13  ;;  %v3620_v13 = vld [vmem:[#allocation2 + $0x368] sm:$0xff]  }
  0x4d   :  { %3235 = vmatprep.subr.bf16.mxu0 %v3578_v19  ;;  %v3626_v19 = vld [vmem:[#allocation2 + $0x3e0] sm:$0xff]  }
  0x4e   :  { %3228 = vmatpush3.bf16.msra.mxu1 %v3577_v17  ;;  %v3624_v17 = vld [vmem:[#allocation2 + $0x360] sm:$0xff]  }
  0x4f   :  { %2279 = vmatmul.mubr.bf16.vlgmr.msra.gmra.mxu0 %v213_v23  ;;  %3257 = vmatprep.subr.bf16.mxu1 %v3581_v24  ;;  %v3630_v23 = vld [vmem:[#allocation2 + $0x3d8] sm:$0xff]  }
  0x50   :  { %3236 = vmatpush3.bf16.msra.mxu0 %v3580_v22  ;;  %2358 = vmatprep.mubr.bf16.mxu0 %v218_v4  ;;  %v3629_v22 = vld [vmem:[#allocation2 + $0x318] sm:$0xff]   ;;  %v3665_v4 = vld [vmem:[#allocation2 + $0x450] sm:$0xff]  }
  0x51   :  { %2319 = vmatmul.mubr.bf16.vlgmr.msra.gmra.mxu1 %v215_v28  ;;  %3237 = vmatprep.subr.bf16.mxu0 %v3583_v29  ;;  %v3631_v24 = vld [vmem:[#allocation2 + $0x398] sm:$0xff]   ;;  %v3635_v28 = vld [vmem:[#allocation2 + $0x390] sm:$0xff]   ;;  %v3636_v29 = vld [vmem:[#allocation2 + $0x348] sm:$0xff]  }
  0x52   :  { %3258 = vmatpush3.bf16.msra.mxu1 %v3582_v27  ;;  %2398 = vmatprep.mubr.bf16.mxu1 %v220_v9  ;;  %v3634_v27 = vld [vmem:[#allocation2 + $0x3d0] sm:$0xff]   ;;  %v3670_v9 = vld [vmem:[#allocation2 + $0x408] sm:$0xff]  }
  0x53   :  { %3259 = vmatprep.subr.bf16.mxu1 %v3585_v32  ;;  %v3639_v32 = vld [vmem:[#allocation2 + $0x388] sm:$0xff]  }
  0x54   :  { %3238 = vmatpush3.bf16.msra.mxu0 %v3584_v31  ;;  %v3638_v31 = vld [vmem:[#allocation2 + $0x3c8] sm:$0xff]  }
  0x55   :  { %3239 = vmatprep.subr.bf16.mxu0 %v3587_v35  ;;  %v3641_v35 = vld [vmem:[#allocation2 + $0x300] sm:$0xff]  }
  0x56   :  { %3260 = vmatpush3.bf16.msra.mxu1 %v3586_v33  ;;  %v3640_v33 = vld [vmem:[#allocation2 + $0x340] sm:$0xff]  }
  0x57   :  { %3261 = vmatprep.subr.bf16.mxu1 %v3589_v37  ;;  %v39_v37 = vld [vmem:[%s3925_s0 + $0x18] sm:$0xff] }
  0x58   :  { %3240 = vmatpush3.bf16.msra.mxu0 %v3588_v36  ;;  %v3642_v36 = vld [vmem:[#allocation2 + $0x3c0] sm:$0xff]  }
  0x59   :  { %3241 = vmatprep.subr.bf16.mxu0 %v3591_v39  ;;  %v3643_v39 = vld [vmem:[#allocation2 + $0x380] sm:$0xff]  }
  0x5a   :  { %3262 = vmatpush3.bf16.msra.mxu1 %v3590_v38  ;;  %v110_v38 = vrot.slane %v39_v37, %v3852_v34 }
  0x5b   :  { %3263 = vmatprep.subr.bf16.mxu1 %v3593_v41  ;;  %v3644_v41 = vld [vmem:[#allocation2 + $0x478] sm:$0xff]  }
  0x5c   :  { %3242 = vmatpush3.bf16.msra.mxu0 %v3592_v40  ;;  %v103_v40 = vcombine.high %v39_v37, %v39_v37  ;;  %v3688_v37 = vld [vmem:[#allocation2 + $0x5e8] sm:$0xff]  }
  0x5d   :  { %3243 = vmatprep.subr.bf16.mxu0 %v3595_v43 }
  0x5e   :  { %3264 = vmatpush3.bf16.msra.mxu1 %v3594_v42  ;;  %v118_v42 = vcombine.high %v110_v38, %v110_v38  ;;  %v117_v43 = vrot.slane %v103_v40, %v3852_v34  ;;  %v3691_v40 = vld [vmem:[#allocation2 + $0x520] sm:$0xff]  }
  0x5f   :  { %3265 = vmatprep.subr.bf16.mxu1 %v3597_v45  ;;  %v221_v45 = vpack.c.bf16 %v110_v38, %v110_v38  ;;  %v3689_v38 = vld [vmem:[#allocation2 + $0x5a8] sm:$0xff]  }
  0x60   :  { %3244 = vmatpush3.bf16.msra.mxu0 %v3596_v44  ;;  %v3646_v44 = vld [vmem:[#allocation2 + $0x438] sm:$0xff]  }
  0x61   :  { %3245 = vmatprep.subr.bf16.mxu0 %v3599_v47  ;;  %v222_v47 = vpack.c.bf16 %v118_v42, %v118_v42  ;;  %v3693_v42 = vld [vmem:[#allocation2 + $0x5a0] sm:$0xff]  }
  0x62   :  { %3266 = vmatpush3.bf16.msra.mxu1 %v3598_v46  ;;  %v3647_v46 = vld [vmem:[#allocation2 + $0x4f8] sm:$0xff]  }
  0x63   :  { %3267 = vmatprep.subr.bf16.mxu1 %v3601_v49  ;;  %v3648_v49 = vld [vmem:[#allocation2 + $0x4b8] sm:$0xff]  }
  0x64   :  { %3246 = vmatpush3.bf16.msra.mxu0 %v3600_v48  ;;  %v119_v48 = vcombine.high %v117_v43, %v117_v43 }
  0x65   :  { %3247 = vmatprep.subr.bf16.mxu0 %v3603_v51  ;;  %v3649_v51 = vld [vmem:[#allocation2 + $0x470] sm:$0xff]  }
  0x66   :  { %3268 = vmatpush3.bf16.msra.mxu1 %v3602_v50  ;;  %v223_v50 = vpack.c.bf16 %v117_v43, %v117_v43  ;;  %v3694_v43 = vld [vmem:[#allocation2 + $0x558] sm:$0xff]  }
  0x67   :  { %3269 = vmatprep.subr.bf16.mxu1 %v3605_v53  ;;  %v3650_v53 = vld [vmem:[#allocation2 + $0x430] sm:$0xff]  }
  0x68   :  { %3248 = vmatpush3.bf16.msra.mxu0 %v3604_v52  ;;  %v224_v52 = vpack.c.bf16 %v119_v48, %v119_v48  ;;  %v3699_v48 = vld [vmem:[#allocation2 + $0x510] sm:$0xff]  }
  0x69   :  { %3249 = vmatprep.subr.bf16.mxu0 %v3607_v55  ;;  %v3652_v55 = vld [vmem:[#allocation2 + $0x4b0] sm:$0xff]  }
  0x6a   :  { %3270 = vmatpush3.bf16.msra.mxu1 %v3606_v54  ;;  %v3651_v54 = vld [vmem:[#allocation2 + $0x4f0] sm:$0xff]  }
  0x6b   :  { %3271 = vmatprep.subr.bf16.mxu1 %v3609_v57  ;;  %v3654_v57 = vld [vmem:[#allocation2 + $0x428] sm:$0xff]  }
  0x6c   :  { %3250 = vmatpush3.bf16.msra.mxu0 %v3608_v56  ;;  %v3653_v56 = vld [vmem:[#allocation2 + $0x468] sm:$0xff]  }
  0x6d   :  { %3279 = vmatprep.subr.bf16.mxu0 %v3611_v62  ;;  %v3659_v62 = vld [vmem:[#allocation2 + $0x4e0] sm:$0xff]  }
  0x6e   :  { %3272 = vmatpush3.bf16.msra.mxu1 %v3610_v60  ;;  %v3657_v60 = vld [vmem:[#allocation2 + $0x460] sm:$0xff]  }
  0x6f   :  { %2359 = vmatmul.mubr.bf16.vlgmr.msra.gmra.mxu0 %v217_v2  ;;  %3301 = vmatprep.subr.bf16.mxu1 %v3614_v3  ;;  %v3663_v2 = vld [vmem:[#allocation2 + $0x4d8] sm:$0xff]  }
  0x70   :  { %3280 = vmatpush3.bf16.msra.mxu0 %v3613_v1  ;;  %2438 = vmatprep.mubr.bf16.mxu0 %v222_v47  ;;  %v3662_v1 = vld [vmem:[#allocation2 + $0x418] sm:$0xff]   ;;  %v3698_v47 = vld [vmem:[#allocation2 + $0x550] sm:$0xff]  }
  0x71   :  { %2399 = vmatmul.mubr.bf16.vlgmr.msra.gmra.mxu1 %v219_v7  ;;  %3281 = vmatprep.subr.bf16.mxu0 %v3616_v8  ;;  %v3664_v3 = vld [vmem:[#allocation2 + $0x498] sm:$0xff]   ;;  %v3668_v7 = vld [vmem:[#allocation2 + $0x490] sm:$0xff]   ;;  %v3669_v8 = vld [vmem:[#allocation2 + $0x448] sm:$0xff]  }
  0x72   :  { %3302 = vmatpush3.bf16.msra.mxu1 %v3615_v6  ;;  %2478 = vmatprep.mubr.bf16.mxu1 %v224_v52  ;;  %v3667_v6 = vld [vmem:[#allocation2 + $0x4d0] sm:$0xff]   ;;  %v3703_v52 = vld [vmem:[#allocation2 + $0x508] sm:$0xff]  }
  0x73   :  { %3303 = vmatprep.subr.bf16.mxu1 %v3618_v11  ;;  %v3672_v11 = vld [vmem:[#allocation2 + $0x488] sm:$0xff]  }
  0x74   :  { %3282 = vmatpush3.bf16.msra.mxu0 %v3617_v10  ;;  %v3671_v10 = vld [vmem:[#allocation2 + $0x4c8] sm:$0xff]  }
  0x75   :  { %3283 = vmatprep.subr.bf16.mxu0 %v3620_v13  ;;  %v3674_v13 = vld [vmem:[#allocation2 + $0x400] sm:$0xff]  }
  0x76   :  { %3304 = vmatpush3.bf16.msra.mxu1 %v3619_v12  ;;  %v3673_v12 = vld [vmem:[#allocation2 + $0x440] sm:$0xff]  }
  0x77   :  { %3305 = vmatprep.subr.bf16.mxu1 %v3622_v15  ;;  %v40_v15 = vld [vmem:[%s3925_s0 + $0x20] sm:$0xff] }
  0x78   :  { %3284 = vmatpush3.bf16.msra.mxu0 %v3621_v14  ;;  %v3675_v14 = vld [vmem:[#allocation2 + $0x4c0] sm:$0xff]  }
  0x79   :  { %3285 = vmatprep.subr.bf16.mxu0 %v3624_v17  ;;  %v3676_v17 = vld [vmem:[#allocation2 + $0x480] sm:$0xff]  }
  0x7a   :  { %3306 = vmatpush3.bf16.msra.mxu1 %v3623_v16  ;;  %v127_v16 = vrot.slane %v40_v15, %v3852_v34 }
  0x7b   :  { %3307 = vmatprep.subr.bf16.mxu1 %v3626_v19  ;;  %v3677_v19 = vld [vmem:[#allocation2 + $0x578] sm:$0xff]  }
  0x7c   :  { %3286 = vmatpush3.bf16.msra.mxu0 %v3625_v18  ;;  %v120_v18 = vcombine.high %v40_v15, %v40_v15  ;;  %v3721_v15 = vld [vmem:[#allocation2 + $0x6e8] sm:$0xff]  }
  0x7d   :  { %3287 = vmatprep.subr.bf16.mxu0 %v3628_v21 }
  0x7e   :  { %3308 = vmatpush3.bf16.msra.mxu1 %v3627_v20  ;;  %v135_v20 = vcombine.high %v127_v16, %v127_v16  ;;  %v134_v21 = vrot.slane %v120_v18, %v3852_v34  ;;  %v3724_v18 = vld [vmem:[#allocation2 + $0x620] sm:$0xff]  }
  0x7f   :  { %3309 = vmatprep.subr.bf16.mxu1 %v3630_v23  ;;  %v225_v23 = vpack.c.bf16 %v127_v16, %v127_v16  ;;  %v3722_v16 = vld [vmem:[#allocation2 + $0x6a8] sm:$0xff]  }
  0x80   :  { %3288 = vmatpush3.bf16.msra.mxu0 %v3629_v22  ;;  %v3679_v22 = vld [vmem:[#allocation2 + $0x538] sm:$0xff]  }
  0x81   :  { %3289 = vmatprep.subr.bf16.mxu0 %v3632_v25  ;;  %v226_v25 = vpack.c.bf16 %v135_v20, %v135_v20  ;;  %v3726_v20 = vld [vmem:[#allocation2 + $0x6a0] sm:$0xff]  }
  0x82   :  { %3310 = vmatpush3.bf16.msra.mxu1 %v3631_v24  ;;  %v3680_v24 = vld [vmem:[#allocation2 + $0x5f8] sm:$0xff]  }
  0x83   :  { %3311 = vmatprep.subr.bf16.mxu1 %v3634_v27  ;;  %v3681_v27 = vld [vmem:[#allocation2 + $0x5b8] sm:$0xff]  }
  0x84   :  { %3290 = vmatpush3.bf16.msra.mxu0 %v3633_v26  ;;  %v136_v26 = vcombine.high %v134_v21, %v134_v21 }
  0x85   :  { %3291 = vmatprep.subr.bf16.mxu0 %v3636_v29  ;;  %v3682_v29 = vld [vmem:[#allocation2 + $0x570] sm:$0xff]  }
  0x86   :  { %3312 = vmatpush3.bf16.msra.mxu1 %v3635_v28  ;;  %v227_v28 = vpack.c.bf16 %v134_v21, %v134_v21  ;;  %v3727_v21 = vld [vmem:[#allocation2 + $0x658] sm:$0xff]  }
  0x87   :  { %3313 = vmatprep.subr.bf16.mxu1 %v3638_v31  ;;  %v3683_v31 = vld [vmem:[#allocation2 + $0x530] sm:$0xff]  }
  0x88   :  { %3292 = vmatpush3.bf16.msra.mxu0 %v3637_v30  ;;  %v228_v30 = vpack.c.bf16 %v136_v26, %v136_v26  ;;  %v3732_v26 = vld [vmem:[#allocation2 + $0x610] sm:$0xff]  }
  0x89   :  { %3293 = vmatprep.subr.bf16.mxu0 %v3640_v33  ;;  %v3685_v33 = vld [vmem:[#allocation2 + $0x5b0] sm:$0xff]  }
  0x8a   :  { %3314 = vmatpush3.bf16.msra.mxu1 %v3639_v32  ;;  %v3684_v32 = vld [vmem:[#allocation2 + $0x5f0] sm:$0xff]  }
  0x8b   :  { %3315 = vmatprep.subr.bf16.mxu1 %v3642_v36  ;;  %v3687_v36 = vld [vmem:[#allocation2 + $0x528] sm:$0xff]  }
  0x8c   :  { %3294 = vmatpush3.bf16.msra.mxu0 %v3641_v35  ;;  %v3686_v35 = vld [vmem:[#allocation2 + $0x568] sm:$0xff]  }
  0x8d   :  { %3323 = vmatprep.subr.bf16.mxu0 %v3644_v41  ;;  %v3692_v41 = vld [vmem:[#allocation2 + $0x5e0] sm:$0xff]  }
  0x8e   :  { %3316 = vmatpush3.bf16.msra.mxu1 %v3643_v39  ;;  %v3690_v39 = vld [vmem:[#allocation2 + $0x560] sm:$0xff]  }
  0x8f   :  { %3345 = vmatprep.subr.bf16.mxu1 %v3647_v46  ;;  %2439 = vmatmul.mubr.bf16.vlgmr.msra.gmra.mxu0 %v221_v45  ;;  %v3696_v45 = vld [vmem:[#allocation2 + $0x5d8] sm:$0xff]  }
  0x90   :  { %3324 = vmatpush3.bf16.msra.mxu0 %v3646_v44  ;;  %2518 = vmatprep.mubr.bf16.mxu0 %v226_v25  ;;  %v3695_v44 = vld [vmem:[#allocation2 + $0x518] sm:$0xff]   ;;  %v3731_v25 = vld [vmem:[#allocation2 + $0x650] sm:$0xff]  }
  0x91   :  { %2479 = vmatmul.mubr.bf16.vlgmr.msra.gmra.mxu1 %v223_v50  ;;  %3325 = vmatprep.subr.bf16.mxu0 %v3649_v51  ;;  %v3697_v46 = vld [vmem:[#allocation2 + $0x598] sm:$0xff]   ;;  %v3701_v50 = vld [vmem:[#allocation2 + $0x590] sm:$0xff]   ;;  %v3702_v51 = vld [vmem:[#allocation2 + $0x548] sm:$0xff]  }
  0x92   :  { %3346 = vmatpush3.bf16.msra.mxu1 %v3648_v49  ;;  %2558 = vmatprep.mubr.bf16.mxu1 %v228_v30  ;;  %v3700_v49 = vld [vmem:[#allocation2 + $0x5d0] sm:$0xff]   ;;  %v3736_v30 = vld [vmem:[#allocation2 + $0x608] sm:$0xff]  }
  0x93   :  { %3347 = vmatprep.subr.bf16.mxu1 %v3651_v54  ;;  %v3705_v54 = vld [vmem:[#allocation2 + $0x588] sm:$0xff]  }
  0x94   :  { %3326 = vmatpush3.bf16.msra.mxu0 %v3650_v53  ;;  %v3704_v53 = vld [vmem:[#allocation2 + $0x5c8] sm:$0xff]  }
  0x95   :  { %3327 = vmatprep.subr.bf16.mxu0 %v3653_v56  ;;  %v3707_v56 = vld [vmem:[#allocation2 + $0x500] sm:$0xff]  }
  0x96   :  { %3348 = vmatpush3.bf16.msra.mxu1 %v3652_v55  ;;  %v3706_v55 = vld [vmem:[#allocation2 + $0x540] sm:$0xff]  }
  0x97   :  { %3349 = vmatprep.subr.bf16.mxu1 %v3655_v58  ;;  %v41_v58 = vld [vmem:[%s3925_s0 + $0x28] sm:$0xff] }
  0x98   :  { %3328 = vmatpush3.bf16.msra.mxu0 %v3654_v57  ;;  %v3708_v57 = vld [vmem:[#allocation2 + $0x5c0] sm:$0xff]  }
  0x99   :  { %3329 = vmatprep.subr.bf16.mxu0 %v3657_v60  ;;  %v3709_v60 = vld [vmem:[#allocation2 + $0x580] sm:$0xff]  }
  0x9a   :  { %3350 = vmatpush3.bf16.msra.mxu1 %v3656_v59  ;;  %v144_v59 = vrot.slane %v41_v58, %v3852_v34 }
  0x9b   :  { %3351 = vmatprep.subr.bf16.mxu1 %v3659_v62  ;;  %v3710_v62 = vld [vmem:[#allocation2 + $0x678] sm:$0xff]  }
  0x9c   :  { %3330 = vmatpush3.bf16.msra.mxu0 %v3658_v61  ;;  %v137_v61 = vcombine.high %v41_v58, %v41_v58  ;;  %v3748_v58 = vld [vmem:[#allocation2 + $0x768] sm:$0xff]  }
  0x9d   :  { %3331 = vmatprep.subr.bf16.mxu0 %v3661_v0 }
  0x9e   :  { %3352 = vmatpush3.bf16.msra.mxu1 %v3660_v63  ;;  %v152_v63 = vcombine.high %v144_v59, %v144_v59  ;;  %v151_v0 = vrot.slane %v137_v61, %v3852_v34 }
  0x9f   :  { %3353 = vmatprep.subr.bf16.mxu1 %v3663_v2  ;;  %v229_v2 = vpack.c.bf16 %v144_v59, %v144_v59 }
  0xa0   :  { %3332 = vmatpush3.bf16.msra.mxu0 %v3662_v1  ;;  %v3712_v1 = vld [vmem:[#allocation2 + $0x638] sm:$0xff]  }
  0xa1   :  { %3333 = vmatprep.subr.bf16.mxu0 %v3665_v4  ;;  %v230_v4 = vpack.c.bf16 %v152_v63, %v152_v63 }
  0xa2   :  { %3354 = vmatpush3.bf16.msra.mxu1 %v3664_v3  ;;  %v3713_v3 = vld [vmem:[#allocation2 + $0x6f8] sm:$0xff]  }
  0xa3   :  { %3355 = vmatprep.subr.bf16.mxu1 %v3667_v6  ;;  %v3714_v6 = vld [vmem:[#allocation2 + $0x6b8] sm:$0xff]  }
  0xa4   :  { %3334 = vmatpush3.bf16.msra.mxu0 %v3666_v5  ;;  %v153_v5 = vcombine.high %v151_v0, %v151_v0 }
  0xa5   :  { %3335 = vmatprep.subr.bf16.mxu0 %v3669_v8  ;;  %v3715_v8 = vld [vmem:[#allocation2 + $0x670] sm:$0xff]  }
  0xa6   :  { %3356 = vmatpush3.bf16.msra.mxu1 %v3668_v7  ;;  %v231_v7 = vpack.c.bf16 %v151_v0, %v151_v0  ;;  %v3749_v0 = vld [vmem:[#allocation2 + $0x728] sm:$0xff]  }
  0xa7   :  { %3357 = vmatprep.subr.bf16.mxu1 %v3671_v10  ;;  %v3716_v10 = vld [vmem:[#allocation2 + $0x630] sm:$0xff]  }
  0xa8   :  { %3336 = vmatpush3.bf16.msra.mxu0 %v3670_v9  ;;  %v232_v9 = vpack.c.bf16 %v153_v5, %v153_v5  ;;  %v2896_v5 = vld.sshfl [vmem:[%s3925_s0 + $0x38] sm:$0x33 pattern:$0x76325410] }
  0xa9   :  { %3337 = vmatprep.subr.bf16.mxu0 %v3673_v12  ;;  %v3718_v12 = vld [vmem:[#allocation2 + $0x6b0] sm:$0xff]  }
  0xaa   :  { %3358 = vmatpush3.bf16.msra.mxu1 %v3672_v11  ;;  %v3717_v11 = vld [vmem:[#allocation2 + $0x6f0] sm:$0xff]  }
  0xab   :  { %3359 = vmatprep.subr.bf16.mxu1 %v3675_v14  ;;  %v3720_v14 = vld [vmem:[#allocation2 + $0x628] sm:$0xff]  }
  0xac   :  { %3338 = vmatpush3.bf16.msra.mxu0 %v3674_v13  ;;  %v3719_v13 = vld [vmem:[#allocation2 + $0x668] sm:$0xff]  }
  0xad   :  { %3367 = vmatprep.subr.bf16.mxu0 %v3677_v19  ;;  %v3725_v19 = vld [vmem:[#allocation2 + $0x6e0] sm:$0xff]  }
  0xae   :  { %3360 = vmatpush3.bf16.msra.mxu1 %v3676_v17  ;;  %v3723_v17 = vld [vmem:[#allocation2 + $0x660] sm:$0xff]  }
  0xaf   :  { %2519 = vmatmul.mubr.bf16.vlgmr.msra.gmra.mxu0 %v225_v23  ;;  %3389 = vmatprep.subr.bf16.mxu1 %v3680_v24  ;;  %v3729_v23 = vld [vmem:[#allocation2 + $0x6d8] sm:$0xff]  }
  0xb0   :  { %3368 = vmatpush3.bf16.msra.mxu0 %v3679_v22  ;;  %2598 = vmatprep.mubr.bf16.mxu0 %v230_v4  ;;  %v3728_v22 = vld [vmem:[#allocation2 + $0x618] sm:$0xff]  }
  0xb1   :  { %2559 = vmatmul.mubr.bf16.vlgmr.msra.gmra.mxu1 %v227_v28  ;;  %3369 = vmatprep.subr.bf16.mxu0 %v3682_v29  ;;  %v3730_v24 = vld [vmem:[#allocation2 + $0x698] sm:$0xff]   ;;  %v3734_v28 = vld [vmem:[#allocation2 + $0x690] sm:$0xff]   ;;  %v3735_v29 = vld [vmem:[#allocation2 + $0x648] sm:$0xff]  }
  0xb2   :  { %3390 = vmatpush3.bf16.msra.mxu1 %v3681_v27  ;;  %2638 = vmatprep.mubr.bf16.mxu1 %v232_v9  ;;  %v3733_v27 = vld [vmem:[#allocation2 + $0x6d0] sm:$0xff]   ;;  %v3752_v4 = vld [vmem:[#allocation2 + $0x758] sm:$0xff]  }
  0xb3   :  { %3391 = vmatprep.subr.bf16.mxu1 %v3684_v32  ;;  %v3738_v32 = vld [vmem:[#allocation2 + $0x688] sm:$0xff]  }
  0xb4   :  { %3370 = vmatpush3.bf16.msra.mxu0 %v3683_v31  ;;  %v3737_v31 = vld [vmem:[#allocation2 + $0x6c8] sm:$0xff]  }
  0xb5   :  { %3371 = vmatprep.subr.bf16.mxu0 %v3686_v35  ;;  %v3740_v35 = vld [vmem:[#allocation2 + $0x600] sm:$0xff]  }
  0xb6   :  { %3392 = vmatpush3.bf16.msra.mxu1 %v3685_v33  ;;  %v3739_v33 = vld [vmem:[#allocation2 + $0x640] sm:$0xff]  }
  0xb7   :  { %3393 = vmatprep.subr.bf16.mxu1 %v3688_v37  ;;  %v42_v37 = vld [vmem:[%s3925_s0 + $0x30] sm:$0xff] }
  0xb8   :  { %3372 = vmatpush3.bf16.msra.mxu0 %v3687_v36  ;;  %v3741_v36 = vld [vmem:[#allocation2 + $0x6c0] sm:$0xff]  }
  0xb9   :  { %3373 = vmatprep.subr.bf16.mxu0 %v3690_v39  ;;  %v3742_v39 = vld [vmem:[#allocation2 + $0x680] sm:$0xff]  }
  0xba   :  { %3394 = vmatpush3.bf16.msra.mxu1 %v3689_v38  ;;  %v161_v38 = vrot.slane %v42_v37, %v3852_v34 }
  0xbb   :  { %3395 = vmatprep.subr.bf16.mxu1 %v3692_v41  ;;  %v3743_v41 = vld [vmem:[#allocation2 + $0x778] sm:$0xff]  }
  0xbc   :  { %3374 = vmatpush3.bf16.msra.mxu0 %v3691_v40  ;;  %v154_v40 = vcombine.high %v42_v37, %v42_v37 }
  0xbd   :  { %3375 = vmatprep.subr.bf16.mxu0 %v3694_v43 }
  0xbe   :  { %3396 = vmatpush3.bf16.msra.mxu1 %v3693_v42  ;;  %v169_v42 = vcombine.high %v161_v38, %v161_v38  ;;  %v168_v43 = vrot.slane %v154_v40, %v3852_v34 }
  0xbf   :  { %3397 = vmatprep.subr.bf16.mxu1 %v3696_v45 }
  0xc0   :  { %3376 = vmatpush3.bf16.msra.mxu0 %v3695_v44  ;;  %v233_v44 = vpack.c.bf16 %v161_v38, %v161_v38  ;;  %v234_v45 = vpack.c.bf16 %v169_v42, %v169_v42  ;;  %v3816_v42 = vmov 0.0  }
  0xc1   :  { %3377 = vmatprep.subr.bf16.mxu0 %v3698_v47  ;;  %v3745_v47 = vld [vmem:[#allocation2 + $0x738] sm:$0xff]  }
  0xc2   :  { %3398 = vmatpush3.bf16.msra.mxu1 %v3697_v46  ;;  %v170_v46 = vcombine.high %v168_v43, %v168_v43 }
  0xc3   :  { %3399 = vmatprep.subr.bf16.mxu1 %v3700_v49  ;;  %v235_v49 = vpack.c.bf16 %v168_v43, %v168_v43  ;;  %v3761_v43 = vld [vmem:[%s3928_s3 + $0x30] sm:$0xff]  }
  0xc4   :  { %3378 = vmatpush3.bf16.msra.mxu0 %v3699_v48 }
  0xc5   :  { %3379 = vmatprep.subr.bf16.mxu0 %v3702_v51  ;;  %v236_v51 = vpack.c.bf16 %v170_v46, %v170_v46  ;;  %v3764_v46 = vld [vmem:[%s3928_s3 + $0x18] sm:$0xff]  }
  0xc6   :  { %3400 = vmatpush3.bf16.msra.mxu1 %v3701_v50  ;;  %v3746_v50 = vld [vmem:[#allocation2 + $0x770] sm:$0xff]  }
  0xc7   :  { %3401 = vmatprep.subr.bf16.mxu1 %v3704_v53 }
  0xc8   :  { %3380 = vmatpush3.bf16.msra.mxu0 %v3703_v52  ;;  %v2897_v52 = vld [vmem:[%s3927_s2] ss:$0 sm:$0xff] }
  0xc9   :  { %3381 = vmatprep.subr.bf16.mxu0 %v3706_v55  ;;  %v3747_v55 = vld [vmem:[#allocation2 + $0x730] sm:$0xff]  }
  0xca   :  { %3402 = vmatpush3.bf16.msra.mxu1 %v3705_v54 }
  0xcb   :  { %3403 = vmatprep.subr.bf16.mxu1 %v3708_v57 }
  0xcc   :  { %3382 = vmatpush3.bf16.msra.mxu0 %v3707_v56 }
  0xcd   :  { %3411 = vmatprep.subr.bf16.mxu0 %v3710_v62 }
  0xce   :  { %3404 = vmatpush3.bf16.msra.mxu1 %v3709_v60 }
  0xcf   :  { %2599 = vmatmul.mubr.bf16.vlgmr.msra.gmra.mxu0 %v229_v2  ;;  %3433 = vmatprep.subr.bf16.mxu1 %v3713_v3  ;;  %v3751_v3 = vld [vmem:[#allocation2 + $0x720] sm:$0xff]  }
  0xd0   :  { %3412 = vmatpush3.bf16.msra.mxu0 %v3712_v1  ;;  %2678 = vmatprep.mubr.bf16.mxu0 %v234_v45  ;;  %v3750_v1 = vld [vmem:[#allocation2 + $0x760] sm:$0xff]  }
  0xd1   :  { %2639 = vmatmul.mubr.bf16.vlgmr.msra.gmra.mxu1 %v231_v7  ;;  %3413 = vmatprep.subr.bf16.mxu0 %v3715_v8  ;;  %v178_v7 = vcombine.high %v2896_v5, %v2896_v5  ;;  %v3754_v8 = vld [vmem:[#allocation2 + $0x750] sm:$0xff]   ;;  %v3763_v45 = vld [vmem:[%s3928_s3 + $0x20] sm:$0xff]  }
  0xd2   :  { %3434 = vmatpush3.bf16.msra.mxu1 %v3714_v6  ;;  %2718 = vmatprep.mubr.bf16.mxu1 %v236_v51  ;;  %v3753_v6 = vld [vmem:[#allocation2 + $0x718] sm:$0xff]  }
  0xd3   :  { %3435 = vmatprep.subr.bf16.mxu1 %v3717_v11  ;;  %v238_v9 = vpack.c.bf16 %v178_v7, %v178_v7  ;;  %v3756_v11 = vld [vmem:[#allocation2 + $0x748] sm:$0xff]  }
  0xd4   :  { %3414 = vmatpush3.bf16.msra.mxu0 %v3716_v10  ;;  %v3755_v10 = vld [vmem:[#allocation2 + $0x710] sm:$0xff]  }
  0xd5   :  { %3415 = vmatprep.subr.bf16.mxu0 %v3719_v13  ;;  %v3758_v13 = vld [vmem:[#allocation2 + $0x740] sm:$0xff]  }
  0xd6   :  { %3436 = vmatpush3.bf16.msra.mxu1 %v3718_v12  ;;  %v3757_v12 = vld [vmem:[#allocation2 + $0x708] sm:$0xff]  }
  0xd7   :  { %3437 = vmatprep.subr.bf16.mxu1 %v3721_v15  ;;  %v237_v15 = vpack.c.bf16 %v2896_v5, %v2896_v5 }
  0xd8   :  { %3416 = vmatpush3.bf16.msra.mxu0 %v3720_v14  ;;  %v3759_v14 = vld [vmem:[#allocation2 + $0x700] sm:$0xff]  }
  0xd9   :  { %3417 = vmatprep.subr.bf16.mxu0 %v3723_v17 }
  0xda   :  { %3438 = vmatpush3.bf16.msra.mxu1 %v3722_v16 }
  0xdb   :  { %3439 = vmatprep.subr.bf16.mxu1 %v3725_v19 }
  0xdc   :  { %3418 = vmatpush3.bf16.msra.mxu0 %v3724_v18 }
  0xdd   :  { %3419 = vmatprep.subr.bf16.mxu0 %v3727_v21 }
  0xde   :  { %3440 = vmatpush3.bf16.msra.mxu1 %v3726_v20 }
  0xdf   :  { %3441 = vmatprep.subr.bf16.mxu1 %v3729_v23 }
  0xe0   :  { %3420 = vmatpush3.bf16.msra.mxu0 %v3728_v22 }
  0xe1   :  { %3421 = vmatprep.subr.bf16.mxu0 %v3731_v25 }
  0xe2   :  { %3442 = vmatpush3.bf16.msra.mxu1 %v3730_v24 }
  0xe3   :  { %3443 = vmatprep.subr.bf16.mxu1 %v3733_v27 }
  0xe4   :  { %3422 = vmatpush3.bf16.msra.mxu0 %v3732_v26 }
  0xe5   :  { %3423 = vmatprep.subr.bf16.mxu0 %v3735_v29 }
  0xe6   :  { %3444 = vmatpush3.bf16.msra.mxu1 %v3734_v28 }
  0xe7   :  { %3445 = vmatprep.subr.bf16.mxu1 %v3737_v31 }
  0xe8   :  { %3424 = vmatpush3.bf16.msra.mxu0 %v3736_v30 }
  0xe9   :  { %3425 = vmatprep.subr.bf16.mxu0 %v3739_v33 }
  0xea   :  { %3446 = vmatpush3.bf16.msra.mxu1 %v3738_v32 }
  0xeb   :  { %3447 = vmatprep.subr.bf16.mxu1 %v3741_v36 }
  0xec   :  { %3426 = vmatpush3.bf16.msra.mxu0 %v3740_v35 }
  0xed   :  { %3455 = vmatprep.subr.bf16.mxu0 %v3743_v41  ;;  %v3760_v41 = vld [vmem:[%s3928_s3 + $0x38] sm:$0xff]  }
  0xee   :  { %3448 = vmatpush3.bf16.msra.mxu1 %v3742_v39 }
  0xef   :  { %v3163_v48 = vpop.f32.mrf.mxu0  ;;  %2679 = vmatmul.mubr.bf16.vlgmr.msra.gmra.mxu0 %v233_v44  ;;  %3486 = vmatprep.subr.bf16.mxu1 %v3816_v42  ;;  %v3762_v44 = vld [vmem:[%s3928_s3 + $0x28] sm:$0xff]  }
  0xf0   :  { %3456 = vmatpush3.bf16.msra.mxu0 %v3745_v47  ;;  %2758 = vmatprep.mubr.bf16.mxu0 %v238_v9  ;;  %v3765_v47 = vld [vmem:[%s3928_s3 + $0x10] sm:$0xff]  }
  0xf1   :  { %v3164_v53 = vpop.f32.mrf.mxu0  ;;  %v3185_v54 = vpop.f32.mrf.mxu1  ;;  %2719 = vmatmul.mubr.bf16.vlgmr.msra.gmra.mxu1 %v235_v49  ;;  %3457 = vmatprep.subr.bf16.mxu0 %v3746_v50 }
  0xf2   :  { %v3165_v34 = vadd.f32 %v3164_v53, %v3163_v48  ;;  %3487 = vmatpush3.bf16.msra.mxu1 %v3760_v41  ;;  %3502 = vmatprep.mubr.msk.bf16.mxu1 %vm3817_vm0, %v3816_v42 }
  0xf3   :  { %v3166_v56 = vpop.f32.mrf.mxu0  ;;  %v3186_v57 = vpop.f32.mrf.mxu1  ;;  %3488 = vmatprep.subr.bf16.mxu1 %v3816_v42 }
  0xf4   :  { %v2201_v59 = vadd.f32 %v3165_v34, %v2897_v52  ;;  %v3187_v60 = vadd.f32 %v3186_v57, %v3185_v54  ;;  %3458 = vmatpush3.bf16.msra.mxu0 %v3747_v55  ;;  %v3766_v52 = vld [vmem:[%s3928_s3 + $0x8] sm:$0xff]  }
  0xf5   :  { %v3167_v61 = vpop.f32.mrf.mxu0  ;;  %v3188_v62 = vpop.f32.mrf.mxu1  ;;  %3459 = vmatprep.subr.bf16.mxu0 %v3748_v58 }
  0xf6   :  { %v2241_v63 = vadd.f32 %v3187_v60, %v2201_v59  ;;  %3489 = vmatpush3.bf16.msra.mxu1 %v3761_v43  ;;  %v3767_v59 = vld [vmem:[%s3928_s3] sm:$0xff]  }
  0xf7   :  { %v3189_v2 = vpop.f32.mrf.mxu1  ;;  %3490 = vmatprep.subr.bf16.mxu1 %v3816_v42 }
  0xf8   :  { %3460 = vmatpush3.bf16.msra.mxu0 %v3749_v0 }
  0xf9   :  { %3461 = vmatprep.subr.bf16.mxu0 %v3750_v1 }
  0xfa   :  { %3491 = vmatpush3.bf16.msra.mxu1 %v3762_v44 }
  0xfb   :  { %3492 = vmatprep.subr.bf16.mxu1 %v3816_v42 }
  0xfc   :  { %3462 = vmatpush3.bf16.msra.mxu0 %v3751_v3 }
  0xfd   :  { %3463 = vmatprep.subr.bf16.mxu0 %v3752_v4 }
  0xfe   :  { %3493 = vmatpush3.bf16.msra.mxu1 %v3763_v45 }
  0xff   :  { %3494 = vmatprep.subr.bf16.mxu1 %v3816_v42 }
 0x100   :  { %3464 = vmatpush3.bf16.msra.mxu0 %v3753_v6 }
 0x101   :  { %3465 = vmatprep.subr.bf16.mxu0 %v3754_v8 }
 0x102   :  { %3495 = vmatpush3.bf16.msra.mxu1 %v3764_v46 }
 0x103   :  { %3496 = vmatprep.subr.bf16.mxu1 %v3816_v42 }
 0x104   :  { %3466 = vmatpush3.bf16.msra.mxu0 %v3755_v10 }
 0x105   :  { %3467 = vmatprep.subr.bf16.mxu0 %v3756_v11 }
 0x106   :  { %3497 = vmatpush3.bf16.msra.mxu1 %v3765_v47 }
 0x107   :  { %3498 = vmatprep.subr.bf16.mxu1 %v3816_v42 }
 0x108   :  { %3468 = vmatpush3.bf16.msra.mxu0 %v3757_v12 }
 0x109   :  { %3469 = vmatprep.subr.bf16.mxu0 %v3758_v13 }
 0x10a   :  { %3499 = vmatpush3.bf16.msra.mxu1 %v3766_v52 }
 0x10b   :  { %3500 = vmatprep.subr.bf16.mxu1 %v3816_v42  ;;  %v3138_v42 = vld [vmem:[%s3929_s4] ss:$0 sm:$0xff] }
 0x10c   :  { %3470 = vmatpush3.bf16.msra.mxu0 %v3759_v14 }
 0x10e   :  { %3501 = vmatpush3.bf16.msra.mxu1 %v3767_v59 }
 0x10f   :  { %v3207_v16 = vpop.f32.mrf.mxu0  ;;  %2759 = vmatmul.mubr.bf16.vlgmr.msra.gmra.mxu0 %v237_v15 }
 0x111   :  { %v3208_v17 = vpop.f32.mrf.mxu0  ;;  %v3229_v18 = vpop.f32.mrf.mxu1 }
 0x112   :  { %v3209_v19 = vadd.f32 %v3208_v17, %v3207_v16 }
 0x113   :  { %v3210_v20 = vpop.f32.mrf.mxu0  ;;  %v3230_v21 = vpop.f32.mrf.mxu1 }
 0x114   :  { %v2281_v22 = vadd.f32 %v3209_v19, %v2241_v63  ;;  %v3231_v23 = vadd.f32 %v3230_v21, %v3229_v18 }
 0x115   :  { %v3211_v24 = vpop.f32.mrf.mxu0  ;;  %v3232_v25 = vpop.f32.mrf.mxu1 }
 0x116   :  { %v2321_v26 = vadd.f32 %v3231_v23, %v2281_v22 }
 0x117   :  { %v3233_v27 = vpop.f32.mrf.mxu1 }
 0x12f   :  { %v3251_v28 = vpop.f32.mrf.mxu0 }
 0x131   :  { %v3252_v29 = vpop.f32.mrf.mxu0  ;;  %v3273_v30 = vpop.f32.mrf.mxu1 }
 0x132   :  { %v3253_v31 = vadd.f32 %v3252_v29, %v3251_v28 }
 0x133   :  { %v3254_v32 = vpop.f32.mrf.mxu0  ;;  %v3274_v33 = vpop.f32.mrf.mxu1 }
 0x134   :  { %v2361_v35 = vadd.f32 %v3253_v31, %v2321_v26  ;;  %v3275_v36 = vadd.f32 %v3274_v33, %v3273_v30 }
 0x135   :  { %v3255_v37 = vpop.f32.mrf.mxu0  ;;  %v3276_v38 = vpop.f32.mrf.mxu1 }
 0x136   :  { %v2401_v39 = vadd.f32 %v3275_v36, %v2361_v35 }
 0x137   :  { %v3277_v40 = vpop.f32.mrf.mxu1 }
 0x14f   :  { %v3295_v48 = vpop.f32.mrf.mxu0 }
 0x151   :  { %v3296_v49 = vpop.f32.mrf.mxu0  ;;  %v3317_v50 = vpop.f32.mrf.mxu1 }
 0x152   :  { %v3297_v51 = vadd.f32 %v3296_v49, %v3295_v48 }
 0x153   :  { %v3298_v53 = vpop.f32.mrf.mxu0  ;;  %v3318_v54 = vpop.f32.mrf.mxu1 }
 0x154   :  { %v2441_v34 = vadd.f32 %v3297_v51, %v2401_v39  ;;  %v3319_v55 = vadd.f32 %v3318_v54, %v3317_v50 }
 0x155   :  { %v3299_v56 = vpop.f32.mrf.mxu0  ;;  %v3320_v57 = vpop.f32.mrf.mxu1 }
 0x156   :  { %v2481_v58 = vadd.f32 %v3319_v55, %v2441_v34 }
 0x157   :  { %v3321_v60 = vpop.f32.mrf.mxu1 }
 0x16f   :  { %v3339_v61 = vpop.f32.mrf.mxu0 }
 0x171   :  { %v3340_v62 = vpop.f32.mrf.mxu0  ;;  %v3361_v63 = vpop.f32.mrf.mxu1 }
 0x172   :  { %v3341_v0 = vadd.f32 %v3340_v62, %v3339_v61 }
 0x173   :  { %v3342_v1 = vpop.f32.mrf.mxu0  ;;  %v3362_v2 = vpop.f32.mrf.mxu1 }
 0x174   :  { %v2521_v3 = vadd.f32 %v3341_v0, %v2481_v58  ;;  %v3363_v4 = vadd.f32 %v3362_v2, %v3361_v63 }
 0x175   :  { %v3343_v5 = vpop.f32.mrf.mxu0  ;;  %v3364_v6 = vpop.f32.mrf.mxu1 }
 0x176   :  { %v2561_v7 = vadd.f32 %v3363_v4, %v2521_v3 }
 0x177   :  { %v3365_v8 = vpop.f32.mrf.mxu1 }
 0x18f   :  { %v3383_v9 = vpop.f32.mrf.mxu0 }
 0x191   :  { %v3384_v10 = vpop.f32.mrf.mxu0  ;;  %v3405_v11 = vpop.f32.mrf.mxu1 }
 0x192   :  { %v3385_v25 = vadd.f32 %v3384_v10, %v3383_v9 }
 0x193   :  { %v3386_v12 = vpop.f32.mrf.mxu0  ;;  %v3406_v13 = vpop.f32.mrf.mxu1 }
 0x194   :  { %v2601_v26 = vadd.f32 %v3385_v25, %v2561_v7  ;;  %v3407_v27 = vadd.f32 %v3406_v13, %v3405_v11 }
 0x195   :  { %v3387_v14 = vpop.f32.mrf.mxu0  ;;  %v3408_v15 = vpop.f32.mrf.mxu1 }
 0x196   :  { %v2641_v29 = vadd.f32 %v3407_v27, %v2601_v26 }
 0x197   :  { %v3409_v16 = vpop.f32.mrf.mxu1 }
 0x1af   :  { %v3427_v17 = vpop.f32.mrf.mxu0 }
 0x1b1   :  { %v3428_v18 = vpop.f32.mrf.mxu0  ;;  %v3449_v19 = vpop.f32.mrf.mxu1 }
 0x1b2   :  { %v3429_v28 = vadd.f32 %v3428_v18, %v3427_v17 }
 0x1b3   :  { %v3430_v20 = vpop.f32.mrf.mxu0  ;;  %v3450_v21 = vpop.f32.mrf.mxu1 }
 0x1b4   :  { %v2681_v30 = vadd.f32 %v3429_v28, %v2641_v29  ;;  %v3451_v31 = vadd.f32 %v3450_v21, %v3449_v19 }
 0x1b5   :  { %v3431_v22 = vpop.f32.mrf.mxu0  ;;  %v3452_v23 = vpop.f32.mrf.mxu1 }
 0x1b6   :  { %v2721_v35 = vadd.f32 %v3451_v31, %v2681_v30 }
 0x1b7   :  { %v3453_v24 = vpop.f32.mrf.mxu1 }
 0x1cf   :  { %v3471_v32 = vpop.f32.mrf.mxu0 }
 0x1d1   :  { %v3472_v33 = vpop.f32.mrf.mxu0 }
 0x1d2   :  { %v3473_v36 = vadd.f32 %v3472_v33, %v3471_v32 }
 0x1d3   :  { %v3474_v37 = vpop.f32.mrf.mxu0 }
 0x1d4   :  { %v2761_v38 = vadd.f32 %v3473_v36, %v2721_v35 }
 0x1d5   :  { %v3475_v39 = vpop.f32.mrf.mxu0 }
 0x1d6   :  { %v2766_v40 = vmax.f32 %v2761_v38, 0.0 }
 0x1d8   :  { %v2767_v41 = vpack.c.bf16 %v2766_v40, %v2766_v40 }
 0x1da   :  { %3503 = vmatmul.mubr.bf16.vlgmr.msra.gmra.mxu1 %v2767_v41 }
 0x29a   :  { %v2873_v43 = vpop.f32.mrf.mxu1 }
 0x29b   :  { %v2874_v44 = vadd.f32 %v3138_v42, %v2873_v43 }
 0x29c   :  { %v3504_v45 = vpop.f32.mrf.mxu1 }
 0x29d   :  { %2880 = vst.msk [vmem:[#allocation5] sm:$0x3] %vm2879_vm1, %v2874_v44 }
 0x29e   :  { %v2876_v46 = vpop.f32.mrf.mxu1 }
 0x29f   :  { %3799 = shalt.err (!%p3796_p9)
}
 0x2a0   :  { %2890 = dma.vmem_to_hbm [thread:$0]  %s2888_s7, 32, %s3930_s5, [#allocation4]   ;;  %v3505_v47 = vpop.f32.mrf.mxu1 }
 0x2a1   :  { %3810 = dma.done.wait [#allocation4], 32  }
 0x2a2   :  { %3811 = vsyncadd [#allocation4], 4294967264 }
 0x2a3   :  { %2894 = vsyncpa [#allocation3], 1 }
 0x2a4   :  { %2895 = vsyncpa [#allocation4], 1 }

// kernel: forward.2
= control target key start
LH: loop header
LB: loop body
LE: loop exit
PB: predicated region body
PF: predicated region fallthrough
CT: control target
= control target key end

     0   :  { %vm72_vm0 = vcmask 1045504   ;;  %vm59_vm1 = vcmask 97280   ;;  %v187_v14 = vlaneseq  ;;  %v14093_v18 = vmov 0.0   ;;  %s11078_s16 = smov 64   ;;  %s11079_s17 = smov 96   ;;  %s14081_s1 = inlined_call_operand.vmem [shape: bf16[12,96], index: 1, kind: input, shape index: {}]   ;;  %s14082_s0 = inlined_call_operand.vmem [shape: f32[2,60,12], index: 0, kind: input, shape index: {}]   ;;  %s14083_s3 = inlined_call_operand.vmem [shape: f32[32,2], index: 3, kind: input, shape index: {}]   ;;  %s14084_s2 = inlined_call_operand.vmem [shape: f32[1,32], index: 2, kind: input, shape index: {}]   ;;  %s14085_s4 = inlined_call_operand.vmem [shape: f32[2,32], index: 4, kind: input, shape index: {}]   ;;  %s14086_s5 = inlined_call_operand.vmem [shape: f32[2,7], index: 5, kind: input, shape index: {}]   ;;  %s14087_s6 = inlined_call_operand.vmem [shape: bf16[32,192], index: 6, kind: input, shape index: {}]   ;;  %s14088_s8 = inlined_call_operand.vmem [shape: f32[64,4], index: 8, kind: input, shape index: {}]   ;;  %s14089_s7 = inlined_call_operand.vmem [shape: f32[1,64], index: 7, kind: input, shape index: {}]   ;;  %s14090_s9 = inlined_call_operand.vmem [shape: f32[4,64], index: 9, kind: input, shape index: {}]   ;;  %s14091_s10 = inlined_call_operand.vmem [shape: f32[2,7], index: 10, kind: input, shape index: {}]   ;;  %s14092_s11 = inlined_call_operand.vmem [shape: f32[2,60,64], index: 11, kind: output, shape index: {}]  }
   0x1   :  { %v10919_v0 = vld [vmem:[%s14081_s1] sm:$0x3f]   ;;  %v40_v2 = vld [vmem:[%s14082_s0 + $0x8] sm:$0xff]  ;;  %v41_v3 = vld [vmem:[%s14082_s0 + $0x10] sm:$0xff]  ;;  %vm230_vm3 = vcmask 490496   ;;  %vm255_vm4 = vcmask 1043456  }
   0x2   :  { %v39_v1 = vld [vmem:[%s14082_s0] sm:$0xff]  ;;  %10903 = vmatprep.subr.msk.bf16.mxu0 %vm72_vm0, %v10919_v0  ;;  %v74_v4 = vsel %vm72_vm0, %v10919_v0, 0  ;;  %v42_v6 = vld [vmem:[%s14082_s0 + $0x18] sm:$0xff]  ;;  %v44_v8 = vld [vmem:[%s14082_s0 + $0x28] sm:$0xff]  ;;  %v11182_v15 = vshrl.u32 %v187_v14, 7  ;;  %v11184_v16 = vand.u32 127, %v187_v14 }
   0x3   :  { %v50_v5 = vpack.c.bf16 %v40_v2, %v39_v1  ;;  %v43_v7 = vld [vmem:[%s14082_s0 + $0x20] sm:$0xff]  ;;  %9772 = vmatpush3.bf16.msra.mxu0 %v74_v4  ;;  %v51_v9 = vpack.c.bf16 %v42_v6, %v41_v3  ;;  %v45_v11 = vld [vmem:[%s14082_s0 + $0x30] sm:$0xff]  ;;  %v46_v12 = vld [vmem:[%s14082_s0 + $0x38] sm:$0xf]  ;;  %s11081_s13 = smov 127   ;;  %s11082_s14 = smov 126  }
   0x4   :  { %v52_v10 = vpack.c.bf16 %v44_v8, %v43_v7  ;;  %v53_v13 = vpack.c.bf16 %v46_v12, %v45_v11  ;;  %v8657_v17 = vadd.s32 4294967295, %v11182_v15  ;;  %v8682_v27 = vadd.s32 1, %v11182_v15  ;;  %v574_v11 = vld [vmem:[%s14083_s3 + $0x8] sm:$0xff]  ;;  %v573_v12 = vld [vmem:[%s14083_s3] sm:$0xff]  ;;  %s11083_s15 = smov 124   ;;  %s11084_s18 = smov 123  }
   0x5   :  { %9773 = vmatprep.mubr.msk.bf16.mxu0 %vm59_vm1, %v50_v5  ;;  %v11216_v29 = vadd.s32 8, %v11182_v15  ;;  %v11221_v30 = vadd.s32 16, %v11182_v15  ;;  %v11237_v33 = vadd.s32 24, %v11182_v15  ;;  %v11242_v35 = vadd.s32 32, %v11182_v15  ;;  %s11085_s19 = smov 122   ;;  %s11086_s20 = smov 3  }
   0x6   :  { %9774 = vmatmul.mubr.msk.bf16.vlgmr.msra.gmra.mxu0 %vm59_vm1, %v51_v9  ;;  %vm206_vm2 = vcmp.eq.s32.totalorder %v11184_v16, %v8657_v17  ;;  %vm379_vm5 = vcmp.eq.s32.totalorder %v11184_v16, %v8682_v27  ;;  %v11254_v37 = vadd.s32 40, %v11182_v15  ;;  %v11260_v39 = vadd.s32 48, %v11182_v15  ;;  %v576_v9 = vld [vmem:[%s14083_s3 + $0x18] sm:$0xff] }
   0x7   :  { %9777 = vmatprep.mubr.msk.bf16.mxu0 %vm59_vm1, %v52_v10  ;;  %v11189_v19 = vsel %vm206_vm2, 1.0, %v14093_v18  ;;  %v11224_v31 = vsel %vm379_vm5, 1.0, %v14093_v18  ;;  %v8658_v32 = vadd.s32 4294967295, %v11216_v29  ;;  %v8659_v34 = vadd.s32 4294967295, %v11221_v30  ;;  %v575_v10 = vld [vmem:[%s14083_s3 + $0x10] sm:$0xff] }
   0x8   :  { %14255 = vst [vmem:[#allocation2_spill] sm:$0xff] %v11189_v19  ;;  %9797 = vmatprep.mubr.msk.f32.mxu1 %vm230_vm3, %v11189_v19  ;;  %14256 = vst [vmem:[#allocation3_spill] sm:$0xff] %v11224_v31  ;;  %v8660_v36 = vadd.s32 4294967295, %v11237_v33  ;;  %v8661_v38 = vadd.s32 4294967295, %v11242_v35  ;;  %v8662_v42 = vadd.s32 4294967295, %v11254_v37  ;;  %v11273_v43 = vadd.s32 56, %v11182_v15 }
   0x9   :  { %vm207_vm6 = vcmp.eq.s32.totalorder %v11184_v16, %v8658_v32  ;;  %vm208_vm7 = vcmp.eq.s32.totalorder %v11184_v16, %v8659_v34  ;;  %v8663_v44 = vadd.s32 4294967295, %v11260_v39  ;;  %v8683_v56 = vadd.s32 1, %v11216_v29 }
   0xa   :  { %v11264_v40 = vsel %vm207_vm6, 1.0, %v14093_v18  ;;  %v11268_v41 = vsel %vm208_vm7, 1.0, %v14093_v18  ;;  %vm209_vm8 = vcmp.eq.s32.totalorder %v11184_v16, %v8660_v36  ;;  %vm210_vm9 = vcmp.eq.s32.totalorder %v11184_v16, %v8661_v38 }
   0xb   :  { %14257 = vst [vmem:[#allocation4_spill] sm:$0xff] %v11264_v40  ;;  %14258 = vst [vmem:[#allocation5_spill] sm:$0xff] %v11268_v41  ;;  %v11283_v45 = vsel %vm209_vm8, 1.0, %v14093_v18  ;;  %v11288_v46 = vsel %vm210_vm9, 1.0, %v14093_v18  ;;  %vm211_vm10 = vcmp.eq.s32.totalorder %v11184_v16, %v8662_v42  ;;  %v8664_v47 = vadd.s32 4294967295, %v11273_v43 }
   0xc   :  { %14259 = vst [vmem:[#allocation6_spill] sm:$0xff] %v11283_v45  ;;  %14260 = vst [vmem:[#allocation7_spill] sm:$0xff] %v11288_v46  ;;  %vm212_vm11 = vcmp.eq.s32.totalorder %v11184_v16, %v8663_v44  ;;  %v11300_v48 = vsel %vm211_vm10, 1.0, %v14093_v18  ;;  %v8684_v58 = vadd.s32 1, %v11221_v30  ;;  %vm380_vm13 = vcmp.eq.s32.totalorder %v11184_v16, %v8683_v56 }
   0xd   :  { %14261 = vst [vmem:[#allocation8_spill] sm:$0xff] %v11300_v48  ;;  %v11305_v49 = vsel %vm212_vm11, 1.0, %v14093_v18  ;;  %vm213_vm12 = vcmp.eq.s32.totalorder %v11184_v16, %v8664_v47  ;;  %v8685_v59 = vadd.s32 1, %v11237_v33  ;;  %v8686_v61 = vadd.s32 1, %v11242_v35 }
   0xe   :  { %9778 = vmatmul.mubr.msk.bf16.gmra.mxu0 %vm59_vm1, %v53_v13  ;;  %14262 = vst [vmem:[#allocation9_spill] sm:$0xff] %v11305_v49  ;;  %v11315_v50 = vsel %vm213_vm12, 1.0, %v14093_v18  ;;  %vm381_vm14 = vcmp.eq.s32.totalorder %v11184_v16, %v8684_v58  ;;  %v11334_v63 = vsel %vm380_vm13, 1.0, %v14093_v18  ;;  %v8687_v1 = vadd.s32 1, %v11254_v37 }
   0xf   :  { %9825 = vmatprep.mubr.msk.f32.mxu0 %vm230_vm3, %v11224_v31  ;;  %14263 = vst [vmem:[#allocation10_spill] sm:$0xff] %v11315_v50  ;;  %14264 = vst [vmem:[#allocation11_spill] sm:$0xff] %v11334_v63  ;;  %v11337_v0 = vsel %vm381_vm14, 1.0, %v14093_v18  ;;  %vm382_vm15 = vcmp.eq.s32.totalorder %v11184_v16, %v8685_v59  ;;  %vm383_vm2 = vcmp.eq.s32.totalorder %v11184_v16, %v8686_v61  ;;  %v8688_v2 = vadd.s32 1, %v11260_v39 }
  0x10   :  { %14265 = vst [vmem:[#allocation12_spill] sm:$0xff] %v11337_v0  ;;  %v11349_v3 = vsel %vm382_vm15, 1.0, %v14093_v18  ;;  %v11352_v4 = vsel %vm383_vm2, 1.0, %v14093_v18  ;;  %vm384_vm5 = vcmp.eq.s32.totalorder %v11184_v16, %v8687_v1  ;;  %v8689_v5 = vadd.s32 1, %v11273_v43 }
  0x11   :  { %14266 = vst [vmem:[#allocation13_spill] sm:$0xff] %v11349_v3  ;;  %14267 = vst [vmem:[#allocation14_spill] sm:$0xff] %v11352_v4  ;;  %vm385_vm6 = vcmp.eq.s32.totalorder %v11184_v16, %v8688_v2  ;;  %v11362_v6 = vsel %vm384_vm5, 1.0, %v14093_v18  ;;  %vm11080_vm8 = vmmov 0   ;;  %vm578_vm9 = vcmask 261120  }
  0x12   :  { %14268 = vst [vmem:[#allocation15_spill] sm:$0xff] %v11362_v6  ;;  %v11365_v7 = vsel %vm385_vm6, 1.0, %v14093_v18  ;;  %vm386_vm7 = vcmp.eq.s32.totalorder %v11184_v16, %v8689_v5  ;;  %vm592_vm10 = vcmask 257024   ;;  %vm776_vm11 = vcmask 1041408  }
  0x13   :  { %14269 = vst [vmem:[#allocation16_spill] sm:$0xff] %v11365_v7  ;;  %v11373_v8 = vsel %vm386_vm7, 1.0, %v14093_v18  ;;  %vm772_vm12 = vcmask 15360   ;;  %vm998_vm13 = vcmask 7168  }
  0x14   :  { %14270 = vst [vmem:[#allocation17_spill] sm:$0xff] %v11373_v8 }
  0xc6   :  { %v11193_v20 = vpop.f32.mrf.mxu0 }
  0xc8   :  { %v110_v21 = vpop.f32.mrf.mxu0 }
  0xca   :  { %v11195_v22 = vpop.f32.mrf.mxu0 }
  0xcc   :  { %v113_v23 = vpop.f32.mrf.mxu0 }
  0xce   :  { %v11197_v24 = vpop.f32.mrf.mxu0 }
  0xd0   :  { %v11199_v25 = vpop.f32.mrf.mxu0 }
  0xd2   :  { %v11201_v26 = vpop.f32.mrf.mxu0 }
  0xd3   :  { %417 = vrot.lane.b32.xlu0 %v11201_v26, %s11078_s16  ;;  %9781 = vmatprep.subr.msk.mxu1 %vm255_vm4, %v11201_v26 }
  0xd4   :  { %v11208_v28 = vpop.f32.mrf.mxu0  ;;  %9782 = vmatpush3.msk.msra.mxu1 %vm255_vm4, %v11201_v26 }
  0xd5   :  { %9783 = vmatprep.subr.mxu1 %v11197_v24  ;;  %413 = vrot.lane.b32.xlu1 %v11208_v28, %s11078_s16 }
  0xd6   :  { %9784 = vmatpush3.msra.mxu1 %v11197_v24 }
  0xd7   :  { %415 = vrot.lane.b32.xlu0 %v11197_v24, %s11078_s16  ;;  %9785 = vmatprep.subr.mxu1 %v11208_v28 }
  0xd8   :  { %9786 = vmatpush3.msra.mxu1 %v11208_v28 }
  0xd9   :  { %411 = vrot.lane.b32.xlu1 %v11199_v25, %s11078_s16  ;;  %9787 = vmatprep.subr.mxu1 %v11199_v25 }
  0xda   :  { %9788 = vmatpush3.msra.mxu1 %v11199_v25 }
  0xdb   :  { %409 = vrot.lane.b32.xlu0 %v11195_v22, %s11078_s16  ;;  %9789 = vmatprep.subr.mxu1 %v11195_v22 }
  0xdc   :  { %9790 = vmatpush3.msra.mxu1 %v11195_v22 }
  0xdd   :  { %407 = vrot.lane.b32.xlu1 %v11193_v20, %s11078_s16  ;;  %9791 = vmatprep.subr.mxu1 %v11193_v20 }
  0xde   :  { %9792 = vmatpush3.msra.mxu1 %v11193_v20 }
  0xdf   :  { %405 = vrot.lane.b32.xlu0 %v113_v23, %s11078_s16  ;;  %9793 = vmatprep.subr.mxu1 %v113_v23 }
  0xe0   :  { %9794 = vmatpush3.msra.mxu1 %v113_v23 }
  0xe1   :  { %403 = vrot.lane.b32.xlu1 %v110_v21, %s11078_s16  ;;  %9795 = vmatprep.subr.mxu1 %v110_v21 }
  0xe2   :  { %9796 = vmatpush3.msra.mxu1 %v110_v21 }
  0xe3   :  { %155 = vrot.lane.b32.xlu0 %v110_v21, %s11079_s17  ;;  %9798 = vmatmul.mubr.msk.f32.vlgmr.msra.gmra.mxu1 %vm230_vm3, %v11264_v40 }
  0xe4   :  { %9800 = vmatprep.mubr.msk.f32.mxu1 %vm230_vm3, %v11268_v41  ;;  %9837 = vmatprep.subr.mxu1 %v14093_v18 }
  0xe5   :  { %157 = vrot.lane.b32.xlu1 %v113_v23, %s11079_s17  ;;  %9838 = vmatpush3.msra.mxu1 %v576_v9 }
  0xe6   :  { %9839 = vmatprep.subr.mxu1 %v14093_v18 }
  0xe7   :  { %159 = vrot.lane.b32.xlu0 %v11193_v20, %s11079_s17  ;;  %9801 = vmatmul.mubr.msk.f32.gmra.mxu1 %vm230_vm3, %v11283_v45 }
  0xe8   :  { %9803 = vmatprep.mubr.msk.f32.mxu1 %vm230_vm3, %v11288_v46  ;;  %9840 = vmatpush3.msra.mxu1 %v575_v10 }
  0xe9   :  { %161 = vrot.lane.b32.xlu1 %v11195_v22, %s11079_s17  ;;  %9841 = vmatprep.subr.mxu1 %v14093_v18 }
  0xea   :  { %9842 = vmatpush3.msra.mxu1 %v574_v11 }
  0xeb   :  { %163 = vrot.lane.b32.xlu0 %v11199_v25, %s11079_s17  ;;  %9804 = vmatmul.mubr.msk.f32.gmra.mxu1 %vm230_vm3, %v11300_v48  ;;  %v8656_v25 = vld [vmem:[%s14084_s2] ss:$0 sm:$0xff] }
  0xec   :  { %9806 = vmatprep.mubr.msk.f32.mxu1 %vm230_vm3, %v11305_v49  ;;  %9843 = vmatprep.subr.mxu1 %v14093_v18 }
  0xed   :  { %165 = vrot.lane.b32.xlu1 %v11208_v28, %s11079_s17  ;;  %9844 = vmatpush3.msra.mxu1 %v573_v12 }
  0xee   :  { %9859 = vmatprep.subr.mxu1 %v14093_v18 }
  0xef   :  { %167 = vrot.lane.b32.xlu0 %v11197_v24, %s11079_s17  ;;  %9807 = vmatmul.mubr.msk.f32.gmra.mxu1 %vm230_vm3, %v11315_v50 }
  0xf0   :  { %9845 = vmatprep.mubr.msk.f32.mxu1 %vm11080_vm8, %v14093_v18 }
  0xf1   :  { %169 = vrot.lane.b32.xlu1 %v11201_v26, %s11079_s17 }
 0x145   :  { %v418_v51 = vpop.permute.xlu0 %417 }
 0x146   :  { %9809 = vmatprep.subr.msk.mxu0 %vm255_vm4, %v418_v51 }
 0x147   :  { %9810 = vmatpush3.msk.msra.mxu0 %vm255_vm4, %v418_v51  ;;  %v414_v52 = vpop.permute.xlu1 %413 }
 0x149   :  { %v416_v53 = vpop.permute.xlu0 %415 }
 0x14a   :  { %9811 = vmatprep.subr.mxu0 %v416_v53 }
 0x14b   :  { %9812 = vmatpush3.msra.mxu0 %v416_v53  ;;  %v412_v54 = vpop.permute.xlu1 %411 }
 0x14c   :  { %9813 = vmatprep.subr.mxu0 %v414_v52 }
 0x14d   :  { %v410_v55 = vpop.permute.xlu0 %409  ;;  %9814 = vmatpush3.msra.mxu0 %v414_v52 }
 0x14e   :  { %9815 = vmatprep.subr.mxu0 %v412_v54 }
 0x14f   :  { %9816 = vmatpush3.msra.mxu0 %v412_v54  ;;  %v408_v57 = vpop.permute.xlu1 %407 }
 0x150   :  { %9817 = vmatprep.subr.mxu0 %v410_v55 }
 0x151   :  { %9818 = vmatpush3.msra.mxu0 %v410_v55  ;;  %v406_v60 = vpop.permute.xlu0 %405 }
 0x152   :  { %9819 = vmatprep.subr.mxu0 %v408_v57 }
 0x153   :  { %9820 = vmatpush3.msra.mxu0 %v408_v57  ;;  %v404_v62 = vpop.permute.xlu1 %403 }
 0x154   :  { %9821 = vmatprep.subr.mxu0 %v406_v60 }
 0x155   :  { %9822 = vmatpush3.msra.mxu0 %v406_v60  ;;  %v156_v20 = vpop.permute.xlu0 %155 }
 0x156   :  { %9823 = vmatprep.subr.mxu0 %v404_v62  ;;  %v179_v28 = vadd.f32 %v8656_v25, %v156_v20 }
 0x157   :  { %9824 = vmatpush3.msra.mxu0 %v404_v62  ;;  %v158_v17 = vpop.permute.xlu1 %157 }
 0x158   :  { %9826 = vmatmul.mubr.msk.f32.vlgmr.msra.gmra.mxu0 %vm230_vm3, %v11334_v63  ;;  %9848 = vmatprep.subr.mxu0 %v14093_v18  ;;  %v180_v26 = vadd.f32 %v8656_v25, %v158_v17 }
 0x159   :  { %9828 = vmatprep.mubr.msk.f32.mxu0 %vm230_vm3, %v11337_v0  ;;  %9849 = vmatpush3.msra.mxu0 %v576_v9  ;;  %v160_v24 = vpop.permute.xlu0 %159 }
 0x15a   :  { %9850 = vmatprep.subr.mxu0 %v14093_v18  ;;  %v181_v53 = vadd.f32 %v8656_v25, %v160_v24 }
 0x15b   :  { %9851 = vmatpush3.msra.mxu0 %v575_v10  ;;  %v162_v22 = vpop.permute.xlu1 %161 }
 0x15c   :  { %9829 = vmatmul.mubr.msk.f32.gmra.mxu0 %vm230_vm3, %v11349_v3  ;;  %9852 = vmatprep.subr.mxu0 %v14093_v18  ;;  %v182_v38 = vadd.f32 %v8656_v25, %v162_v22 }
 0x15d   :  { %9831 = vmatprep.mubr.msk.f32.mxu0 %vm230_vm3, %v11352_v4  ;;  %9853 = vmatpush3.msra.mxu0 %v574_v11  ;;  %v164_v42 = vpop.permute.xlu0 %163 }
 0x15e   :  { %9854 = vmatprep.subr.mxu0 %v14093_v18  ;;  %v183_v2 = vadd.f32 %v8656_v25, %v164_v42 }
 0x15f   :  { %9855 = vmatpush3.msra.mxu0 %v573_v12  ;;  %v166_v32 = vpop.permute.xlu1 %165 }
 0x160   :  { %9832 = vmatmul.mubr.msk.f32.gmra.mxu0 %vm230_vm3, %v11362_v6  ;;  %9864 = vmatprep.subr.mxu0 %v14093_v18  ;;  %v184_v56 = vadd.f32 %v8656_v25, %v166_v32 }
 0x161   :  { %9834 = vmatprep.mubr.msk.f32.mxu0 %vm230_vm3, %v11365_v7  ;;  %v168_v9 = vpop.permute.xlu0 %167 }
 0x163   :  { %v170_v58 = vpop.permute.xlu1 %169 }
 0x164   :  { %9835 = vmatmul.mubr.msk.f32.gmra.mxu0 %vm230_vm3, %v11373_v8 }
 0x165   :  { %9856 = vmatprep.mubr.msk.f32.mxu0 %vm11080_vm8, %v14093_v18 }
 0x1a3   :  { %v9799_v13 = vpop.f32.mrf.mxu1 }
 0x1a4   :  { %v364_v34 = vadd.f32 %v9799_v13, %v180_v26  ;;  %v186_v13 = vadd.f32 %v8656_v25, %v170_v58  ;;  %v185_v26 = vadd.f32 %v8656_v25, %v168_v9 }
 0x1a5   :  { %v324_v14 = vpop.f32.mrf.mxu1 }
 0x1a6   :  { %v363_v44 = vadd.f32 %v324_v14, %v179_v28 }
 0x1a7   :  { %v9802_v21 = vpop.f32.mrf.mxu1 }
 0x1a8   :  { %v366_v54 = vadd.f32 %v9802_v21, %v182_v38 }
 0x1a9   :  { %v334_v23 = vpop.f32.mrf.mxu1 }
 0x1aa   :  { %v365_v59 = vadd.f32 %v334_v23, %v181_v53 }
 0x1ab   :  { %v9805_v27 = vpop.f32.mrf.mxu1 }
 0x1ac   :  { %v368_v10 = vadd.f32 %v9805_v27, %v184_v56 }
 0x1ad   :  { %v344_v47 = vpop.f32.mrf.mxu1 }
 0x1ae   :  { %v367_v14 = vadd.f32 %v344_v47, %v183_v2 }
 0x1af   :  { %v9808_v60 = vpop.f32.mrf.mxu1 }
 0x1b0   :  { %v370_v27 = vadd.f32 %v9808_v60, %v186_v13 }
 0x1b1   :  { %v354_v20 = vpop.f32.mrf.mxu1 }
 0x1b2   :  { %v369_v38 = vadd.f32 %v354_v20, %v185_v26 }
 0x218   :  { %v9827_v36 = vpop.f32.mrf.mxu0 }
 0x219   :  { %v558_v51 = vadd.f32 %v9827_v36, %v364_v34 }
 0x21a   :  { %v518_v52 = vpop.f32.mrf.mxu0 }
 0x21b   :  { %v557_v55 = vadd.f32 %v518_v52, %v363_v44  ;;  %v11404_v61 = vmax.f32 %v558_v51, 0.0 }
 0x21c   :  { %v9830_v57 = vpop.f32.mrf.mxu0 }
 0x21d   :  { %v11406_v62 = vmax.f32 %v557_v55, 0.0  ;;  %v560_v1 = vadd.f32 %v9830_v57, %v366_v54  ;;  %v580_v21 = vsel %vm578_vm9, %v11404_v61, 0.0 }
 0x21e   :  { %v528_v5 = vpop.f32.mrf.mxu0 }
 0x21f   :  { %v579_v11 = vsel %vm578_vm9, %v11406_v62, 0.0  ;;  %v559_v12 = vadd.f32 %v528_v5, %v365_v59  ;;  %v11412_v22 = vmax.f32 %v560_v1, 0.0  ;;  %v603_v59 = vsel %vm578_vm9, %v11406_v62, -inf }
 0x220   :  { %v9833_v17 = vpop.f32.mrf.mxu0  ;;  %v581_v28 = vadd.f32 %v580_v21, %v579_v11 }
 0x221   :  { %v11414_v23 = vmax.f32 %v559_v12, 0.0  ;;  %v562_v24 = vadd.f32 %v9833_v17, %v368_v10  ;;  %v584_v47 = vsel %vm578_vm9, %v11412_v22, 0.0  ;;  %v604_v10 = vsel %vm578_vm9, %v11404_v61, -inf }
 0x222   :  { %v538_v32 = vpop.f32.mrf.mxu0  ;;  %v606_v13 = vsel %vm578_vm9, %v11412_v22, -inf }
 0x223   :  { %v582_v34 = vsel %vm578_vm9, %v11414_v23, 0.0  ;;  %v561_v36 = vadd.f32 %v538_v32, %v367_v14  ;;  %v11420_v51 = vmax.f32 %v562_v24, 0.0  ;;  %v605_v14 = vsel %vm578_vm9, %v11414_v23, -inf }
 0x224   :  { %v583_v42 = vadd.f32 %v582_v34, %v581_v28  ;;  %v9836_v44 = vpop.f32.mrf.mxu0 }
 0x225   :  { %v11422_v52 = vmax.f32 %v561_v36, 0.0  ;;  %v564_v53 = vadd.f32 %v9836_v44, %v370_v27  ;;  %v588_v1 = vsel %vm578_vm9, %v11420_v51, 0.0  ;;  %v609_v2 = vsel %vm578_vm9, %v11420_v51, -inf }
 0x226   :  { %v585_v54 = vadd.f32 %v584_v47, %v583_v42  ;;  %v548_v25 = vpop.f32.mrf.mxu0  ;;  %v610_v21 = vmax.f32 %v604_v10, %v609_v2 }
 0x227   :  { %v586_v55 = vsel %vm578_vm9, %v11422_v52, 0.0  ;;  %v607_v56 = vsel %vm578_vm9, %v11422_v52, -inf  ;;  %v11428_v57 = vmax.f32 %v564_v53, 0.0  ;;  %v563_v58 = vadd.f32 %v548_v25, %v369_v38 }
 0x228   :  { %v587_v60 = vadd.f32 %v586_v55, %v585_v54  ;;  %v608_v11 = vmax.f32 %v603_v59, %v607_v56 }
 0x229   :  { %v613_v5 = vsel %vm592_vm10, %v11428_v57, -inf  ;;  %v11438_v9 = vmax.f32 %v563_v58, 0.0  ;;  %v593_v32 = vsel %vm592_vm10, %v11428_v57, 0.0 }
 0x22a   :  { %v589_v12 = vadd.f32 %v588_v1, %v587_v60  ;;  %v614_v24 = vmax.f32 %v606_v13, %v613_v5  ;;  %v615_v27 = vmax.f32 %v608_v11, %v610_v21  ;;  %v577_v5 = vld [vmem:[%s14085_s4] sm:$0x3] }
 0x22b   :  { %v590_v17 = vsel %vm578_vm9, %v11438_v9, 0.0  ;;  %v611_v20 = vsel %vm578_vm9, %v11438_v9, -inf }
 0x22c   :  { %v591_v26 = vadd.f32 %v590_v17, %v589_v12  ;;  %v612_v28 = vmax.f32 %v605_v14, %v611_v20 }
 0x22e   :  { %v594_v34 = vadd.f32 %v593_v32, %v591_v26  ;;  %v616_v36 = vmax.f32 %v612_v28, %v614_v24 }
 0x230   :  { %v595_v38 = vrot.slane %v594_v34, 4  ;;  %v617_v42 = vmax.f32 %v615_v27, %v616_v36 }
 0x232   :  { %v596_v44 = vadd.f32 %v595_v38, %v594_v34  ;;  %v618_v47 = vrot.slane %v617_v42, 4  ;;  %v11466_v38 = vsub.s32 0, %v11182_v15 }
 0x234   :  { %v597_v53 = vrot.slane %v596_v44, 2  ;;  %v619_v54 = vmax.f32 %v617_v42, %v618_v47  ;;  %14271 = vst [vmem:[#allocation18_spill] sm:$0xff] %v11466_v38 }
 0x236   :  { %v598_v25 = vadd.f32 %v597_v53, %v596_v44  ;;  %v620_v55 = vrot.slane %v619_v54, 2 }
 0x238   :  { %v599_v56 = vrot.slane %v598_v25, 1  ;;  %v621_v58 = vmax.f32 %v619_v54, %v620_v55 }
 0x23a   :  { %v600_v59 = vadd.f32 %v599_v56, %v598_v25  ;;  %v622_v60 = vrot.slane %v621_v58, 1 }
 0x23c   :  { %v602_v1 = vmul.f32 0.016666668, %v600_v59  ;;  %v623_v2 = vmax.f32 %v621_v58, %v622_v60 }
 0x23e   :  { %9846 = vmatmul.mubr.msk.f32.vlgmr.msra.gmra.mxu1 %vm578_vm9, %v602_v1  ;;  %9857 = vmatmul.mubr.msk.f32.vlgmr.msra.gmra.mxu0 %vm578_vm9, %v623_v2 }
 0x23f   :  { %9861 = vmatprep.mubr.msk.f32.mxu1 %vm11080_vm8, %v14093_v18  ;;  %9866 = vmatprep.mubr.msk.f32.mxu0 %vm11080_vm8, %v14093_v18 }
 0x240   :  { %9860 = vmatpush3.msk.msra.mxu1 %vm776_vm11, %v577_v5  ;;  %9865 = vmatpush3.msk.msra.mxu0 %vm776_vm11, %v577_v5 }
 0x2fe   :  { %v693_v10 = vpop.f32.mrf.mxu1  ;;  %v767_v11 = vpop.f32.mrf.mxu0 }
 0x2ff   :  { %v697_v12 = vmax.f32 %v693_v10, 0.0  ;;  %v771_v13 = vmax.f32 %v767_v11, 0.0  ;;  %v940_v10 = vld [vmem:[%s14086_s5] sm:$0x3] }
 0x300   :  { %v9847_v14 = vpop.f32.mrf.mxu1  ;;  %v9858_v17 = vpop.f32.mrf.mxu0  ;;  %9869 = vmatprep.subr.msk.mxu1 %vm776_vm11, %v940_v10 }
 0x301   :  { %9862 = vmatmul.mubr.msk.f32.vlgmr.msra.gmra.mxu1 %vm772_vm12, %v771_v13  ;;  %9867 = vmatmul.mubr.msk.f32.vlgmr.msra.gmra.mxu0 %vm772_vm12, %v697_v12 }
 0x302   :  { %9870 = vmatpush3.msk.msra.mxu1 %vm776_vm11, %v940_v10 }
 0x3c1   :  { %v846_v20 = vpop.f32.mrf.mxu1  ;;  %v919_v21 = vpop.f32.mrf.mxu0 }
 0x3c2   :  { %v920_v24 = vadd.f32 %v919_v21, %v846_v20 }
 0x3c3   :  { %v9863_v26 = vpop.f32.mrf.mxu1  ;;  %v9868_v28 = vpop.f32.mrf.mxu0 }
 0x3c4   :  { %v923_v32 = vsub.f32 0.0, %v920_v24 }
 0x3c6   :  { %v924_v27 = vmul.f32 1.442695, %v923_v32 }
 0x3c8   :  { %10933 = vpow2.f32 %v924_v27 }
 0x3d5   :  { %v10934_v34 = vpop.eup %10933 }
 0x3d6   :  { %v926_v36 = vadd.f32 1.0, %v10934_v34 }
 0x3d8   :  { %10935 = vrcp.f32 %v926_v36 }
 0x3e5   :  { %v10936_v42 = vpop.eup %10935 }
 0x3e6   :  { %v931_v44 = vrot.slane %v10936_v42, %v11466_v38 }
 0x3e8   :  { %v11470_v47 = vmul.f32 %v931_v44, %v11404_v61  ;;  %v11473_v53 = vmul.f32 %v931_v44, %v11406_v62  ;;  %v11480_v55 = vmul.f32 %v931_v44, %v11414_v23  ;;  %v11491_v59 = vmul.f32 %v931_v44, %v11422_v52 }
 0x3e9   :  { %v11494_v23 = vmul.f32 %v931_v44, %v11412_v22  ;;  %v11505_v5 = vmul.f32 %v931_v44, %v11438_v9  ;;  %v11508_v22 = vmul.f32 %v931_v44, %v11420_v51  ;;  %v11524_v13 = vmul.f32 %v931_v44, %v11428_v57 }
 0x3ea   :  { %v944_v54 = vsel %vm578_vm9, %v11470_v47, 0.0  ;;  %v941_v25 = vsel %vm578_vm9, %v11473_v53, 0.0  ;;  %v947_v56 = vsel %vm578_vm9, %v11480_v55, 0.0  ;;  %v974_v61 = vsel %vm578_vm9, %v11473_v53, -inf }
 0x3eb   :  { %945 = vadd.xlane.f32.xlu1 %v944_v54  ;;  %942 = vadd.xlane.f32.xlu0 %v941_v25  ;;  %v980_v62 = vsel %vm578_vm9, %v11480_v55, -inf  ;;  %v977_v58 = vsel %vm578_vm9, %v11470_v47, -inf  ;;  %v953_v60 = vsel %vm578_vm9, %v11491_v59, 0.0  ;;  %v950_v1 = vsel %vm578_vm9, %v11494_v23, 0.0  ;;  %14272 = vst [vmem:[#allocation19_spill] sm:$0xff] %v11505_v5  ;;  %14273 = vst [vmem:[#allocation20_spill] sm:$0xff] %v11524_v13 }
 0x3ec   :  { %v986_v2 = vsel %vm578_vm9, %v11491_v59, -inf  ;;  %v983_v52 = vsel %vm578_vm9, %v11494_v23, -inf  ;;  %v959_v11 = vsel %vm578_vm9, %v11505_v5, 0.0  ;;  %v956_v9 = vsel %vm578_vm9, %v11508_v22, 0.0 }
 0x3ed   :  { %v992_v51 = vsel %vm578_vm9, %v11505_v5, -inf  ;;  %v989_v12 = vsel %vm578_vm9, %v11508_v22, -inf  ;;  %v962_v14 = vsel %vm592_vm10, %v11524_v13, 0.0  ;;  %v995_v17 = vsel %vm592_vm10, %v11524_v13, -inf }
 0x3ee   :  { %v14283_v5 = vmov 0.0  }
 0x3ef   :  { %948 = vadd.xlane.f32.xlu1 %v947_v56  ;;  %975 = vmax.xlane.f32.xlu0 %v974_v61 }
 0x3f3   :  { %981 = vmax.xlane.f32.xlu1 %v980_v62  ;;  %978 = vmax.xlane.f32.xlu0 %v977_v58 }
 0x3f7   :  { %954 = vadd.xlane.f32.xlu1 %v953_v60  ;;  %951 = vadd.xlane.f32.xlu0 %v950_v1 }
 0x3fb   :  { %987 = vmax.xlane.f32.xlu1 %v986_v2  ;;  %984 = vmax.xlane.f32.xlu0 %v983_v52 }
 0x3ff   :  { %960 = vadd.xlane.f32.xlu1 %v959_v11  ;;  %957 = vadd.xlane.f32.xlu0 %v956_v9 }
 0x403   :  { %993 = vmax.xlane.f32.xlu1 %v992_v51  ;;  %990 = vmax.xlane.f32.xlu0 %v989_v12 }
 0x407   :  { %963 = vadd.xlane.f32.xlu0 %v962_v14 }
 0x40b   :  { %996 = vmax.xlane.f32.xlu0 %v995_v17 }
 0x474   :  { %v946_v20 = vpop.xlane.xlu1 %945  ;;  %v943_v21 = vpop.xlane.xlu0 %942 }
 0x475   :  { %v966_v24 = vmul.f32 0.03125, %v943_v21  ;;  %v967_v57 = vmul.f32 0.03125, %v946_v20 }
 0x478   :  { %v949_v26 = vpop.xlane.xlu1 %948  ;;  %v976_v28 = vpop.xlane.xlu0 %975 }
 0x479   :  { %v999_v32 = vsel %vm998_vm13, %v966_v24, %v976_v28  ;;  %v968_v27 = vmul.f32 0.03125, %v949_v26  ;;  %v8722_v26 = vadd.s32 4294967293, %v11182_v15 }
 0x47a   :  { %9871 = vmatprep.mubr.msk.f32.mxu1 %vm772_vm12, %v999_v32 }
 0x47b   :  { %vm1147_vm14 = vcmp.eq.s32.totalorder %v11184_v16, %v8722_v26 }
 0x47c   :  { %v982_v34 = vpop.xlane.xlu1 %981  ;;  %v979_v36 = vpop.xlane.xlu0 %978  ;;  %v11549_v28 = vsel %vm1147_vm14, 1.0, %v14093_v18 }
 0x47d   :  { %v1001_v42 = vsel %vm998_vm13, %v968_v27, %v982_v34  ;;  %v1000_v44 = vsel %vm998_vm13, %v967_v57, %v979_v36  ;;  %14274 = vst [vmem:[#allocation21_spill] sm:$0xff] %v11549_v28  ;;  %9899 = vmatprep.mubr.msk.f32.mxu0 %vm230_vm3, %v11549_v28 }
 0x47e   :  { %9872 = vmatmul.mubr.msk.f32.vlgmr.msra.gmra.mxu1 %vm772_vm12, %v1000_v44 }
 0x47f   :  { %9874 = vmatprep.mubr.msk.f32.mxu1 %vm772_vm12, %v1001_v42 }
 0x480   :  { %v955_v54 = vpop.xlane.xlu1 %954  ;;  %v952_v25 = vpop.xlane.xlu0 %951 }
 0x481   :  { %v970_v56 = vmul.f32 0.03125, %v955_v54  ;;  %v969_v61 = vmul.f32 0.03125, %v952_v25  ;;  %v8723_v25 = vadd.s32 4294967293, %v11216_v29 }
 0x483   :  { %vm1148_vm15 = vcmp.eq.s32.totalorder %v11184_v16, %v8723_v25 }
 0x484   :  { %v988_v62 = vpop.xlane.xlu1 %987  ;;  %v985_v58 = vpop.xlane.xlu0 %984 }
 0x485   :  { %v1003_v60 = vsel %vm998_vm13, %v970_v56, %v988_v62  ;;  %v1002_v1 = vsel %vm998_vm13, %v969_v61, %v985_v58  ;;  %v8724_v56 = vadd.s32 4294967293, %v11221_v30  ;;  %v8725_v61 = vadd.s32 4294967293, %v11237_v33 }
 0x486   :  { %9875 = vmatmul.mubr.msk.f32.gmra.mxu1 %vm772_vm12, %v1002_v1  ;;  %v8726_v62 = vadd.s32 4294967293, %v11242_v35  ;;  %v8747_v58 = vadd.s32 4294967294, %v11182_v15 }
 0x487   :  { %9877 = vmatprep.mubr.msk.f32.mxu1 %vm772_vm12, %v1003_v60  ;;  %vm1149_vm2 = vcmp.eq.s32.totalorder %v11184_v16, %v8724_v56  ;;  %v11629_v60 = vsel %vm1148_vm15, 1.0, %v14093_v18  ;;  %vm1150_vm5 = vcmp.eq.s32.totalorder %v11184_v16, %v8725_v61 }
 0x488   :  { %v961_v2 = vpop.xlane.xlu1 %960  ;;  %v958_v52 = vpop.xlane.xlu0 %957  ;;  %14275 = vst [vmem:[#allocation22_spill] sm:$0xff] %v11629_v60  ;;  %v11633_v1 = vsel %vm1149_vm2, 1.0, %v14093_v18  ;;  %vm1351_vm6 = vcmp.eq.s32.totalorder %v11184_v16, %v8747_v58  ;;  %vm1151_vm7 = vcmp.eq.s32.totalorder %v11184_v16, %v8726_v62 }
 0x489   :  { %v972_v10 = vmul.f32 0.03125, %v961_v2  ;;  %v971_v11 = vmul.f32 0.03125, %v958_v52  ;;  %14276 = vst [vmem:[#allocation23_spill] sm:$0xff] %v11633_v1  ;;  %v8727_v2 = vadd.s32 4294967293, %v11254_v37  ;;  %v8728_v52 = vadd.s32 4294967293, %v11260_v39 }
 0x48b   :  { %vm1152_vm14 = vcmp.eq.s32.totalorder %v11184_v16, %v8727_v2  ;;  %vm1153_vm15 = vcmp.eq.s32.totalorder %v11184_v16, %v8728_v52 }
 0x48c   :  { %v994_v9 = vpop.xlane.xlu1 %993  ;;  %v991_v51 = vpop.xlane.xlu0 %990 }
 0x48d   :  { %v1005_v12 = vsel %vm998_vm13, %v972_v10, %v994_v9  ;;  %v1004_v14 = vsel %vm998_vm13, %v971_v11, %v991_v51  ;;  %v11644_v10 = vsel %vm1351_vm6, 1.0, %v14093_v18  ;;  %v11653_v11 = vsel %vm1150_vm5, 1.0, %v14093_v18 }
 0x48e   :  { %9878 = vmatmul.mubr.msk.f32.gmra.mxu1 %vm772_vm12, %v1004_v14  ;;  %14277 = vst [vmem:[#allocation24_spill] sm:$0xff] %v11644_v10  ;;  %14278 = vst [vmem:[#allocation25_spill] sm:$0xff] %v11653_v11  ;;  %v11658_v9 = vsel %vm1151_vm7, 1.0, %v14093_v18  ;;  %v8729_v51 = vadd.s32 4294967293, %v11273_v43  ;;  %v11675_v14 = vsel %vm1153_vm15, 1.0, %v14093_v18 }
 0x48f   :  { %9880 = vmatprep.mubr.msk.f32.mxu1 %vm772_vm12, %v1005_v12  ;;  %14279 = vst [vmem:[#allocation26_spill] sm:$0xff] %v11658_v9  ;;  %v11672_v12 = vsel %vm1152_vm14, 1.0, %v14093_v18  ;;  %14281 = vst [vmem:[#allocation28_spill] sm:$0xff] %v11675_v14 }
 0x490   :  { %v964_v17 = vpop.xlane.xlu0 %963  ;;  %14280 = vst [vmem:[#allocation27_spill] sm:$0xff] %v11672_v12  ;;  %vm1154_vm2 = vcmp.eq.s32.totalorder %v11184_v16, %v8729_v51 }
 0x491   :  { %v973_v20 = vmul.f32 0.03125, %v964_v17  ;;  %v11687_v17 = vsel %vm1154_vm2, 1.0, %v14093_v18 }
 0x492   :  { %14282 = vst [vmem:[#allocation29_spill] sm:$0xff] %v11687_v17 }
 0x494   :  { %v997_v21 = vpop.xlane.xlu0 %996 }
 0x495   :  { %v1006_v24 = vsel %vm998_vm13, %v973_v20, %v997_v21 }
 0x496   :  { %9881 = vmatmul.mubr.msk.f32.gmra.mxu1 %vm772_vm12, %v1006_v24 }
 0x497   :  { %9927 = vmatprep.mubr.msk.f32.mxu1 %vm230_vm3, %v11644_v10 }
 0x53e   :  { %v11553_v32 = vpop.f32.mrf.mxu1 }
 0x53f   :  { %1384 = vrot.lane.b32.xlu0 %v11553_v32, %s11081_s13 }
 0x540   :  { %v11557_v57 = vpop.f32.mrf.mxu1 }
 0x541   :  { %1382 = vrot.lane.b32.xlu1 %v11557_v57, %s11081_s13 }
 0x546   :  { %v11561_v27 = vpop.f32.mrf.mxu1 }
 0x547   :  { %1582 = vrot.lane.b32.xlu1 %v11561_v27, %s11082_s14  ;;  %1388 = vrot.lane.b32.xlu0 %v11561_v27, %s11081_s13 }
 0x548   :  { %v11567_v34 = vpop.f32.mrf.mxu1 }
 0x54b   :  { %1752 = vrot.lane.b32.xlu0 %v11561_v27, %s11083_s15  ;;  %1386 = vrot.lane.b32.xlu1 %v11567_v34, %s11081_s13 }
 0x54e   :  { %v11573_v36 = vpop.f32.mrf.mxu1 }
 0x54f   :  { %1580 = vrot.lane.b32.xlu1 %v11567_v34, %s11082_s14  ;;  %1756 = vrot.lane.b32.xlu0 %v11573_v36, %s11083_s15 }
 0x550   :  { %v11579_v42 = vpop.f32.mrf.mxu1 }
 0x553   :  { %1392 = vrot.lane.b32.xlu1 %v11573_v36, %s11081_s13  ;;  %1754 = vrot.lane.b32.xlu0 %v11579_v42, %s11083_s15 }
 0x556   :  { %v11585_v44 = vpop.f32.mrf.mxu1 }
 0x557   :  { %1586 = vrot.lane.b32.xlu1 %v11573_v36, %s11082_s14  ;;  %1590 = vrot.lane.b32.xlu0 %v11585_v44, %s11082_s14 }
 0x558   :  { %9883 = vmatprep.subr.msk.mxu0 %vm255_vm4, %v11585_v44  ;;  %v11593_v54 = vpop.f32.mrf.mxu1 }
 0x559   :  { %9884 = vmatpush3.msk.msra.mxu0 %vm255_vm4, %v11585_v44 }
 0x55a   :  { %9885 = vmatprep.subr.mxu0 %v11593_v54 }
 0x55b   :  { %9886 = vmatpush3.msra.mxu0 %v11593_v54  ;;  %1390 = vrot.lane.b32.xlu1 %v11579_v42, %s11081_s13 }
 0x55c   :  { %1760 = vrot.lane.b32.xlu0 %v11585_v44, %s11083_s15  ;;  %9887 = vmatprep.subr.mxu0 %v11573_v36 }
 0x55d   :  { %9888 = vmatpush3.msra.mxu0 %v11573_v36 }
 0x55e   :  { %9889 = vmatprep.subr.mxu0 %v11579_v42 }
 0x55f   :  { %9890 = vmatpush3.msra.mxu0 %v11579_v42  ;;  %1584 = vrot.lane.b32.xlu1 %v11579_v42, %s11082_s14 }
 0x560   :  { %1394 = vrot.lane.b32.xlu0 %v11593_v54, %s11081_s13  ;;  %9891 = vmatprep.subr.mxu0 %v11561_v27 }
 0x561   :  { %9892 = vmatpush3.msra.mxu0 %v11561_v27 }
 0x562   :  { %9893 = vmatprep.subr.mxu0 %v11567_v34 }
 0x563   :  { %9894 = vmatpush3.msra.mxu0 %v11567_v34  ;;  %1396 = vrot.lane.b32.xlu1 %v11585_v44, %s11081_s13 }
 0x564   :  { %1750 = vrot.lane.b32.xlu0 %v11567_v34, %s11083_s15  ;;  %9895 = vmatprep.subr.mxu0 %v11553_v32 }
 0x565   :  { %9896 = vmatpush3.msra.mxu0 %v11553_v32 }
 0x566   :  { %9897 = vmatprep.subr.mxu0 %v11557_v57 }
 0x567   :  { %9898 = vmatpush3.msra.mxu0 %v11557_v57  ;;  %1578 = vrot.lane.b32.xlu1 %v11553_v32, %s11082_s14 }
 0x568   :  { %1748 = vrot.lane.b32.xlu0 %v11553_v32, %s11083_s15  ;;  %9900 = vmatmul.mubr.msk.f32.vlgmr.msra.gmra.mxu0 %vm230_vm3, %v11629_v60 }
 0x569   :  { %9902 = vmatprep.mubr.msk.f32.mxu0 %vm230_vm3, %v11633_v1 }
 0x56b   :  { %1576 = vrot.lane.b32.xlu1 %v11557_v57, %s11082_s14 }
 0x56c   :  { %1962 = vrot.lane.b32.xlu0 %v11585_v44, %s11084_s18  ;;  %9903 = vmatmul.mubr.msk.f32.gmra.mxu0 %vm230_vm3, %v11653_v11 }
 0x56d   :  { %9905 = vmatprep.mubr.msk.f32.mxu0 %vm230_vm3, %v11658_v9 }
 0x56f   :  { %1746 = vrot.lane.b32.xlu1 %v11557_v57, %s11083_s15 }
 0x570   :  { %1758 = vrot.lane.b32.xlu0 %v11593_v54, %s11083_s15  ;;  %9906 = vmatmul.mubr.msk.f32.gmra.mxu0 %vm230_vm3, %v11672_v12 }
 0x571   :  { %9908 = vmatprep.mubr.msk.f32.mxu0 %vm230_vm3, %v11675_v14 }
 0x573   :  { %1588 = vrot.lane.b32.xlu1 %v11593_v54, %s11082_s14 }
 0x574   :  { %2188 = vrot.lane.b32.xlu0 %v11585_v44, %s11085_s19  ;;  %9909 = vmatmul.mubr.msk.f32.gmra.mxu0 %vm230_vm3, %v11687_v17 }
 0x575   :  { %9955 = vmatprep.mubr.msk.f32.mxu0 %vm230_vm3, %v11189_v19 }
 0x577   :  { %1958 = vrot.lane.b32.xlu1 %v11573_v36, %s11084_s18 }
 0x578   :  { %2184 = vrot.lane.b32.xlu0 %v11573_v36, %s11085_s19 }
 0x57b   :  { %1956 = vrot.lane.b32.xlu1 %v11579_v42, %s11084_s18 }
 0x57c   :  { %2182 = vrot.lane.b32.xlu0 %v11579_v42, %s11085_s19 }
 0x57f   :  { %1954 = vrot.lane.b32.xlu1 %v11561_v27, %s11084_s18 }
 0x580   :  { %2186 = vrot.lane.b32.xlu0 %v11593_v54, %s11085_s19 }
 0x583   :  { %1960 = vrot.lane.b32.xlu1 %v11593_v54, %s11084_s18 }
 0x584   :  { %2180 = vrot.lane.b32.xlu0 %v11561_v27, %s11085_s19 }
 0x587   :  { %1952 = vrot.lane.b32.xlu1 %v11567_v34, %s11084_s18 }
 0x588   :  { %2178 = vrot.lane.b32.xlu0 %v11567_v34, %s11085_s19 }
 0x58b   :  { %1950 = vrot.lane.b32.xlu1 %v11553_v32, %s11084_s18 }
 0x58c   :  { %2176 = vrot.lane.b32.xlu0 %v11553_v32, %s11085_s19 }
 0x58f   :  { %1948 = vrot.lane.b32.xlu1 %v11557_v57, %s11084_s18 }
 0x593   :  { %2174 = vrot.lane.b32.xlu1 %v11557_v57, %s11085_s19 }
 0x5b1   :  { %v1385_v20 = vpop.permute.xlu0 %1384 }
 0x5b3   :  { %v1383_v21 = vpop.permute.xlu1 %1382 }
 0x5b9   :  { %v11725_v24 = vpop.permute.xlu1 %1582  ;;  %v1389_v26 = vpop.permute.xlu0 %1388 }
 0x5bd   :  { %v11727_v25 = vpop.permute.xlu0 %1752  ;;  %v1387_v56 = vpop.permute.xlu1 %1386 }
 0x5c1   :  { %v11729_v61 = vpop.permute.xlu1 %1580  ;;  %v11731_v62 = vpop.permute.xlu0 %1756 }
 0x5c5   :  { %v1393_v58 = vpop.permute.xlu1 %1392  ;;  %v11733_v2 = vpop.permute.xlu0 %1754 }
 0x5c9   :  { %v1587_v52 = vpop.permute.xlu1 %1586  ;;  %v1591_v51 = vpop.permute.xlu0 %1590 }
 0x5ca   :  { %9939 = vmatprep.subr.msk.mxu0 %vm255_vm4, %v1591_v51 }
 0x5cb   :  { %9940 = vmatpush3.msk.msra.mxu0 %vm255_vm4, %v1591_v51  ;;  %v8748_v51 = vadd.s32 4294967294, %v11216_v29 }
 0x5cd   :  { %v1391_v18 = vpop.permute.xlu1 %1390  ;;  %vm1352_vm5 = vcmp.eq.s32.totalorder %v11184_v16, %v8748_v51 }
 0x5ce   :  { %v1761_v17 = vpop.permute.xlu0 %1760  ;;  %v11756_v13 = vsel %vm1352_vm5, 1.0, %v14283_v5 }
 0x5cf   :  { %14284 = vst [vmem:[#allocation30_spill] sm:$0xff] %v11756_v13 }
 0x5d1   :  { %v1585_v14 = vpop.permute.xlu1 %1584 }
 0x5d2   :  { %v1395_v12 = vpop.permute.xlu0 %1394 }
 0x5d5   :  { %v1397_v9 = vpop.permute.xlu1 %1396 }
 0x5d6   :  { %v11737_v11 = vpop.permute.xlu0 %1750  ;;  %9911 = vmatprep.subr.msk.mxu1 %vm255_vm4, %v1397_v9 }
 0x5d7   :  { %9912 = vmatpush3.msk.msra.mxu1 %vm255_vm4, %v1397_v9  ;;  %v8749_v9 = vadd.s32 4294967294, %v11221_v30 }
 0x5d8   :  { %9913 = vmatprep.subr.mxu1 %v1395_v12 }
 0x5d9   :  { %v11741_v1 = vpop.permute.xlu1 %1578  ;;  %9914 = vmatpush3.msra.mxu1 %v1395_v12  ;;  %vm1353_vm6 = vcmp.eq.s32.totalorder %v11184_v16, %v8749_v9 }
 0x5da   :  { %v11743_v60 = vpop.permute.xlu0 %1748  ;;  %9915 = vmatprep.subr.mxu1 %v1393_v58 }
 0x5db   :  { %9916 = vmatpush3.msra.mxu1 %v1393_v58  ;;  %v8750_v58 = vadd.s32 4294967294, %v11237_v33 }
 0x5dc   :  { %9917 = vmatprep.subr.mxu1 %v1391_v18 }
 0x5dd   :  { %v11746_v10 = vpop.permute.xlu1 %1576  ;;  %9918 = vmatpush3.msra.mxu1 %v1391_v18  ;;  %vm1354_vm7 = vcmp.eq.s32.totalorder %v11184_v16, %v8750_v58 }
 0x5de   :  { %v11748_v38 = vpop.permute.xlu0 %1962  ;;  %9919 = vmatprep.subr.mxu1 %v1389_v26  ;;  %v11774_v9 = vsel %vm1354_vm7, 1.0, %v14283_v5 }
 0x5df   :  { %9920 = vmatpush3.msra.mxu1 %v1389_v26  ;;  %v8751_v26 = vadd.s32 4294967294, %v11242_v35  ;;  %14286 = vst [vmem:[#allocation32_spill] sm:$0xff] %v11774_v9 }
 0x5e0   :  { %9921 = vmatprep.subr.mxu1 %v1387_v56 }
 0x5e1   :  { %v11752_v12 = vpop.permute.xlu1 %1746  ;;  %9922 = vmatpush3.msra.mxu1 %v1387_v56  ;;  %v8752_v56 = vadd.s32 4294967294, %v11254_v37  ;;  %vm1355_vm14 = vcmp.eq.s32.totalorder %v11184_v16, %v8751_v26 }
 0x5e2   :  { %v1759_v28 = vpop.permute.xlu0 %1758  ;;  %9923 = vmatprep.subr.mxu1 %v1385_v20 }
 0x5e3   :  { %9924 = vmatpush3.msra.mxu1 %v1385_v20  ;;  %v11767_v20 = vsel %vm1353_vm6, 1.0, %v14283_v5  ;;  %vm1356_vm15 = vcmp.eq.s32.totalorder %v11184_v16, %v8752_v56  ;;  %v8792_v56 = vadd.s32 2, %v11221_v30 }
 0x5e4   :  { %9925 = vmatprep.subr.mxu1 %v1383_v21  ;;  %14285 = vst [vmem:[#allocation31_spill] sm:$0xff] %v11767_v20  ;;  %v11795_v26 = vsel %vm1356_vm15, 1.0, %v14283_v5 }
 0x5e5   :  { %v1589_v18 = vpop.permute.xlu1 %1588  ;;  %9926 = vmatpush3.msra.mxu1 %v1383_v21  ;;  %14288 = vst [vmem:[#allocation34_spill] sm:$0xff] %v11795_v26 }
 0x5e6   :  { %v11760_v51 = vpop.permute.xlu0 %2188  ;;  %9928 = vmatmul.mubr.msk.f32.vlgmr.msra.gmra.mxu1 %vm230_vm3, %v11756_v13  ;;  %9941 = vmatprep.subr.mxu0 %v1589_v18 }
 0x5e7   :  { %9967 = vmatprep.subr.msk.mxu1 %vm255_vm4, %v1761_v17  ;;  %9942 = vmatpush3.msra.mxu0 %v1589_v18  ;;  %v8753_v18 = vadd.s32 4294967294, %v11260_v39 }
 0x5e8   :  { %9968 = vmatpush3.msk.msra.mxu1 %vm255_vm4, %v1761_v17  ;;  %9943 = vmatprep.subr.mxu0 %v1587_v52  ;;  %v11787_v17 = vsel %vm1355_vm14, 1.0, %v14283_v5  ;;  %vm1926_vm14 = vcmp.eq.s32.totalorder %v11184_v16, %v8792_v56 }
 0x5e9   :  { %9969 = vmatprep.subr.mxu1 %v1759_v28  ;;  %v11771_v21 = vpop.permute.xlu1 %1958  ;;  %9944 = vmatpush3.msra.mxu0 %v1587_v52  ;;  %14287 = vst [vmem:[#allocation33_spill] sm:$0xff] %v11787_v17  ;;  %vm1357_vm2 = vcmp.eq.s32.totalorder %v11184_v16, %v8753_v18 }
 0x5ea   :  { %9970 = vmatpush3.msra.mxu1 %v1759_v28  ;;  %v11777_v58 = vpop.permute.xlu0 %2184  ;;  %9930 = vmatprep.mubr.msk.f32.mxu1 %vm230_vm3, %v11767_v20  ;;  %v8754_v28 = vadd.s32 4294967294, %v11273_v43 }
 0x5eb   :  { %9945 = vmatprep.subr.mxu0 %v1585_v14  ;;  %9971 = vmatprep.subr.mxu1 %v11731_v62 }
 0x5ec   :  { %9931 = vmatmul.mubr.msk.f32.gmra.mxu1 %vm230_vm3, %v11774_v9  ;;  %9946 = vmatpush3.msra.mxu0 %v1585_v14  ;;  %vm1358_vm5 = vcmp.eq.s32.totalorder %v11184_v16, %v8754_v28  ;;  %v8793_v28 = vadd.s32 2, %v11237_v33 }
 0x5ed   :  { %9972 = vmatpush3.msra.mxu1 %v11731_v62  ;;  %9947 = vmatprep.subr.mxu0 %v11725_v24  ;;  %v1957_v52 = vpop.permute.xlu1 %1956  ;;  %v11808_v62 = vsel %vm1357_vm2, 1.0, %v14283_v5 }
 0x5ee   :  { %9973 = vmatprep.subr.mxu1 %v11733_v2  ;;  %9948 = vmatpush3.msra.mxu0 %v11725_v24  ;;  %v2183_v14 = vpop.permute.xlu0 %2182  ;;  %14289 = vst [vmem:[#allocation35_spill] sm:$0xff] %v11808_v62  ;;  %vm1927_vm15 = vcmp.eq.s32.totalorder %v11184_v16, %v8793_v28  ;;  %v8821_v28 = vadd.s32 3, %v11260_v39 }
 0x5ef   :  { %9974 = vmatpush3.msra.mxu1 %v11733_v2  ;;  %9933 = vmatprep.mubr.msk.f32.mxu1 %vm230_vm3, %v11787_v17  ;;  %v11815_v2 = vsel %vm1358_vm5, 1.0, %v14283_v5 }
 0x5f0   :  { %9949 = vmatprep.subr.mxu0 %v11729_v61  ;;  %9975 = vmatprep.subr.mxu1 %v11727_v25  ;;  %14290 = vst [vmem:[#allocation36_spill] sm:$0xff] %v11815_v2 }
 0x5f1   :  { %9934 = vmatmul.mubr.msk.f32.gmra.mxu1 %vm230_vm3, %v11795_v26  ;;  %9950 = vmatpush3.msra.mxu0 %v11729_v61  ;;  %v1955_v24 = vpop.permute.xlu1 %1954 }
 0x5f2   :  { %9976 = vmatpush3.msra.mxu1 %v11727_v25  ;;  %9951 = vmatprep.subr.mxu0 %v11741_v1  ;;  %v2187_v25 = vpop.permute.xlu0 %2186 }
 0x5f3   :  { %9977 = vmatprep.subr.mxu1 %v11737_v11  ;;  %9952 = vmatpush3.msra.mxu0 %v11741_v1 }
 0x5f4   :  { %9978 = vmatpush3.msra.mxu1 %v11737_v11  ;;  %9936 = vmatprep.mubr.msk.f32.mxu1 %vm230_vm3, %v11808_v62 }
 0x5f5   :  { %9953 = vmatprep.subr.mxu0 %v11746_v10  ;;  %9979 = vmatprep.subr.mxu1 %v11743_v60  ;;  %v1961_v61 = vpop.permute.xlu1 %1960 }
 0x5f6   :  { %9937 = vmatmul.mubr.msk.f32.gmra.mxu1 %vm230_vm3, %v11815_v2  ;;  %9954 = vmatpush3.msra.mxu0 %v11746_v10 }
 0x5f7   :  { %9980 = vmatpush3.msra.mxu1 %v11743_v60  ;;  %9956 = vmatmul.mubr.msk.f32.vlgmr.msra.gmra.mxu0 %vm230_vm3, %v11264_v40  ;;  %v2181_v60 = vpop.permute.xlu0 %2180 }
 0x5f8   :  { %9981 = vmatprep.subr.mxu1 %v11752_v12  ;;  %9995 = vmatprep.subr.msk.mxu0 %vm255_vm4, %v11748_v38 }
 0x5f9   :  { %9982 = vmatpush3.msra.mxu1 %v11752_v12  ;;  %9996 = vmatpush3.msk.msra.mxu0 %vm255_vm4, %v11748_v38  ;;  %v1953_v1 = vpop.permute.xlu1 %1952  ;;  %v8790_v12 = vadd.s32 2, %v11182_v15 }
 0x5fa   :  { %9983 = vmatprep.mubr.msk.f32.mxu1 %vm230_vm3, %v11224_v31  ;;  %9997 = vmatprep.subr.mxu0 %v1961_v61 }
 0x5fb   :  { %10023 = vmatprep.subr.msk.mxu1 %vm255_vm4, %v11760_v51  ;;  %9984 = vmatmul.mubr.msk.f32.vlgmr.msra.gmra.mxu1 %vm230_vm3, %v11334_v63  ;;  %v2179_v10 = vpop.permute.xlu0 %2178  ;;  %vm1924_vm6 = vcmp.eq.s32.totalorder %v11184_v16, %v8790_v12 }
 0x5fc   :  { %9998 = vmatpush3.msra.mxu0 %v1961_v61  ;;  %10024 = vmatpush3.msk.msra.mxu1 %vm255_vm4, %v11760_v51  ;;  %v8791_v51 = vadd.s32 2, %v11216_v29  ;;  %v11859_v18 = vsel %vm1924_vm6, 1.0, %v14283_v5  ;;  %v11880_v61 = vsel %vm1926_vm14, 1.0, %v14283_v5 }
 0x5fd   :  { %9999 = vmatprep.subr.mxu0 %v11771_v21  ;;  %10025 = vmatprep.subr.mxu1 %v2187_v25  ;;  %v1951_v38 = vpop.permute.xlu1 %1950  ;;  %14291 = vst [vmem:[#allocation37_spill] sm:$0xff] %v11859_v18  ;;  %14293 = vst [vmem:[#allocation39_spill] sm:$0xff] %v11880_v61 }
 0x5fe   :  { %10026 = vmatpush3.msra.mxu1 %v2187_v25  ;;  %9958 = vmatprep.mubr.msk.f32.mxu0 %vm230_vm3, %v11268_v41  ;;  %vm1925_vm7 = vcmp.eq.s32.totalorder %v11184_v16, %v8791_v51  ;;  %v8795_v25 = vadd.s32 2, %v11254_v37  ;;  %v8819_v51 = vadd.s32 3, %v11242_v35 }
 0x5ff   :  { %10000 = vmatpush3.msra.mxu0 %v11771_v21  ;;  %10027 = vmatprep.subr.mxu1 %v11777_v58  ;;  %v2177_v21 = vpop.permute.xlu0 %2176 }
 0x600   :  { %9959 = vmatmul.mubr.msk.f32.gmra.mxu0 %vm230_vm3, %v11283_v45  ;;  %10001 = vmatprep.subr.mxu0 %v1957_v52  ;;  %vm1929_vm6 = vcmp.eq.s32.totalorder %v11184_v16, %v8795_v25 }
 0x601   :  { %10002 = vmatpush3.msra.mxu0 %v1957_v52  ;;  %10028 = vmatpush3.msra.mxu1 %v11777_v58  ;;  %v1949_v11 = vpop.permute.xlu1 %1948  ;;  %v8794_v52 = vadd.s32 2, %v11242_v35  ;;  %v11918_v12 = vsel %vm1929_vm6, 1.0, %v14283_v5  ;;  %v8820_v35 = vadd.s32 3, %v11254_v37  ;;  %vm2154_vm6 = vcmp.eq.s32.totalorder %v11184_v16, %v8819_v51 }
 0x602   :  { %10003 = vmatprep.subr.mxu0 %v1955_v24  ;;  %10029 = vmatprep.subr.mxu1 %v2183_v14  ;;  %14297 = vst [vmem:[#allocation43_spill] sm:$0xff] %v11918_v12  ;;  %v11955_v37 = vsel %vm2154_vm6, 1.0, %v14283_v5  ;;  %vm3057_vm6 = vcmask 31744  }
 0x603   :  { %10030 = vmatpush3.msra.mxu1 %v2183_v14  ;;  %10004 = vmatpush3.msra.mxu0 %v1955_v24  ;;  %v11872_v14 = vsel %vm1925_vm7, 1.0, %v14283_v5  ;;  %v8815_v24 = vadd.s32 3, %v11182_v15  ;;  %vm1928_vm2 = vcmp.eq.s32.totalorder %v11184_v16, %v8794_v52  ;;  %v8816_v15 = vadd.s32 3, %v11216_v29  ;;  %14303 = vst [vmem:[#allocation49_spill] sm:$0xff] %v11955_v37 }
 0x604   :  { %10005 = vmatprep.subr.mxu0 %v1953_v1  ;;  %10031 = vmatprep.subr.mxu1 %v2181_v60  ;;  %14292 = vst [vmem:[#allocation38_spill] sm:$0xff] %v11872_v14  ;;  %v8797_v29 = vadd.s32 2, %v11273_v43 }
 0x605   :  { %10006 = vmatpush3.msra.mxu0 %v1953_v1  ;;  %10032 = vmatpush3.msra.mxu1 %v2181_v60  ;;  %v2175_v58 = vpop.permute.xlu1 %2174  ;;  %v8796_v1 = vadd.s32 2, %v11260_v39  ;;  %v11894_v60 = vsel %vm1927_vm15, 1.0, %v14283_v5  ;;  %vm2150_vm5 = vcmp.eq.s32.totalorder %v11184_v16, %v8815_v24  ;;  %vm2151_vm14 = vcmp.eq.s32.totalorder %v11184_v16, %v8816_v15 }
 0x606   :  { %10007 = vmatprep.subr.mxu0 %v1951_v38  ;;  %10033 = vmatprep.subr.mxu1 %v2179_v10  ;;  %14294 = vst [vmem:[#allocation40_spill] sm:$0xff] %v11894_v60  ;;  %v8822_v24 = vadd.s32 3, %v11273_v43 }
 0x607   :  { %9961 = vmatprep.mubr.msk.f32.mxu0 %vm230_vm3, %v11288_v46  ;;  %10008 = vmatpush3.msra.mxu0 %v1951_v38  ;;  %v8817_v38 = vadd.s32 3, %v11221_v30  ;;  %vm1930_vm7 = vcmp.eq.s32.totalorder %v11184_v16, %v8796_v1  ;;  %v11911_v30 = vsel %vm2150_vm5, 1.0, %v14283_v5 }
 0x608   :  { %10034 = vmatpush3.msra.mxu1 %v2179_v10  ;;  %9962 = vmatmul.mubr.msk.f32.gmra.mxu0 %vm230_vm3, %v11300_v48  ;;  %v11901_v10 = vsel %vm1928_vm2, 1.0, %v14283_v5  ;;  %14296 = vst [vmem:[#allocation42_spill] sm:$0xff] %v11911_v30  ;;  %v11925_v56 = vsel %vm1930_vm7, 1.0, %v14283_v5  ;;  %vm1931_vm2 = vcmp.eq.s32.totalorder %v11184_v16, %v8797_v29  ;;  %vm2155_vm7 = vcmp.eq.s32.totalorder %v11184_v16, %v8820_v35 }
 0x609   :  { %10009 = vmatprep.subr.mxu0 %v1949_v11  ;;  %10035 = vmatprep.subr.mxu1 %v2177_v21  ;;  %14295 = vst [vmem:[#allocation41_spill] sm:$0xff] %v11901_v10  ;;  %vm2152_vm15 = vcmp.eq.s32.totalorder %v11184_v16, %v8817_v38  ;;  %14298 = vst [vmem:[#allocation44_spill] sm:$0xff] %v11925_v56  ;;  %v11967_v39 = vsel %vm2155_vm7, 1.0, %v14283_v5 }
 0x60a   :  { %10010 = vmatpush3.msra.mxu0 %v1949_v11  ;;  %10036 = vmatpush3.msra.mxu1 %v2177_v21  ;;  %v8818_v11 = vadd.s32 3, %v11237_v33  ;;  %v11931_v33 = vsel %vm2151_vm14, 1.0, %v14283_v5  ;;  %v11936_v21 = vsel %vm2152_vm15, 1.0, %v14283_v5  ;;  %vm2156_vm14 = vcmp.eq.s32.totalorder %v11184_v16, %v8821_v28  ;;  %14304 = vst [vmem:[#allocation50_spill] sm:$0xff] %v11967_v39 }
 0x60b   :  { %10037 = vmatprep.subr.mxu1 %v2175_v58  ;;  %9964 = vmatprep.mubr.msk.f32.mxu0 %vm230_vm3, %v11305_v49  ;;  %14299 = vst [vmem:[#allocation45_spill] sm:$0xff] %v11931_v33  ;;  %14300 = vst [vmem:[#allocation46_spill] sm:$0xff] %v11936_v21  ;;  %v11970_v25 = vsel %vm2156_vm14, 1.0, %v14283_v5  ;;  %vm2157_vm15 = vcmp.eq.s32.totalorder %v11184_v16, %v8822_v24 }
 0x60c   :  { %10038 = vmatpush3.msra.mxu1 %v2175_v58  ;;  %9965 = vmatmul.mubr.msk.f32.gmra.mxu0 %vm230_vm3, %v11315_v50  ;;  %vm2153_vm5 = vcmp.eq.s32.totalorder %v11184_v16, %v8818_v11  ;;  %v11944_v58 = vsel %vm1931_vm2, 1.0, %v14283_v5  ;;  %14305 = vst [vmem:[#allocation51_spill] sm:$0xff] %v11970_v25  ;;  %v11978_v43 = vsel %vm2157_vm15, 1.0, %v14283_v5  ;;  %vm2864_vm2 = vcmask 523264  }
 0x60d   :  { %10011 = vmatprep.mubr.msk.f32.mxu0 %vm230_vm3, %v11859_v18  ;;  %9986 = vmatprep.mubr.msk.f32.mxu1 %vm230_vm3, %v11337_v0  ;;  %14301 = vst [vmem:[#allocation47_spill] sm:$0xff] %v11944_v58  ;;  %v11952_v52 = vsel %vm2153_vm5, 1.0, %v14283_v5  ;;  %14306 = vst [vmem:[#allocation52_spill] sm:$0xff] %v11978_v43  ;;  %vm2878_vm5 = vcmask 519168  }
 0x60e   :  { %9987 = vmatmul.mubr.msk.f32.gmra.mxu1 %vm230_vm3, %v11349_v3  ;;  %14302 = vst [vmem:[#allocation48_spill] sm:$0xff] %v11952_v52 }
 0x60f   :  { %9989 = vmatprep.mubr.msk.f32.mxu1 %vm230_vm3, %v11352_v4 }
 0x610   :  { %10012 = vmatmul.mubr.msk.f32.vlgmr.msra.gmra.mxu0 %vm230_vm3, %v11872_v14 }
 0x611   :  { %10014 = vmatprep.mubr.msk.f32.mxu0 %vm230_vm3, %v11880_v61 }
 0x612   :  { %9990 = vmatmul.mubr.msk.f32.gmra.mxu1 %vm230_vm3, %v11362_v6 }
 0x613   :  { %9992 = vmatprep.mubr.msk.f32.mxu1 %vm230_vm3, %v11365_v7 }
 0x614   :  { %10015 = vmatmul.mubr.msk.f32.gmra.mxu0 %vm230_vm3, %v11894_v60 }
 0x615   :  { %10017 = vmatprep.mubr.msk.f32.mxu0 %vm230_vm3, %v11901_v10 }
 0x616   :  { %9993 = vmatmul.mubr.msk.f32.gmra.mxu1 %vm230_vm3, %v11373_v8 }
 0x617   :  { %10039 = vmatprep.mubr.msk.f32.mxu1 %vm230_vm3, %v11911_v30 }
 0x618   :  { %10018 = vmatmul.mubr.msk.f32.gmra.mxu0 %vm230_vm3, %v11918_v12 }
 0x619   :  { %10020 = vmatprep.mubr.msk.f32.mxu0 %vm230_vm3, %v11925_v56 }
 0x61a   :  { %10040 = vmatmul.mubr.msk.f32.vlgmr.msra.gmra.mxu1 %vm230_vm3, %v11931_v33 }
 0x61b   :  { %10042 = vmatprep.mubr.msk.f32.mxu1 %vm230_vm3, %v11936_v21 }
 0x61c   :  { %10021 = vmatmul.mubr.msk.f32.gmra.mxu0 %vm230_vm3, %v11944_v58 }
 0x61e   :  { %10043 = vmatmul.mubr.msk.f32.gmra.mxu1 %vm230_vm3, %v11952_v52 }
 0x61f   :  { %10045 = vmatprep.mubr.msk.f32.mxu1 %vm230_vm3, %v11955_v37 }
 0x622   :  { %10046 = vmatmul.mubr.msk.f32.gmra.mxu1 %vm230_vm3, %v11967_v39 }
 0x623   :  { %10048 = vmatprep.mubr.msk.f32.mxu1 %vm230_vm3, %v11970_v25 }
 0x626   :  { %10049 = vmatmul.mubr.msk.f32.gmra.mxu1 %vm230_vm3, %v11978_v43 }
 0x627   :  { %10067 = vmatprep.mubr.msk.f32.mxu1 %vm230_vm3, %v11189_v19 }
 0x628   :  { %v9901_v1 = vpop.f32.mrf.mxu0 }
 0x629   :  { %1313 = vrot.lane.b32.xlu1 %v9901_v1, %s11086_s20 }
 0x62a   :  { %v1264_v16 = vpop.f32.mrf.mxu0 }
 0x62b   :  { %1311 = vrot.lane.b32.xlu0 %v1264_v16, %s11086_s20 }
 0x62c   :  { %v9904_v15 = vpop.f32.mrf.mxu0 }
 0x62d   :  { %1317 = vrot.lane.b32.xlu1 %v9904_v15, %s11086_s20 }
 0x62e   :  { %v1274_v38 = vpop.f32.mrf.mxu0 }
 0x62f   :  { %1315 = vrot.lane.b32.xlu0 %v1274_v38, %s11086_s20 }
 0x630   :  { %v9907_v29 = vpop.f32.mrf.mxu0 }
 0x631   :  { %1321 = vrot.lane.b32.xlu1 %v9907_v29, %s11086_s20 }
 0x632   :  { %v1284_v11 = vpop.f32.mrf.mxu0 }
 0x633   :  { %1319 = vrot.lane.b32.xlu0 %v1284_v11, %s11086_s20 }
 0x634   :  { %v9910_v51 = vpop.f32.mrf.mxu0 }
 0x635   :  { %1325 = vrot.lane.b32.xlu1 %v9910_v51, %s11086_s20 }
 0x636   :  { %v1294_v35 = vpop.f32.mrf.mxu0 }
 0x637   :  { %1323 = vrot.lane.b32.xlu0 %v1294_v35, %s11086_s20 }
 0x6a6   :  { %v9929_v28 = vpop.f32.mrf.mxu1 }
 0x6a7   :  { %1546 = vrot.lane.b32.xlu1 %v9929_v28, %s11086_s20 }
 0x6a8   :  { %v1497_v24 = vpop.f32.mrf.mxu1 }
 0x6a9   :  { %1544 = vrot.lane.b32.xlu0 %v1497_v24, %s11086_s20 }
 0x6ac   :  { %v9932_v1 = vpop.f32.mrf.mxu1 }
 0x6ae   :  { %v1507_v38 = vpop.f32.mrf.mxu1 }
 0x6b1   :  { %v9935_v29 = vpop.f32.mrf.mxu1 }
 0x6b3   :  { %v1517_v51 = vpop.f32.mrf.mxu1 }
 0x6b6   :  { %v9938_v28 = vpop.f32.mrf.mxu1 }
 0x6b7   :  { %v9957_v16 = vpop.f32.mrf.mxu0 }
 0x6b8   :  { %1716 = vrot.lane.b32.xlu1 %v9957_v16, %s11086_s20  ;;  %v1527_v24 = vpop.f32.mrf.mxu1 }
 0x6b9   :  { %v1667_v15 = vpop.f32.mrf.mxu0 }
 0x6ba   :  { %1714 = vrot.lane.b32.xlu0 %v1667_v15, %s11086_s20 }
 0x6bb   :  { %v9985_v15 = vpop.f32.mrf.mxu1 }
 0x6bc   :  { %1550 = vrot.lane.b32.xlu1 %v9932_v1, %s11086_s20 }
 0x6bd   :  { %v1837_v43 = vpop.f32.mrf.mxu1 }
 0x6be   :  { %1548 = vrot.lane.b32.xlu0 %v1507_v38, %s11086_s20 }
 0x6c0   :  { %v9960_v11 = vpop.f32.mrf.mxu0 }
 0x6c1   :  { %1720 = vrot.lane.b32.xlu1 %v9960_v11, %s11086_s20 }
 0x6c2   :  { %v1677_v35 = vpop.f32.mrf.mxu0 }
 0x6c3   :  { %1718 = vrot.lane.b32.xlu0 %v1677_v35, %s11086_s20 }
 0x6c5   :  { %1554 = vrot.lane.b32.xlu1 %v9935_v29, %s11086_s20 }
 0x6c7   :  { %1552 = vrot.lane.b32.xlu0 %v1517_v51, %s11086_s20 }
 0x6c8   :  { %v9963_v16 = vpop.f32.mrf.mxu0 }
 0x6c9   :  { %1724 = vrot.lane.b32.xlu1 %v9963_v16, %s11086_s20 }
 0x6ca   :  { %v1687_v1 = vpop.f32.mrf.mxu0 }
 0x6cb   :  { %1722 = vrot.lane.b32.xlu0 %v1687_v1, %s11086_s20 }
 0x6cc   :  { %v9966_v38 = vpop.f32.mrf.mxu0 }
 0x6cd   :  { %1558 = vrot.lane.b32.xlu1 %v9938_v28, %s11086_s20 }
 0x6ce   :  { %v1697_v11 = vpop.f32.mrf.mxu0  ;;  %v9988_v35 = vpop.f32.mrf.mxu1 }
 0x6cf   :  { %1556 = vrot.lane.b32.xlu0 %v1527_v24, %s11086_s20 }
 0x6d0   :  { %v10013_v29 = vpop.f32.mrf.mxu0  ;;  %v1847_v51 = vpop.f32.mrf.mxu1 }
 0x6d1   :  { %1886 = vrot.lane.b32.xlu1 %v9985_v15, %s11086_s20 }
 0x6d2   :  { %v2063_v16 = vpop.f32.mrf.mxu0  ;;  %v9991_v25 = vpop.f32.mrf.mxu1 }
 0x6d3   :  { %1884 = vrot.lane.b32.xlu0 %v1837_v43, %s11086_s20 }
 0x6d4   :  { %v10016_v28 = vpop.f32.mrf.mxu0  ;;  %v1857_v1 = vpop.f32.mrf.mxu1 }
 0x6d5   :  { %2112 = vrot.lane.b32.xlu1 %v10013_v29, %s11086_s20 }
 0x6d6   :  { %v2073_v24 = vpop.f32.mrf.mxu0  ;;  %v9994_v15 = vpop.f32.mrf.mxu1 }
 0x6d7   :  { %2110 = vrot.lane.b32.xlu0 %v2063_v16, %s11086_s20 }
 0x6d8   :  { %v10019_v43 = vpop.f32.mrf.mxu0  ;;  %v1867_v29 = vpop.f32.mrf.mxu1 }
 0x6d9   :  { %1890 = vrot.lane.b32.xlu1 %v9988_v35, %s11086_s20 }
 0x6da   :  { %v2083_v16 = vpop.f32.mrf.mxu0  ;;  %v10041_v35 = vpop.f32.mrf.mxu1 }
 0x6db   :  { %1888 = vrot.lane.b32.xlu0 %v1847_v51, %s11086_s20 }
 0x6dc   :  { %v2289_v51 = vpop.f32.mrf.mxu1 }
 0x6dd   :  { %2116 = vrot.lane.b32.xlu1 %v10016_v28, %s11086_s20 }
 0x6de   :  { %v10044_v28 = vpop.f32.mrf.mxu1 }
 0x6df   :  { %2114 = vrot.lane.b32.xlu0 %v2073_v24, %s11086_s20 }
 0x6e1   :  { %1894 = vrot.lane.b32.xlu1 %v9991_v25, %s11086_s20  ;;  %v2299_v25 = vpop.f32.mrf.mxu1 }
 0x6e3   :  { %1892 = vrot.lane.b32.xlu0 %v1857_v1, %s11086_s20  ;;  %v10047_v1 = vpop.f32.mrf.mxu1 }
 0x6e5   :  { %2120 = vrot.lane.b32.xlu1 %v10019_v43, %s11086_s20  ;;  %v2309_v24 = vpop.f32.mrf.mxu1  ;;  %v10022_v43 = vpop.f32.mrf.mxu0 }
 0x6e7   :  { %2118 = vrot.lane.b32.xlu0 %v2083_v16, %s11086_s20 }
 0x6e9   :  { %2338 = vrot.lane.b32.xlu1 %v10041_v35, %s11086_s20  ;;  %v11087_v35 = vmov 3  }
 0x6ea   :  { %10918 = vset.pattern.permute.xlu1 %v11087_v35  ;;  %10917 = vset.pattern.permute.xlu0 %v11087_v35 }
 0x6eb   :  { %2336 = vrot.lane.b32.xlu0 %v2289_v51, %s11086_s20 }
 0x6ed   :  { %1728 = vrot.lane.b32.xlu1 %v9966_v38, %s11086_s20  ;;  %v2093_v38 = vpop.f32.mrf.mxu0 }
 0x6ef   :  { %1726 = vrot.lane.b32.xlu0 %v1697_v11, %s11086_s20  ;;  %v10050_v11 = vpop.f32.mrf.mxu1 }
 0x6f1   :  { %2342 = vrot.lane.b32.xlu1 %v10044_v28, %s11086_s20  ;;  %v2319_v16 = vpop.f32.mrf.mxu1 }
 0x6f3   :  { %2340 = vrot.lane.b32.xlu0 %v2299_v25, %s11086_s20 }
 0x6f5   :  { %1898 = vrot.lane.b32.xlu1 %v9994_v15, %s11086_s20  ;;  %v1314_v15 = vpop.permute.xlu1 %1313 }
 0x6f6   :  { %v1336_v61 = vadd.f32 %v11553_v32, %v1314_v15 }
 0x6f7   :  { %1896 = vrot.lane.b32.xlu0 %v1867_v29, %s11086_s20  ;;  %v1312_v29 = vpop.permute.xlu0 %1311 }
 0x6f8   :  { %v1335_v18 = vadd.f32 %v1312_v29, %v11557_v57 }
 0x6f9   :  { %2346 = vrot.lane.b32.xlu1 %v10047_v1, %s11086_s20  ;;  %v1318_v51 = vpop.permute.xlu1 %1317  ;;  %v10920_v1 = vld [vmem:[%s14087_s6 + $0x10] ss:$8 sps:$4 sm:$0xff]  }
 0x6fa   :  { %v1338_v31 = vadd.f32 %v11561_v27, %v1318_v51 }
 0x6fb   :  { %2344 = vrot.lane.b32.xlu0 %v2309_v24, %s11086_s20  ;;  %v1316_v28 = vpop.permute.xlu0 %1315  ;;  %v10922_v24 = vld [vmem:[%s14087_s6 + $0x14] ss:$8 sps:$4 sm:$0xff]  }
 0x6fc   :  { %2509 = vmatprep.subr.bf16.mxu0 %v10922_v24  ;;  %v1337_v46 = vadd.f32 %v1316_v28, %v11567_v34 }
 0x6fd   :  { %2124 = vrot.lane.b32.xlu1 %v10022_v43, %s11086_s20  ;;  %v12032_v25 = vpop.permute.xlu1 %1321  ;;  %2510 = vmatpush1.bf16.msra.mxu0 %v10920_v1 }
 0x6ff   :  { %2122 = vrot.lane.b32.xlu0 %v2093_v38, %s11086_s20  ;;  %v12040_v43 = vpop.permute.xlu0 %1319  ;;  %v10925_v38 = vld [vmem:[%s14087_s6 + $0x4] ss:$8 sps:$4 sm:$0xff]  }
 0x700   :  { %2511 = vmatprep.subr.bf16.mxu0 %v10925_v38 }
 0x701   :  { %2350 = vrot.lane.b32.xlu1 %v10050_v11, %s11086_s20  ;;  %v10923_v11 = vld [vmem:[%s14087_s6] ss:$8 sps:$4 sm:$0xff]  }
 0x702   :  { %2512 = vmatpush1.bf16.msra.mxu0 %v10923_v11 }
 0x703   :  { %2348 = vrot.lane.b32.xlu0 %v2319_v16, %s11086_s20  ;;  %v12048_v16 = vpop.permute.xlu1 %1325  ;;  %v12050_v35 = vpop.permute.xlu0 %1323  ;;  %10107 = vmatprep.subr.mxu0 %v14283_v5 }
 0x719   :  { %v1547_v39 = vpop.permute.xlu1 %1546 }
 0x71a   :  { %v1569_v19 = vadd.f32 %v1547_v39, %v1336_v61 }
 0x71b   :  { %v1545_v37 = vpop.permute.xlu0 %1544 }
 0x71c   :  { %v1568_v7 = vadd.f32 %v1545_v37, %v1335_v18  ;;  %v1342_v37 = vadd.f32 %v11585_v44, %v12048_v16 }
 0x72a   :  { %v1717_v52 = vpop.permute.xlu1 %1716 }
 0x72b   :  { %v1739_v6 = vadd.f32 %v1717_v52, %v1569_v19 }
 0x72c   :  { %v1715_v21 = vpop.permute.xlu0 %1714 }
 0x72d   :  { %v1738_v3 = vadd.f32 %v1715_v21, %v1568_v7 }
 0x72e   :  { %v1551_v33 = vpop.permute.xlu1 %1550 }
 0x72f   :  { %v1571_v45 = vadd.f32 %v1551_v33, %v1338_v31 }
 0x730   :  { %v1549_v30 = vpop.permute.xlu0 %1548 }
 0x731   :  { %v1570_v57 = vadd.f32 %v1549_v30, %v1337_v46 }
 0x733   :  { %v1721_v24 = vpop.permute.xlu1 %1720 }
 0x734   :  { %v1741_v61 = vadd.f32 %v1721_v24, %v1571_v45 }
 0x735   :  { %v1719_v1 = vpop.permute.xlu0 %1718 }
 0x736   :  { %v1740_v52 = vadd.f32 %v1719_v1, %v1570_v57 }
 0x737   :  { %v1555_v2 = vpop.permute.xlu1 %1554 }
 0x739   :  { %v1553_v62 = vpop.permute.xlu0 %1552 }
 0x73b   :  { %v1725_v26 = vpop.permute.xlu1 %1724 }
 0x73d   :  { %v1723_v17 = vpop.permute.xlu0 %1722 }
 0x73f   :  { %v12053_v38 = vpop.permute.xlu1 %1558 }
 0x741   :  { %v12055_v9 = vpop.permute.xlu0 %1556 }
 0x743   :  { %v1887_v20 = vpop.permute.xlu1 %1886 }
 0x744   :  { %v1909_v0 = vadd.f32 %v1887_v20, %v1739_v6 }
 0x745   :  { %v1885_v11 = vpop.permute.xlu0 %1884 }
 0x746   :  { %v1908_v50 = vadd.f32 %v1885_v11, %v1738_v3  ;;  %v1340_v3 = vadd.f32 %v11573_v36, %v12032_v25 }
 0x747   :  { %v2113_v13 = vpop.permute.xlu1 %2112 }
 0x748   :  { %v2135_v49 = vadd.f32 %v2113_v13, %v1909_v0  ;;  %v1573_v45 = vadd.f32 %v1555_v2, %v1340_v3 }
 0x749   :  { %v2111_v58 = vpop.permute.xlu0 %2110 }
 0x74a   :  { %v2134_v32 = vadd.f32 %v2111_v58, %v1908_v50  ;;  %v1743_v30 = vadd.f32 %v1725_v26, %v1573_v45  ;;  %v1575_v26 = vadd.f32 %v12053_v38, %v1342_v37 }
 0x74b   :  { %v1891_v56 = vpop.permute.xlu1 %1890 }
 0x74c   :  { %v1911_v7 = vadd.f32 %v1891_v56, %v1741_v61 }
 0x74d   :  { %v1889_v12 = vpop.permute.xlu0 %1888 }
 0x74e   :  { %v1910_v13 = vadd.f32 %v1889_v12, %v1740_v52 }
 0x74f   :  { %v2117_v10 = vpop.permute.xlu1 %2116 }
 0x750   :  { %v2137_v27 = vadd.f32 %v2117_v10, %v1911_v7 }
 0x751   :  { %v2115_v60 = vpop.permute.xlu0 %2114 }
 0x753   :  { %v1895_v14 = vpop.permute.xlu1 %1894 }
 0x754   :  { %v1913_v58 = vadd.f32 %v1895_v14, %v1743_v30 }
 0x755   :  { %v1893_v8 = vpop.permute.xlu0 %1892 }
 0x757   :  { %v2121_v4 = vpop.permute.xlu1 %2120 }
 0x758   :  { %v2139_v51 = vadd.f32 %v2121_v4, %v1913_v58 }
 0x759   :  { %v2119_v63 = vpop.permute.xlu0 %2118 }
 0x75b   :  { %v2339_v48 = vpop.permute.xlu1 %2338 }
 0x75c   :  { %v2361_v15 = vadd.f32 %v2339_v48, %v2135_v49  ;;  %v1339_v48 = vadd.f32 %v12040_v43, %v11579_v42  ;;  %v2136_v49 = vadd.f32 %v2115_v60, %v1910_v13  ;;  %v1341_v60 = vadd.f32 %v12050_v35, %v11593_v54 }
 0x75d   :  { %v2337_v41 = vpop.permute.xlu0 %2336 }
 0x75e   :  { %v2369_v39 = vsub.f32 0.0, %v2361_v15  ;;  %v2360_v18 = vadd.f32 %v2337_v41, %v2134_v32  ;;  %v1572_v34 = vadd.f32 %v1553_v62, %v1339_v48  ;;  %v1574_v14 = vadd.f32 %v12055_v9, %v1341_v60 }
 0x75f   :  { %v1729_v19 = vpop.permute.xlu1 %1728 }
 0x760   :  { %v2378_v6 = vmul.f32 1.442695, %v2369_v39  ;;  %v2368_v20 = vsub.f32 0.0, %v2360_v18  ;;  %v1742_v36 = vadd.f32 %v1723_v17, %v1572_v34  ;;  %v1745_v43 = vadd.f32 %v1729_v19, %v1575_v26 }
 0x761   :  { %v1727_v0 = vpop.permute.xlu0 %1726 }
 0x762   :  { %10937 = vpow2.f32 %v2378_v6  ;;  %v2376_v31 = vmul.f32 1.442695, %v2368_v20  ;;  %v1912_v42 = vadd.f32 %v1893_v8, %v1742_v36  ;;  %v1744_v8 = vadd.f32 %v1727_v0, %v1574_v14 }
 0x763   :  { %v2343_v46 = vpop.permute.xlu1 %2342 }
 0x764   :  { %10939 = vpow2.f32 %v2376_v31  ;;  %v2363_v41 = vadd.f32 %v2343_v46, %v2137_v27  ;;  %v2138_v28 = vadd.f32 %v2119_v63, %v1912_v42 }
 0x765   :  { %v2341_v50 = vpop.permute.xlu0 %2340 }
 0x766   :  { %v2371_v56 = vsub.f32 0.0, %v2363_v41  ;;  %v2362_v33 = vadd.f32 %v2341_v50, %v2136_v49  ;;  %v14193_v41 = vmov 0  }
 0x767   :  { %v1899_v21 = vpop.permute.xlu1 %1898  ;;  %2529 = vmatprep.mubr.bf16.mxu0 %v14193_v41 }
 0x768   :  { %v2382_v12 = vmul.f32 1.442695, %v2371_v56  ;;  %v2370_v10 = vsub.f32 0.0, %v2362_v33  ;;  %v1915_v11 = vadd.f32 %v1899_v21, %v1745_v43 }
 0x769   :  { %v1897_v29 = vpop.permute.xlu0 %1896 }
 0x76a   :  { %10941 = vpow2.f32 %v2382_v12  ;;  %v2380_v2 = vmul.f32 1.442695, %v2370_v10  ;;  %v1914_v35 = vadd.f32 %v1897_v29, %v1744_v8  ;;  %v14307_v8 = vld [vmem:[#allocation20_spill] sm:$0xff] }
 0x76b   :  { %v2347_v62 = vpop.permute.xlu1 %2346 }
 0x76c   :  { %10943 = vpow2.f32 %v2380_v2  ;;  %v2365_v17 = vadd.f32 %v2347_v62, %v2139_v51 }
 0x76d   :  { %v2345_v25 = vpop.permute.xlu0 %2344 }
 0x76e   :  { %v2373_v24 = vsub.f32 0.0, %v2365_v17  ;;  %v2364_v44 = vadd.f32 %v2345_v25, %v2138_v28 }
 0x76f   :  { %v10938_v16 = vpop.eup %10937  ;;  %v2125_v4 = vpop.permute.xlu1 %2124 }
 0x770   :  { %v2393_v1 = vadd.f32 1.0, %v10938_v16  ;;  %v2386_v32 = vmul.f32 1.442695, %v2373_v24  ;;  %v2372_v15 = vsub.f32 0.0, %v2364_v44  ;;  %v2141_v61 = vadd.f32 %v2125_v4, %v1915_v11  ;;  %v14308_v4 = vld [vmem:[#allocation19_spill] sm:$0xff] }
 0x771   :  { %v10940_v54 = vpop.eup %10939  ;;  %v2123_v57 = vpop.permute.xlu0 %2122 }
 0x772   :  { %10945 = vrcp.f32 %v2393_v1  ;;  %v2392_v63 = vadd.f32 1.0, %v10940_v54  ;;  %v2384_v38 = vmul.f32 1.442695, %v2372_v15  ;;  %v2140_v39 = vadd.f32 %v2123_v57, %v1914_v35 }
 0x773   :  { %10947 = vpow2.f32 %v2386_v32  ;;  %v2351_v9 = vpop.permute.xlu1 %2350 }
 0x774   :  { %10949 = vrcp.f32 %v2392_v63  ;;  %v2367_v18 = vadd.f32 %v2351_v9, %v2141_v61 }
 0x775   :  { %10951 = vpow2.f32 %v2384_v38  ;;  %v2349_v19 = vpop.permute.xlu0 %2348 }
 0x776   :  { %v2375_v52 = vsub.f32 0.0, %v2367_v18  ;;  %v2366_v7 = vadd.f32 %v2349_v19, %v2140_v39 }
 0x777   :  { %v10942_v6 = vpop.eup %10941 }
 0x778   :  { %v2395_v20 = vadd.f32 1.0, %v10942_v6  ;;  %v2390_v3 = vmul.f32 1.442695, %v2375_v52  ;;  %v2374_v0 = vsub.f32 0.0, %v2366_v7  ;;  %v14309_v6 = vld [vmem:[#allocation5_spill] sm:$0xff] }
 0x779   :  { %v10944_v13 = vpop.eup %10943 }
 0x77a   :  { %10953 = vrcp.f32 %v2395_v20  ;;  %v2394_v27 = vadd.f32 1.0, %v10944_v13  ;;  %v2388_v31 = vmul.f32 1.442695, %v2374_v0  ;;  %v14310_v20 = vld [vmem:[#allocation6_spill] sm:$0xff]  ;;  %v14312_v0 = vld [vmem:[#allocation8_spill] sm:$0xff]  ;;  %v14313_v13 = vld [vmem:[#allocation9_spill] sm:$0xff] }
 0x77b   :  { %10955 = vpow2.f32 %v2390_v3  ;;  %v14311_v3 = vld [vmem:[#allocation7_spill] sm:$0xff] }
 0x77c   :  { %10957 = vrcp.f32 %v2394_v27  ;;  %v14314_v27 = vld [vmem:[#allocation10_spill] sm:$0xff] }
 0x77d   :  { %10959 = vpow2.f32 %v2388_v31  ;;  %v14315_v31 = vld [vmem:[#allocation3_spill] sm:$0xff] }
 0x77f   :  { %v10946_v48 = vpop.eup %10945 }
 0x780   :  { %v10948_v46 = vpop.eup %10947  ;;  %2415 = vperm.xlu1 %10918, %v10946_v48   ;;  %v14316_v48 = vld [vmem:[#allocation11_spill] sm:$0xff] }
 0x781   :  { %v10950_v45 = vpop.eup %10949  ;;  %v2397_v49 = vadd.f32 1.0, %v10948_v46  ;;  %v14317_v46 = vld [vmem:[#allocation12_spill] sm:$0xff] }
 0x782   :  { %v10952_v50 = vpop.eup %10951  ;;  %2410 = vperm.xlu0 %10917, %v10950_v45   ;;  %v14318_v45 = vld [vmem:[#allocation13_spill] sm:$0xff] }
 0x783   :  { %10961 = vrcp.f32 %v2397_v49  ;;  %v2396_v34 = vadd.f32 1.0, %v10952_v50  ;;  %v14319_v49 = vld [vmem:[#allocation14_spill] sm:$0xff]  ;;  %v14320_v50 = vld [vmem:[#allocation15_spill] sm:$0xff] }
 0x785   :  { %10963 = vrcp.f32 %v2396_v34  ;;  %v14321_v34 = vld [vmem:[#allocation16_spill] sm:$0xff] }
 0x787   :  { %v10954_v30 = vpop.eup %10953 }
 0x788   :  { %v10956_v56 = vpop.eup %10955  ;;  %2425 = vperm.xlu0 %10917, %v10954_v30   ;;  %v14322_v30 = vld [vmem:[#allocation17_spill] sm:$0xff] }
 0x789   :  { %v10958_v33 = vpop.eup %10957  ;;  %v2399_v21 = vadd.f32 1.0, %v10956_v56  ;;  %v2862_v56 = vld [vmem:[%s14088_s8 + $0x38] sm:$0xff] }
 0x78a   :  { %v10960_v36 = vpop.eup %10959  ;;  %2420 = vperm.xlu1 %10918, %v10958_v33   ;;  %v2861_v33 = vld [vmem:[%s14088_s8 + $0x30] sm:$0xff] }
 0x78b   :  { %10965 = vrcp.f32 %v2399_v21  ;;  %v2398_v58 = vadd.f32 1.0, %v10960_v36  ;;  %v2860_v21 = vld [vmem:[%s14088_s8 + $0x28] sm:$0xff]  ;;  %v2859_v36 = vld [vmem:[%s14088_s8 + $0x20] sm:$0xff] }
 0x78d   :  { %10967 = vrcp.f32 %v2398_v58  ;;  %v2858_v58 = vld [vmem:[%s14088_s8 + $0x18] sm:$0xff] }
 0x790   :  { %v10962_v12 = vpop.eup %10961 }
 0x791   :  { %2435 = vperm.xlu0 %10917, %v10962_v12   ;;  %v2857_v12 = vld [vmem:[%s14088_s8 + $0x10] sm:$0xff] }
 0x792   :  { %v10964_v10 = vpop.eup %10963 }
 0x793   :  { %2430 = vperm.xlu1 %10918, %v10964_v10   ;;  %v2856_v10 = vld [vmem:[%s14088_s8 + $0x8] sm:$0xff] }
 0x798   :  { %v10966_v37 = vpop.eup %10965 }
 0x799   :  { %2445 = vperm.xlu0 %10917, %v10966_v37   ;;  %v2855_v37 = vld [vmem:[%s14088_s8] sm:$0xff] }
 0x79a   :  { %v10968_v29 = vpop.eup %10967 }
 0x79b   :  { %2440 = vperm.xlu1 %10918, %v10968_v29  }
 0x7fb   :  { %v2416_v42 = vpop.permute.xlu1 %2415 }
 0x7fc   :  { %v2449_v2 = vmul.f32 %v2416_v42, %v11470_v47 }
 0x7fd   :  { %v2411_v51 = vpop.permute.xlu0 %2410 }
 0x7fe   :  { %v2448_v60 = vmul.f32 %v2411_v51, %v11473_v53 }
 0x800   :  { %v2461_v62 = vpack.c.bf16 %v2449_v2, %v2448_v60 }
 0x802   :  { %8844 = vmatmul.mubr.msk.bf16.vlgmr.msra.gmra.mxu0 %vm578_vm9, %v2461_v62 }
 0x803   :  { %v2426_v26 = vpop.permute.xlu0 %2425  ;;  %2539 = vmatprep.mubr.bf16.mxu0 %v14193_v41  ;;  %10108 = vmatpush3.msra.mxu0 %v2862_v56 }
 0x804   :  { %v2451_v17 = vmul.f32 %v2426_v26, %v11494_v23  ;;  %10109 = vmatprep.subr.mxu0 %v14283_v5 }
 0x805   :  { %v2421_v28 = vpop.permute.xlu1 %2420  ;;  %10110 = vmatpush3.msra.mxu0 %v2861_v33 }
 0x806   :  { %v2450_v14 = vmul.f32 %v2421_v28, %v11480_v55  ;;  %10111 = vmatprep.subr.mxu0 %v14283_v5 }
 0x807   :  { %10112 = vmatpush3.msra.mxu0 %v2860_v21 }
 0x808   :  { %v2462_v25 = vpack.c.bf16 %v2451_v17, %v2450_v14  ;;  %10113 = vmatprep.subr.mxu0 %v14283_v5  ;;  %v8848_v17 = vld [vmem:[%s14089_s7] ss:$0 sm:$0xff] }
 0x809   :  { %10114 = vmatpush3.msra.mxu0 %v2859_v36 }
 0x80a   :  { %8845 = vmatmul.mubr.msk.bf16.gmra.mxu0 %vm578_vm9, %v2462_v25  ;;  %10115 = vmatprep.subr.mxu0 %v14283_v5 }
 0x80b   :  { %2549 = vmatprep.mubr.bf16.mxu0 %v14193_v41  ;;  %10116 = vmatpush3.msra.mxu0 %v2858_v58 }
 0x80c   :  { %v2436_v43 = vpop.permute.xlu0 %2435  ;;  %10117 = vmatprep.subr.mxu0 %v14283_v5 }
 0x80d   :  { %v2453_v53 = vmul.f32 %v2436_v43, %v11508_v22  ;;  %10118 = vmatpush3.msra.mxu0 %v2857_v12 }
 0x80e   :  { %v2431_v47 = vpop.permute.xlu1 %2430  ;;  %10119 = vmatprep.subr.mxu0 %v14283_v5 }
 0x80f   :  { %v2452_v24 = vmul.f32 %v2431_v47, %v11491_v59  ;;  %10120 = vmatpush3.msra.mxu0 %v2856_v10 }
 0x810   :  { %10121 = vmatprep.subr.mxu0 %v14283_v5 }
 0x811   :  { %v2463_v44 = vpack.c.bf16 %v2453_v53, %v2452_v24  ;;  %10122 = vmatpush3.msra.mxu0 %v2855_v37 }
 0x812   :  { %10145 = vmatprep.subr.mxu0 %v14283_v5 }
 0x813   :  { %8846 = vmatmul.mubr.msk.bf16.gmra.mxu0 %vm578_vm9, %v2463_v44 }
 0x814   :  { %v2446_v16 = vpop.permute.xlu0 %2445  ;;  %2559 = vmatprep.mubr.bf16.mxu0 %v14193_v41 }
 0x815   :  { %v2455_v55 = vmul.f32 %v2446_v16, %v14307_v8 }
 0x816   :  { %v2441_v23 = vpop.permute.xlu1 %2440 }
 0x817   :  { %v2454_v1 = vmul.f32 %v2441_v23, %v14308_v4 }
 0x819   :  { %v2464_v11 = vpack.c.bf16 %v2455_v55, %v2454_v1 }
 0x81b   :  { %8847 = vmatmul.mubr.msk.bf16.gmra.mxu0 %vm578_vm9, %v2464_v11 }
 0x81c   :  { %10123 = vmatprep.mubr.msk.f32.mxu0 %vm11080_vm8, %v14283_v5 }
 0x8c2   :  { %v2531_v22 = vpop.f32.mrf.mxu0 }
 0x8c3   :  { %2584 = vrot.lane.b32.xlu1 %v2531_v22, %s11078_s16 }
 0x8c4   :  { %v2533_v59 = vpop.f32.mrf.mxu0 }
 0x8c6   :  { %v2535_v32 = vpop.f32.mrf.mxu0 }
 0x8c7   :  { %2586 = vrot.lane.b32.xlu0 %v2535_v32, %s11078_s16 }
 0x8c8   :  { %v2537_v15 = vpop.f32.mrf.mxu0 }
 0x8ca   :  { %v2541_v54 = vpop.f32.mrf.mxu0 }
 0x8cb   :  { %2588 = vrot.lane.b32.xlu1 %v2541_v54, %s11078_s16 }
 0x8cc   :  { %v2543_v35 = vpop.f32.mrf.mxu0 }
 0x8ce   :  { %v2545_v57 = vpop.f32.mrf.mxu0 }
 0x8cf   :  { %2590 = vrot.lane.b32.xlu0 %v2545_v57, %s11078_s16 }
 0x8d0   :  { %v2547_v63 = vpop.f32.mrf.mxu0 }
 0x8d3   :  { %v2551_v38 = vpop.f32.mrf.mxu0 }
 0x8d4   :  { %2592 = vrot.lane.b32.xlu1 %v2551_v38, %s11078_s16 }
 0x8d5   :  { %v2553_v61 = vpop.f32.mrf.mxu0 }
 0x8d7   :  { %v2555_v9 = vpop.f32.mrf.mxu0 }
 0x8d8   :  { %2594 = vrot.lane.b32.xlu0 %v2555_v9, %s11078_s16 }
 0x8d9   :  { %v2557_v39 = vpop.f32.mrf.mxu0 }
 0x8db   :  { %v2561_v18 = vpop.f32.mrf.mxu0 }
 0x8dc   :  { %2596 = vrot.lane.b32.xlu1 %v2561_v18, %s11078_s16 }
 0x8dd   :  { %v2563_v19 = vpop.f32.mrf.mxu0 }
 0x8df   :  { %v2565_v52 = vpop.f32.mrf.mxu0 }
 0x8e0   :  { %2598 = vrot.lane.b32.xlu0 %v2565_v52, %s11078_s16  ;;  %10051 = vmatprep.subr.msk.mxu1 %vm255_vm4, %v2565_v52 }
 0x8e1   :  { %10052 = vmatpush3.msk.msra.mxu1 %vm255_vm4, %v2565_v52  ;;  %v2567_v7 = vpop.f32.mrf.mxu0 }
 0x8e2   :  { %10053 = vmatprep.subr.mxu1 %v2561_v18 }
 0x8e3   :  { %10054 = vmatpush3.msra.mxu1 %v2561_v18 }
 0x8e4   :  { %10055 = vmatprep.subr.mxu1 %v2555_v9 }
 0x8e5   :  { %10056 = vmatpush3.msra.mxu1 %v2555_v9 }
 0x8e6   :  { %10057 = vmatprep.subr.mxu1 %v2551_v38 }
 0x8e7   :  { %10058 = vmatpush3.msra.mxu1 %v2551_v38 }
 0x8e8   :  { %10059 = vmatprep.subr.mxu1 %v2545_v57 }
 0x8e9   :  { %10060 = vmatpush3.msra.mxu1 %v2545_v57 }
 0x8ea   :  { %10061 = vmatprep.subr.mxu1 %v2541_v54 }
 0x8eb   :  { %10062 = vmatpush3.msra.mxu1 %v2541_v54 }
 0x8ec   :  { %10063 = vmatprep.subr.mxu1 %v2535_v32 }
 0x8ed   :  { %10064 = vmatpush3.msra.mxu1 %v2535_v32 }
 0x8ee   :  { %10065 = vmatprep.subr.mxu1 %v2531_v22 }
 0x8ef   :  { %10066 = vmatpush3.msra.mxu1 %v2531_v22 }
 0x8f0   :  { %10068 = vmatmul.mubr.msk.f32.vlgmr.msra.gmra.mxu1 %vm230_vm3, %v11264_v40  ;;  %10079 = vmatprep.subr.msk.mxu1 %vm255_vm4, %v2567_v7 }
 0x8f1   :  { %10080 = vmatpush3.msk.msra.mxu1 %vm255_vm4, %v2567_v7  ;;  %10070 = vmatprep.mubr.msk.f32.mxu1 %vm230_vm3, %v14309_v6 }
 0x8f2   :  { %10081 = vmatprep.subr.mxu1 %v2563_v19 }
 0x8f3   :  { %10082 = vmatpush3.msra.mxu1 %v2563_v19 }
 0x8f4   :  { %10071 = vmatmul.mubr.msk.f32.gmra.mxu1 %vm230_vm3, %v14310_v20  ;;  %10083 = vmatprep.subr.mxu1 %v2557_v39 }
 0x8f5   :  { %10084 = vmatpush3.msra.mxu1 %v2557_v39  ;;  %10073 = vmatprep.mubr.msk.f32.mxu1 %vm230_vm3, %v14311_v3 }
 0x8f6   :  { %10085 = vmatprep.subr.mxu1 %v2553_v61 }
 0x8f7   :  { %10086 = vmatpush3.msra.mxu1 %v2553_v61 }
 0x8f8   :  { %10074 = vmatmul.mubr.msk.f32.gmra.mxu1 %vm230_vm3, %v14312_v0  ;;  %10087 = vmatprep.subr.mxu1 %v2547_v63 }
 0x8f9   :  { %10088 = vmatpush3.msra.mxu1 %v2547_v63  ;;  %10076 = vmatprep.mubr.msk.f32.mxu1 %vm230_vm3, %v14313_v13 }
 0x8fa   :  { %10089 = vmatprep.subr.mxu1 %v2543_v35 }
 0x8fb   :  { %10090 = vmatpush3.msra.mxu1 %v2543_v35 }
 0x8fc   :  { %10077 = vmatmul.mubr.msk.f32.gmra.mxu1 %vm230_vm3, %v14314_v27  ;;  %10091 = vmatprep.subr.mxu1 %v2537_v15 }
 0x8fd   :  { %10092 = vmatpush3.msra.mxu1 %v2537_v15  ;;  %10095 = vmatprep.mubr.msk.f32.mxu1 %vm230_vm3, %v14315_v31 }
 0x8fe   :  { %10093 = vmatprep.subr.mxu1 %v2533_v59 }
 0x8ff   :  { %10094 = vmatpush3.msra.mxu1 %v2533_v59 }
 0x900   :  { %10096 = vmatmul.mubr.msk.f32.vlgmr.msra.gmra.mxu1 %vm230_vm3, %v14316_v48  ;;  %10126 = vmatprep.subr.mxu1 %v14283_v5 }
 0x901   :  { %10098 = vmatprep.mubr.msk.f32.mxu1 %vm230_vm3, %v14317_v46  ;;  %10127 = vmatpush3.msra.mxu1 %v2862_v56 }
 0x902   :  { %10128 = vmatprep.subr.mxu1 %v14283_v5 }
 0x903   :  { %10129 = vmatpush3.msra.mxu1 %v2861_v33 }
 0x904   :  { %10099 = vmatmul.mubr.msk.f32.gmra.mxu1 %vm230_vm3, %v14318_v45  ;;  %10130 = vmatprep.subr.mxu1 %v14283_v5 }
 0x905   :  { %10101 = vmatprep.mubr.msk.f32.mxu1 %vm230_vm3, %v14319_v49  ;;  %10131 = vmatpush3.msra.mxu1 %v2860_v21 }
 0x906   :  { %10132 = vmatprep.subr.mxu1 %v14283_v5 }
 0x907   :  { %10133 = vmatpush3.msra.mxu1 %v2859_v36 }
 0x908   :  { %10102 = vmatmul.mubr.msk.f32.gmra.mxu1 %vm230_vm3, %v14320_v50  ;;  %10134 = vmatprep.subr.mxu1 %v14283_v5 }
 0x909   :  { %10104 = vmatprep.mubr.msk.f32.mxu1 %vm230_vm3, %v14321_v34  ;;  %10135 = vmatpush3.msra.mxu1 %v2858_v58 }
 0x90a   :  { %10136 = vmatprep.subr.mxu1 %v14283_v5 }
 0x90b   :  { %10137 = vmatpush3.msra.mxu1 %v2857_v12 }
 0x90c   :  { %10105 = vmatmul.mubr.msk.f32.gmra.mxu1 %vm230_vm3, %v14322_v30  ;;  %10138 = vmatprep.subr.mxu1 %v14283_v5 }
 0x90d   :  { %10142 = vmatprep.mubr.msk.f32.mxu1 %vm11080_vm8, %v14283_v5  ;;  %10139 = vmatpush3.msra.mxu1 %v2856_v10 }
 0x90e   :  { %10140 = vmatprep.subr.mxu1 %v14283_v5 }
 0x90f   :  { %10141 = vmatpush3.msra.mxu1 %v2855_v37 }
 0x910   :  { %10150 = vmatprep.subr.mxu1 %v14283_v5 }
 0x935   :  { %v2585_v28 = vpop.permute.xlu1 %2584 }
 0x936   :  { %v2608_v53 = vadd.f32 %v8848_v17, %v2585_v28 }
 0x939   :  { %v2587_v62 = vpop.permute.xlu0 %2586 }
 0x93a   :  { %v2609_v25 = vadd.f32 %v8848_v17, %v2587_v62 }
 0x93d   :  { %v2589_v24 = vpop.permute.xlu1 %2588 }
 0x93e   :  { %v2610_v11 = vadd.f32 %v8848_v17, %v2589_v24 }
 0x941   :  { %v2591_v43 = vpop.permute.xlu0 %2590 }
 0x942   :  { %v2611_v23 = vadd.f32 %v8848_v17, %v2591_v43 }
 0x946   :  { %v2593_v22 = vpop.permute.xlu1 %2592 }
 0x947   :  { %v2612_v9 = vadd.f32 %v8848_v17, %v2593_v22 }
 0x94a   :  { %v2595_v8 = vpop.permute.xlu0 %2594 }
 0x94b   :  { %v2613_v15 = vadd.f32 %v8848_v17, %v2595_v8 }
 0x94e   :  { %v2597_v18 = vpop.permute.xlu1 %2596 }
 0x94f   :  { %v2614_v37 = vadd.f32 %v8848_v17, %v2597_v18 }
 0x952   :  { %v2599_v35 = vpop.permute.xlu0 %2598 }
 0x953   :  { %v2615_v56 = vadd.f32 %v8848_v17, %v2599_v35 }
 0x9b0   :  { %v10069_v29 = vpop.f32.mrf.mxu1 }
 0x9b1   :  { %v2724_v44 = vadd.f32 %v10069_v29, %v2609_v25 }
 0x9b2   :  { %v2684_v42 = vpop.f32.mrf.mxu1 }
 0x9b3   :  { %v2723_v55 = vadd.f32 %v2684_v42, %v2608_v53 }
 0x9b4   :  { %v10072_v51 = vpop.f32.mrf.mxu1 }
 0x9b5   :  { %v2726_v59 = vadd.f32 %v10072_v51, %v2611_v23 }
 0x9b6   :  { %v2694_v2 = vpop.f32.mrf.mxu1 }
 0x9b7   :  { %v2725_v57 = vadd.f32 %v2694_v2, %v2610_v11 }
 0x9b8   :  { %v10075_v60 = vpop.f32.mrf.mxu1 }
 0x9b9   :  { %v2728_v19 = vadd.f32 %v10075_v60, %v2613_v15 }
 0x9ba   :  { %v2704_v26 = vpop.f32.mrf.mxu1 }
 0x9bb   :  { %v2727_v33 = vadd.f32 %v2704_v26, %v2612_v9 }
 0x9bc   :  { %v10078_v14 = vpop.f32.mrf.mxu1 }
 0x9bd   :  { %v2730_v51 = vadd.f32 %v10078_v14, %v2615_v56 }
 0x9be   :  { %v2714_v47 = vpop.f32.mrf.mxu1 }
 0x9bf   :  { %v2729_v62 = vadd.f32 %v2714_v47, %v2614_v37 }
 0x9c0   :  { %v10097_v16 = vpop.f32.mrf.mxu1 }
 0x9c1   :  { %v2840_v4 = vadd.f32 %v10097_v16, %v2724_v44 }
 0x9c2   :  { %v2800_v1 = vpop.f32.mrf.mxu1 }
 0x9c3   :  { %v2839_v32 = vadd.f32 %v2800_v1, %v2723_v55  ;;  %v12177_v63 = vmax.f32 %v2840_v4, 0.0 }
 0x9c4   :  { %v10100_v54 = vpop.f32.mrf.mxu1 }
 0x9c5   :  { %v12179_v38 = vmax.f32 %v2839_v32, 0.0  ;;  %v2842_v61 = vadd.f32 %v10100_v54, %v2726_v59  ;;  %v2866_v36 = vsel %vm2864_vm2, %v12177_v63, 0.0  ;;  %v2889_v59 = vsel %vm2864_vm2, %v12177_v63, -inf }
 0x9c6   :  { %v2810_v39 = vpop.f32.mrf.mxu1 }
 0x9c7   :  { %v2865_v52 = vsel %vm2864_vm2, %v12179_v38, 0.0  ;;  %v2841_v7 = vadd.f32 %v2810_v39, %v2725_v57  ;;  %v12185_v58 = vmax.f32 %v2842_v61, 0.0  ;;  %v2888_v8 = vsel %vm2864_vm2, %v12179_v38, -inf }
 0x9c8   :  { %v10103_v21 = vpop.f32.mrf.mxu1  ;;  %v2867_v29 = vadd.f32 %v2866_v36, %v2865_v52 }
 0x9c9   :  { %v12187_v12 = vmax.f32 %v2841_v7, 0.0  ;;  %v2844_v10 = vadd.f32 %v10103_v21, %v2728_v19  ;;  %v2870_v25 = vsel %vm2864_vm2, %v12185_v58, 0.0  ;;  %v2891_v54 = vsel %vm2864_vm2, %v12185_v58, -inf }
 0x9ca   :  { %v2820_v42 = vpop.f32.mrf.mxu1 }
 0x9cb   :  { %v2868_v2 = vsel %vm2864_vm2, %v12187_v12, 0.0  ;;  %v2843_v60 = vadd.f32 %v2820_v42, %v2727_v33  ;;  %v12193_v43 = vmax.f32 %v2844_v10, 0.0  ;;  %v2890_v35 = vsel %vm2864_vm2, %v12187_v12, -inf }
 0x9cc   :  { %v2869_v28 = vadd.f32 %v2868_v2, %v2867_v29  ;;  %v10106_v26 = vpop.f32.mrf.mxu1 }
 0x9cd   :  { %v12195_v53 = vmax.f32 %v2843_v60, 0.0  ;;  %v2846_v24 = vadd.f32 %v10106_v26, %v2730_v51  ;;  %v2874_v4 = vsel %vm2864_vm2, %v12193_v43, 0.0  ;;  %v2894_v1 = vsel %vm2864_vm2, %v12193_v43, -inf }
 0x9ce   :  { %v2871_v44 = vadd.f32 %v2870_v25, %v2869_v28  ;;  %v2830_v17 = vpop.f32.mrf.mxu1  ;;  %v2895_v9 = vmax.f32 %v2889_v59, %v2894_v1 }
 0x9cf   :  { %v2872_v14 = vsel %vm2864_vm2, %v12195_v53, 0.0  ;;  %v2892_v16 = vsel %vm2864_vm2, %v12195_v53, -inf  ;;  %v12201_v47 = vmax.f32 %v2846_v24, 0.0  ;;  %v2845_v23 = vadd.f32 %v2830_v17, %v2729_v62 }
 0x9d0   :  { %v2873_v55 = vadd.f32 %v2872_v14, %v2871_v44  ;;  %v2893_v32 = vmax.f32 %v2888_v8, %v2892_v16  ;;  %v2863_v44 = vld [vmem:[%s14090_s9] sm:$0xf] }
 0x9d1   :  { %v2898_v11 = vsel %vm2878_vm5, %v12201_v47, -inf  ;;  %v12211_v22 = vmax.f32 %v2845_v23, 0.0  ;;  %v2879_v52 = vsel %vm2878_vm5, %v12201_v47, 0.0 }
 0x9d2   :  { %v2875_v15 = vadd.f32 %v2874_v4, %v2873_v55  ;;  %v2899_v39 = vmax.f32 %v2891_v54, %v2898_v11  ;;  %v2900_v7 = vmax.f32 %v2893_v32, %v2895_v9  ;;  %v14323_v4 = vld [vmem:[#allocation21_spill] sm:$0xff] }
 0x9d3   :  { %v2876_v57 = vsel %vm2864_vm2, %v12211_v22, 0.0  ;;  %v2896_v61 = vsel %vm2864_vm2, %v12211_v22, -inf }
 0x9d4   :  { %v2877_v18 = vadd.f32 %v2876_v57, %v2875_v15  ;;  %v2897_v19 = vmax.f32 %v2890_v35, %v2896_v61 }
 0x9d6   :  { %v2880_v56 = vadd.f32 %v2879_v52, %v2877_v18  ;;  %v2901_v33 = vmax.f32 %v2897_v19, %v2899_v39  ;;  %v14324_v39 = vld [vmem:[#allocation18_spill] sm:$0xff] }
 0x9d8   :  { %v2881_v21 = vrot.slane %v2880_v56, 4  ;;  %v2902_v36 = vmax.f32 %v2900_v7, %v2901_v33 }
 0x9da   :  { %v2882_v10 = vadd.f32 %v2881_v21, %v2880_v56  ;;  %v2903_v37 = vrot.slane %v2902_v36, 4 }
 0x9dc   :  { %v2883_v29 = vrot.slane %v2882_v10, 2  ;;  %v2904_v42 = vmax.f32 %v2902_v36, %v2903_v37 }
 0x9de   :  { %v2884_v51 = vadd.f32 %v2883_v29, %v2882_v10  ;;  %v2905_v2 = vrot.slane %v2904_v42, 2 }
 0x9e0   :  { %v2885_v60 = vrot.slane %v2884_v51, 1  ;;  %v2906_v62 = vmax.f32 %v2904_v42, %v2905_v2  ;;  %v3224_v2 = vld [vmem:[%s14091_s10] sm:$0x3] }
 0x9e2   :  { %v2886_v28 = vadd.f32 %v2885_v60, %v2884_v51  ;;  %v2907_v26 = vrot.slane %v2906_v62, 1 }
 0x9e4   :  { %v2887_v25 = vmul.f32 0.016666668, %v2886_v28  ;;  %v2908_v24 = vmax.f32 %v2906_v62, %v2907_v26 }
 0x9e6   :  { %10124 = vmatmul.mubr.msk.f32.vlgmr.msra.gmra.mxu0 %vm2864_vm2, %v2887_v25  ;;  %10143 = vmatmul.mubr.msk.f32.vlgmr.msra.gmra.mxu1 %vm2864_vm2, %v2908_v24 }
 0x9e7   :  { %10147 = vmatprep.mubr.msk.f32.mxu0 %vm11080_vm8, %v14283_v5  ;;  %10152 = vmatprep.mubr.msk.f32.mxu1 %vm11080_vm8, %v14283_v5 }
 0x9e8   :  { %10146 = vmatpush3.msk.msra.mxu0 %vm255_vm4, %v2863_v44  ;;  %10151 = vmatpush3.msk.msra.mxu1 %vm255_vm4, %v2863_v44 }
 0x9e9   :  { %10155 = vmatprep.subr.msk.mxu0 %vm776_vm11, %v3224_v2 }
 0xaa6   :  { %v2978_v17 = vpop.f32.mrf.mxu0  ;;  %v3052_v14 = vpop.f32.mrf.mxu1 }
 0xaa7   :  { %v2982_v16 = vmax.f32 %v2978_v17, 0.0  ;;  %v3056_v23 = vmax.f32 %v3052_v14, 0.0 }
 0xaa8   :  { %v10125_v8 = vpop.f32.mrf.mxu0  ;;  %v10144_v55 = vpop.f32.mrf.mxu1 }
 0xaa9   :  { %10148 = vmatmul.mubr.msk.f32.vlgmr.msra.gmra.mxu0 %vm3057_vm6, %v3056_v23  ;;  %10153 = vmatmul.mubr.msk.f32.vlgmr.msra.gmra.mxu1 %vm3057_vm6, %v2982_v16 }
 0xaaa   :  { %10185 = vmatprep.mubr.msk.f32.mxu1 %vm230_vm3, %v14323_v4  ;;  %10156 = vmatpush3.msk.msra.mxu0 %vm776_vm11, %v3224_v2 }
 0xb69   :  { %v3130_v1 = vpop.f32.mrf.mxu0  ;;  %v3203_v11 = vpop.f32.mrf.mxu1 }
 0xb6a   :  { %v3204_v59 = vadd.f32 %v3203_v11, %v3130_v1 }
 0xb6b   :  { %v10149_v32 = vpop.f32.mrf.mxu0  ;;  %v10154_v15 = vpop.f32.mrf.mxu1 }
 0xb6c   :  { %v3207_v54 = vsub.f32 0.0, %v3204_v59 }
 0xb6e   :  { %v3208_v35 = vmul.f32 1.442695, %v3207_v54 }
 0xb70   :  { %10969 = vpow2.f32 %v3208_v35 }
 0xb7d   :  { %v10970_v57 = vpop.eup %10969 }
 0xb7e   :  { %v3210_v61 = vadd.f32 1.0, %v10970_v57 }
 0xb80   :  { %10971 = vrcp.f32 %v3210_v61 }
 0xb8d   :  { %v10972_v9 = vpop.eup %10971 }
 0xb8e   :  { %v3215_v18 = vrot.slane %v10972_v9, %v14324_v39 }
 0xb90   :  { %v12242_v19 = vmul.f32 %v3215_v18, %v12177_v63  ;;  %v12245_v52 = vmul.f32 %v3215_v18, %v12179_v38  ;;  %v12256_v63 = vmul.f32 %v3215_v18, %v12187_v12  ;;  %v12259_v38 = vmul.f32 %v3215_v18, %v12185_v58 }
 0xb91   :  { %v12270_v29 = vmul.f32 %v3215_v18, %v12195_v53  ;;  %v12273_v58 = vmul.f32 %v3215_v18, %v12193_v43  ;;  %v12289_v60 = vmul.f32 %v3215_v18, %v12211_v22  ;;  %v12292_v62 = vmul.f32 %v3215_v18, %v12201_v47 }
 0xb92   :  { %14325 = vst [vmem:[#allocation20_spill] sm:$0xff] %v12242_v19  ;;  %14326 = vst [vmem:[#allocation19_spill] sm:$0xff] %v12245_v52  ;;  %v3228_v7 = vsel %vm2864_vm2, %v12242_v19, 0.0  ;;  %v3225_v56 = vsel %vm2864_vm2, %v12245_v52, 0.0  ;;  %v3258_v33 = vsel %vm2864_vm2, %v12245_v52, -inf  ;;  %v3261_v21 = vsel %vm2864_vm2, %v12242_v19, -inf }
 0xb93   :  { %3229 = vadd.xlane.f32.xlu0 %v3228_v7  ;;  %3226 = vadd.xlane.f32.xlu1 %v3225_v56  ;;  %14327 = vst [vmem:[#allocation53_spill] sm:$0xff] %v12256_v63  ;;  %14328 = vst [vmem:[#allocation54_spill] sm:$0xff] %v12259_v38  ;;  %v3231_v36 = vsel %vm2864_vm2, %v12256_v63, 0.0  ;;  %v3234_v10 = vsel %vm2864_vm2, %v12259_v38, 0.0  ;;  %v3264_v37 = vsel %vm2864_vm2, %v12256_v63, -inf  ;;  %v3267_v12 = vsel %vm2864_vm2, %v12259_v38, -inf }
 0xb94   :  { %14329 = vst [vmem:[#allocation55_spill] sm:$0xff] %v12270_v29  ;;  %14330 = vst [vmem:[#allocation56_spill] sm:$0xff] %v12273_v58  ;;  %v3237_v42 = vsel %vm2864_vm2, %v12270_v29, 0.0  ;;  %v3240_v51 = vsel %vm2864_vm2, %v12273_v58, 0.0  ;;  %v3270_v43 = vsel %vm2864_vm2, %v12270_v29, -inf  ;;  %v3273_v53 = vsel %vm2864_vm2, %v12273_v58, -inf }
 0xb95   :  { %14331 = vst [vmem:[#allocation57_spill] sm:$0xff] %v12289_v60  ;;  %14332 = vst [vmem:[#allocation58_spill] sm:$0xff] %v12292_v62  ;;  %v3243_v28 = vsel %vm2864_vm2, %v12289_v60, 0.0  ;;  %v3246_v26 = vsel %vm2878_vm5, %v12292_v62, 0.0  ;;  %v3276_v25 = vsel %vm2864_vm2, %v12289_v60, -inf  ;;  %v3279_v22 = vsel %vm2878_vm5, %v12292_v62, -inf }
 0xb96   :  { %v14362_v60 = vld [vmem:[#allocation34_spill] sm:$0xff]  ;;  %v14372_v29 = vld [vmem:[#allocation52_spill] sm:$0xff] }
 0xb97   :  { %3259 = vmax.xlane.f32.xlu0 %v3258_v33  ;;  %3262 = vmax.xlane.f32.xlu1 %v3261_v21  ;;  %v14370_v62 = vld [vmem:[#allocation50_spill] sm:$0xff] }
 0xb9b   :  { %3232 = vadd.xlane.f32.xlu0 %v3231_v36  ;;  %3235 = vadd.xlane.f32.xlu1 %v3234_v10 }
 0xb9f   :  { %3265 = vmax.xlane.f32.xlu0 %v3264_v37  ;;  %3268 = vmax.xlane.f32.xlu1 %v3267_v12 }
 0xba3   :  { %3238 = vadd.xlane.f32.xlu0 %v3237_v42  ;;  %3241 = vadd.xlane.f32.xlu1 %v3240_v51 }
 0xba7   :  { %3271 = vmax.xlane.f32.xlu0 %v3270_v43  ;;  %3274 = vmax.xlane.f32.xlu1 %v3273_v53  ;;  %v14333_v53 = vld [vmem:[#allocation24_spill] sm:$0xff] }
 0xbab   :  { %3244 = vadd.xlane.f32.xlu0 %v3243_v28  ;;  %3247 = vadd.xlane.f32.xlu1 %v3246_v26 }
 0xbaf   :  { %3277 = vmax.xlane.f32.xlu0 %v3276_v25  ;;  %3280 = vmax.xlane.f32.xlu1 %v3279_v22 }
 0xc1c   :  { %v3230_v47 = vpop.xlane.xlu0 %3229  ;;  %v3227_v24 = vpop.xlane.xlu1 %3226 }
 0xc1d   :  { %v3251_v44 = vmul.f32 0.015625, %v3230_v47  ;;  %v3250_v17 = vmul.f32 0.015625, %v3227_v24 }
 0xc20   :  { %v3260_v14 = vpop.xlane.xlu0 %3259  ;;  %v3263_v16 = vpop.xlane.xlu1 %3262 }
 0xc21   :  { %v3282_v23 = vsel %vm998_vm13, %v3250_v17, %v3260_v14  ;;  %v3283_v8 = vsel %vm998_vm13, %v3251_v44, %v3263_v16  ;;  %v14342_v14 = vld [vmem:[#allocation22_spill] sm:$0xff]  ;;  %v14343_v16 = vld [vmem:[#allocation23_spill] sm:$0xff] }
 0xc22   :  { %10157 = vmatprep.mubr.msk.f32.mxu0 %vm772_vm12, %v3282_v23  ;;  %v14344_v23 = vld [vmem:[#allocation25_spill] sm:$0xff] }
 0xc23   :  { %10158 = vmatmul.mubr.msk.f32.vlgmr.msra.gmra.mxu0 %vm772_vm12, %v3283_v8  ;;  %v14345_v8 = vld [vmem:[#allocation26_spill] sm:$0xff] }
 0xc24   :  { %v3233_v55 = vpop.xlane.xlu0 %3232  ;;  %v3236_v1 = vpop.xlane.xlu1 %3235 }
 0xc25   :  { %v3252_v11 = vmul.f32 0.015625, %v3233_v55  ;;  %v3253_v59 = vmul.f32 0.015625, %v3236_v1  ;;  %v14346_v55 = vld [vmem:[#allocation27_spill] sm:$0xff]  ;;  %v14347_v1 = vld [vmem:[#allocation28_spill] sm:$0xff] }
 0xc28   :  { %v3266_v32 = vpop.xlane.xlu0 %3265  ;;  %v3269_v15 = vpop.xlane.xlu1 %3268 }
 0xc29   :  { %v3284_v54 = vsel %vm998_vm13, %v3252_v11, %v3266_v32  ;;  %v3285_v35 = vsel %vm998_vm13, %v3253_v59, %v3269_v15  ;;  %v14348_v11 = vld [vmem:[#allocation29_spill] sm:$0xff]  ;;  %v14349_v59 = vld [vmem:[#allocation2_spill] sm:$0xff] }
 0xc2a   :  { %10160 = vmatprep.mubr.msk.f32.mxu0 %vm772_vm12, %v3284_v54 }
 0xc2b   :  { %10161 = vmatmul.mubr.msk.f32.gmra.mxu0 %vm772_vm12, %v3285_v35 }
 0xc2c   :  { %v3239_v57 = vpop.xlane.xlu0 %3238  ;;  %v3242_v61 = vpop.xlane.xlu1 %3241 }
 0xc2d   :  { %v3254_v9 = vmul.f32 0.015625, %v3239_v57  ;;  %v3255_v18 = vmul.f32 0.015625, %v3242_v61 }
 0xc30   :  { %v3272_v7 = vpop.xlane.xlu0 %3271  ;;  %v3275_v56 = vpop.xlane.xlu1 %3274 }
 0xc31   :  { %v3286_v33 = vsel %vm998_vm13, %v3254_v9, %v3272_v7  ;;  %v3287_v21 = vsel %vm998_vm13, %v3255_v18, %v3275_v56 }
 0xc32   :  { %10163 = vmatprep.mubr.msk.f32.mxu0 %vm772_vm12, %v3286_v33 }
 0xc33   :  { %10164 = vmatmul.mubr.msk.f32.gmra.mxu0 %vm772_vm12, %v3287_v21 }
 0xc34   :  { %v3245_v36 = vpop.xlane.xlu0 %3244  ;;  %v3248_v10 = vpop.xlane.xlu1 %3247 }
 0xc35   :  { %v3256_v37 = vmul.f32 0.015625, %v3245_v36  ;;  %v3257_v12 = vmul.f32 0.015625, %v3248_v10 }
 0xc38   :  { %v3278_v42 = vpop.xlane.xlu0 %3277  ;;  %v3281_v51 = vpop.xlane.xlu1 %3280 }
 0xc39   :  { %v3288_v2 = vsel %vm998_vm13, %v3256_v37, %v3278_v42  ;;  %v3289_v43 = vsel %vm998_vm13, %v3257_v12, %v3281_v51  ;;  %v10926_v42 = vld [vmem:[%s14081_s1] sm:$0x3f]  }
 0xc3a   :  { %10166 = vmatprep.mubr.msk.f32.mxu0 %vm772_vm12, %v3288_v2  ;;  %v14350_v2 = vld [vmem:[#allocation37_spill] sm:$0xff] }
 0xc3b   :  { %10167 = vmatmul.mubr.msk.f32.gmra.mxu0 %vm772_vm12, %v3289_v43 }
 0xc3c   :  { %10213 = vmatprep.mubr.msk.f32.mxu0 %vm230_vm3, %v14333_v53 }
 0xce3   :  { %v12320_v28 = vpop.f32.mrf.mxu0 }
 0xce4   :  { %14334 = vst [vmem:[#allocation59_spill] sm:$0xff] %v12320_v28 }
 0xce5   :  { %v12322_v26 = vpop.f32.mrf.mxu0 }
 0xce6   :  { %14335 = vst [vmem:[#allocation60_spill] sm:$0xff] %v12322_v26 }
 0xceb   :  { %v12324_v25 = vpop.f32.mrf.mxu0 }
 0xcec   :  { %14336 = vst [vmem:[#allocation61_spill] sm:$0xff] %v12324_v25 }
 0xced   :  { %v12326_v22 = vpop.f32.mrf.mxu0 }
 0xcee   :  { %14337 = vst [vmem:[#allocation62_spill] sm:$0xff] %v12326_v22 }
 0xcf3   :  { %v12328_v47 = vpop.f32.mrf.mxu0 }
 0xcf4   :  { %14338 = vst [vmem:[#allocation63_spill] sm:$0xff] %v12328_v47 }
 0xcf5   :  { %v12330_v24 = vpop.f32.mrf.mxu0 }
 0xcf6   :  { %14339 = vst [vmem:[#allocation64_spill] sm:$0xff] %v12330_v24 }
 0xcfb   :  { %v12332_v44 = vpop.f32.mrf.mxu0 }
 0xcfc   :  { %14340 = vst [vmem:[#allocation65_spill] sm:$0xff] %v12332_v44  ;;  %3761 = vrot.lane.b32.xlu0 %v12332_v44, %s11082_s14  ;;  %10169 = vmatprep.subr.msk.mxu1 %vm255_vm4, %v12332_v44 }
 0xcfd   :  { %v12338_v17 = vpop.f32.mrf.mxu0  ;;  %10170 = vmatpush3.msk.msra.mxu1 %vm255_vm4, %v12332_v44 }
 0xcfe   :  { %14341 = vst [vmem:[#allocation66_spill] sm:$0xff] %v12338_v17  ;;  %3759 = vrot.lane.b32.xlu1 %v12338_v17, %s11082_s14  ;;  %10171 = vmatprep.subr.mxu1 %v12338_v17 }
 0xcff   :  { %10172 = vmatpush3.msra.mxu1 %v12338_v17 }
 0xd00   :  { %3755 = vrot.lane.b32.xlu0 %v12330_v24, %s11082_s14  ;;  %10173 = vmatprep.subr.mxu1 %v12328_v47 }
 0xd01   :  { %10174 = vmatpush3.msra.mxu1 %v12328_v47 }
 0xd02   :  { %3757 = vrot.lane.b32.xlu1 %v12328_v47, %s11082_s14  ;;  %10175 = vmatprep.subr.mxu1 %v12330_v24 }
 0xd03   :  { %10176 = vmatpush3.msra.mxu1 %v12330_v24 }
 0xd04   :  { %3751 = vrot.lane.b32.xlu0 %v12326_v22, %s11082_s14  ;;  %10177 = vmatprep.subr.mxu1 %v12324_v25 }
 0xd05   :  { %10178 = vmatpush3.msra.mxu1 %v12324_v25 }
 0xd06   :  { %3753 = vrot.lane.b32.xlu1 %v12324_v25, %s11082_s14  ;;  %10179 = vmatprep.subr.mxu1 %v12326_v22 }
 0xd07   :  { %10180 = vmatpush3.msra.mxu1 %v12326_v22 }
 0xd08   :  { %3747 = vrot.lane.b32.xlu0 %v12322_v26, %s11082_s14  ;;  %10181 = vmatprep.subr.mxu1 %v12320_v28 }
 0xd09   :  { %10182 = vmatpush3.msra.mxu1 %v12320_v28 }
 0xd0a   :  { %3749 = vrot.lane.b32.xlu1 %v12320_v28, %s11082_s14  ;;  %10183 = vmatprep.subr.mxu1 %v12322_v26 }
 0xd0b   :  { %10184 = vmatpush3.msra.mxu1 %v12322_v26 }
 0xd0c   :  { %4099 = vrot.lane.b32.xlu0 %v12338_v17, %s11084_s18  ;;  %10186 = vmatmul.mubr.msk.f32.vlgmr.msra.gmra.mxu1 %vm230_vm3, %v14342_v14 }
 0xd0d   :  { %10188 = vmatprep.mubr.msk.f32.mxu1 %vm230_vm3, %v14343_v16 }
 0xd0e   :  { %4101 = vrot.lane.b32.xlu1 %v12332_v44, %s11084_s18 }
 0xd10   :  { %4095 = vrot.lane.b32.xlu0 %v12330_v24, %s11084_s18  ;;  %10189 = vmatmul.mubr.msk.f32.gmra.mxu1 %vm230_vm3, %v14344_v23 }
 0xd11   :  { %10191 = vmatprep.mubr.msk.f32.mxu1 %vm230_vm3, %v14345_v8 }
 0xd12   :  { %4097 = vrot.lane.b32.xlu1 %v12328_v47, %s11084_s18 }
 0xd14   :  { %4091 = vrot.lane.b32.xlu0 %v12326_v22, %s11084_s18  ;;  %10192 = vmatmul.mubr.msk.f32.gmra.mxu1 %vm230_vm3, %v14346_v55 }
 0xd15   :  { %10194 = vmatprep.mubr.msk.f32.mxu1 %vm230_vm3, %v14347_v1 }
 0xd16   :  { %4093 = vrot.lane.b32.xlu1 %v12324_v25, %s11084_s18 }
 0xd18   :  { %4087 = vrot.lane.b32.xlu0 %v12322_v26, %s11084_s18  ;;  %10195 = vmatmul.mubr.msk.f32.gmra.mxu1 %vm230_vm3, %v14348_v11 }
 0xd19   :  { %10241 = vmatprep.mubr.msk.f32.mxu1 %vm230_vm3, %v14349_v59 }
 0xd1a   :  { %4089 = vrot.lane.b32.xlu1 %v12320_v28, %s11084_s18 }
 0xd1c   :  { %3589 = vrot.lane.b32.xlu0 %v12338_v17, %s11081_s13 }
 0xd1e   :  { %3591 = vrot.lane.b32.xlu1 %v12332_v44, %s11081_s13 }
 0xd20   :  { %3585 = vrot.lane.b32.xlu0 %v12330_v24, %s11081_s13 }
 0xd22   :  { %3587 = vrot.lane.b32.xlu1 %v12328_v47, %s11081_s13 }
 0xd24   :  { %3581 = vrot.lane.b32.xlu0 %v12326_v22, %s11081_s13 }
 0xd26   :  { %3583 = vrot.lane.b32.xlu1 %v12324_v25, %s11081_s13 }
 0xd28   :  { %3577 = vrot.lane.b32.xlu0 %v12322_v26, %s11081_s13 }
 0xd2a   :  { %3579 = vrot.lane.b32.xlu1 %v12320_v28, %s11081_s13 }
 0xd2c   :  { %3929 = vrot.lane.b32.xlu0 %v12338_v17, %s11083_s15 }
 0xd2e   :  { %3931 = vrot.lane.b32.xlu1 %v12332_v44, %s11083_s15 }
 0xd30   :  { %3925 = vrot.lane.b32.xlu0 %v12330_v24, %s11083_s15 }
 0xd32   :  { %3927 = vrot.lane.b32.xlu1 %v12328_v47, %s11083_s15 }
 0xd34   :  { %3921 = vrot.lane.b32.xlu0 %v12326_v22, %s11083_s15 }
 0xd36   :  { %3923 = vrot.lane.b32.xlu1 %v12324_v25, %s11083_s15 }
 0xd38   :  { %3917 = vrot.lane.b32.xlu0 %v12322_v26, %s11083_s15 }
 0xd3a   :  { %3919 = vrot.lane.b32.xlu1 %v12320_v28, %s11083_s15 }
 0xd3c   :  { %4269 = vrot.lane.b32.xlu0 %v12338_v17, %s11085_s19 }
 0xd3e   :  { %4271 = vrot.lane.b32.xlu1 %v12332_v44, %s11085_s19 }
 0xd40   :  { %4265 = vrot.lane.b32.xlu0 %v12330_v24, %s11085_s19 }
 0xd42   :  { %4267 = vrot.lane.b32.xlu1 %v12328_v47, %s11085_s19 }
 0xd44   :  { %4261 = vrot.lane.b32.xlu0 %v12326_v22, %s11085_s19 }
 0xd46   :  { %4263 = vrot.lane.b32.xlu1 %v12324_v25, %s11085_s19 }
 0xd48   :  { %4257 = vrot.lane.b32.xlu0 %v12322_v26, %s11085_s19 }
 0xd4a   :  { %4259 = vrot.lane.b32.xlu1 %v12320_v28, %s11085_s19 }
 0xd6e   :  { %v3762_v32 = vpop.permute.xlu0 %3761 }
 0xd6f   :  { %10225 = vmatprep.subr.msk.mxu1 %vm255_vm4, %v3762_v32 }
 0xd70   :  { %v3760_v15 = vpop.permute.xlu1 %3759  ;;  %10226 = vmatpush3.msk.msra.mxu1 %vm255_vm4, %v3762_v32  ;;  %v4557_v32 = vsel %vm72_vm0, %v10926_v42, 0 }
 0xd71   :  { %10227 = vmatprep.subr.mxu1 %v3760_v15 }
 0xd72   :  { %v3756_v54 = vpop.permute.xlu0 %3755  ;;  %10228 = vmatpush3.msra.mxu1 %v3760_v15  ;;  %v14351_v15 = vld [vmem:[#allocation38_spill] sm:$0xff] }
 0xd74   :  { %v3758_v35 = vpop.permute.xlu1 %3757 }
 0xd75   :  { %10229 = vmatprep.subr.mxu1 %v3758_v35 }
 0xd76   :  { %v3752_v57 = vpop.permute.xlu0 %3751  ;;  %10230 = vmatpush3.msra.mxu1 %v3758_v35 }
 0xd77   :  { %10231 = vmatprep.subr.mxu1 %v3756_v54 }
 0xd78   :  { %v3754_v61 = vpop.permute.xlu1 %3753  ;;  %10232 = vmatpush3.msra.mxu1 %v3756_v54 }
 0xd79   :  { %10233 = vmatprep.subr.mxu1 %v3754_v61 }
 0xd7a   :  { %v3748_v9 = vpop.permute.xlu0 %3747  ;;  %10234 = vmatpush3.msra.mxu1 %v3754_v61  ;;  %v14353_v61 = vld [vmem:[#allocation40_spill] sm:$0xff] }
 0xd7b   :  { %10235 = vmatprep.subr.mxu1 %v3752_v57 }
 0xd7c   :  { %v3750_v18 = vpop.permute.xlu1 %3749  ;;  %10236 = vmatpush3.msra.mxu1 %v3752_v57  ;;  %v14352_v57 = vld [vmem:[#allocation39_spill] sm:$0xff] }
 0xd7d   :  { %10237 = vmatprep.subr.mxu1 %v3750_v18 }
 0xd7e   :  { %v4100_v7 = vpop.permute.xlu0 %4099  ;;  %10238 = vmatpush3.msra.mxu1 %v3750_v18  ;;  %v14354_v18 = vld [vmem:[#allocation41_spill] sm:$0xff] }
 0xd7f   :  { %10239 = vmatprep.subr.mxu1 %v3748_v9 }
 0xd80   :  { %v4102_v56 = vpop.permute.xlu1 %4101  ;;  %10240 = vmatpush3.msra.mxu1 %v3748_v9 }
 0xd81   :  { %10242 = vmatmul.mubr.msk.f32.vlgmr.msra.gmra.mxu1 %vm230_vm3, %v11264_v40  ;;  %10281 = vmatprep.subr.msk.mxu1 %vm255_vm4, %v4102_v56 }
 0xd82   :  { %v4096_v33 = vpop.permute.xlu0 %4095  ;;  %10282 = vmatpush3.msk.msra.mxu1 %vm255_vm4, %v4102_v56  ;;  %10244 = vmatprep.mubr.msk.f32.mxu1 %vm230_vm3, %v14309_v6  ;;  %v8937_v56 = vld [vmem:[%s14082_s0 + $0x48] sm:$0xff] }
 0xd83   :  { %10283 = vmatprep.subr.mxu1 %v4100_v7 }
 0xd84   :  { %v4098_v21 = vpop.permute.xlu1 %4097  ;;  %10284 = vmatpush3.msra.mxu1 %v4100_v7  ;;  %v8936_v7 = vld [vmem:[%s14082_s0 + $0x40] sm:$0xff] }
 0xd85   :  { %10245 = vmatmul.mubr.msk.f32.gmra.mxu1 %vm230_vm3, %v14310_v20  ;;  %10285 = vmatprep.subr.mxu1 %v4098_v21 }
 0xd86   :  { %v4092_v36 = vpop.permute.xlu0 %4091  ;;  %10286 = vmatpush3.msra.mxu1 %v4098_v21  ;;  %10247 = vmatprep.mubr.msk.f32.mxu1 %vm230_vm3, %v14311_v3  ;;  %v14355_v21 = vld [vmem:[#allocation43_spill] sm:$0xff] }
 0xd87   :  { %10287 = vmatprep.subr.mxu1 %v4096_v33 }
 0xd88   :  { %v4094_v10 = vpop.permute.xlu1 %4093  ;;  %10288 = vmatpush3.msra.mxu1 %v4096_v33 }
 0xd89   :  { %10248 = vmatmul.mubr.msk.f32.gmra.mxu1 %vm230_vm3, %v14312_v0  ;;  %10289 = vmatprep.subr.mxu1 %v4094_v10 }
 0xd8a   :  { %v4088_v37 = vpop.permute.xlu0 %4087  ;;  %10290 = vmatpush3.msra.mxu1 %v4094_v10  ;;  %10250 = vmatprep.mubr.msk.f32.mxu1 %vm230_vm3, %v14313_v13  ;;  %v14356_v10 = vld [vmem:[#allocation44_spill] sm:$0xff] }
 0xd8b   :  { %10291 = vmatprep.subr.mxu1 %v4092_v36 }
 0xd8c   :  { %v4090_v12 = vpop.permute.xlu1 %4089  ;;  %10292 = vmatpush3.msra.mxu1 %v4092_v36 }
 0xd8d   :  { %10251 = vmatmul.mubr.msk.f32.gmra.mxu1 %vm230_vm3, %v14314_v27  ;;  %10293 = vmatprep.subr.mxu1 %v4090_v12 }
 0xd8e   :  { %v3590_v51 = vpop.permute.xlu0 %3589  ;;  %10294 = vmatpush3.msra.mxu1 %v4090_v12  ;;  %10297 = vmatprep.mubr.msk.f32.mxu1 %vm230_vm3, %v14350_v2  ;;  %v8938_v12 = vld [vmem:[%s14082_s0 + $0x50] sm:$0xff] }
 0xd8f   :  { %10295 = vmatprep.subr.mxu1 %v4088_v37 }
 0xd90   :  { %v3592_v43 = vpop.permute.xlu1 %3591  ;;  %10296 = vmatpush3.msra.mxu1 %v4088_v37  ;;  %v4535_v37 = vpack.c.bf16 %v8937_v56, %v8936_v7 }
 0xd91   :  { %10197 = vmatprep.subr.msk.mxu0 %vm255_vm4, %v3592_v43  ;;  %10298 = vmatmul.mubr.msk.f32.vlgmr.msra.gmra.mxu1 %vm230_vm3, %v14351_v15 }
 0xd92   :  { %10904 = vmatprep.subr.msk.bf16.mxu1 %vm72_vm0, %v10926_v42  ;;  %v3586_v54 = vpop.permute.xlu0 %3585  ;;  %10198 = vmatpush3.msk.msra.mxu0 %vm255_vm4, %v3592_v43  ;;  %v8939_v42 = vld [vmem:[%s14082_s0 + $0x58] sm:$0xff]  ;;  %v8941_v43 = vld [vmem:[%s14082_s0 + $0x68] sm:$0xff] }
 0xd93   :  { %10338 = vmatpush3.bf16.msra.mxu1 %v4557_v32  ;;  %10199 = vmatprep.subr.mxu0 %v3590_v51 }
 0xd94   :  { %10200 = vmatpush3.msra.mxu0 %v3590_v51  ;;  %v3588_v35 = vpop.permute.xlu1 %3587  ;;  %10300 = vmatprep.mubr.msk.f32.mxu1 %vm230_vm3, %v14352_v57  ;;  %v8940_v51 = vld [vmem:[%s14082_s0 + $0x60] sm:$0xff] }
 0xd95   :  { %10201 = vmatprep.subr.mxu0 %v3588_v35  ;;  %10301 = vmatmul.mubr.msk.f32.gmra.mxu1 %vm230_vm3, %v14353_v61  ;;  %v4537_v56 = vpack.c.bf16 %v8941_v43, %v8940_v51 }
 0xd96   :  { %v3582_v9 = vpop.permute.xlu0 %3581  ;;  %10202 = vmatpush3.msra.mxu0 %v3588_v35  ;;  %10303 = vmatprep.mubr.msk.f32.mxu1 %vm230_vm3, %v14354_v18  ;;  %v4536_v35 = vpack.c.bf16 %v8939_v42, %v8938_v12  ;;  %v8942_v12 = vld [vmem:[%s14082_s0 + $0x70] sm:$0xff] }
 0xd97   :  { %10203 = vmatprep.subr.mxu0 %v3586_v54 }
 0xd98   :  { %10204 = vmatpush3.msra.mxu0 %v3586_v54  ;;  %v3584_v33 = vpop.permute.xlu1 %3583  ;;  %v14357_v54 = vld [vmem:[#allocation47_spill] sm:$0xff] }
 0xd99   :  { %10205 = vmatprep.subr.mxu0 %v3584_v33  ;;  %10304 = vmatmul.mubr.msk.f32.gmra.mxu1 %vm230_vm3, %v14355_v21 }
 0xd9a   :  { %v3578_v36 = vpop.permute.xlu0 %3577  ;;  %10206 = vmatpush3.msra.mxu0 %v3584_v33  ;;  %10306 = vmatprep.mubr.msk.f32.mxu1 %vm230_vm3, %v14356_v10 }
 0xd9b   :  { %10207 = vmatprep.subr.mxu0 %v3582_v9 }
 0xd9c   :  { %10208 = vmatpush3.msra.mxu0 %v3582_v9  ;;  %v3580_v32 = vpop.permute.xlu1 %3579  ;;  %v14358_v9 = vld [vmem:[#allocation30_spill] sm:$0xff] }
 0xd9d   :  { %10209 = vmatprep.subr.mxu0 %v3580_v32  ;;  %10307 = vmatmul.mubr.msk.f32.gmra.mxu1 %vm230_vm3, %v14357_v54 }
 0xd9e   :  { %v3930_v7 = vpop.permute.xlu0 %3929  ;;  %10210 = vmatpush3.msra.mxu0 %v3580_v32  ;;  %10339 = vmatprep.mubr.msk.bf16.mxu1 %vm59_vm1, %v4535_v37  ;;  %v8943_v37 = vld [vmem:[%s14082_s0 + $0x78] sm:$0xf]  ;;  %v14360_v32 = vld [vmem:[#allocation32_spill] sm:$0xff] }
 0xd9f   :  { %10211 = vmatprep.subr.mxu0 %v3578_v36  ;;  %v4538_v51 = vpack.c.bf16 %v8943_v37, %v8942_v12 }
 0xda0   :  { %10212 = vmatpush3.msra.mxu0 %v3578_v36  ;;  %v3932_v33 = vpop.permute.xlu1 %3931  ;;  %v14359_v36 = vld [vmem:[#allocation31_spill] sm:$0xff] }
 0xda1   :  { %10253 = vmatprep.subr.msk.mxu0 %vm255_vm4, %v3932_v33  ;;  %10340 = vmatmul.mubr.msk.bf16.vlgmr.msra.gmra.mxu1 %vm59_vm1, %v4536_v35  ;;  %v14361_v35 = vld [vmem:[#allocation33_spill] sm:$0xff] }
 0xda2   :  { %v3926_v41 = vpop.permute.xlu0 %3925  ;;  %10214 = vmatmul.mubr.msk.f32.vlgmr.msra.gmra.mxu0 %vm230_vm3, %v14358_v9  ;;  %10343 = vmatprep.mubr.msk.bf16.mxu1 %vm59_vm1, %v4537_v56 }
 0xda3   :  { %10254 = vmatpush3.msk.msra.mxu0 %vm255_vm4, %v3932_v33  ;;  %10216 = vmatprep.mubr.msk.f32.mxu0 %vm230_vm3, %v14359_v36 }
 0xda4   :  { %10255 = vmatprep.subr.mxu0 %v3930_v7  ;;  %v3928_v42 = vpop.permute.xlu1 %3927 }
 0xda5   :  { %10256 = vmatpush3.msra.mxu0 %v3930_v7  ;;  %v14363_v7 = vld [vmem:[#allocation35_spill] sm:$0xff] }
 0xda6   :  { %10257 = vmatprep.subr.mxu0 %v3928_v42  ;;  %v3922_v43 = vpop.permute.xlu0 %3921  ;;  %10217 = vmatmul.mubr.msk.f32.gmra.mxu0 %vm230_vm3, %v14360_v32 }
 0xda7   :  { %10258 = vmatpush3.msra.mxu0 %v3928_v42  ;;  %10219 = vmatprep.mubr.msk.f32.mxu0 %vm230_vm3, %v14361_v35 }
 0xda8   :  { %10259 = vmatprep.subr.mxu0 %v3926_v41  ;;  %v3924_v56 = vpop.permute.xlu1 %3923 }
 0xda9   :  { %10260 = vmatpush3.msra.mxu0 %v3926_v41  ;;  %10344 = vmatmul.mubr.msk.bf16.gmra.mxu1 %vm59_vm1, %v4538_v51  ;;  %v14364_v41 = vld [vmem:[#allocation36_spill] sm:$0xff] }
 0xdaa   :  { %10261 = vmatprep.subr.mxu0 %v3924_v56  ;;  %v3918_v33 = vpop.permute.xlu0 %3917  ;;  %10220 = vmatmul.mubr.msk.f32.gmra.mxu0 %vm230_vm3, %v14362_v60 }
 0xdab   :  { %10262 = vmatpush3.msra.mxu0 %v3924_v56  ;;  %10222 = vmatprep.mubr.msk.f32.mxu0 %vm230_vm3, %v14363_v7 }
 0xdac   :  { %10263 = vmatprep.subr.mxu0 %v3922_v43  ;;  %v3920_v12 = vpop.permute.xlu1 %3919  ;;  %10391 = vmatprep.mubr.msk.f32.mxu1 %vm230_vm3, %v14315_v31 }
 0xdad   :  { %10264 = vmatpush3.msra.mxu0 %v3922_v43 }
 0xdae   :  { %10265 = vmatprep.subr.mxu0 %v3920_v12  ;;  %v4270_v37 = vpop.permute.xlu0 %4269  ;;  %10223 = vmatmul.mubr.msk.f32.gmra.mxu0 %vm230_vm3, %v14364_v41 }
 0xdaf   :  { %10266 = vmatpush3.msra.mxu0 %v3920_v12  ;;  %10269 = vmatprep.mubr.msk.f32.mxu0 %vm230_vm3, %v14315_v31 }
 0xdb0   :  { %10267 = vmatprep.subr.mxu0 %v3918_v33  ;;  %v4272_v42 = vpop.permute.xlu1 %4271 }
 0xdb1   :  { %10268 = vmatpush3.msra.mxu0 %v3918_v33 }
 0xdb2   :  { %10309 = vmatprep.subr.msk.mxu0 %vm255_vm4, %v4272_v42  ;;  %10270 = vmatmul.mubr.msk.f32.vlgmr.msra.gmra.mxu0 %vm230_vm3, %v14316_v48  ;;  %v4266_v51 = vpop.permute.xlu0 %4265 }
 0xdb3   :  { %10310 = vmatpush3.msk.msra.mxu0 %vm255_vm4, %v4272_v42  ;;  %10272 = vmatprep.mubr.msk.f32.mxu0 %vm230_vm3, %v14317_v46  ;;  %v14365_v42 = vld [vmem:[#allocation42_spill] sm:$0xff] }
 0xdb4   :  { %10311 = vmatprep.subr.mxu0 %v4270_v37  ;;  %v4268_v43 = vpop.permute.xlu1 %4267 }
 0xdb5   :  { %10312 = vmatpush3.msra.mxu0 %v4270_v37 }
 0xdb6   :  { %10313 = vmatprep.subr.mxu0 %v4268_v43  ;;  %10273 = vmatmul.mubr.msk.f32.gmra.mxu0 %vm230_vm3, %v14318_v45  ;;  %v4262_v33 = vpop.permute.xlu0 %4261 }
 0xdb7   :  { %10314 = vmatpush3.msra.mxu0 %v4268_v43  ;;  %10275 = vmatprep.mubr.msk.f32.mxu0 %vm230_vm3, %v14319_v49  ;;  %v14367_v43 = vld [vmem:[#allocation46_spill] sm:$0xff] }
 0xdb8   :  { %10315 = vmatprep.subr.mxu0 %v4266_v51  ;;  %v4264_v56 = vpop.permute.xlu1 %4263 }
 0xdb9   :  { %10316 = vmatpush3.msra.mxu0 %v4266_v51  ;;  %v14366_v51 = vld [vmem:[#allocation45_spill] sm:$0xff] }
 0xdba   :  { %10317 = vmatprep.subr.mxu0 %v4264_v56  ;;  %10276 = vmatmul.mubr.msk.f32.gmra.mxu0 %vm230_vm3, %v14320_v50  ;;  %v4258_v37 = vpop.permute.xlu0 %4257 }
 0xdbb   :  { %10318 = vmatpush3.msra.mxu0 %v4264_v56  ;;  %10278 = vmatprep.mubr.msk.f32.mxu0 %vm230_vm3, %v14321_v34  ;;  %v14368_v56 = vld [vmem:[#allocation48_spill] sm:$0xff] }
 0xdbc   :  { %10319 = vmatprep.subr.mxu0 %v4262_v33  ;;  %v4260_v12 = vpop.permute.xlu1 %4259 }
 0xdbd   :  { %10320 = vmatpush3.msra.mxu0 %v4262_v33  ;;  %v14369_v33 = vld [vmem:[#allocation49_spill] sm:$0xff] }
 0xdbe   :  { %10321 = vmatprep.subr.mxu0 %v4260_v12  ;;  %10279 = vmatmul.mubr.msk.f32.gmra.mxu0 %vm230_vm3, %v14322_v30 }
 0xdbf   :  { %10322 = vmatpush3.msra.mxu0 %v4260_v12  ;;  %10325 = vmatprep.mubr.msk.f32.mxu0 %vm230_vm3, %v14365_v42  ;;  %v14371_v12 = vld [vmem:[#allocation51_spill] sm:$0xff] }
 0xdc0   :  { %10323 = vmatprep.subr.mxu0 %v4258_v37 }
 0xdc1   :  { %10324 = vmatpush3.msra.mxu0 %v4258_v37 }
 0xdc2   :  { %10326 = vmatmul.mubr.msk.f32.vlgmr.msra.gmra.mxu0 %vm230_vm3, %v14366_v51 }
 0xdc3   :  { %10328 = vmatprep.mubr.msk.f32.mxu0 %vm230_vm3, %v14367_v43 }
 0xdc6   :  { %10329 = vmatmul.mubr.msk.f32.gmra.mxu0 %vm230_vm3, %v14368_v56 }
 0xdc7   :  { %10331 = vmatprep.mubr.msk.f32.mxu0 %vm230_vm3, %v14369_v33 }
 0xdca   :  { %10332 = vmatmul.mubr.msk.f32.gmra.mxu0 %vm230_vm3, %v14370_v62 }
 0xdcb   :  { %10334 = vmatprep.mubr.msk.f32.mxu0 %vm230_vm3, %v14371_v12 }
 0xdcc   :  { %v12573_v37 = vpop.f32.mrf.mxu1 }
 0xdcd   :  { %14373 = vst [vmem:[#allocation67_spill] sm:$0xff] %v12573_v37 }
 0xdce   :  { %10335 = vmatmul.mubr.msk.f32.gmra.mxu0 %vm230_vm3, %v14372_v29  ;;  %v12575_v58 = vpop.f32.mrf.mxu1 }
 0xdcf   :  { %10363 = vmatprep.mubr.msk.f32.mxu0 %vm230_vm3, %v14349_v59  ;;  %14374 = vst [vmem:[#allocation68_spill] sm:$0xff] %v12575_v58 }
 0xdd0   :  { %v12577_v63 = vpop.f32.mrf.mxu1 }
 0xdd1   :  { %14375 = vst [vmem:[#allocation69_spill] sm:$0xff] %v12577_v63 }
 0xdd2   :  { %v12579_v38 = vpop.f32.mrf.mxu1 }
 0xdd3   :  { %14376 = vst [vmem:[#allocation70_spill] sm:$0xff] %v12579_v38 }
 0xdd4   :  { %v12581_v52 = vpop.f32.mrf.mxu1 }
 0xdd5   :  { %14377 = vst [vmem:[#allocation71_spill] sm:$0xff] %v12581_v52 }
 0xdd6   :  { %v12583_v19 = vpop.f32.mrf.mxu1 }
 0xdd7   :  { %14378 = vst [vmem:[#allocation72_spill] sm:$0xff] %v12583_v19 }
 0xdd8   :  { %v12585_v17 = vpop.f32.mrf.mxu1 }
 0xdd9   :  { %14379 = vst [vmem:[#allocation73_spill] sm:$0xff] %v12585_v17 }
 0xdda   :  { %v12587_v44 = vpop.f32.mrf.mxu1 }
 0xddb   :  { %14380 = vst [vmem:[#allocation74_spill] sm:$0xff] %v12587_v44 }
 0xe41   :  { %v12589_v24 = vpop.f32.mrf.mxu1 }
 0xe42   :  { %14381 = vst [vmem:[#allocation75_spill] sm:$0xff] %v12589_v24 }
 0xe43   :  { %v12591_v47 = vpop.f32.mrf.mxu1 }
 0xe44   :  { %14382 = vst [vmem:[#allocation76_spill] sm:$0xff] %v12591_v47 }
 0xe45   :  { %v12593_v22 = vpop.f32.mrf.mxu1 }
 0xe46   :  { %14383 = vst [vmem:[#allocation77_spill] sm:$0xff] %v12593_v22 }
 0xe47   :  { %v12595_v25 = vpop.f32.mrf.mxu1 }
 0xe48   :  { %14384 = vst [vmem:[#allocation78_spill] sm:$0xff] %v12595_v25 }
 0xe49   :  { %v12597_v26 = vpop.f32.mrf.mxu1 }
 0xe4a   :  { %14385 = vst [vmem:[#allocation79_spill] sm:$0xff] %v12597_v26 }
 0xe4b   :  { %v12599_v28 = vpop.f32.mrf.mxu1 }
 0xe4c   :  { %14386 = vst [vmem:[#allocation80_spill] sm:$0xff] %v12599_v28 }
 0xe4d   :  { %v12601_v38 = vpop.f32.mrf.mxu1 }
 0xe4e   :  { %14387 = vst [vmem:[#allocation81_spill] sm:$0xff] %v12601_v38 }
 0xe4f   :  { %v12603_v52 = vpop.f32.mrf.mxu1 }
 0xe50   :  { %14388 = vst [vmem:[#allocation82_spill] sm:$0xff] %v12603_v52 }
 0xe51   :  { %v12605_v19 = vpop.f32.mrf.mxu1 }
 0xe52   :  { %14389 = vst [vmem:[#allocation83_spill] sm:$0xff] %v12605_v19 }
 0xe53   :  { %v12607_v17 = vpop.f32.mrf.mxu1 }
 0xe54   :  { %14390 = vst [vmem:[#allocation84_spill] sm:$0xff] %v12607_v17 }
 0xe55   :  { %v12609_v44 = vpop.f32.mrf.mxu1 }
 0xe56   :  { %14391 = vst [vmem:[#allocation85_spill] sm:$0xff] %v12609_v44 }
 0xe57   :  { %v12611_v24 = vpop.f32.mrf.mxu1 }
 0xe58   :  { %14392 = vst [vmem:[#allocation86_spill] sm:$0xff] %v12611_v24 }
 0xe59   :  { %v12613_v47 = vpop.f32.mrf.mxu1 }
 0xe5a   :  { %14393 = vst [vmem:[#allocation87_spill] sm:$0xff] %v12613_v47 }
 0xe5b   :  { %v12615_v22 = vpop.f32.mrf.mxu1 }
 0xe5c   :  { %14394 = vst [vmem:[#allocation88_spill] sm:$0xff] %v12615_v22  ;;  %v12710_v22 = vld [vmem:[%s14083_s3] sm:$0xff] }
 0xe5d   :  { %v12617_v25 = vpop.f32.mrf.mxu1 }
 0xe5e   :  { %14395 = vst [vmem:[#allocation89_spill] sm:$0xff] %v12617_v25 }
 0xe5f   :  { %v12619_v26 = vpop.f32.mrf.mxu1 }
 0xe60   :  { %14396 = vst [vmem:[#allocation90_spill] sm:$0xff] %v12619_v26  ;;  %v12704_v26 = vld [vmem:[%s14083_s3 + $0x8] sm:$0xff] }
 0xe61   :  { %v10341_v28 = vpop.f32.mrf.mxu1 }
 0xe63   :  { %v4593_v38 = vpop.f32.mrf.mxu1 }
 0xe65   :  { %v10342_v63 = vpop.f32.mrf.mxu1 }
 0xe67   :  { %v4596_v52 = vpop.f32.mrf.mxu1 }
 0xe69   :  { %v10345_v58 = vpop.f32.mrf.mxu1 }
 0xe6a   :  { %4797 = vrot.lane.b32.xlu0 %v10345_v58, %s11078_s16 }
 0xe6b   :  { %v4609_v17 = vpop.f32.mrf.mxu1 }
 0xe6d   :  { %v10346_v19 = vpop.f32.mrf.mxu1 }
 0xe6e   :  { %4793 = vrot.lane.b32.xlu0 %v4609_v17, %s11078_s16  ;;  %4799 = vrot.lane.b32.xlu1 %v10346_v19, %s11078_s16 }
 0xe6f   :  { %10347 = vmatprep.subr.msk.mxu0 %vm255_vm4, %v10346_v19  ;;  %v4612_v25 = vpop.f32.mrf.mxu1 }
 0xe70   :  { %10348 = vmatpush3.msk.msra.mxu0 %vm255_vm4, %v10346_v19 }
 0xe71   :  { %10349 = vmatprep.subr.mxu0 %v10345_v58 }
 0xe72   :  { %10350 = vmatpush3.msra.mxu0 %v10345_v58  ;;  %4789 = vrot.lane.b32.xlu0 %v10341_v28, %s11078_s16 }
 0xe73   :  { %4795 = vrot.lane.b32.xlu1 %v4612_v25, %s11078_s16  ;;  %10351 = vmatprep.subr.mxu0 %v4612_v25 }
 0xe74   :  { %10352 = vmatpush3.msra.mxu0 %v4612_v25 }
 0xe75   :  { %10353 = vmatprep.subr.mxu0 %v4609_v17 }
 0xe76   :  { %10354 = vmatpush3.msra.mxu0 %v4609_v17  ;;  %4785 = vrot.lane.b32.xlu0 %v4593_v38, %s11078_s16 }
 0xe77   :  { %4791 = vrot.lane.b32.xlu1 %v10342_v63, %s11078_s16  ;;  %10355 = vmatprep.subr.mxu0 %v10342_v63 }
 0xe78   :  { %10356 = vmatpush3.msra.mxu0 %v10342_v63 }
 0xe79   :  { %10357 = vmatprep.subr.mxu0 %v10341_v28 }
 0xe7a   :  { %10358 = vmatpush3.msra.mxu0 %v10341_v28  ;;  %4640 = vrot.lane.b32.xlu0 %v4596_v52, %s11079_s17 }
 0xe7b   :  { %4787 = vrot.lane.b32.xlu1 %v4596_v52, %s11078_s16  ;;  %10359 = vmatprep.subr.mxu0 %v4596_v52 }
 0xe7c   :  { %10360 = vmatpush3.msra.mxu0 %v4596_v52 }
 0xe7d   :  { %10361 = vmatprep.subr.mxu0 %v4593_v38 }
 0xe7e   :  { %10362 = vmatpush3.msra.mxu0 %v4593_v38  ;;  %4644 = vrot.lane.b32.xlu0 %v10342_v63, %s11079_s17 }
 0xe7f   :  { %4638 = vrot.lane.b32.xlu1 %v4593_v38, %s11079_s17  ;;  %10364 = vmatmul.mubr.msk.f32.vlgmr.msra.gmra.mxu0 %vm230_vm3, %v11264_v40 }
 0xe80   :  { %10366 = vmatprep.mubr.msk.f32.mxu0 %vm230_vm3, %v14309_v6  ;;  %10403 = vmatprep.subr.mxu0 %v14283_v5 }
 0xe82   :  { %4648 = vrot.lane.b32.xlu0 %v4612_v25, %s11079_s17 }
 0xe83   :  { %4642 = vrot.lane.b32.xlu1 %v10341_v28, %s11079_s17  ;;  %10367 = vmatmul.mubr.msk.f32.gmra.mxu0 %vm230_vm3, %v14310_v20 }
 0xe84   :  { %10369 = vmatprep.mubr.msk.f32.mxu0 %vm230_vm3, %v14311_v3 }
 0xe86   :  { %4652 = vrot.lane.b32.xlu0 %v10346_v19, %s11079_s17 }
 0xe87   :  { %4646 = vrot.lane.b32.xlu1 %v4609_v17, %s11079_s17  ;;  %10370 = vmatmul.mubr.msk.f32.gmra.mxu0 %vm230_vm3, %v14312_v0 }
 0xe88   :  { %10372 = vmatprep.mubr.msk.f32.mxu0 %vm230_vm3, %v14313_v13 }
 0xe8b   :  { %4650 = vrot.lane.b32.xlu1 %v10345_v58, %s11079_s17  ;;  %10373 = vmatmul.mubr.msk.f32.gmra.mxu0 %vm230_vm3, %v14314_v27 }
 0xe8c   :  { %10411 = vmatprep.mubr.msk.f32.mxu0 %vm11080_vm8, %v14283_v5 }
 0xedc   :  { %v4798_v52 = vpop.permute.xlu0 %4797 }
 0xee0   :  { %v4800_v63 = vpop.permute.xlu1 %4799  ;;  %v4794_v19 = vpop.permute.xlu0 %4793 }
 0xee1   :  { %10375 = vmatprep.subr.msk.mxu1 %vm255_vm4, %v4800_v63 }
 0xee2   :  { %10376 = vmatpush3.msk.msra.mxu1 %vm255_vm4, %v4800_v63 }
 0xee3   :  { %10377 = vmatprep.subr.mxu1 %v4798_v52 }
 0xee4   :  { %10378 = vmatpush3.msra.mxu1 %v4798_v52  ;;  %v4790_v58 = vpop.permute.xlu0 %4789  ;;  %v12675_v52 = vpop.f32.mrf.mxu0 }
 0xee5   :  { %v4796_v38 = vpop.permute.xlu1 %4795  ;;  %14397 = vst [vmem:[#allocation91_spill] sm:$0xff] %v12675_v52 }
 0xee6   :  { %10379 = vmatprep.subr.mxu1 %v4796_v38  ;;  %v12677_v63 = vpop.f32.mrf.mxu0 }
 0xee7   :  { %10380 = vmatpush3.msra.mxu1 %v4796_v38  ;;  %14398 = vst [vmem:[#allocation92_spill] sm:$0xff] %v12677_v63 }
 0xee8   :  { %10381 = vmatprep.subr.mxu1 %v4794_v19  ;;  %v4786_v17 = vpop.permute.xlu0 %4785 }
 0xee9   :  { %10382 = vmatpush3.msra.mxu1 %v4794_v19  ;;  %v4792_v28 = vpop.permute.xlu1 %4791  ;;  %v12679_v19 = vpop.f32.mrf.mxu0 }
 0xeea   :  { %10383 = vmatprep.subr.mxu1 %v4792_v28  ;;  %14399 = vst [vmem:[#allocation93_spill] sm:$0xff] %v12679_v19 }
 0xeeb   :  { %10384 = vmatpush3.msra.mxu1 %v4792_v28  ;;  %v12681_v38 = vpop.f32.mrf.mxu0  ;;  %v12688_v28 = vld [vmem:[%s14083_s3 + $0x18] sm:$0xff] }
 0xeec   :  { %10385 = vmatprep.subr.mxu1 %v4790_v58  ;;  %14400 = vst [vmem:[#allocation94_spill] sm:$0xff] %v12681_v38  ;;  %10404 = vmatpush3.msra.mxu0 %v12688_v28  ;;  %v4641_v62 = vpop.permute.xlu0 %4640 }
 0xeed   :  { %10386 = vmatpush3.msra.mxu1 %v4790_v58  ;;  %v4788_v25 = vpop.permute.xlu1 %4787  ;;  %v12683_v58 = vpop.f32.mrf.mxu0  ;;  %10405 = vmatprep.subr.mxu0 %v14283_v5 }
 0xeee   :  { %10387 = vmatprep.subr.mxu1 %v4788_v25  ;;  %14401 = vst [vmem:[#allocation95_spill] sm:$0xff] %v12683_v58 }
 0xeef   :  { %10388 = vmatpush3.msra.mxu1 %v4788_v25  ;;  %v12691_v25 = vpop.f32.mrf.mxu0 }
 0xef0   :  { %10389 = vmatprep.subr.mxu1 %v4786_v17  ;;  %14402 = vst [vmem:[#allocation96_spill] sm:$0xff] %v12691_v25  ;;  %v12724_v25 = vld [vmem:[%s14085_s4] sm:$0x3] }
 0xef1   :  { %10390 = vmatpush3.msra.mxu1 %v4786_v17  ;;  %v12697_v17 = vld [vmem:[%s14083_s3 + $0x10] sm:$0xff]  ;;  %v12712_v47 = vpop.f32.mrf.mxu0 }
 0xef2   :  { %10392 = vmatmul.mubr.msk.f32.vlgmr.msra.gmra.mxu1 %vm230_vm3, %v14316_v48  ;;  %10430 = vmatprep.subr.mxu1 %v14283_v5  ;;  %14403 = vst [vmem:[#allocation97_spill] sm:$0xff] %v12712_v47 }
 0xef3   :  { %10394 = vmatprep.mubr.msk.f32.mxu1 %vm230_vm3, %v14317_v46  ;;  %10406 = vmatpush3.msra.mxu0 %v12697_v17  ;;  %v12717_v24 = vpop.f32.mrf.mxu0 }
 0xef4   :  { %10407 = vmatprep.subr.mxu0 %v14283_v5  ;;  %14404 = vst [vmem:[#allocation98_spill] sm:$0xff] %v12717_v24  ;;  %10431 = vmatpush3.msk.msra.mxu1 %vm776_vm11, %v12724_v25 }
 0xef5   :  { %10408 = vmatpush3.msra.mxu0 %v12704_v26  ;;  %v12719_v44 = vpop.f32.mrf.mxu0 }
 0xef6   :  { %10395 = vmatmul.mubr.msk.f32.gmra.mxu1 %vm230_vm3, %v14318_v45  ;;  %10409 = vmatprep.subr.mxu0 %v14283_v5  ;;  %14405 = vst [vmem:[#allocation99_spill] sm:$0xff] %v12719_v44 }
 0xef7   :  { %10397 = vmatprep.mubr.msk.f32.mxu1 %vm230_vm3, %v14319_v49  ;;  %10410 = vmatpush3.msra.mxu0 %v12710_v22  ;;  %v12728_v58 = vpop.f32.mrf.mxu0 }
 0xef8   :  { %10414 = vmatprep.subr.mxu0 %v14283_v5  ;;  %14406 = vst [vmem:[#allocation100_spill] sm:$0xff] %v12728_v58 }
 0xef9   :  { %v12730_v47 = vpop.f32.mrf.mxu0 }
 0xefa   :  { %10398 = vmatmul.mubr.msk.f32.gmra.mxu1 %vm230_vm3, %v14320_v50  ;;  %14407 = vst [vmem:[#allocation101_spill] sm:$0xff] %v12730_v47 }
 0xefb   :  { %10400 = vmatprep.mubr.msk.f32.mxu1 %vm230_vm3, %v14321_v34  ;;  %v12732_v38 = vpop.f32.mrf.mxu0 }
 0xefc   :  { %14408 = vst [vmem:[#allocation102_spill] sm:$0xff] %v12732_v38 }
 0xefd   :  { %v12734_v19 = vpop.f32.mrf.mxu0 }
 0xefe   :  { %10401 = vmatmul.mubr.msk.f32.gmra.mxu1 %vm230_vm3, %v14322_v30  ;;  %14409 = vst [vmem:[#allocation103_spill] sm:$0xff] %v12734_v19 }
 0xeff   :  { %10432 = vmatprep.mubr.msk.f32.mxu1 %vm11080_vm8, %v14283_v5  ;;  %v12736_v63 = vpop.f32.mrf.mxu0 }
 0xf00   :  { %14410 = vst [vmem:[#allocation104_spill] sm:$0xff] %v12736_v63 }
 0xf01   :  { %v12738_v24 = vpop.f32.mrf.mxu0 }
 0xf02   :  { %14411 = vst [vmem:[#allocation105_spill] sm:$0xff] %v12738_v24 }
 0xf03   :  { %v12740_v44 = vpop.f32.mrf.mxu0 }
 0xf04   :  { %14412 = vst [vmem:[#allocation106_spill] sm:$0xff] %v12740_v44  ;;  %v4639_v44 = vpop.permute.xlu1 %4638 }
 0xf05   :  { %v12742_v52 = vpop.f32.mrf.mxu0 }
 0xf06   :  { %14413 = vst [vmem:[#allocation107_spill] sm:$0xff] %v12742_v52  ;;  %v4645_v52 = vpop.permute.xlu0 %4644 }
 0xf07   :  { %v12744_v37 = vpop.f32.mrf.mxu0 }
 0xf08   :  { %14414 = vst [vmem:[#allocation108_spill] sm:$0xff] %v12744_v37 }
 0xf09   :  { %v12746_v29 = vpop.f32.mrf.mxu0 }
 0xf0a   :  { %14415 = vst [vmem:[#allocation109_spill] sm:$0xff] %v12746_v29  ;;  %v8949_v29 = vld [vmem:[%s14084_s2] ss:$0 sm:$0xff] }
 0xf0b   :  { %v12748_v12 = vpop.f32.mrf.mxu0  ;;  %v4663_v37 = vadd.f32 %v8949_v29, %v4641_v62  ;;  %v4662_v54 = vadd.f32 %v8949_v29, %v4639_v44  ;;  %v4665_v51 = vadd.f32 %v8949_v29, %v4645_v52 }
 0xf0c   :  { %14416 = vst [vmem:[#allocation110_spill] sm:$0xff] %v12748_v12  ;;  %v4643_v12 = vpop.permute.xlu1 %4642 }
 0xf0d   :  { %v12750_v58 = vpop.f32.mrf.mxu0  ;;  %v4664_v18 = vadd.f32 %v8949_v29, %v4643_v12 }
 0xf0e   :  { %14417 = vst [vmem:[#allocation111_spill] sm:$0xff] %v12750_v58 }
 0xf0f   :  { %v12752_v47 = vpop.f32.mrf.mxu0 }
 0xf10   :  { %14418 = vst [vmem:[#allocation112_spill] sm:$0xff] %v12752_v47  ;;  %v4649_v47 = vpop.permute.xlu0 %4648 }
 0xf11   :  { %v12754_v38 = vpop.f32.mrf.mxu0  ;;  %v4667_v50 = vadd.f32 %v8949_v29, %v4649_v47 }
 0xf12   :  { %14419 = vst [vmem:[#allocation113_spill] sm:$0xff] %v12754_v38 }
 0xf13   :  { %v12756_v19 = vpop.f32.mrf.mxu0 }
 0xf14   :  { %14420 = vst [vmem:[#allocation114_spill] sm:$0xff] %v12756_v19  ;;  %v4647_v19 = vpop.permute.xlu1 %4646  ;;  %v4653_v49 = vpop.permute.xlu0 %4652 }
 0xf18   :  { %v4651_v2 = vpop.permute.xlu1 %4650 }
 0xf3f   :  { %v10365_v63 = vpop.f32.mrf.mxu0 }
 0xf40   :  { %v4778_v43 = vadd.f32 %v10365_v63, %v4663_v37  ;;  %v4666_v63 = vadd.f32 %v8949_v29, %v4647_v19 }
 0xf41   :  { %v4738_v24 = vpop.f32.mrf.mxu0 }
 0xf42   :  { %v4777_v10 = vadd.f32 %v4738_v24, %v4662_v54 }
 0xf43   :  { %v10368_v33 = vpop.f32.mrf.mxu0 }
 0xf44   :  { %v4780_v34 = vadd.f32 %v10368_v33, %v4665_v51  ;;  %v4669_v51 = vadd.f32 %v8949_v29, %v4653_v49 }
 0xf45   :  { %v4748_v56 = vpop.f32.mrf.mxu0 }
 0xf46   :  { %v4779_v15 = vadd.f32 %v4748_v56, %v4664_v18 }
 0xf47   :  { %v10371_v58 = vpop.f32.mrf.mxu0 }
 0xf48   :  { %v4782_v24 = vadd.f32 %v10371_v58, %v4667_v50 }
 0xf49   :  { %v4758_v42 = vpop.f32.mrf.mxu0 }
 0xf4b   :  { %v10374_v45 = vpop.f32.mrf.mxu0 }
 0xf4c   :  { %v4784_v50 = vadd.f32 %v10374_v45, %v4669_v51 }
 0xfb2   :  { %v10393_v38 = vpop.f32.mrf.mxu1 }
 0xfb3   :  { %v4916_v21 = vadd.f32 %v10393_v38, %v4778_v43 }
 0xfb4   :  { %v4876_v30 = vpop.f32.mrf.mxu1 }
 0xfb5   :  { %v4915_v61 = vadd.f32 %v4876_v30, %v4777_v10  ;;  %v12761_v62 = vmax.f32 %v4916_v21, 0.0  ;;  %v4781_v30 = vadd.f32 %v4758_v42, %v4666_v63  ;;  %v4768_v10 = vpop.f32.mrf.mxu0 }
 0xfb6   :  { %v10396_v57 = vpop.f32.mrf.mxu1 }
 0xfb7   :  { %v12763_v44 = vmax.f32 %v4915_v61, 0.0  ;;  %v4918_v37 = vadd.f32 %v10396_v57, %v4780_v34  ;;  %v4937_v18 = vsel %vm578_vm9, %v12761_v62, 0.0  ;;  %v4668_v57 = vadd.f32 %v8949_v29, %v4651_v2 }
 0xfb8   :  { %v4886_v52 = vpop.f32.mrf.mxu1 }
 0xfb9   :  { %v4936_v54 = vsel %vm578_vm9, %v12763_v44, 0.0  ;;  %v4917_v43 = vadd.f32 %v4886_v52, %v4779_v15  ;;  %v12769_v21 = vmax.f32 %v4918_v37, 0.0  ;;  %v4783_v49 = vadd.f32 %v4768_v10, %v4668_v57 }
 0xfba   :  { %v10399_v47 = vpop.f32.mrf.mxu1  ;;  %v4938_v56 = vadd.f32 %v4937_v18, %v4936_v54 }
 0xfbb   :  { %v12771_v61 = vmax.f32 %v4917_v43, 0.0  ;;  %v4920_v34 = vadd.f32 %v10399_v47, %v4782_v24  ;;  %v4941_v38 = vsel %vm578_vm9, %v12769_v21, 0.0  ;;  %v4958_v43 = vsel %vm578_vm9, %v12763_v44, -inf }
 0xfbc   :  { %v4896_v33 = vpop.f32.mrf.mxu1 }
 0xfbd   :  { %v4939_v12 = vsel %vm578_vm9, %v12771_v61, 0.0  ;;  %v4919_v15 = vadd.f32 %v4896_v33, %v4781_v30  ;;  %v12777_v58 = vmax.f32 %v4920_v34, 0.0  ;;  %v4959_v34 = vsel %vm578_vm9, %v12761_v62, -inf }
 0xfbe   :  { %v4940_v42 = vadd.f32 %v4939_v12, %v4938_v56  ;;  %v10402_v19 = vpop.f32.mrf.mxu1  ;;  %v4961_v33 = vsel %vm578_vm9, %v12769_v21, -inf }
 0xfbf   :  { %v12779_v37 = vmax.f32 %v4919_v15, 0.0  ;;  %v4922_v63 = vadd.f32 %v10402_v19, %v4784_v50  ;;  %v4945_v30 = vsel %vm578_vm9, %v12777_v58, 0.0  ;;  %v4964_v47 = vsel %vm578_vm9, %v12777_v58, -inf }
 0xfc0   :  { %v4942_v52 = vadd.f32 %v4941_v38, %v4940_v42  ;;  %v4906_v29 = vpop.f32.mrf.mxu1  ;;  %v4960_v50 = vsel %vm578_vm9, %v12771_v61, -inf }
 0xfc1   :  { %v4943_v45 = vsel %vm578_vm9, %v12779_v37, 0.0  ;;  %v4962_v2 = vsel %vm578_vm9, %v12779_v37, -inf  ;;  %v12785_v24 = vmax.f32 %v4922_v63, 0.0  ;;  %v4921_v54 = vadd.f32 %v4906_v29, %v4783_v49 }
 0xfc2   :  { %v4944_v51 = vadd.f32 %v4943_v45, %v4942_v52  ;;  %v4963_v57 = vmax.f32 %v4958_v43, %v4962_v2  ;;  %v4965_v49 = vmax.f32 %v4959_v34, %v4964_v47 }
 0xfc3   :  { %v4968_v10 = vsel %vm592_vm10, %v12785_v24, -inf  ;;  %v12795_v18 = vmax.f32 %v4921_v54, 0.0  ;;  %v4949_v63 = vsel %vm592_vm10, %v12785_v24, 0.0 }
 0xfc4   :  { %v4946_v56 = vadd.f32 %v4945_v30, %v4944_v51  ;;  %v4969_v42 = vmax.f32 %v4961_v33, %v4968_v10  ;;  %v4970_v52 = vmax.f32 %v4963_v57, %v4965_v49 }
 0xfc5   :  { %v4947_v12 = vsel %vm578_vm9, %v12795_v18, 0.0  ;;  %v4966_v15 = vsel %vm578_vm9, %v12795_v18, -inf }
 0xfc6   :  { %v4948_v19 = vadd.f32 %v4947_v12, %v4946_v56  ;;  %v4967_v38 = vmax.f32 %v4960_v50, %v4966_v15 }
 0xfc8   :  { %v4950_v29 = vadd.f32 %v4949_v63, %v4948_v19  ;;  %v4971_v45 = vmax.f32 %v4967_v38, %v4969_v42 }
 0xfca   :  { %v4951_v2 = vrot.slane %v4950_v29, 4  ;;  %v4972_v54 = vmax.f32 %v4970_v52, %v4971_v45 }
 0xfcc   :  { %v4952_v43 = vadd.f32 %v4951_v2, %v4950_v29  ;;  %v4973_v51 = vrot.slane %v4972_v54, 4 }
 0xfce   :  { %v4953_v30 = vrot.slane %v4952_v43, 2  ;;  %v4974_v27 = vmax.f32 %v4972_v54, %v4973_v51 }
 0xfd0   :  { %v4954_v46 = vadd.f32 %v4953_v30, %v4952_v43  ;;  %v4975_v0 = vrot.slane %v4974_v27, 2  ;;  %v5293_v30 = vld [vmem:[%s14086_s5] sm:$0x3] }
 0xfd2   :  { %v4955_v13 = vrot.slane %v4954_v46, 1  ;;  %v4976_v10 = vmax.f32 %v4974_v27, %v4975_v0 }
 0xfd4   :  { %v4956_v3 = vadd.f32 %v4955_v13, %v4954_v46  ;;  %v4977_v34 = vrot.slane %v4976_v10, 1 }
 0xfd6   :  { %v4957_v47 = vmul.f32 0.016666668, %v4956_v3  ;;  %v4978_v3 = vmax.f32 %v4976_v10, %v4977_v34 }
 0xfd8   :  { %10412 = vmatmul.mubr.msk.f32.vlgmr.msra.gmra.mxu0 %vm578_vm9, %v4957_v47 }
 0xfd9   :  { %10415 = vmatpush3.msra.mxu0 %v12688_v28  ;;  %10422 = vmatprep.mubr.msk.f32.mxu0 %vm11080_vm8, %v14283_v5 }
 0xfda   :  { %10416 = vmatprep.subr.mxu0 %v14283_v5 }
 0xfdb   :  { %10417 = vmatpush3.msra.mxu0 %v12697_v17 }
 0xfdc   :  { %10418 = vmatprep.subr.mxu0 %v14283_v5 }
 0xfdd   :  { %10419 = vmatpush3.msra.mxu0 %v12704_v26 }
 0xfde   :  { %10420 = vmatprep.subr.mxu0 %v14283_v5 }
 0xfdf   :  { %10421 = vmatpush3.msra.mxu0 %v12710_v22 }
 0xfe0   :  { %10423 = vmatmul.mubr.msk.f32.vlgmr.msra.gmra.mxu0 %vm578_vm9, %v4978_v3  ;;  %10425 = vmatprep.subr.mxu0 %v14283_v5 }
 0xfe1   :  { %10426 = vmatpush3.msk.msra.mxu0 %vm776_vm11, %v12724_v25  ;;  %10427 = vmatprep.mubr.msk.f32.mxu0 %vm11080_vm8, %v14283_v5 }
 0xfe2   :  { %10435 = vmatprep.subr.msk.mxu0 %vm776_vm11, %v5293_v30 }
0x1098   :  { %v5048_v0 = vpop.f32.mrf.mxu0 }
0x1099   :  { %v5052_v13 = vmax.f32 %v5048_v0, 0.0 }
0x109a   :  { %v10413_v27 = vpop.f32.mrf.mxu0 }
0x109b   :  { %10433 = vmatmul.mubr.msk.f32.vlgmr.msra.gmra.mxu1 %vm772_vm12, %v5052_v13 }
0x109c   :  { %10465 = vmatprep.mubr.msk.f32.mxu1 %vm230_vm3, %v14323_v4 }
0x10a0   :  { %v5122_v46 = vpop.f32.mrf.mxu0 }
0x10a1   :  { %v5126_v26 = vmax.f32 %v5122_v46, 0.0 }
0x10a2   :  { %v10424_v22 = vpop.f32.mrf.mxu0 }
0x10a3   :  { %10428 = vmatmul.mubr.msk.f32.vlgmr.msra.gmra.mxu0 %vm772_vm12, %v5126_v26 }
0x10a4   :  { %10436 = vmatpush3.msk.msra.mxu0 %vm776_vm11, %v5293_v30 }
0x115b   :  { %v5272_v28 = vpop.f32.mrf.mxu1 }
0x115d   :  { %v10434_v17 = vpop.f32.mrf.mxu1 }
0x1163   :  { %v5199_v57 = vpop.f32.mrf.mxu0 }
0x1164   :  { %v5273_v25 = vadd.f32 %v5272_v28, %v5199_v57 }
0x1165   :  { %v10429_v56 = vpop.f32.mrf.mxu0 }
0x1166   :  { %v5276_v33 = vsub.f32 0.0, %v5273_v25 }
0x1168   :  { %v5277_v50 = vmul.f32 1.442695, %v5276_v33 }
0x116a   :  { %10973 = vpow2.f32 %v5277_v50 }
0x1177   :  { %v10974_v12 = vpop.eup %10973 }
0x1178   :  { %v5279_v15 = vadd.f32 1.0, %v10974_v12 }
0x117a   :  { %10975 = vrcp.f32 %v5279_v15 }
0x1187   :  { %v10976_v49 = vpop.eup %10975 }
0x1188   :  { %v5284_v42 = vrot.slane %v10976_v49, %v14324_v39 }
0x118a   :  { %v12831_v19 = vmul.f32 %v5284_v42, %v12761_v62  ;;  %v12834_v38 = vmul.f32 %v5284_v42, %v12763_v44  ;;  %v12845_v62 = vmul.f32 %v5284_v42, %v12771_v61  ;;  %v12848_v44 = vmul.f32 %v5284_v42, %v12769_v21 }
0x118b   :  { %v12859_v51 = vmul.f32 %v5284_v42, %v12779_v37  ;;  %v12862_v21 = vmul.f32 %v5284_v42, %v12777_v58  ;;  %v12878_v34 = vmul.f32 %v5284_v42, %v12795_v18  ;;  %v12881_v3 = vmul.f32 %v5284_v42, %v12785_v24 }
0x118c   :  { %v5297_v63 = vsel %vm578_vm9, %v12831_v19, 0.0  ;;  %v5294_v52 = vsel %vm578_vm9, %v12834_v38, 0.0  ;;  %v5326_v29 = vsel %vm578_vm9, %v12834_v38, -inf  ;;  %v5329_v45 = vsel %vm578_vm9, %v12831_v19, -inf }
0x118d   :  { %5298 = vadd.xlane.f32.xlu0 %v5297_v63  ;;  %5295 = vadd.xlane.f32.xlu1 %v5294_v52  ;;  %v5300_v2 = vsel %vm578_vm9, %v12845_v62, 0.0  ;;  %v5303_v54 = vsel %vm578_vm9, %v12848_v44, 0.0  ;;  %v5332_v43 = vsel %vm578_vm9, %v12845_v62, -inf  ;;  %v5335_v61 = vsel %vm578_vm9, %v12848_v44, -inf  ;;  %14421 = vst [vmem:[#allocation115_spill] sm:$0xff] %v12878_v34 }
0x118e   :  { %v5306_v47 = vsel %vm578_vm9, %v12859_v51, 0.0  ;;  %v5309_v10 = vsel %vm578_vm9, %v12862_v21, 0.0  ;;  %v5338_v58 = vsel %vm578_vm9, %v12859_v51, -inf  ;;  %v5341_v37 = vsel %vm578_vm9, %v12862_v21, -inf }
0x118f   :  { %v5312_v0 = vsel %vm578_vm9, %v12878_v34, 0.0  ;;  %v5315_v13 = vsel %vm592_vm10, %v12881_v3, 0.0  ;;  %v5344_v27 = vsel %vm578_vm9, %v12878_v34, -inf  ;;  %v5347_v18 = vsel %vm592_vm10, %v12881_v3, -inf }
0x1191   :  { %5327 = vmax.xlane.f32.xlu0 %v5326_v29  ;;  %5330 = vmax.xlane.f32.xlu1 %v5329_v45 }
0x1195   :  { %5301 = vadd.xlane.f32.xlu0 %v5300_v2  ;;  %5304 = vadd.xlane.f32.xlu1 %v5303_v54 }
0x1199   :  { %5333 = vmax.xlane.f32.xlu0 %v5332_v43  ;;  %5336 = vmax.xlane.f32.xlu1 %v5335_v61 }
0x119d   :  { %5307 = vadd.xlane.f32.xlu0 %v5306_v47  ;;  %5310 = vadd.xlane.f32.xlu1 %v5309_v10 }
0x11a1   :  { %5339 = vmax.xlane.f32.xlu0 %v5338_v58  ;;  %5342 = vmax.xlane.f32.xlu1 %v5341_v37 }
0x11a5   :  { %5313 = vadd.xlane.f32.xlu0 %v5312_v0  ;;  %5316 = vadd.xlane.f32.xlu1 %v5315_v13 }
0x11a9   :  { %5345 = vmax.xlane.f32.xlu0 %v5344_v27  ;;  %5348 = vmax.xlane.f32.xlu1 %v5347_v18 }
0x1216   :  { %v5299_v24 = vpop.xlane.xlu0 %5298  ;;  %v5296_v46 = vpop.xlane.xlu1 %5295 }
0x1217   :  { %v5319_v26 = vmul.f32 0.03125, %v5299_v24  ;;  %v5318_v22 = vmul.f32 0.03125, %v5296_v46 }
0x121a   :  { %v5328_v28 = vpop.xlane.xlu0 %5327  ;;  %v5331_v17 = vpop.xlane.xlu1 %5330 }
0x121b   :  { %v5350_v57 = vsel %vm998_vm13, %v5318_v22, %v5328_v28  ;;  %v5351_v25 = vsel %vm998_vm13, %v5319_v26, %v5331_v17 }
0x121c   :  { %10437 = vmatprep.mubr.msk.f32.mxu0 %vm772_vm12, %v5350_v57 }
0x121d   :  { %10438 = vmatmul.mubr.msk.f32.vlgmr.msra.gmra.mxu0 %vm772_vm12, %v5351_v25 }
0x121e   :  { %v5302_v56 = vpop.xlane.xlu0 %5301  ;;  %v5305_v33 = vpop.xlane.xlu1 %5304 }
0x121f   :  { %v5320_v50 = vmul.f32 0.03125, %v5302_v56  ;;  %v5321_v12 = vmul.f32 0.03125, %v5305_v33 }
0x1222   :  { %v5334_v15 = vpop.xlane.xlu0 %5333  ;;  %v5337_v49 = vpop.xlane.xlu1 %5336 }
0x1223   :  { %v5352_v42 = vsel %vm998_vm13, %v5320_v50, %v5334_v15  ;;  %v5353_v63 = vsel %vm998_vm13, %v5321_v12, %v5337_v49 }
0x1224   :  { %10440 = vmatprep.mubr.msk.f32.mxu0 %vm772_vm12, %v5352_v42 }
0x1225   :  { %10441 = vmatmul.mubr.msk.f32.gmra.mxu0 %vm772_vm12, %v5353_v63 }
0x1226   :  { %v5308_v52 = vpop.xlane.xlu0 %5307  ;;  %v5311_v29 = vpop.xlane.xlu1 %5310 }
0x1227   :  { %v5322_v45 = vmul.f32 0.03125, %v5308_v52  ;;  %v5323_v2 = vmul.f32 0.03125, %v5311_v29 }
0x122a   :  { %v5340_v54 = vpop.xlane.xlu0 %5339  ;;  %v5343_v43 = vpop.xlane.xlu1 %5342 }
0x122b   :  { %v5354_v61 = vsel %vm998_vm13, %v5322_v45, %v5340_v54  ;;  %v5355_v30 = vsel %vm998_vm13, %v5323_v2, %v5343_v43 }
0x122c   :  { %10443 = vmatprep.mubr.msk.f32.mxu0 %vm772_vm12, %v5354_v61 }
0x122d   :  { %10444 = vmatmul.mubr.msk.f32.gmra.mxu0 %vm772_vm12, %v5355_v30 }
0x122e   :  { %v5314_v47 = vpop.xlane.xlu0 %5313  ;;  %v5317_v10 = vpop.xlane.xlu1 %5316 }
0x122f   :  { %v5324_v58 = vmul.f32 0.03125, %v5314_v47  ;;  %v5325_v37 = vmul.f32 0.03125, %v5317_v10 }
0x1232   :  { %v5346_v0 = vpop.xlane.xlu0 %5345  ;;  %v5349_v13 = vpop.xlane.xlu1 %5348 }
0x1233   :  { %v5356_v27 = vsel %vm998_vm13, %v5324_v58, %v5346_v0  ;;  %v5357_v18 = vsel %vm998_vm13, %v5325_v37, %v5349_v13 }
0x1234   :  { %10446 = vmatprep.mubr.msk.f32.mxu0 %vm772_vm12, %v5356_v27 }
0x1235   :  { %10447 = vmatmul.mubr.msk.f32.gmra.mxu0 %vm772_vm12, %v5357_v18 }
0x1236   :  { %10493 = vmatprep.mubr.msk.f32.mxu0 %vm230_vm3, %v14333_v53 }
0x12dd   :  { %v12909_v24 = vpop.f32.mrf.mxu0 }
0x12de   :  { %5647 = vrot.lane.b32.xlu1 %v12909_v24, %s11081_s13 }
0x12df   :  { %v12913_v46 = vpop.f32.mrf.mxu0 }
0x12e0   :  { %5645 = vrot.lane.b32.xlu0 %v12913_v46, %s11081_s13 }
0x12e5   :  { %v12917_v26 = vpop.f32.mrf.mxu0 }
0x12e6   :  { %5821 = vrot.lane.b32.xlu0 %v12917_v26, %s11082_s14  ;;  %5651 = vrot.lane.b32.xlu1 %v12917_v26, %s11081_s13 }
0x12e7   :  { %v12923_v22 = vpop.f32.mrf.mxu0 }
0x12ea   :  { %5991 = vrot.lane.b32.xlu1 %v12917_v26, %s11083_s15  ;;  %5649 = vrot.lane.b32.xlu0 %v12923_v22, %s11081_s13 }
0x12ed   :  { %v12929_v28 = vpop.f32.mrf.mxu0 }
0x12ee   :  { %5819 = vrot.lane.b32.xlu0 %v12923_v22, %s11082_s14  ;;  %5655 = vrot.lane.b32.xlu1 %v12929_v28, %s11081_s13 }
0x12ef   :  { %v12939_v17 = vpop.f32.mrf.mxu0 }
0x12f2   :  { %5825 = vrot.lane.b32.xlu0 %v12929_v28, %s11082_s14  ;;  %5995 = vrot.lane.b32.xlu1 %v12929_v28, %s11083_s15 }
0x12f5   :  { %v12941_v57 = vpop.f32.mrf.mxu0 }
0x12f6   :  { %5993 = vrot.lane.b32.xlu1 %v12939_v17, %s11083_s15  ;;  %5653 = vrot.lane.b32.xlu0 %v12939_v17, %s11081_s13 }
0x12f7   :  { %10449 = vmatprep.subr.msk.mxu1 %vm255_vm4, %v12941_v57  ;;  %v12949_v25 = vpop.f32.mrf.mxu0 }
0x12f8   :  { %10450 = vmatpush3.msk.msra.mxu1 %vm255_vm4, %v12941_v57 }
0x12f9   :  { %10451 = vmatprep.subr.mxu1 %v12949_v25 }
0x12fa   :  { %10452 = vmatpush3.msra.mxu1 %v12949_v25  ;;  %5823 = vrot.lane.b32.xlu0 %v12939_v17, %s11082_s14 }
0x12fb   :  { %5829 = vrot.lane.b32.xlu1 %v12941_v57, %s11082_s14  ;;  %10453 = vmatprep.subr.mxu1 %v12929_v28 }
0x12fc   :  { %10454 = vmatpush3.msra.mxu1 %v12929_v28 }
0x12fd   :  { %10455 = vmatprep.subr.mxu1 %v12939_v17 }
0x12fe   :  { %10456 = vmatpush3.msra.mxu1 %v12939_v17  ;;  %5659 = vrot.lane.b32.xlu0 %v12941_v57, %s11081_s13 }
0x12ff   :  { %5999 = vrot.lane.b32.xlu1 %v12941_v57, %s11083_s15  ;;  %10457 = vmatprep.subr.mxu1 %v12917_v26 }
0x1300   :  { %10458 = vmatpush3.msra.mxu1 %v12917_v26 }
0x1301   :  { %10459 = vmatprep.subr.mxu1 %v12923_v22 }
0x1302   :  { %10460 = vmatpush3.msra.mxu1 %v12923_v22  ;;  %5817 = vrot.lane.b32.xlu0 %v12909_v24, %s11082_s14 }
0x1303   :  { %5657 = vrot.lane.b32.xlu1 %v12949_v25, %s11081_s13  ;;  %10461 = vmatprep.subr.mxu1 %v12909_v24 }
0x1304   :  { %10462 = vmatpush3.msra.mxu1 %v12909_v24 }
0x1305   :  { %10463 = vmatprep.subr.mxu1 %v12913_v46 }
0x1306   :  { %10464 = vmatpush3.msra.mxu1 %v12913_v46  ;;  %5815 = vrot.lane.b32.xlu0 %v12913_v46, %s11082_s14 }
0x1307   :  { %5989 = vrot.lane.b32.xlu1 %v12923_v22, %s11083_s15  ;;  %10466 = vmatmul.mubr.msk.f32.vlgmr.msra.gmra.mxu1 %vm230_vm3, %v14342_v14 }
0x1308   :  { %10468 = vmatprep.mubr.msk.f32.mxu1 %vm230_vm3, %v14343_v16 }
0x130a   :  { %5985 = vrot.lane.b32.xlu0 %v12913_v46, %s11083_s15 }
0x130b   :  { %5987 = vrot.lane.b32.xlu1 %v12909_v24, %s11083_s15  ;;  %10469 = vmatmul.mubr.msk.f32.gmra.mxu1 %vm230_vm3, %v14344_v23 }
0x130c   :  { %10471 = vmatprep.mubr.msk.f32.mxu1 %vm230_vm3, %v14345_v8 }
0x130e   :  { %5827 = vrot.lane.b32.xlu0 %v12949_v25, %s11082_s14 }
0x130f   :  { %6169 = vrot.lane.b32.xlu1 %v12941_v57, %s11084_s18  ;;  %10472 = vmatmul.mubr.msk.f32.gmra.mxu1 %vm230_vm3, %v14346_v55 }
0x1310   :  { %10474 = vmatprep.mubr.msk.f32.mxu1 %vm230_vm3, %v14347_v1 }
0x1312   :  { %6165 = vrot.lane.b32.xlu0 %v12929_v28, %s11084_s18 }
0x1313   :  { %5997 = vrot.lane.b32.xlu1 %v12949_v25, %s11083_s15  ;;  %10475 = vmatmul.mubr.msk.f32.gmra.mxu1 %vm230_vm3, %v14348_v11 }
0x1314   :  { %10521 = vmatprep.mubr.msk.f32.mxu1 %vm230_vm3, %v14349_v59 }
0x1316   :  { %6163 = vrot.lane.b32.xlu0 %v12939_v17, %s11084_s18 }
0x1317   :  { %6339 = vrot.lane.b32.xlu1 %v12941_v57, %s11085_s19 }
0x131a   :  { %6161 = vrot.lane.b32.xlu0 %v12917_v26, %s11084_s18 }
0x131b   :  { %6335 = vrot.lane.b32.xlu1 %v12929_v28, %s11085_s19 }
0x131e   :  { %6167 = vrot.lane.b32.xlu0 %v12949_v25, %s11084_s18 }
0x131f   :  { %6333 = vrot.lane.b32.xlu1 %v12939_v17, %s11085_s19 }
0x1322   :  { %6159 = vrot.lane.b32.xlu0 %v12923_v22, %s11084_s18 }
0x1323   :  { %6337 = vrot.lane.b32.xlu1 %v12949_v25, %s11085_s19 }
0x1326   :  { %6157 = vrot.lane.b32.xlu0 %v12909_v24, %s11084_s18 }
0x1327   :  { %6331 = vrot.lane.b32.xlu1 %v12917_v26, %s11085_s19 }
0x132a   :  { %6155 = vrot.lane.b32.xlu0 %v12913_v46, %s11084_s18 }
0x132b   :  { %6329 = vrot.lane.b32.xlu1 %v12923_v22, %s11085_s19 }
0x132e   :  { %6325 = vrot.lane.b32.xlu0 %v12913_v46, %s11085_s19 }
0x132f   :  { %6327 = vrot.lane.b32.xlu1 %v12909_v24, %s11085_s19 }
0x1350   :  { %v5648_v56 = vpop.permute.xlu1 %5647 }
0x1352   :  { %v5646_v33 = vpop.permute.xlu0 %5645 }
0x1358   :  { %v5822_v50 = vpop.permute.xlu0 %5821  ;;  %v5652_v12 = vpop.permute.xlu1 %5651 }
0x135c   :  { %v13039_v15 = vpop.permute.xlu1 %5991  ;;  %v5650_v49 = vpop.permute.xlu0 %5649 }
0x1360   :  { %v5820_v42 = vpop.permute.xlu0 %5819  ;;  %v5656_v63 = vpop.permute.xlu1 %5655 }
0x1364   :  { %v5826_v52 = vpop.permute.xlu0 %5825  ;;  %v5996_v29 = vpop.permute.xlu1 %5995 }
0x1368   :  { %v5994_v45 = vpop.permute.xlu1 %5993  ;;  %v5654_v2 = vpop.permute.xlu0 %5653 }
0x136c   :  { %v5824_v54 = vpop.permute.xlu0 %5823 }
0x136d   :  { %v5830_v43 = vpop.permute.xlu1 %5829 }
0x136e   :  { %10505 = vmatprep.subr.msk.mxu1 %vm255_vm4, %v5830_v43 }
0x136f   :  { %10506 = vmatpush3.msk.msra.mxu1 %vm255_vm4, %v5830_v43 }
0x1370   :  { %v5660_v61 = vpop.permute.xlu0 %5659 }
0x1371   :  { %v6000_v30 = vpop.permute.xlu1 %5999  ;;  %10477 = vmatprep.subr.msk.mxu0 %vm255_vm4, %v5660_v61 }
0x1372   :  { %10478 = vmatpush3.msk.msra.mxu0 %vm255_vm4, %v5660_v61  ;;  %v14422_v61 = vld [vmem:[#allocation7_spill] sm:$0xff] }
0x1374   :  { %v5818_v47 = vpop.permute.xlu0 %5817 }
0x1375   :  { %v5658_v10 = vpop.permute.xlu1 %5657 }
0x1376   :  { %10479 = vmatprep.subr.mxu0 %v5658_v10 }
0x1377   :  { %10480 = vmatpush3.msra.mxu0 %v5658_v10  ;;  %v14424_v10 = vld [vmem:[#allocation9_spill] sm:$0xff] }
0x1378   :  { %10481 = vmatprep.subr.mxu0 %v5656_v63  ;;  %v5816_v58 = vpop.permute.xlu0 %5815 }
0x1379   :  { %10482 = vmatpush3.msra.mxu0 %v5656_v63  ;;  %v5990_v37 = vpop.permute.xlu1 %5989 }
0x137a   :  { %10483 = vmatprep.subr.mxu0 %v5654_v2 }
0x137b   :  { %10484 = vmatpush3.msra.mxu0 %v5654_v2 }
0x137c   :  { %10485 = vmatprep.subr.mxu0 %v5652_v12  ;;  %v5986_v0 = vpop.permute.xlu0 %5985 }
0x137d   :  { %10486 = vmatpush3.msra.mxu0 %v5652_v12  ;;  %v5988_v13 = vpop.permute.xlu1 %5987 }
0x137e   :  { %10487 = vmatprep.subr.mxu0 %v5650_v49 }
0x137f   :  { %10488 = vmatpush3.msra.mxu0 %v5650_v49 }
0x1380   :  { %10489 = vmatprep.subr.mxu0 %v5648_v56  ;;  %v5828_v27 = vpop.permute.xlu0 %5827 }
0x1381   :  { %10490 = vmatpush3.msra.mxu0 %v5648_v56  ;;  %v6170_v18 = vpop.permute.xlu1 %6169  ;;  %10507 = vmatprep.subr.mxu1 %v5828_v27 }
0x1382   :  { %10491 = vmatprep.subr.mxu0 %v5646_v33  ;;  %10508 = vmatpush3.msra.mxu1 %v5828_v27  ;;  %v14428_v27 = vld [vmem:[#allocation13_spill] sm:$0xff] }
0x1383   :  { %10492 = vmatpush3.msra.mxu0 %v5646_v33  ;;  %10509 = vmatprep.subr.mxu1 %v5826_v52 }
0x1384   :  { %10494 = vmatmul.mubr.msk.f32.vlgmr.msra.gmra.mxu0 %vm230_vm3, %v14358_v9  ;;  %10533 = vmatprep.subr.msk.mxu0 %vm255_vm4, %v6000_v30  ;;  %v6166_v63 = vpop.permute.xlu0 %6165 }
0x1385   :  { %10534 = vmatpush3.msk.msra.mxu0 %vm255_vm4, %v6000_v30  ;;  %v5998_v12 = vpop.permute.xlu1 %5997  ;;  %10510 = vmatpush3.msra.mxu1 %v5826_v52  ;;  %v14423_v30 = vld [vmem:[#allocation8_spill] sm:$0xff] }
0x1386   :  { %10511 = vmatprep.subr.mxu1 %v5824_v54  ;;  %10535 = vmatprep.subr.mxu0 %v5998_v12 }
0x1387   :  { %10512 = vmatpush3.msra.mxu1 %v5824_v54  ;;  %10536 = vmatpush3.msra.mxu0 %v5998_v12  ;;  %v14431_v12 = vld [vmem:[#allocation39_spill] sm:$0xff] }
0x1388   :  { %10496 = vmatprep.mubr.msk.f32.mxu0 %vm230_vm3, %v14359_v36  ;;  %10513 = vmatprep.subr.mxu1 %v5822_v50  ;;  %v6164_v56 = vpop.permute.xlu0 %6163 }
0x1389   :  { %10537 = vmatprep.subr.mxu0 %v5996_v29  ;;  %10497 = vmatmul.mubr.msk.f32.gmra.mxu0 %vm230_vm3, %v14360_v32  ;;  %v6340_v33 = vpop.permute.xlu1 %6339 }
0x138a   :  { %10538 = vmatpush3.msra.mxu0 %v5996_v29  ;;  %10514 = vmatpush3.msra.mxu1 %v5822_v50 }
0x138b   :  { %10515 = vmatprep.subr.mxu1 %v5820_v42  ;;  %10539 = vmatprep.subr.mxu0 %v5994_v45 }
0x138c   :  { %10516 = vmatpush3.msra.mxu1 %v5820_v42  ;;  %10540 = vmatpush3.msra.mxu0 %v5994_v45  ;;  %v6162_v49 = vpop.permute.xlu0 %6161 }
0x138d   :  { %10499 = vmatprep.mubr.msk.f32.mxu0 %vm230_vm3, %v14361_v35  ;;  %10517 = vmatprep.subr.mxu1 %v5818_v47  ;;  %v6336_v52 = vpop.permute.xlu1 %6335 }
0x138e   :  { %10541 = vmatprep.subr.mxu0 %v13039_v15  ;;  %10500 = vmatmul.mubr.msk.f32.gmra.mxu0 %vm230_vm3, %v14362_v60 }
0x138f   :  { %10542 = vmatpush3.msra.mxu0 %v13039_v15  ;;  %10518 = vmatpush3.msra.mxu1 %v5818_v47 }
0x1390   :  { %10519 = vmatprep.subr.mxu1 %v5816_v58  ;;  %10543 = vmatprep.subr.mxu0 %v5990_v37  ;;  %v6168_v50 = vpop.permute.xlu0 %6167 }
0x1391   :  { %10520 = vmatpush3.msra.mxu1 %v5816_v58  ;;  %10544 = vmatpush3.msra.mxu0 %v5990_v37  ;;  %v6334_v42 = vpop.permute.xlu1 %6333  ;;  %v14425_v58 = vld [vmem:[#allocation12_spill] sm:$0xff] }
0x1392   :  { %10502 = vmatprep.mubr.msk.f32.mxu0 %vm230_vm3, %v14363_v7  ;;  %10522 = vmatmul.mubr.msk.f32.vlgmr.msra.gmra.mxu1 %vm230_vm3, %v11264_v40 }
0x1393   :  { %10545 = vmatprep.subr.mxu0 %v5988_v13  ;;  %10561 = vmatprep.subr.msk.mxu1 %vm255_vm4, %v6170_v18 }
0x1394   :  { %10503 = vmatmul.mubr.msk.f32.gmra.mxu0 %vm230_vm3, %v14364_v41  ;;  %10562 = vmatpush3.msk.msra.mxu1 %vm255_vm4, %v6170_v18  ;;  %v6160_v15 = vpop.permute.xlu0 %6159  ;;  %v14429_v18 = vld [vmem:[#allocation38_spill] sm:$0xff] }
0x1395   :  { %10546 = vmatpush3.msra.mxu0 %v5988_v13  ;;  %10563 = vmatprep.subr.mxu1 %v6168_v50  ;;  %v6338_v29 = vpop.permute.xlu1 %6337  ;;  %v14427_v13 = vld [vmem:[#allocation37_spill] sm:$0xff] }
0x1396   :  { %10547 = vmatprep.subr.mxu0 %v5986_v0  ;;  %10564 = vmatpush3.msra.mxu1 %v6168_v50  ;;  %v14436_v50 = vld [vmem:[#allocation17_spill] sm:$0xff] }
0x1397   :  { %10548 = vmatpush3.msra.mxu0 %v5986_v0  ;;  %10549 = vmatprep.mubr.msk.f32.mxu0 %vm230_vm3, %v14315_v31  ;;  %v14426_v0 = vld [vmem:[#allocation10_spill] sm:$0xff] }
0x1398   :  { %10565 = vmatprep.subr.mxu1 %v6166_v63  ;;  %10589 = vmatprep.subr.msk.mxu0 %vm255_vm4, %v6340_v33  ;;  %v6158_v2 = vpop.permute.xlu0 %6157 }
0x1399   :  { %10550 = vmatmul.mubr.msk.f32.vlgmr.msra.gmra.mxu0 %vm230_vm3, %v14316_v48  ;;  %10524 = vmatprep.mubr.msk.f32.mxu1 %vm230_vm3, %v14309_v6  ;;  %v6332_v45 = vpop.permute.xlu1 %6331 }
0x139a   :  { %10590 = vmatpush3.msk.msra.mxu0 %vm255_vm4, %v6340_v33  ;;  %10566 = vmatpush3.msra.mxu1 %v6166_v63  ;;  %v14430_v63 = vld [vmem:[#allocation14_spill] sm:$0xff]  ;;  %v14433_v33 = vld [vmem:[#allocation40_spill] sm:$0xff] }
0x139b   :  { %10525 = vmatmul.mubr.msk.f32.gmra.mxu1 %vm230_vm3, %v14310_v20  ;;  %10567 = vmatprep.subr.mxu1 %v6164_v56 }
0x139c   :  { %10591 = vmatprep.subr.mxu0 %v6338_v29  ;;  %10568 = vmatpush3.msra.mxu1 %v6164_v56  ;;  %v6156_v43 = vpop.permute.xlu0 %6155  ;;  %v14432_v56 = vld [vmem:[#allocation15_spill] sm:$0xff] }
0x139d   :  { %10592 = vmatpush3.msra.mxu0 %v6338_v29  ;;  %10569 = vmatprep.subr.mxu1 %v6162_v49  ;;  %v6330_v54 = vpop.permute.xlu1 %6329  ;;  %v14439_v29 = vld [vmem:[#allocation44_spill] sm:$0xff] }
0x139e   :  { %10593 = vmatprep.subr.mxu0 %v6336_v52  ;;  %10570 = vmatpush3.msra.mxu1 %v6162_v49  ;;  %v14434_v49 = vld [vmem:[#allocation16_spill] sm:$0xff] }
0x139f   :  { %10594 = vmatpush3.msra.mxu0 %v6336_v52  ;;  %10571 = vmatprep.subr.mxu1 %v6160_v15  ;;  %v14435_v52 = vld [vmem:[#allocation41_spill] sm:$0xff] }
0x13a0   :  { %10595 = vmatprep.subr.mxu0 %v6334_v42  ;;  %10572 = vmatpush3.msra.mxu1 %v6160_v15  ;;  %v6326_v37 = vpop.permute.xlu0 %6325  ;;  %v14438_v15 = vld [vmem:[#allocation42_spill] sm:$0xff] }
0x13a1   :  { %10596 = vmatpush3.msra.mxu0 %v6334_v42  ;;  %10573 = vmatprep.subr.mxu1 %v6158_v2  ;;  %v6328_v47 = vpop.permute.xlu1 %6327  ;;  %v14437_v42 = vld [vmem:[#allocation43_spill] sm:$0xff] }
0x13a2   :  { %10597 = vmatprep.subr.mxu0 %v6332_v45  ;;  %10527 = vmatprep.mubr.msk.f32.mxu1 %vm230_vm3, %v14422_v61 }
0x13a3   :  { %10598 = vmatpush3.msra.mxu0 %v6332_v45  ;;  %10574 = vmatpush3.msra.mxu1 %v6158_v2  ;;  %v14440_v45 = vld [vmem:[#allocation45_spill] sm:$0xff]  ;;  %v14441_v2 = vld [vmem:[#allocation46_spill] sm:$0xff] }
0x13a4   :  { %10528 = vmatmul.mubr.msk.f32.gmra.mxu1 %vm230_vm3, %v14423_v30  ;;  %10575 = vmatprep.subr.mxu1 %v6156_v43 }
0x13a5   :  { %10599 = vmatprep.subr.mxu0 %v6330_v54  ;;  %10576 = vmatpush3.msra.mxu1 %v6156_v43  ;;  %v14443_v43 = vmov 0  }
0x13a6   :  { %10600 = vmatpush3.msra.mxu0 %v6330_v54  ;;  %10530 = vmatprep.mubr.msk.f32.mxu1 %vm230_vm3, %v14424_v10  ;;  %v14442_v54 = vld [vmem:[#allocation47_spill] sm:$0xff] }
0x13a7   :  { %10601 = vmatprep.subr.mxu0 %v6328_v47  ;;  %10552 = vmatprep.mubr.msk.f32.mxu0 %vm230_vm3, %v14425_v58 }
0x13a8   :  { %10602 = vmatpush3.msra.mxu0 %v6328_v47  ;;  %10531 = vmatmul.mubr.msk.f32.gmra.mxu1 %vm230_vm3, %v14426_v0  ;;  %v14444_v47 = vld [vmem:[#allocation48_spill] sm:$0xff] }
0x13a9   :  { %10603 = vmatprep.subr.mxu0 %v6326_v37  ;;  %10577 = vmatprep.mubr.msk.f32.mxu1 %vm230_vm3, %v14427_v13 }
0x13aa   :  { %10604 = vmatpush3.msra.mxu0 %v6326_v37  ;;  %v14445_v37 = vld [vmem:[#allocation49_spill] sm:$0xff] }
0x13ab   :  { %10553 = vmatmul.mubr.msk.f32.gmra.mxu0 %vm230_vm3, %v14428_v27 }
0x13ac   :  { %10578 = vmatmul.mubr.msk.f32.vlgmr.msra.gmra.mxu1 %vm230_vm3, %v14429_v18  ;;  %10555 = vmatprep.mubr.msk.f32.mxu0 %vm230_vm3, %v14430_v63 }
0x13ad   :  { %10580 = vmatprep.mubr.msk.f32.mxu1 %vm230_vm3, %v14431_v12 }
0x13af   :  { %10556 = vmatmul.mubr.msk.f32.gmra.mxu0 %vm230_vm3, %v14432_v56 }
0x13b0   :  { %10581 = vmatmul.mubr.msk.f32.gmra.mxu1 %vm230_vm3, %v14433_v33  ;;  %10558 = vmatprep.mubr.msk.f32.mxu0 %vm230_vm3, %v14434_v49 }
0x13b1   :  { %10583 = vmatprep.mubr.msk.f32.mxu1 %vm230_vm3, %v14435_v52 }
0x13b3   :  { %10559 = vmatmul.mubr.msk.f32.gmra.mxu0 %vm230_vm3, %v14436_v50 }
0x13b4   :  { %10584 = vmatmul.mubr.msk.f32.gmra.mxu1 %vm230_vm3, %v14437_v42  ;;  %10605 = vmatprep.mubr.msk.f32.mxu0 %vm230_vm3, %v14438_v15  ;;  %v14446_v42 = vld [vmem:[#allocation50_spill] sm:$0xff] }
0x13b5   :  { %10586 = vmatprep.mubr.msk.f32.mxu1 %vm230_vm3, %v14439_v29  ;;  %v14447_v29 = vld [vmem:[#allocation51_spill] sm:$0xff] }
0x13b7   :  { %10606 = vmatmul.mubr.msk.f32.vlgmr.msra.gmra.mxu0 %vm230_vm3, %v14440_v45  ;;  %v14448_v45 = vld [vmem:[#allocation52_spill] sm:$0xff] }
0x13b8   :  { %10608 = vmatprep.mubr.msk.f32.mxu0 %vm230_vm3, %v14441_v2  ;;  %10587 = vmatmul.mubr.msk.f32.gmra.mxu1 %vm230_vm3, %v14442_v54 }
0x13b9   :  { %6656 = vmatprep.mubr.bf16.mxu1 %v14443_v43 }
0x13bb   :  { %10609 = vmatmul.mubr.msk.f32.gmra.mxu0 %vm230_vm3, %v14444_v47 }
0x13bc   :  { %10611 = vmatprep.mubr.msk.f32.mxu0 %vm230_vm3, %v14445_v37 }
0x13bf   :  { %10612 = vmatmul.mubr.msk.f32.gmra.mxu0 %vm230_vm3, %v14446_v42 }
0x13c0   :  { %10614 = vmatprep.mubr.msk.f32.mxu0 %vm230_vm3, %v14447_v29 }
0x13c3   :  { %10615 = vmatmul.mubr.msk.f32.gmra.mxu0 %vm230_vm3, %v14448_v45 }
0x13c4   :  { %10633 = vmatprep.mubr.msk.f32.mxu0 %vm230_vm3, %v14349_v59 }
0x13c7   :  { %v10467_v54 = vpop.f32.mrf.mxu1 }
0x13c8   :  { %5608 = vrot.lane.b32.xlu0 %v10467_v54, %s11086_s20 }
0x13c9   :  { %v5559_v2 = vpop.f32.mrf.mxu1 }
0x13ca   :  { %5606 = vrot.lane.b32.xlu1 %v5559_v2, %s11086_s20 }
0x13cb   :  { %v10470_v47 = vpop.f32.mrf.mxu1 }
0x13cc   :  { %5612 = vrot.lane.b32.xlu0 %v10470_v47, %s11086_s20 }
0x13cd   :  { %v5569_v37 = vpop.f32.mrf.mxu1 }
0x13ce   :  { %5610 = vrot.lane.b32.xlu1 %v5569_v37, %s11086_s20 }
0x13cf   :  { %v10473_v42 = vpop.f32.mrf.mxu1 }
0x13d0   :  { %5616 = vrot.lane.b32.xlu0 %v10473_v42, %s11086_s20 }
0x13d1   :  { %v5579_v29 = vpop.f32.mrf.mxu1 }
0x13d2   :  { %5614 = vrot.lane.b32.xlu1 %v5579_v29, %s11086_s20 }
0x13d3   :  { %v10476_v45 = vpop.f32.mrf.mxu1 }
0x13d4   :  { %5620 = vrot.lane.b32.xlu0 %v10476_v45, %s11086_s20 }
0x13d5   :  { %v5589_v15 = vpop.f32.mrf.mxu1 }
0x13d6   :  { %5618 = vrot.lane.b32.xlu1 %v5589_v15, %s11086_s20 }
0x1444   :  { %v10495_v54 = vpop.f32.mrf.mxu0 }
0x1445   :  { %5785 = vrot.lane.b32.xlu0 %v10495_v54, %s11086_s20 }
0x1446   :  { %v5736_v2 = vpop.f32.mrf.mxu0 }
0x1447   :  { %5783 = vrot.lane.b32.xlu1 %v5736_v2, %s11086_s20 }
0x1449   :  { %v10498_v37 = vpop.f32.mrf.mxu0 }
0x144b   :  { %v5746_v29 = vpop.f32.mrf.mxu0 }
0x144e   :  { %v10501_v45 = vpop.f32.mrf.mxu0 }
0x1450   :  { %v5756_v54 = vpop.f32.mrf.mxu0 }
0x1452   :  { %v10523_v47 = vpop.f32.mrf.mxu1 }
0x1453   :  { %5955 = vrot.lane.b32.xlu0 %v10523_v47, %s11086_s20 }
0x1454   :  { %v5906_v42 = vpop.f32.mrf.mxu1  ;;  %v10504_v2 = vpop.f32.mrf.mxu0 }
0x1455   :  { %5953 = vrot.lane.b32.xlu1 %v5906_v42, %s11086_s20 }
0x1456   :  { %v5766_v47 = vpop.f32.mrf.mxu0 }
0x1457   :  { %5789 = vrot.lane.b32.xlu0 %v10498_v37, %s11086_s20 }
0x1459   :  { %5787 = vrot.lane.b32.xlu1 %v5746_v29, %s11086_s20  ;;  %v10551_v33 = vpop.f32.mrf.mxu0 }
0x145b   :  { %v10526_v15 = vpop.f32.mrf.mxu1  ;;  %v6076_v12 = vpop.f32.mrf.mxu0 }
0x145c   :  { %5959 = vrot.lane.b32.xlu0 %v10526_v15, %s11086_s20 }
0x145d   :  { %v5916_v52 = vpop.f32.mrf.mxu1 }
0x145e   :  { %5957 = vrot.lane.b32.xlu1 %v5916_v52, %s11086_s20 }
0x1460   :  { %5793 = vrot.lane.b32.xlu0 %v10501_v45, %s11086_s20 }
0x1462   :  { %5791 = vrot.lane.b32.xlu1 %v5756_v54, %s11086_s20 }
0x1464   :  { %v10529_v42 = vpop.f32.mrf.mxu1 }
0x1465   :  { %5963 = vrot.lane.b32.xlu0 %v10529_v42, %s11086_s20 }
0x1466   :  { %v5926_v37 = vpop.f32.mrf.mxu1 }
0x1467   :  { %5961 = vrot.lane.b32.xlu1 %v5926_v37, %s11086_s20 }
0x1468   :  { %v10532_v29 = vpop.f32.mrf.mxu1 }
0x1469   :  { %5797 = vrot.lane.b32.xlu0 %v10504_v2, %s11086_s20 }
0x146a   :  { %v5936_v15 = vpop.f32.mrf.mxu1 }
0x146b   :  { %5795 = vrot.lane.b32.xlu1 %v5766_v47, %s11086_s20  ;;  %v10554_v52 = vpop.f32.mrf.mxu0 }
0x146c   :  { %v10579_v45 = vpop.f32.mrf.mxu1 }
0x146d   :  { %6125 = vrot.lane.b32.xlu0 %v10551_v33, %s11086_s20  ;;  %v6086_v54 = vpop.f32.mrf.mxu0 }
0x146e   :  { %v6246_v42 = vpop.f32.mrf.mxu1 }
0x146f   :  { %6123 = vrot.lane.b32.xlu1 %v6076_v12, %s11086_s20  ;;  %v10557_v18 = vpop.f32.mrf.mxu0 }
0x1470   :  { %v10582_v2 = vpop.f32.mrf.mxu1 }
0x1471   :  { %6295 = vrot.lane.b32.xlu0 %v10579_v45, %s11086_s20  ;;  %v6096_v37 = vpop.f32.mrf.mxu0 }
0x1472   :  { %v6256_v47 = vpop.f32.mrf.mxu1 }
0x1473   :  { %6293 = vrot.lane.b32.xlu1 %v6246_v42, %s11086_s20  ;;  %v10560_v33 = vpop.f32.mrf.mxu0 }
0x1474   :  { %v10585_v12 = vpop.f32.mrf.mxu1 }
0x1475   :  { %6129 = vrot.lane.b32.xlu0 %v10554_v52, %s11086_s20  ;;  %v6106_v45 = vpop.f32.mrf.mxu0 }
0x1476   :  { %v6266_v42 = vpop.f32.mrf.mxu1 }
0x1477   :  { %6127 = vrot.lane.b32.xlu1 %v6086_v54, %s11086_s20  ;;  %v10607_v52 = vpop.f32.mrf.mxu0 }
0x1479   :  { %6299 = vrot.lane.b32.xlu0 %v10582_v2, %s11086_s20  ;;  %v6416_v54 = vpop.f32.mrf.mxu0 }
0x147b   :  { %6297 = vrot.lane.b32.xlu1 %v6256_v47, %s11086_s20  ;;  %v10610_v2 = vpop.f32.mrf.mxu0 }
0x147d   :  { %6133 = vrot.lane.b32.xlu0 %v10557_v18, %s11086_s20  ;;  %v6426_v18 = vpop.f32.mrf.mxu0 }
0x147f   :  { %6131 = vrot.lane.b32.xlu1 %v6096_v37, %s11086_s20  ;;  %v10613_v37 = vpop.f32.mrf.mxu0 }
0x1481   :  { %6303 = vrot.lane.b32.xlu0 %v10585_v12, %s11086_s20  ;;  %v6436_v47 = vpop.f32.mrf.mxu0  ;;  %v10588_v12 = vpop.f32.mrf.mxu1 }
0x1483   :  { %6301 = vrot.lane.b32.xlu1 %v6266_v42, %s11086_s20 }
0x1485   :  { %6465 = vrot.lane.b32.xlu0 %v10607_v52, %s11086_s20  ;;  %v5607_v52 = vpop.permute.xlu1 %5606 }
0x1486   :  { %v5630_v49 = vadd.f32 %v5607_v52, %v12913_v46 }
0x1487   :  { %6463 = vrot.lane.b32.xlu1 %v6416_v54, %s11086_s20 }
0x1489   :  { %5967 = vrot.lane.b32.xlu0 %v10532_v29, %s11086_s20  ;;  %v6276_v29 = vpop.f32.mrf.mxu1  ;;  %v5611_v54 = vpop.permute.xlu1 %5610 }
0x148a   :  { %v5632_v40 = vadd.f32 %v5611_v54, %v12923_v22 }
0x148b   :  { %5965 = vrot.lane.b32.xlu1 %v5936_v15, %s11086_s20  ;;  %v10616_v15 = vpop.f32.mrf.mxu0 }
0x148d   :  { %6469 = vrot.lane.b32.xlu0 %v10610_v2, %s11086_s20  ;;  %v6446_v42 = vpop.f32.mrf.mxu0 }
0x148f   :  { %6467 = vrot.lane.b32.xlu1 %v6426_v18, %s11086_s20  ;;  %v10927_v18 = vld [vmem:[%s14087_s6 + $0x10] ss:$8 sps:$4 sm:$0xff]  }
0x1491   :  { %6137 = vrot.lane.b32.xlu0 %v10560_v33, %s11086_s20  ;;  %v5609_v33 = vpop.permute.xlu0 %5608 }
0x1492   :  { %v5631_v4 = vadd.f32 %v12909_v24, %v5609_v33 }
0x1493   :  { %6135 = vrot.lane.b32.xlu1 %v6106_v45, %s11086_s20 }
0x1495   :  { %6473 = vrot.lane.b32.xlu0 %v10613_v37, %s11086_s20  ;;  %v5613_v45 = vpop.permute.xlu0 %5612  ;;  %v10929_v37 = vld [vmem:[%s14087_s6 + $0x14] ss:$8 sps:$4 sm:$0xff]  }
0x1496   :  { %6636 = vmatprep.subr.bf16.mxu1 %v10929_v37  ;;  %v5633_v30 = vadd.f32 %v12917_v26, %v5613_v45 }
0x1497   :  { %6471 = vrot.lane.b32.xlu1 %v6436_v47, %s11086_s20  ;;  %v10932_v47 = vld [vmem:[%s14087_s6 + $0x4] ss:$8 sps:$4 sm:$0xff]   ;;  %6637 = vmatpush1.bf16.msra.mxu1 %v10927_v18 }
0x1498   :  { %6638 = vmatprep.subr.bf16.mxu1 %v10932_v47 }
0x1499   :  { %6307 = vrot.lane.b32.xlu0 %v10588_v12, %s11086_s20  ;;  %v13180_v2 = vpop.permute.xlu0 %5616  ;;  %v13191_v12 = vpop.permute.xlu1 %5614 }
0x149b   :  { %6305 = vrot.lane.b32.xlu1 %v6276_v29, %s11086_s20  ;;  %v10930_v29 = vld [vmem:[%s14087_s6] ss:$8 sps:$4 sm:$0xff]  }
0x149c   :  { %6639 = vmatpush1.bf16.msra.mxu1 %v10930_v29 }
0x149d   :  { %6477 = vrot.lane.b32.xlu0 %v10616_v15, %s11086_s20  ;;  %v13196_v15 = vpop.permute.xlu0 %5620  ;;  %10673 = vmatprep.subr.mxu1 %v14283_v5 }
0x149f   :  { %6475 = vrot.lane.b32.xlu1 %v6446_v42, %s11086_s20  ;;  %v13198_v42 = vpop.permute.xlu1 %5618 }
0x14b7   :  { %v5786_v13 = vpop.permute.xlu0 %5785 }
0x14b8   :  { %v5808_v56 = vadd.f32 %v5786_v13, %v5631_v4 }
0x14b9   :  { %v5784_v41 = vpop.permute.xlu1 %5783 }
0x14ba   :  { %v5807_v27 = vadd.f32 %v5784_v41, %v5630_v49  ;;  %v5637_v49 = vadd.f32 %v12941_v57, %v13196_v15 }
0x14c5   :  { %v5956_v7 = vpop.permute.xlu0 %5955 }
0x14c6   :  { %v5978_v58 = vadd.f32 %v5956_v7, %v5808_v56 }
0x14c7   :  { %v5954_v60 = vpop.permute.xlu1 %5953 }
0x14c8   :  { %v5977_v31 = vadd.f32 %v5954_v60, %v5807_v27 }
0x14c9   :  { %v5790_v35 = vpop.permute.xlu0 %5789 }
0x14ca   :  { %v5810_v5 = vadd.f32 %v5790_v35, %v5633_v30 }
0x14cb   :  { %v5788_v32 = vpop.permute.xlu1 %5787 }
0x14cc   :  { %v5809_v46 = vadd.f32 %v5788_v32, %v5632_v40 }
0x14ce   :  { %v5960_v37 = vpop.permute.xlu0 %5959 }
0x14cf   :  { %v5980_v4 = vadd.f32 %v5960_v37, %v5810_v5 }
0x14d0   :  { %v5958_v18 = vpop.permute.xlu1 %5957 }
0x14d1   :  { %v5979_v56 = vadd.f32 %v5958_v18, %v5809_v46 }
0x14d2   :  { %v5794_v36 = vpop.permute.xlu0 %5793 }
0x14d4   :  { %v5792_v9 = vpop.permute.xlu1 %5791 }
0x14d7   :  { %v5964_v59 = vpop.permute.xlu0 %5963 }
0x14d9   :  { %v5962_v11 = vpop.permute.xlu1 %5961 }
0x14db   :  { %v13201_v47 = vpop.permute.xlu0 %5797 }
0x14dd   :  { %v13203_v1 = vpop.permute.xlu1 %5795 }
0x14df   :  { %v6126_v29 = vpop.permute.xlu0 %6125 }
0x14e0   :  { %v6148_v0 = vadd.f32 %v6126_v29, %v5978_v58 }
0x14e1   :  { %v6124_v55 = vpop.permute.xlu1 %6123 }
0x14e2   :  { %v6147_v61 = vadd.f32 %v6124_v55, %v5977_v31  ;;  %v5635_v31 = vadd.f32 %v12929_v28, %v13180_v2 }
0x14e3   :  { %v6296_v8 = vpop.permute.xlu0 %6295 }
0x14e4   :  { %v6318_v20 = vadd.f32 %v6296_v8, %v6148_v0  ;;  %v5812_v5 = vadd.f32 %v5794_v36, %v5635_v31  ;;  %v5636_v36 = vadd.f32 %v13198_v42, %v12949_v25 }
0x14e5   :  { %v6294_v23 = vpop.permute.xlu1 %6293 }
0x14e6   :  { %v6317_v24 = vadd.f32 %v6294_v23, %v6147_v61 }
0x14e7   :  { %v6130_v16 = vpop.permute.xlu0 %6129 }
0x14e8   :  { %v6150_v60 = vadd.f32 %v6130_v16, %v5980_v4 }
0x14e9   :  { %v6128_v14 = vpop.permute.xlu1 %6127 }
0x14ea   :  { %v6149_v55 = vadd.f32 %v6128_v14, %v5979_v56 }
0x14eb   :  { %v6300_v53 = vpop.permute.xlu0 %6299 }
0x14ec   :  { %v6320_v26 = vadd.f32 %v6300_v53, %v6150_v60 }
0x14ed   :  { %v6298_v39 = vpop.permute.xlu1 %6297 }
0x14ef   :  { %v6134_v50 = vpop.permute.xlu0 %6133 }
0x14f1   :  { %v6132_v63 = vpop.permute.xlu1 %6131 }
0x14f3   :  { %v6304_v48 = vpop.permute.xlu0 %6303 }
0x14f5   :  { %v6302_v10 = vpop.permute.xlu1 %6301 }
0x14f7   :  { %v6466_v6 = vpop.permute.xlu0 %6465 }
0x14f8   :  { %v6488_v33 = vadd.f32 %v6466_v6, %v6318_v20  ;;  %v5634_v6 = vadd.f32 %v13191_v12, %v12939_v17  ;;  %v6319_v20 = vadd.f32 %v6298_v39, %v6149_v55 }
0x14f9   :  { %v6464_v34 = vpop.permute.xlu1 %6463 }
0x14fa   :  { %v6496_v13 = vsub.f32 0.0, %v6488_v33  ;;  %v6487_v41 = vadd.f32 %v6464_v34, %v6317_v24  ;;  %v5811_v16 = vadd.f32 %v5792_v9, %v5634_v6  ;;  %v5982_v34 = vadd.f32 %v5964_v59, %v5812_v5 }
0x14fb   :  { %v5968_v7 = vpop.permute.xlu0 %5967  ;;  %v5814_v59 = vadd.f32 %v13201_v47, %v5637_v49 }
0x14fc   :  { %v6505_v58 = vmul.f32 1.442695, %v6496_v13  ;;  %v6495_v27 = vsub.f32 0.0, %v6487_v41  ;;  %v5981_v28 = vadd.f32 %v5962_v11, %v5811_v16  ;;  %v6152_v0 = vadd.f32 %v6134_v50, %v5982_v34 }
0x14fd   :  { %v5966_v8 = vpop.permute.xlu1 %5965  ;;  %v5813_v50 = vadd.f32 %v13203_v1, %v5636_v36  ;;  %v5984_v12 = vadd.f32 %v5968_v7, %v5814_v59 }
0x14fe   :  { %10977 = vpow2.f32 %v6505_v58  ;;  %v6503_v35 = vmul.f32 1.442695, %v6495_v27  ;;  %v6151_v17 = vadd.f32 %v6132_v63, %v5981_v28  ;;  %v6322_v45 = vadd.f32 %v6304_v48, %v6152_v0 }
0x14ff   :  { %v6470_v40 = vpop.permute.xlu0 %6469  ;;  %v5983_v63 = vadd.f32 %v5966_v8, %v5813_v50 }
0x1500   :  { %10979 = vpow2.f32 %v6503_v35  ;;  %v6490_v23 = vadd.f32 %v6470_v40, %v6320_v26  ;;  %v6321_v54 = vadd.f32 %v6302_v10, %v6151_v17 }
0x1501   :  { %v6468_v32 = vpop.permute.xlu1 %6467 }
0x1502   :  { %v6498_v22 = vsub.f32 0.0, %v6490_v23  ;;  %v6489_v61 = vadd.f32 %v6468_v32, %v6319_v20 }
0x1503   :  { %v6138_v30 = vpop.permute.xlu0 %6137 }
0x1504   :  { %v6509_v14 = vmul.f32 1.442695, %v6498_v22  ;;  %v6497_v53 = vsub.f32 0.0, %v6489_v61  ;;  %v6154_v29 = vadd.f32 %v6138_v30, %v5984_v12 }
0x1505   :  { %v6136_v52 = vpop.permute.xlu1 %6135 }
0x1506   :  { %10981 = vpow2.f32 %v6509_v14  ;;  %v6507_v39 = vmul.f32 1.442695, %v6497_v53  ;;  %v6153_v42 = vadd.f32 %v6136_v52, %v5983_v63 }
0x1507   :  { %v6474_v9 = vpop.permute.xlu0 %6473 }
0x1508   :  { %10983 = vpow2.f32 %v6507_v39  ;;  %v6492_v11 = vadd.f32 %v6474_v9, %v6322_v45 }
0x1509   :  { %v6472_v2 = vpop.permute.xlu1 %6471 }
0x150a   :  { %v6500_v37 = vsub.f32 0.0, %v6492_v11  ;;  %v6491_v57 = vadd.f32 %v6472_v2, %v6321_v54 }
0x150b   :  { %v10978_v15 = vpop.eup %10977  ;;  %v6308_v48 = vpop.permute.xlu0 %6307 }
0x150c   :  { %v6520_v18 = vadd.f32 1.0, %v10978_v15  ;;  %v6513_v24 = vmul.f32 1.442695, %v6500_v37  ;;  %v6499_v33 = vsub.f32 0.0, %v6491_v57  ;;  %v6324_v4 = vadd.f32 %v6308_v48, %v6154_v29  ;;  %v14449_v15 = vld [vmem:[#allocation115_spill] sm:$0xff] }
0x150d   :  { %v10980_v25 = vpop.eup %10979  ;;  %v6306_v46 = vpop.permute.xlu1 %6305 }
0x150e   :  { %10985 = vrcp.f32 %v6520_v18  ;;  %v6519_v10 = vadd.f32 1.0, %v10980_v25  ;;  %v6511_v47 = vmul.f32 1.442695, %v6499_v33  ;;  %v6323_v13 = vadd.f32 %v6306_v46, %v6153_v42 }
0x150f   :  { %10987 = vpow2.f32 %v6513_v24  ;;  %v6478_v1 = vpop.permute.xlu0 %6477  ;;  %v14450_v18 = vmov 0.0  }
0x1510   :  { %10989 = vrcp.f32 %v6519_v10  ;;  %v6494_v41 = vadd.f32 %v6478_v1, %v6324_v4 }
0x1511   :  { %10991 = vpow2.f32 %v6511_v47  ;;  %v6476_v7 = vpop.permute.xlu1 %6475 }
0x1512   :  { %v6502_v56 = vsub.f32 0.0, %v6494_v41  ;;  %v6493_v60 = vadd.f32 %v6476_v7, %v6323_v13  ;;  %v14451_v7 = vld [vmem:[#allocation4_spill] sm:$0xff] }
0x1513   :  { %v10982_v58 = vpop.eup %10981 }
0x1514   :  { %v6522_v27 = vadd.f32 1.0, %v10982_v58  ;;  %v6517_v31 = vmul.f32 1.442695, %v6502_v56  ;;  %v6501_v8 = vsub.f32 0.0, %v6493_v60  ;;  %v14452_v56 = vld [vmem:[#allocation5_spill] sm:$0xff]  ;;  %v14453_v60 = vld [vmem:[#allocation6_spill] sm:$0xff] }
0x1515   :  { %v10984_v55 = vpop.eup %10983  ;;  %v14454_v58 = vld [vmem:[#allocation7_spill] sm:$0xff] }
0x1516   :  { %10993 = vrcp.f32 %v6522_v27  ;;  %v6521_v26 = vadd.f32 1.0, %v10984_v55  ;;  %v6515_v35 = vmul.f32 1.442695, %v6501_v8  ;;  %v14455_v27 = vld [vmem:[#allocation8_spill] sm:$0xff]  ;;  %v14457_v8 = vld [vmem:[#allocation10_spill] sm:$0xff]  ;;  %v14458_v55 = vld [vmem:[#allocation3_spill] sm:$0xff] }
0x1517   :  { %10995 = vpow2.f32 %v6517_v31  ;;  %v14456_v31 = vld [vmem:[#allocation9_spill] sm:$0xff] }
0x1518   :  { %10997 = vrcp.f32 %v6521_v26  ;;  %v14459_v26 = vld [vmem:[#allocation11_spill] sm:$0xff] }
0x1519   :  { %10999 = vpow2.f32 %v6515_v35  ;;  %v14460_v35 = vld [vmem:[#allocation12_spill] sm:$0xff] }
0x151b   :  { %v10986_v6 = vpop.eup %10985 }
0x151c   :  { %v10988_v40 = vpop.eup %10987  ;;  %6542 = vperm.xlu0 %10917, %v10986_v6   ;;  %v14461_v6 = vld [vmem:[#allocation13_spill] sm:$0xff] }
0x151d   :  { %v10990_v5 = vpop.eup %10989  ;;  %v6524_v20 = vadd.f32 1.0, %v10988_v40  ;;  %v14462_v40 = vld [vmem:[#allocation14_spill] sm:$0xff] }
0x151e   :  { %v10992_v23 = vpop.eup %10991  ;;  %6537 = vperm.xlu1 %10918, %v10990_v5   ;;  %v14463_v5 = vld [vmem:[#allocation15_spill] sm:$0xff] }
0x151f   :  { %11001 = vrcp.f32 %v6524_v20  ;;  %v6523_v32 = vadd.f32 1.0, %v10992_v23  ;;  %v14464_v20 = vld [vmem:[#allocation16_spill] sm:$0xff]  ;;  %v14465_v23 = vld [vmem:[#allocation17_spill] sm:$0xff] }
0x1521   :  { %11003 = vrcp.f32 %v6523_v32  ;;  %v6989_v32 = vld [vmem:[%s14088_s8 + $0x38] sm:$0xff] }
0x1523   :  { %v10994_v16 = vpop.eup %10993 }
0x1524   :  { %v10996_v34 = vpop.eup %10995  ;;  %6552 = vperm.xlu0 %10917, %v10994_v16   ;;  %v6988_v16 = vld [vmem:[%s14088_s8 + $0x30] sm:$0xff] }
0x1525   :  { %v10998_v22 = vpop.eup %10997  ;;  %v6526_v61 = vadd.f32 1.0, %v10996_v34  ;;  %v6987_v34 = vld [vmem:[%s14088_s8 + $0x28] sm:$0xff] }
0x1526   :  { %v11000_v30 = vpop.eup %10999  ;;  %6547 = vperm.xlu1 %10918, %v10998_v22   ;;  %v6986_v22 = vld [vmem:[%s14088_s8 + $0x20] sm:$0xff] }
0x1527   :  { %11005 = vrcp.f32 %v6526_v61  ;;  %v6525_v28 = vadd.f32 1.0, %v11000_v30  ;;  %v6985_v61 = vld [vmem:[%s14088_s8 + $0x18] sm:$0xff]  ;;  %v6984_v30 = vld [vmem:[%s14088_s8 + $0x10] sm:$0xff] }
0x1529   :  { %11007 = vrcp.f32 %v6525_v28  ;;  %v6983_v28 = vld [vmem:[%s14088_s8 + $0x8] sm:$0xff] }
0x152c   :  { %v11002_v0 = vpop.eup %11001 }
0x152d   :  { %6562 = vperm.xlu0 %10917, %v11002_v0   ;;  %v6982_v0 = vld [vmem:[%s14088_s8] sm:$0xff] }
0x152e   :  { %v11004_v14 = vpop.eup %11003 }
0x152f   :  { %6557 = vperm.xlu1 %10918, %v11004_v14  }
0x1534   :  { %v11006_v53 = vpop.eup %11005 }
0x1535   :  { %6572 = vperm.xlu0 %10917, %v11006_v53  }
0x1536   :  { %v11008_v49 = vpop.eup %11007 }
0x1537   :  { %6567 = vperm.xlu1 %10918, %v11008_v49  }
0x1597   :  { %v6543_v52 = vpop.permute.xlu0 %6542 }
0x1598   :  { %v6576_v45 = vmul.f32 %v6543_v52, %v12831_v19 }
0x1599   :  { %v6538_v17 = vpop.permute.xlu1 %6537 }
0x159a   :  { %v6575_v39 = vmul.f32 %v6538_v17, %v12834_v38 }
0x159c   :  { %v6588_v36 = vpack.c.bf16 %v6576_v45, %v6575_v39 }
0x159e   :  { %9041 = vmatmul.mubr.msk.bf16.vlgmr.msra.gmra.mxu1 %vm578_vm9, %v6588_v36 }
0x159f   :  { %v6553_v9 = vpop.permute.xlu0 %6552  ;;  %6666 = vmatprep.mubr.bf16.mxu1 %v14443_v43  ;;  %10674 = vmatpush3.msra.mxu1 %v6989_v32 }
0x15a0   :  { %v6578_v54 = vmul.f32 %v6553_v9, %v12848_v44  ;;  %10675 = vmatprep.subr.mxu1 %v14450_v18  ;;  %v9045_v9 = vld [vmem:[%s14089_s7] ss:$0 sm:$0xff] }
0x15a1   :  { %v6548_v59 = vpop.permute.xlu1 %6547  ;;  %10676 = vmatpush3.msra.mxu1 %v6988_v16 }
0x15a2   :  { %v6577_v11 = vmul.f32 %v6548_v59, %v12845_v62  ;;  %10677 = vmatprep.subr.mxu1 %v14450_v18 }
0x15a3   :  { %10678 = vmatpush3.msra.mxu1 %v6987_v34 }
0x15a4   :  { %v6589_v50 = vpack.c.bf16 %v6578_v54, %v6577_v11  ;;  %10679 = vmatprep.subr.mxu1 %v14450_v18 }
0x15a5   :  { %10680 = vmatpush3.msra.mxu1 %v6986_v22 }
0x15a6   :  { %9042 = vmatmul.mubr.msk.bf16.gmra.mxu1 %vm578_vm9, %v6589_v50  ;;  %10681 = vmatprep.subr.mxu1 %v14450_v18 }
0x15a7   :  { %6676 = vmatprep.mubr.bf16.mxu1 %v14443_v43  ;;  %10682 = vmatpush3.msra.mxu1 %v6985_v61 }
0x15a8   :  { %v6563_v2 = vpop.permute.xlu0 %6562  ;;  %10683 = vmatprep.subr.mxu1 %v14450_v18 }
0x15a9   :  { %v6580_v38 = vmul.f32 %v6563_v2, %v12862_v21  ;;  %10684 = vmatpush3.msra.mxu1 %v6984_v30 }
0x15aa   :  { %v6558_v19 = vpop.permute.xlu1 %6557  ;;  %10685 = vmatprep.subr.mxu1 %v14450_v18 }
0x15ab   :  { %v6579_v12 = vmul.f32 %v6558_v19, %v12859_v51  ;;  %10686 = vmatpush3.msra.mxu1 %v6983_v28 }
0x15ac   :  { %10687 = vmatprep.subr.mxu1 %v14450_v18 }
0x15ad   :  { %v6590_v37 = vpack.c.bf16 %v6580_v38, %v6579_v12  ;;  %10688 = vmatpush3.msra.mxu1 %v6982_v0 }
0x15ae   :  { %10711 = vmatprep.subr.mxu1 %v14450_v18 }
0x15af   :  { %9043 = vmatmul.mubr.msk.bf16.gmra.mxu1 %vm578_vm9, %v6590_v37 }
0x15b0   :  { %v6573_v57 = vpop.permute.xlu0 %6572  ;;  %6686 = vmatprep.mubr.bf16.mxu1 %v14443_v43 }
0x15b1   :  { %v6582_v62 = vmul.f32 %v6573_v57, %v12881_v3 }
0x15b2   :  { %v6568_v44 = vpop.permute.xlu1 %6567 }
0x15b3   :  { %v6581_v63 = vmul.f32 %v6568_v44, %v14449_v15 }
0x15b5   :  { %v6591_v48 = vpack.c.bf16 %v6582_v62, %v6581_v63 }
0x15b7   :  { %9044 = vmatmul.mubr.msk.bf16.gmra.mxu1 %vm578_vm9, %v6591_v48 }
0x15b8   :  { %10689 = vmatprep.mubr.msk.f32.mxu1 %vm11080_vm8, %v14450_v18 }
0x165e   :  { %v6658_v21 = vpop.f32.mrf.mxu1 }
0x165f   :  { %6711 = vrot.lane.b32.xlu1 %v6658_v21, %s11078_s16 }
0x1660   :  { %v6660_v51 = vpop.f32.mrf.mxu1 }
0x1662   :  { %v6662_v29 = vpop.f32.mrf.mxu1 }
0x1663   :  { %6713 = vrot.lane.b32.xlu0 %v6662_v29, %s11078_s16 }
0x1664   :  { %v6664_v24 = vpop.f32.mrf.mxu1 }
0x1666   :  { %v6668_v43 = vpop.f32.mrf.mxu1 }
0x1667   :  { %6715 = vrot.lane.b32.xlu1 %v6668_v43, %s11078_s16 }
0x1668   :  { %v6670_v3 = vpop.f32.mrf.mxu1 }
0x166a   :  { %v6672_v33 = vpop.f32.mrf.mxu1 }
0x166b   :  { %6717 = vrot.lane.b32.xlu0 %v6672_v33, %s11078_s16 }
0x166c   :  { %v6674_v25 = vpop.f32.mrf.mxu1 }
0x166f   :  { %v6678_v42 = vpop.f32.mrf.mxu1 }
0x1670   :  { %6719 = vrot.lane.b32.xlu1 %v6678_v42, %s11078_s16 }
0x1671   :  { %v6680_v46 = vpop.f32.mrf.mxu1 }
0x1673   :  { %v6682_v10 = vpop.f32.mrf.mxu1 }
0x1674   :  { %6721 = vrot.lane.b32.xlu0 %v6682_v10, %s11078_s16 }
0x1675   :  { %v6684_v47 = vpop.f32.mrf.mxu1 }
0x1677   :  { %v6688_v4 = vpop.f32.mrf.mxu1 }
0x1678   :  { %6723 = vrot.lane.b32.xlu1 %v6688_v4, %s11078_s16 }
0x1679   :  { %v6690_v1 = vpop.f32.mrf.mxu1 }
0x167b   :  { %v6692_v13 = vpop.f32.mrf.mxu1 }
0x167c   :  { %6725 = vrot.lane.b32.xlu0 %v6692_v13, %s11078_s16  ;;  %10617 = vmatprep.subr.msk.mxu0 %vm255_vm4, %v6692_v13 }
0x167d   :  { %10618 = vmatpush3.msk.msra.mxu0 %vm255_vm4, %v6692_v13  ;;  %v6694_v41 = vpop.f32.mrf.mxu1 }
0x167e   :  { %10619 = vmatprep.subr.mxu0 %v6688_v4 }
0x167f   :  { %10620 = vmatpush3.msra.mxu0 %v6688_v4 }
0x1680   :  { %10621 = vmatprep.subr.mxu0 %v6682_v10 }
0x1681   :  { %10622 = vmatpush3.msra.mxu0 %v6682_v10 }
0x1682   :  { %10623 = vmatprep.subr.mxu0 %v6678_v42 }
0x1683   :  { %10624 = vmatpush3.msra.mxu0 %v6678_v42 }
0x1684   :  { %10625 = vmatprep.subr.mxu0 %v6672_v33 }
0x1685   :  { %10626 = vmatpush3.msra.mxu0 %v6672_v33 }
0x1686   :  { %10627 = vmatprep.subr.mxu0 %v6668_v43 }
0x1687   :  { %10628 = vmatpush3.msra.mxu0 %v6668_v43 }
0x1688   :  { %10629 = vmatprep.subr.mxu0 %v6662_v29 }
0x1689   :  { %10630 = vmatpush3.msra.mxu0 %v6662_v29 }
0x168a   :  { %10631 = vmatprep.subr.mxu0 %v6658_v21 }
0x168b   :  { %10632 = vmatpush3.msra.mxu0 %v6658_v21 }
0x168c   :  { %10634 = vmatmul.mubr.msk.f32.vlgmr.msra.gmra.mxu0 %vm230_vm3, %v14451_v7  ;;  %10645 = vmatprep.subr.msk.mxu0 %vm255_vm4, %v6694_v41 }
0x168d   :  { %10646 = vmatpush3.msk.msra.mxu0 %vm255_vm4, %v6694_v41  ;;  %10636 = vmatprep.mubr.msk.f32.mxu0 %vm230_vm3, %v14452_v56 }
0x168e   :  { %10647 = vmatprep.subr.mxu0 %v6690_v1 }
0x168f   :  { %10648 = vmatpush3.msra.mxu0 %v6690_v1 }
0x1690   :  { %10637 = vmatmul.mubr.msk.f32.gmra.mxu0 %vm230_vm3, %v14453_v60  ;;  %10649 = vmatprep.subr.mxu0 %v6684_v47 }
0x1691   :  { %10650 = vmatpush3.msra.mxu0 %v6684_v47  ;;  %10639 = vmatprep.mubr.msk.f32.mxu0 %vm230_vm3, %v14454_v58 }
0x1692   :  { %10651 = vmatprep.subr.mxu0 %v6680_v46 }
0x1693   :  { %10652 = vmatpush3.msra.mxu0 %v6680_v46 }
0x1694   :  { %10640 = vmatmul.mubr.msk.f32.gmra.mxu0 %vm230_vm3, %v14455_v27  ;;  %10653 = vmatprep.subr.mxu0 %v6674_v25 }
0x1695   :  { %10654 = vmatpush3.msra.mxu0 %v6674_v25  ;;  %10642 = vmatprep.mubr.msk.f32.mxu0 %vm230_vm3, %v14456_v31 }
0x1696   :  { %10655 = vmatprep.subr.mxu0 %v6670_v3 }
0x1697   :  { %10656 = vmatpush3.msra.mxu0 %v6670_v3 }
0x1698   :  { %10643 = vmatmul.mubr.msk.f32.gmra.mxu0 %vm230_vm3, %v14457_v8  ;;  %10657 = vmatprep.subr.mxu0 %v6664_v24 }
0x1699   :  { %10658 = vmatpush3.msra.mxu0 %v6664_v24  ;;  %10661 = vmatprep.mubr.msk.f32.mxu0 %vm230_vm3, %v14458_v55 }
0x169a   :  { %10659 = vmatprep.subr.mxu0 %v6660_v51 }
0x169b   :  { %10660 = vmatpush3.msra.mxu0 %v6660_v51 }
0x169c   :  { %10662 = vmatmul.mubr.msk.f32.vlgmr.msra.gmra.mxu0 %vm230_vm3, %v14459_v26  ;;  %10692 = vmatprep.subr.mxu0 %v14450_v18 }
0x169d   :  { %10664 = vmatprep.mubr.msk.f32.mxu0 %vm230_vm3, %v14460_v35  ;;  %10693 = vmatpush3.msra.mxu0 %v6989_v32 }
0x169e   :  { %10694 = vmatprep.subr.mxu0 %v14450_v18 }
0x169f   :  { %10695 = vmatpush3.msra.mxu0 %v6988_v16 }
0x16a0   :  { %10665 = vmatmul.mubr.msk.f32.gmra.mxu0 %vm230_vm3, %v14461_v6  ;;  %10696 = vmatprep.subr.mxu0 %v14450_v18 }
0x16a1   :  { %10667 = vmatprep.mubr.msk.f32.mxu0 %vm230_vm3, %v14462_v40  ;;  %10697 = vmatpush3.msra.mxu0 %v6987_v34 }
0x16a2   :  { %10698 = vmatprep.subr.mxu0 %v14450_v18 }
0x16a3   :  { %10699 = vmatpush3.msra.mxu0 %v6986_v22 }
0x16a4   :  { %10668 = vmatmul.mubr.msk.f32.gmra.mxu0 %vm230_vm3, %v14463_v5  ;;  %10700 = vmatprep.subr.mxu0 %v14450_v18 }
0x16a5   :  { %10670 = vmatprep.mubr.msk.f32.mxu0 %vm230_vm3, %v14464_v20  ;;  %10701 = vmatpush3.msra.mxu0 %v6985_v61 }
0x16a6   :  { %10702 = vmatprep.subr.mxu0 %v14450_v18 }
0x16a7   :  { %10703 = vmatpush3.msra.mxu0 %v6984_v30 }
0x16a8   :  { %10671 = vmatmul.mubr.msk.f32.gmra.mxu0 %vm230_vm3, %v14465_v23  ;;  %10704 = vmatprep.subr.mxu0 %v14450_v18 }
0x16a9   :  { %10708 = vmatprep.mubr.msk.f32.mxu0 %vm11080_vm8, %v14450_v18  ;;  %10705 = vmatpush3.msra.mxu0 %v6983_v28 }
0x16aa   :  { %10706 = vmatprep.subr.mxu0 %v14450_v18 }
0x16ab   :  { %10707 = vmatpush3.msra.mxu0 %v6982_v0 }
0x16ac   :  { %10716 = vmatprep.subr.mxu0 %v14450_v18 }
0x16d1   :  { %v6712_v36 = vpop.permute.xlu1 %6711 }
0x16d2   :  { %v6735_v2 = vadd.f32 %v9045_v9, %v6712_v36 }
0x16d5   :  { %v6714_v45 = vpop.permute.xlu0 %6713 }
0x16d6   :  { %v6736_v54 = vadd.f32 %v9045_v9, %v6714_v45 }
0x16d9   :  { %v6716_v19 = vpop.permute.xlu1 %6715 }
0x16da   :  { %v6737_v63 = vadd.f32 %v9045_v9, %v6716_v19 }
0x16dd   :  { %v6718_v11 = vpop.permute.xlu0 %6717 }
0x16de   :  { %v6738_v37 = vadd.f32 %v9045_v9, %v6718_v11 }
0x16e2   :  { %v6720_v48 = vpop.permute.xlu1 %6719 }
0x16e3   :  { %v6739_v46 = vadd.f32 %v9045_v9, %v6720_v48 }
0x16e6   :  { %v6722_v57 = vpop.permute.xlu0 %6721 }
0x16e7   :  { %v6740_v29 = vadd.f32 %v9045_v9, %v6722_v57 }
0x16ea   :  { %v6724_v47 = vpop.permute.xlu1 %6723 }
0x16eb   :  { %v6741_v28 = vadd.f32 %v9045_v9, %v6724_v47 }
0x16ee   :  { %v6726_v43 = vpop.permute.xlu0 %6725 }
0x16ef   :  { %v6742_v41 = vadd.f32 %v9045_v9, %v6726_v43 }
0x174c   :  { %v10635_v14 = vpop.f32.mrf.mxu0 }
0x174d   :  { %v6851_v38 = vadd.f32 %v10635_v14, %v6736_v54 }
0x174e   :  { %v6811_v53 = vpop.f32.mrf.mxu0 }
0x174f   :  { %v6850_v44 = vadd.f32 %v6811_v53, %v6735_v2 }
0x1750   :  { %v10638_v49 = vpop.f32.mrf.mxu0 }
0x1751   :  { %v6853_v21 = vadd.f32 %v10638_v49, %v6738_v37 }
0x1752   :  { %v6821_v52 = vpop.f32.mrf.mxu0 }
0x1753   :  { %v6852_v3 = vadd.f32 %v6821_v52, %v6737_v63 }
0x1754   :  { %v10641_v17 = vpop.f32.mrf.mxu0 }
0x1755   :  { %v6855_v4 = vadd.f32 %v10641_v17, %v6740_v29 }
0x1756   :  { %v6831_v39 = vpop.f32.mrf.mxu0 }
0x1757   :  { %v6854_v32 = vadd.f32 %v6831_v39, %v6739_v46 }
0x1758   :  { %v10644_v59 = vpop.f32.mrf.mxu0 }
0x1759   :  { %v6857_v53 = vadd.f32 %v10644_v59, %v6742_v41 }
0x175a   :  { %v6841_v50 = vpop.f32.mrf.mxu0 }
0x175b   :  { %v6856_v17 = vadd.f32 %v6841_v50, %v6741_v28 }
0x175c   :  { %v10663_v12 = vpop.f32.mrf.mxu0 }
0x175d   :  { %v6967_v62 = vadd.f32 %v10663_v12, %v6851_v38 }
0x175e   :  { %v6927_v15 = vpop.f32.mrf.mxu0 }
0x175f   :  { %v6966_v51 = vadd.f32 %v6927_v15, %v6850_v44  ;;  %v13324_v33 = vmax.f32 %v6967_v62, 0.0 }
0x1760   :  { %v10666_v24 = vpop.f32.mrf.mxu0 }
0x1761   :  { %v13326_v25 = vmax.f32 %v6966_v51, 0.0  ;;  %v6969_v42 = vadd.f32 %v10666_v24, %v6853_v21  ;;  %v6992_v34 = vsel %vm2864_vm2, %v13324_v33, 0.0  ;;  %v7014_v48 = vsel %vm2864_vm2, %v13324_v33, -inf }
0x1762   :  { %v6937_v10 = vpop.f32.mrf.mxu0 }
0x1763   :  { %v6991_v1 = vsel %vm2864_vm2, %v13326_v25, 0.0  ;;  %v6968_v13 = vadd.f32 %v6937_v10, %v6852_v3  ;;  %v13332_v22 = vmax.f32 %v6969_v42, 0.0  ;;  %v7013_v37 = vsel %vm2864_vm2, %v13326_v25, -inf }
0x1764   :  { %v10669_v16 = vpop.f32.mrf.mxu0  ;;  %v6993_v0 = vadd.f32 %v6992_v34, %v6991_v1 }
0x1765   :  { %v13334_v61 = vmax.f32 %v6968_v13, 0.0  ;;  %v6971_v30 = vadd.f32 %v10669_v16, %v6855_v4  ;;  %v6996_v36 = vsel %vm2864_vm2, %v13332_v22, 0.0  ;;  %v7016_v29 = vsel %vm2864_vm2, %v13332_v22, -inf }
0x1766   :  { %v6947_v14 = vpop.f32.mrf.mxu0 }
0x1767   :  { %v6994_v49 = vsel %vm2864_vm2, %v13334_v61, 0.0  ;;  %v6970_v52 = vadd.f32 %v6947_v14, %v6854_v32  ;;  %v13340_v54 = vmax.f32 %v6971_v30, 0.0  ;;  %v7015_v24 = vsel %vm2864_vm2, %v13334_v61, -inf }
0x1768   :  { %v6995_v45 = vadd.f32 %v6994_v49, %v6993_v0  ;;  %v10672_v39 = vpop.f32.mrf.mxu0 }
0x1769   :  { %v13342_v11 = vmax.f32 %v6970_v52, 0.0  ;;  %v6973_v2 = vadd.f32 %v10672_v39, %v6857_v53  ;;  %v7000_v44 = vsel %vm2864_vm2, %v13340_v54, 0.0  ;;  %v7019_v62 = vsel %vm2864_vm2, %v13340_v54, -inf }
0x176a   :  { %v6997_v19 = vadd.f32 %v6996_v36, %v6995_v45  ;;  %v6957_v9 = vpop.f32.mrf.mxu0  ;;  %v7020_v42 = vmax.f32 %v7014_v48, %v7019_v62 }
0x176b   :  { %v6998_v59 = vsel %vm2864_vm2, %v13342_v11, 0.0  ;;  %v7017_v38 = vsel %vm2864_vm2, %v13342_v11, -inf  ;;  %v13348_v12 = vmax.f32 %v6973_v2, 0.0  ;;  %v6972_v50 = vadd.f32 %v6957_v9, %v6856_v17  ;;  %v6990_v2 = vld [vmem:[%s14090_s9] sm:$0xf] }
0x176c   :  { %v6999_v57 = vadd.f32 %v6998_v59, %v6997_v19  ;;  %v7018_v21 = vmax.f32 %v7013_v37, %v7017_v38 }
0x176d   :  { %v7023_v15 = vsel %vm2878_vm5, %v13348_v12, -inf  ;;  %v13358_v63 = vmax.f32 %v6972_v50, 0.0  ;;  %v7004_v4 = vsel %vm2878_vm5, %v13348_v12, 0.0 }
0x176e   :  { %v7001_v51 = vadd.f32 %v7000_v44, %v6999_v57  ;;  %v7024_v46 = vmax.f32 %v7016_v29, %v7023_v15  ;;  %v7025_v1 = vmax.f32 %v7018_v21, %v7020_v42  ;;  %v14466_v57 = vld [vmem:[#allocation21_spill] sm:$0xff] }
0x176f   :  { %v7002_v43 = vsel %vm2864_vm2, %v13358_v63, 0.0  ;;  %v7021_v3 = vsel %vm2864_vm2, %v13358_v63, -inf }
0x1770   :  { %v7003_v10 = vadd.f32 %v7002_v43, %v7001_v51  ;;  %v7022_v47 = vmax.f32 %v7015_v24, %v7021_v3  ;;  %v14467_v3 = vld [vmem:[#allocation18_spill] sm:$0xff] }
0x1772   :  { %v7005_v13 = vadd.f32 %v7004_v4, %v7003_v10  ;;  %v7026_v41 = vmax.f32 %v7022_v47, %v7024_v46 }
0x1774   :  { %v7006_v32 = vrot.slane %v7005_v13, 4  ;;  %v7027_v16 = vmax.f32 %v7025_v1, %v7026_v41 }
0x1776   :  { %v7007_v34 = vadd.f32 %v7006_v32, %v7005_v13  ;;  %v7028_v30 = vrot.slane %v7027_v16, 4 }
0x1778   :  { %v7008_v28 = vrot.slane %v7007_v34, 2  ;;  %v7029_v0 = vmax.f32 %v7027_v16, %v7028_v30  ;;  %v7348_v30 = vld [vmem:[%s14091_s10] sm:$0x3] }
0x177a   :  { %v7009_v14 = vadd.f32 %v7008_v28, %v7007_v34  ;;  %v7030_v53 = vrot.slane %v7029_v0, 2 }
0x177c   :  { %v7010_v49 = vrot.slane %v7009_v14, 1  ;;  %v7031_v52 = vmax.f32 %v7029_v0, %v7030_v53 }
0x177e   :  { %v7011_v17 = vadd.f32 %v7010_v49, %v7009_v14  ;;  %v7032_v45 = vrot.slane %v7031_v52, 1 }
0x1780   :  { %v7012_v39 = vmul.f32 0.016666668, %v7011_v17  ;;  %v7033_v36 = vmax.f32 %v7031_v52, %v7032_v45 }
0x1782   :  { %10690 = vmatmul.mubr.msk.f32.vlgmr.msra.gmra.mxu1 %vm2864_vm2, %v7012_v39  ;;  %10709 = vmatmul.mubr.msk.f32.vlgmr.msra.gmra.mxu0 %vm2864_vm2, %v7033_v36 }
0x1783   :  { %10713 = vmatprep.mubr.msk.f32.mxu1 %vm11080_vm8, %v14450_v18  ;;  %10718 = vmatprep.mubr.msk.f32.mxu0 %vm11080_vm8, %v14450_v18 }
0x1784   :  { %10712 = vmatpush3.msk.msra.mxu1 %vm255_vm4, %v6990_v2  ;;  %10717 = vmatpush3.msk.msra.mxu0 %vm255_vm4, %v6990_v2 }
0x1785   :  { %10721 = vmatprep.subr.msk.mxu1 %vm776_vm11, %v7348_v30 }
0x1842   :  { %v7103_v19 = vpop.f32.mrf.mxu1  ;;  %v7177_v9 = vpop.f32.mrf.mxu0 }
0x1843   :  { %v7107_v59 = vmax.f32 %v7103_v19, 0.0  ;;  %v7181_v38 = vmax.f32 %v7177_v9, 0.0 }
0x1844   :  { %v10691_v50 = vpop.f32.mrf.mxu1  ;;  %v10710_v37 = vpop.f32.mrf.mxu0 }
0x1845   :  { %10714 = vmatmul.mubr.msk.f32.vlgmr.msra.gmra.mxu1 %vm3057_vm6, %v7181_v38  ;;  %10719 = vmatmul.mubr.msk.f32.vlgmr.msra.gmra.mxu0 %vm3057_vm6, %v7107_v59 }
0x1846   :  { %10751 = vmatprep.mubr.msk.f32.mxu0 %vm230_vm3, %v14466_v57  ;;  %10722 = vmatpush3.msk.msra.mxu1 %vm776_vm11, %v7348_v30  ;;  %v14476_v30 = vld [vmem:[#allocation24_spill] sm:$0xff] }
0x1905   :  { %v7254_v18 = vpop.f32.mrf.mxu1  ;;  %v7327_v44 = vpop.f32.mrf.mxu0 }
0x1906   :  { %v7328_v62 = vadd.f32 %v7327_v44, %v7254_v18 }
0x1907   :  { %v10715_v15 = vpop.f32.mrf.mxu1  ;;  %v10720_v48 = vpop.f32.mrf.mxu0 }
0x1908   :  { %v7331_v21 = vsub.f32 0.0, %v7328_v62 }
0x190a   :  { %v7332_v51 = vmul.f32 1.442695, %v7331_v21 }
0x190c   :  { %11009 = vpow2.f32 %v7332_v51 }
0x1919   :  { %v11010_v29 = vpop.eup %11009 }
0x191a   :  { %v7334_v24 = vadd.f32 1.0, %v11010_v29 }
0x191c   :  { %11011 = vrcp.f32 %v7334_v24 }
0x1929   :  { %v11012_v43 = vpop.eup %11011 }
0x192a   :  { %v7339_v42 = vrot.slane %v11012_v43, %v14467_v3 }
0x192c   :  { %v13389_v46 = vmul.f32 %v7339_v42, %v13324_v33  ;;  %v13392_v10 = vmul.f32 %v7339_v42, %v13326_v25  ;;  %v13403_v33 = vmul.f32 %v7339_v42, %v13334_v61  ;;  %v13406_v25 = vmul.f32 %v7339_v42, %v13332_v22 }
0x192d   :  { %v13417_v34 = vmul.f32 %v7339_v42, %v13342_v11  ;;  %v13420_v22 = vmul.f32 %v7339_v42, %v13340_v54  ;;  %v13436_v14 = vmul.f32 %v7339_v42, %v13358_v63  ;;  %v13439_v53 = vmul.f32 %v7339_v42, %v13348_v12 }
0x192e   :  { %14468 = vst [vmem:[#allocation115_spill] sm:$0xff] %v13389_v46  ;;  %14469 = vst [vmem:[#allocation4_spill] sm:$0xff] %v13392_v10  ;;  %v7352_v47 = vsel %vm2864_vm2, %v13389_v46, 0.0  ;;  %v7349_v4 = vsel %vm2864_vm2, %v13392_v10, 0.0  ;;  %v7381_v1 = vsel %vm2864_vm2, %v13392_v10, -inf  ;;  %v7384_v13 = vsel %vm2864_vm2, %v13389_v46, -inf }
0x192f   :  { %7353 = vadd.xlane.f32.xlu0 %v7352_v47  ;;  %7350 = vadd.xlane.f32.xlu1 %v7349_v4  ;;  %14470 = vst [vmem:[#allocation5_spill] sm:$0xff] %v13403_v33  ;;  %14471 = vst [vmem:[#allocation6_spill] sm:$0xff] %v13406_v25  ;;  %v7355_v41 = vsel %vm2864_vm2, %v13403_v33, 0.0  ;;  %v7358_v32 = vsel %vm2864_vm2, %v13406_v25, 0.0  ;;  %v7387_v16 = vsel %vm2864_vm2, %v13403_v33, -inf  ;;  %v7390_v61 = vsel %vm2864_vm2, %v13406_v25, -inf }
0x1930   :  { %14472 = vst [vmem:[#allocation7_spill] sm:$0xff] %v13417_v34  ;;  %14473 = vst [vmem:[#allocation8_spill] sm:$0xff] %v13420_v22  ;;  %v7361_v28 = vsel %vm2864_vm2, %v13417_v34, 0.0  ;;  %v7364_v0 = vsel %vm2864_vm2, %v13420_v22, 0.0  ;;  %v7393_v54 = vsel %vm2864_vm2, %v13417_v34, -inf  ;;  %v7396_v11 = vsel %vm2864_vm2, %v13420_v22, -inf }
0x1931   :  { %14474 = vst [vmem:[#allocation9_spill] sm:$0xff] %v13436_v14  ;;  %14475 = vst [vmem:[#allocation10_spill] sm:$0xff] %v13439_v53  ;;  %v7367_v49 = vsel %vm2864_vm2, %v13436_v14, 0.0  ;;  %v7370_v52 = vsel %vm2878_vm5, %v13439_v53, 0.0  ;;  %v7399_v17 = vsel %vm2864_vm2, %v13436_v14, -inf  ;;  %v7402_v63 = vsel %vm2878_vm5, %v13439_v53, -inf }
0x1932   :  { %v14557_v53 = vld [vmem:[#allocation60_spill] sm:$0xff]  ;;  %v14558_v33 = vld [vmem:[#allocation61_spill] sm:$0xff] }
0x1933   :  { %7382 = vmax.xlane.f32.xlu0 %v7381_v1  ;;  %7385 = vmax.xlane.f32.xlu1 %v7384_v13 }
0x1937   :  { %7356 = vadd.xlane.f32.xlu0 %v7355_v41  ;;  %7359 = vadd.xlane.f32.xlu1 %v7358_v32 }
0x193b   :  { %7388 = vmax.xlane.f32.xlu0 %v7387_v16  ;;  %7391 = vmax.xlane.f32.xlu1 %v7390_v61 }
0x193f   :  { %7362 = vadd.xlane.f32.xlu0 %v7361_v28  ;;  %7365 = vadd.xlane.f32.xlu1 %v7364_v0 }
0x1943   :  { %7394 = vmax.xlane.f32.xlu0 %v7393_v54  ;;  %7397 = vmax.xlane.f32.xlu1 %v7396_v11 }
0x1947   :  { %7368 = vadd.xlane.f32.xlu0 %v7367_v49  ;;  %7371 = vadd.xlane.f32.xlu1 %v7370_v52 }
0x194b   :  { %7400 = vmax.xlane.f32.xlu0 %v7399_v17  ;;  %7403 = vmax.xlane.f32.xlu1 %v7402_v63 }
0x19b8   :  { %v7354_v12 = vpop.xlane.xlu0 %7353  ;;  %v7351_v45 = vpop.xlane.xlu1 %7350 }
0x19b9   :  { %v7374_v39 = vmul.f32 0.015625, %v7354_v12  ;;  %v7373_v36 = vmul.f32 0.015625, %v7351_v45  ;;  %v14477_v12 = vld [vmem:[#allocation22_spill] sm:$0xff]  ;;  %v14478_v45 = vld [vmem:[#allocation23_spill] sm:$0xff] }
0x19bc   :  { %v7383_v2 = vpop.xlane.xlu0 %7382  ;;  %v7386_v19 = vpop.xlane.xlu1 %7385 }
0x19bd   :  { %v7405_v9 = vsel %vm998_vm13, %v7373_v36, %v7383_v2  ;;  %v7406_v59 = vsel %vm998_vm13, %v7374_v39, %v7386_v19  ;;  %v14479_v39 = vld [vmem:[#allocation25_spill] sm:$0xff]  ;;  %v14480_v36 = vld [vmem:[#allocation26_spill] sm:$0xff]  ;;  %v14481_v2 = vld [vmem:[#allocation27_spill] sm:$0xff] }
0x19be   :  { %10723 = vmatprep.mubr.msk.f32.mxu1 %vm772_vm12, %v7405_v9  ;;  %v14482_v19 = vld [vmem:[#allocation28_spill] sm:$0xff]  ;;  %v14483_v9 = vld [vmem:[#allocation29_spill] sm:$0xff] }
0x19bf   :  { %10724 = vmatmul.mubr.msk.f32.vlgmr.msra.gmra.mxu1 %vm772_vm12, %v7406_v59  ;;  %v14484_v59 = vld [vmem:[#allocation2_spill] sm:$0xff] }
0x19c0   :  { %v7357_v38 = vpop.xlane.xlu0 %7356  ;;  %v7360_v50 = vpop.xlane.xlu1 %7359 }
0x19c1   :  { %v7375_v37 = vmul.f32 0.015625, %v7357_v38  ;;  %v7376_v57 = vmul.f32 0.015625, %v7360_v50  ;;  %v14485_v38 = vld [vmem:[#allocation67_spill] sm:$0xff]  ;;  %v14486_v50 = vld [vmem:[#allocation68_spill] sm:$0xff] }
0x19c4   :  { %v7389_v18 = vpop.xlane.xlu0 %7388  ;;  %v7392_v44 = vpop.xlane.xlu1 %7391 }
0x19c5   :  { %v7407_v62 = vsel %vm998_vm13, %v7375_v37, %v7389_v18  ;;  %v7408_v15 = vsel %vm998_vm13, %v7376_v57, %v7392_v44  ;;  %v14487_v37 = vld [vmem:[#allocation69_spill] sm:$0xff]  ;;  %v14488_v57 = vld [vmem:[#allocation70_spill] sm:$0xff]  ;;  %v14489_v18 = vld [vmem:[#allocation71_spill] sm:$0xff] }
0x19c6   :  { %10726 = vmatprep.mubr.msk.f32.mxu1 %vm772_vm12, %v7407_v62  ;;  %v14490_v44 = vld [vmem:[#allocation72_spill] sm:$0xff]  ;;  %v14491_v62 = vld [vmem:[#allocation73_spill] sm:$0xff] }
0x19c7   :  { %10727 = vmatmul.mubr.msk.f32.gmra.mxu1 %vm772_vm12, %v7408_v15  ;;  %v14492_v15 = vld [vmem:[#allocation74_spill] sm:$0xff] }
0x19c8   :  { %v7363_v48 = vpop.xlane.xlu0 %7362  ;;  %v7366_v21 = vpop.xlane.xlu1 %7365 }
0x19c9   :  { %v7377_v51 = vmul.f32 0.015625, %v7363_v48  ;;  %v7378_v29 = vmul.f32 0.015625, %v7366_v21  ;;  %v14493_v48 = vld [vmem:[#allocation91_spill] sm:$0xff]  ;;  %v14494_v21 = vld [vmem:[#allocation92_spill] sm:$0xff] }
0x19cc   :  { %v7395_v24 = vpop.xlane.xlu0 %7394  ;;  %v7398_v43 = vpop.xlane.xlu1 %7397 }
0x19cd   :  { %v7409_v3 = vsel %vm998_vm13, %v7377_v51, %v7395_v24  ;;  %v7410_v42 = vsel %vm998_vm13, %v7378_v29, %v7398_v43  ;;  %v14495_v51 = vld [vmem:[#allocation93_spill] sm:$0xff]  ;;  %v14496_v29 = vld [vmem:[#allocation94_spill] sm:$0xff]  ;;  %v14497_v24 = vld [vmem:[#allocation95_spill] sm:$0xff] }
0x19ce   :  { %10729 = vmatprep.mubr.msk.f32.mxu1 %vm772_vm12, %v7409_v3  ;;  %v14498_v43 = vld [vmem:[#allocation96_spill] sm:$0xff]  ;;  %v14499_v3 = vld [vmem:[#allocation97_spill] sm:$0xff] }
0x19cf   :  { %10730 = vmatmul.mubr.msk.f32.gmra.mxu1 %vm772_vm12, %v7410_v42  ;;  %v14500_v42 = vld [vmem:[#allocation98_spill] sm:$0xff] }
0x19d0   :  { %v7369_v47 = vpop.xlane.xlu0 %7368  ;;  %v7372_v4 = vpop.xlane.xlu1 %7371 }
0x19d1   :  { %v7379_v1 = vmul.f32 0.015625, %v7369_v47  ;;  %v7380_v13 = vmul.f32 0.015625, %v7372_v4  ;;  %v14501_v47 = vld [vmem:[#allocation75_spill] sm:$0xff]  ;;  %v14502_v4 = vld [vmem:[#allocation76_spill] sm:$0xff] }
0x19d4   :  { %v7401_v41 = vpop.xlane.xlu0 %7400  ;;  %v7404_v32 = vpop.xlane.xlu1 %7403 }
0x19d5   :  { %v7411_v16 = vsel %vm998_vm13, %v7379_v1, %v7401_v41  ;;  %v7412_v61 = vsel %vm998_vm13, %v7380_v13, %v7404_v32  ;;  %v14503_v41 = vld [vmem:[#allocation77_spill] sm:$0xff]  ;;  %v14504_v32 = vld [vmem:[#allocation78_spill] sm:$0xff] }
0x19d6   :  { %10732 = vmatprep.mubr.msk.f32.mxu1 %vm772_vm12, %v7411_v16 }
0x19d7   :  { %10733 = vmatmul.mubr.msk.f32.gmra.mxu1 %vm772_vm12, %v7412_v61 }
0x19d8   :  { %10779 = vmatprep.mubr.msk.f32.mxu1 %vm230_vm3, %v14476_v30  ;;  %v14505_v30 = vld [vmem:[#allocation79_spill] sm:$0xff] }
0x1a7f   :  { %v13467_v28 = vpop.f32.mrf.mxu1 }
0x1a80   :  { %7702 = vrot.lane.b32.xlu1 %v13467_v28, %s11081_s13 }
0x1a81   :  { %v13471_v0 = vpop.f32.mrf.mxu1 }
0x1a82   :  { %7700 = vrot.lane.b32.xlu0 %v13471_v0, %s11081_s13 }
0x1a87   :  { %v13475_v54 = vpop.f32.mrf.mxu1 }
0x1a88   :  { %7876 = vrot.lane.b32.xlu0 %v13475_v54, %s11082_s14  ;;  %7706 = vrot.lane.b32.xlu1 %v13475_v54, %s11081_s13 }
0x1a89   :  { %v13481_v11 = vpop.f32.mrf.mxu1 }
0x1a8c   :  { %8046 = vrot.lane.b32.xlu1 %v13475_v54, %s11083_s15  ;;  %7704 = vrot.lane.b32.xlu0 %v13481_v11, %s11081_s13 }
0x1a8f   :  { %v13487_v49 = vpop.f32.mrf.mxu1 }
0x1a90   :  { %7874 = vrot.lane.b32.xlu0 %v13481_v11, %s11082_s14  ;;  %7710 = vrot.lane.b32.xlu1 %v13487_v49, %s11081_s13 }
0x1a91   :  { %v13497_v52 = vpop.f32.mrf.mxu1 }
0x1a94   :  { %7880 = vrot.lane.b32.xlu0 %v13487_v49, %s11082_s14  ;;  %8050 = vrot.lane.b32.xlu1 %v13487_v49, %s11083_s15 }
0x1a97   :  { %v13499_v17 = vpop.f32.mrf.mxu1 }
0x1a98   :  { %8048 = vrot.lane.b32.xlu1 %v13497_v52, %s11083_s15  ;;  %7708 = vrot.lane.b32.xlu0 %v13497_v52, %s11081_s13 }
0x1a99   :  { %10735 = vmatprep.subr.msk.mxu0 %vm255_vm4, %v13499_v17  ;;  %v13507_v63 = vpop.f32.mrf.mxu1 }
0x1a9a   :  { %10736 = vmatpush3.msk.msra.mxu0 %vm255_vm4, %v13499_v17 }
0x1a9b   :  { %10737 = vmatprep.subr.mxu0 %v13507_v63 }
0x1a9c   :  { %10738 = vmatpush3.msra.mxu0 %v13507_v63  ;;  %7878 = vrot.lane.b32.xlu0 %v13497_v52, %s11082_s14 }
0x1a9d   :  { %7884 = vrot.lane.b32.xlu1 %v13499_v17, %s11082_s14  ;;  %10739 = vmatprep.subr.mxu0 %v13487_v49 }
0x1a9e   :  { %10740 = vmatpush3.msra.mxu0 %v13487_v49 }
0x1a9f   :  { %10741 = vmatprep.subr.mxu0 %v13497_v52 }
0x1aa0   :  { %10742 = vmatpush3.msra.mxu0 %v13497_v52  ;;  %7714 = vrot.lane.b32.xlu0 %v13499_v17, %s11081_s13 }
0x1aa1   :  { %8054 = vrot.lane.b32.xlu1 %v13499_v17, %s11083_s15  ;;  %10743 = vmatprep.subr.mxu0 %v13475_v54 }
0x1aa2   :  { %10744 = vmatpush3.msra.mxu0 %v13475_v54 }
0x1aa3   :  { %10745 = vmatprep.subr.mxu0 %v13481_v11 }
0x1aa4   :  { %10746 = vmatpush3.msra.mxu0 %v13481_v11  ;;  %7872 = vrot.lane.b32.xlu0 %v13467_v28, %s11082_s14 }
0x1aa5   :  { %7712 = vrot.lane.b32.xlu1 %v13507_v63, %s11081_s13  ;;  %10747 = vmatprep.subr.mxu0 %v13467_v28 }
0x1aa6   :  { %10748 = vmatpush3.msra.mxu0 %v13467_v28 }
0x1aa7   :  { %10749 = vmatprep.subr.mxu0 %v13471_v0 }
0x1aa8   :  { %10750 = vmatpush3.msra.mxu0 %v13471_v0  ;;  %7870 = vrot.lane.b32.xlu0 %v13471_v0, %s11082_s14 }
0x1aa9   :  { %8044 = vrot.lane.b32.xlu1 %v13481_v11, %s11083_s15  ;;  %10752 = vmatmul.mubr.msk.f32.vlgmr.msra.gmra.mxu0 %vm230_vm3, %v14477_v12  ;;  %v14506_v12 = vld [vmem:[#allocation80_spill] sm:$0xff] }
0x1aaa   :  { %10754 = vmatprep.mubr.msk.f32.mxu0 %vm230_vm3, %v14478_v45 }
0x1aac   :  { %8040 = vrot.lane.b32.xlu0 %v13471_v0, %s11083_s15 }
0x1aad   :  { %8042 = vrot.lane.b32.xlu1 %v13467_v28, %s11083_s15  ;;  %10755 = vmatmul.mubr.msk.f32.gmra.mxu0 %vm230_vm3, %v14479_v39 }
0x1aae   :  { %10757 = vmatprep.mubr.msk.f32.mxu0 %vm230_vm3, %v14480_v36  ;;  %v14507_v36 = vld [vmem:[#allocation81_spill] sm:$0xff] }
0x1ab0   :  { %7882 = vrot.lane.b32.xlu0 %v13507_v63, %s11082_s14 }
0x1ab1   :  { %8224 = vrot.lane.b32.xlu1 %v13499_v17, %s11084_s18  ;;  %10758 = vmatmul.mubr.msk.f32.gmra.mxu0 %vm230_vm3, %v14481_v2  ;;  %v14508_v2 = vld [vmem:[#allocation82_spill] sm:$0xff] }
0x1ab2   :  { %10760 = vmatprep.mubr.msk.f32.mxu0 %vm230_vm3, %v14482_v19 }
0x1ab4   :  { %8220 = vrot.lane.b32.xlu0 %v13487_v49, %s11084_s18 }
0x1ab5   :  { %8052 = vrot.lane.b32.xlu1 %v13507_v63, %s11083_s15  ;;  %10761 = vmatmul.mubr.msk.f32.gmra.mxu0 %vm230_vm3, %v14483_v9 }
0x1ab6   :  { %10807 = vmatprep.mubr.msk.f32.mxu0 %vm230_vm3, %v14484_v59  ;;  %v14509_v59 = vld [vmem:[#allocation99_spill] sm:$0xff] }
0x1ab8   :  { %8218 = vrot.lane.b32.xlu0 %v13497_v52, %s11084_s18 }
0x1ab9   :  { %8394 = vrot.lane.b32.xlu1 %v13499_v17, %s11085_s19 }
0x1abc   :  { %8216 = vrot.lane.b32.xlu0 %v13475_v54, %s11084_s18 }
0x1abd   :  { %8390 = vrot.lane.b32.xlu1 %v13487_v49, %s11085_s19 }
0x1ac0   :  { %8222 = vrot.lane.b32.xlu0 %v13507_v63, %s11084_s18 }
0x1ac1   :  { %8388 = vrot.lane.b32.xlu1 %v13497_v52, %s11085_s19 }
0x1ac4   :  { %8214 = vrot.lane.b32.xlu0 %v13481_v11, %s11084_s18 }
0x1ac5   :  { %8392 = vrot.lane.b32.xlu1 %v13507_v63, %s11085_s19 }
0x1ac8   :  { %8212 = vrot.lane.b32.xlu0 %v13467_v28, %s11084_s18 }
0x1ac9   :  { %8386 = vrot.lane.b32.xlu1 %v13475_v54, %s11085_s19 }
0x1acc   :  { %8210 = vrot.lane.b32.xlu0 %v13471_v0, %s11084_s18 }
0x1acd   :  { %8384 = vrot.lane.b32.xlu1 %v13481_v11, %s11085_s19 }
0x1ad0   :  { %8380 = vrot.lane.b32.xlu0 %v13471_v0, %s11085_s19 }
0x1ad1   :  { %8382 = vrot.lane.b32.xlu1 %v13467_v28, %s11085_s19 }
0x1ad4   :  { %3540 = vrot.lane.b32.xlu0 %v14485_v38, %s11086_s20  ;;  %v14510_v38 = vld [vmem:[#allocation100_spill] sm:$0xff] }
0x1ad5   :  { %3538 = vrot.lane.b32.xlu1 %v14486_v50, %s11086_s20 }
0x1ad8   :  { %3544 = vrot.lane.b32.xlu0 %v14487_v37, %s11086_s20 }
0x1ad9   :  { %3542 = vrot.lane.b32.xlu1 %v14488_v57, %s11086_s20  ;;  %v14511_v57 = vld [vmem:[#allocation101_spill] sm:$0xff] }
0x1adc   :  { %3548 = vrot.lane.b32.xlu0 %v14489_v18, %s11086_s20  ;;  %v14512_v18 = vld [vmem:[#allocation102_spill] sm:$0xff] }
0x1add   :  { %3546 = vrot.lane.b32.xlu1 %v14490_v44, %s11086_s20 }
0x1ae0   :  { %3552 = vrot.lane.b32.xlu0 %v14491_v62, %s11086_s20 }
0x1ae1   :  { %3550 = vrot.lane.b32.xlu1 %v14492_v15, %s11086_s20  ;;  %v14513_v15 = vld [vmem:[#allocation103_spill] sm:$0xff] }
0x1ae4   :  { %3717 = vrot.lane.b32.xlu0 %v14493_v48, %s11086_s20  ;;  %v14514_v48 = vld [vmem:[#allocation104_spill] sm:$0xff] }
0x1ae5   :  { %3715 = vrot.lane.b32.xlu1 %v14494_v21, %s11086_s20 }
0x1ae8   :  { %3721 = vrot.lane.b32.xlu0 %v14495_v51, %s11086_s20 }
0x1ae9   :  { %3719 = vrot.lane.b32.xlu1 %v14496_v29, %s11086_s20  ;;  %v14515_v29 = vld [vmem:[#allocation105_spill] sm:$0xff] }
0x1aec   :  { %3725 = vrot.lane.b32.xlu0 %v14497_v24, %s11086_s20  ;;  %v14516_v24 = vld [vmem:[#allocation106_spill] sm:$0xff] }
0x1aed   :  { %3723 = vrot.lane.b32.xlu1 %v14498_v43, %s11086_s20 }
0x1af0   :  { %3729 = vrot.lane.b32.xlu0 %v14499_v3, %s11086_s20 }
0x1af1   :  { %3727 = vrot.lane.b32.xlu1 %v14500_v42, %s11086_s20  ;;  %v14517_v42 = vld [vmem:[#allocation83_spill] sm:$0xff] }
0x1af2   :  { %v7703_v1 = vpop.permute.xlu1 %7702 }
0x1af4   :  { %3887 = vrot.lane.b32.xlu0 %v14501_v47, %s11086_s20  ;;  %v13633_v13 = vpop.permute.xlu0 %7700  ;;  %v14518_v47 = vld [vmem:[#allocation84_spill] sm:$0xff] }
0x1af5   :  { %3885 = vrot.lane.b32.xlu1 %v14502_v4, %s11086_s20 }
0x1af8   :  { %3891 = vrot.lane.b32.xlu0 %v14503_v41, %s11086_s20 }
0x1af9   :  { %3889 = vrot.lane.b32.xlu1 %v14504_v32, %s11086_s20  ;;  %v14519_v32 = vld [vmem:[#allocation85_spill] sm:$0xff] }
0x1afa   :  { %v13639_v16 = vpop.permute.xlu0 %7876  ;;  %v7707_v61 = vpop.permute.xlu1 %7706 }
0x1afc   :  { %3895 = vrot.lane.b32.xlu0 %v14505_v30, %s11086_s20  ;;  %v14520_v30 = vld [vmem:[#allocation86_spill] sm:$0xff] }
0x1afd   :  { %3893 = vrot.lane.b32.xlu1 %v14506_v12, %s11086_s20 }
0x1afe   :  { %v13645_v45 = vpop.permute.xlu1 %8046  ;;  %v7705_v39 = vpop.permute.xlu0 %7704 }
0x1b00   :  { %3899 = vrot.lane.b32.xlu0 %v14507_v36, %s11086_s20 }
0x1b01   :  { %3897 = vrot.lane.b32.xlu1 %v14508_v2, %s11086_s20  ;;  %v14521_v2 = vld [vmem:[#allocation87_spill] sm:$0xff] }
0x1b02   :  { %v13651_v19 = vpop.permute.xlu0 %7874  ;;  %v7711_v9 = vpop.permute.xlu1 %7710 }
0x1b04   :  { %4057 = vrot.lane.b32.xlu0 %v14509_v59, %s11086_s20  ;;  %v14522_v59 = vld [vmem:[#allocation88_spill] sm:$0xff] }
0x1b05   :  { %4055 = vrot.lane.b32.xlu1 %v14510_v38, %s11086_s20 }
0x1b06   :  { %v7881_v50 = vpop.permute.xlu0 %7880  ;;  %v13657_v37 = vpop.permute.xlu1 %8050 }
0x1b08   :  { %4061 = vrot.lane.b32.xlu0 %v14511_v57, %s11086_s20 }
0x1b09   :  { %4059 = vrot.lane.b32.xlu1 %v14512_v18, %s11086_s20  ;;  %v14523_v18 = vld [vmem:[#allocation89_spill] sm:$0xff] }
0x1b0a   :  { %v13663_v44 = vpop.permute.xlu1 %8048  ;;  %v7709_v62 = vpop.permute.xlu0 %7708 }
0x1b0c   :  { %4065 = vrot.lane.b32.xlu0 %v14513_v15, %s11086_s20 }
0x1b0d   :  { %4063 = vrot.lane.b32.xlu1 %v14514_v48, %s11086_s20 }
0x1b0e   :  { %v7879_v21 = vpop.permute.xlu0 %7878 }
0x1b0f   :  { %v7885_v51 = vpop.permute.xlu1 %7884 }
0x1b10   :  { %10791 = vmatprep.subr.msk.mxu0 %vm255_vm4, %v7885_v51  ;;  %4069 = vrot.lane.b32.xlu0 %v14515_v29, %s11086_s20  ;;  %v14528_v29 = vld [vmem:[#allocation109_spill] sm:$0xff] }
0x1b11   :  { %4067 = vrot.lane.b32.xlu1 %v14516_v24, %s11086_s20  ;;  %10792 = vmatpush3.msk.msra.mxu0 %vm255_vm4, %v7885_v51  ;;  %v14527_v51 = vld [vmem:[#allocation30_spill] sm:$0xff] }
0x1b12   :  { %v7715_v43 = vpop.permute.xlu0 %7714  ;;  %v14529_v24 = vld [vmem:[#allocation110_spill] sm:$0xff] }
0x1b13   :  { %v8055_v3 = vpop.permute.xlu1 %8054  ;;  %10763 = vmatprep.subr.msk.mxu1 %vm255_vm4, %v7715_v43 }
0x1b14   :  { %10764 = vmatpush3.msk.msra.mxu1 %vm255_vm4, %v7715_v43  ;;  %4227 = vrot.lane.b32.xlu0 %v14517_v42, %s11086_s20  ;;  %v14530_v42 = vld [vmem:[#allocation31_spill] sm:$0xff] }
0x1b15   :  { %4225 = vrot.lane.b32.xlu1 %v14518_v47, %s11086_s20  ;;  %v14532_v47 = vld [vmem:[#allocation111_spill] sm:$0xff] }
0x1b16   :  { %v13681_v4 = vpop.permute.xlu0 %7872 }
0x1b17   :  { %v7713_v41 = vpop.permute.xlu1 %7712 }
0x1b18   :  { %10765 = vmatprep.subr.mxu1 %v7713_v41  ;;  %4231 = vrot.lane.b32.xlu0 %v14519_v32, %s11086_s20  ;;  %v14534_v32 = vld [vmem:[#allocation33_spill] sm:$0xff] }
0x1b19   :  { %4229 = vrot.lane.b32.xlu1 %v14520_v30, %s11086_s20  ;;  %10766 = vmatpush3.msra.mxu1 %v7713_v41  ;;  %v14533_v41 = vld [vmem:[#allocation112_spill] sm:$0xff]  ;;  %v14537_v30 = vld [vmem:[#allocation114_spill] sm:$0xff] }
0x1b1a   :  { %10767 = vmatprep.subr.mxu1 %v7711_v9  ;;  %v13687_v12 = vpop.permute.xlu0 %7870 }
0x1b1b   :  { %10768 = vmatpush3.msra.mxu1 %v7711_v9  ;;  %v13689_v36 = vpop.permute.xlu1 %8044  ;;  %v14524_v9 = vld [vmem:[#allocation90_spill] sm:$0xff] }
0x1b1c   :  { %10769 = vmatprep.subr.mxu1 %v7709_v62  ;;  %4235 = vrot.lane.b32.xlu0 %v14521_v2, %s11086_s20 }
0x1b1d   :  { %4233 = vrot.lane.b32.xlu1 %v14522_v59, %s11086_s20  ;;  %10770 = vmatpush3.msra.mxu1 %v7709_v62  ;;  %v14525_v62 = vld [vmem:[#allocation107_spill] sm:$0xff] }
0x1b1e   :  { %10771 = vmatprep.subr.mxu1 %v7707_v61  ;;  %v13695_v38 = vpop.permute.xlu0 %8040  ;;  %v14538_v59 = vld [vmem:[#allocation35_spill] sm:$0xff] }
0x1b1f   :  { %10772 = vmatpush3.msra.mxu1 %v7707_v61  ;;  %v13697_v57 = vpop.permute.xlu1 %8042  ;;  %v14526_v61 = vld [vmem:[#allocation108_spill] sm:$0xff] }
0x1b20   :  { %10773 = vmatprep.subr.mxu1 %v7705_v39  ;;  %4239 = vrot.lane.b32.xlu0 %v14523_v18, %s11086_s20  ;;  %v14553_v18 = vld [vmem:[#allocation50_spill] sm:$0xff] }
0x1b21   :  { %4237 = vrot.lane.b32.xlu1 %v14524_v9, %s11086_s20  ;;  %10774 = vmatpush3.msra.mxu1 %v7705_v39  ;;  %v14554_v9 = vld [vmem:[#allocation51_spill] sm:$0xff] }
0x1b22   :  { %10775 = vmatprep.subr.mxu1 %v7703_v1  ;;  %v7883_v15 = vpop.permute.xlu0 %7882 }
0x1b23   :  { %10776 = vmatpush3.msra.mxu1 %v7703_v1  ;;  %v8225_v48 = vpop.permute.xlu1 %8224  ;;  %10793 = vmatprep.subr.mxu0 %v7883_v15 }
0x1b24   :  { %10777 = vmatprep.subr.mxu1 %v13633_v13  ;;  %4397 = vrot.lane.b32.xlu0 %v14525_v62, %s11086_s20 }
0x1b25   :  { %4395 = vrot.lane.b32.xlu1 %v14526_v61, %s11086_s20  ;;  %10778 = vmatpush3.msra.mxu1 %v13633_v13 }
0x1b26   :  { %10794 = vmatpush3.msra.mxu0 %v7883_v15  ;;  %10780 = vmatmul.mubr.msk.f32.vlgmr.msra.gmra.mxu1 %vm230_vm3, %v14527_v51  ;;  %v8221_v39 = vpop.permute.xlu0 %8220  ;;  %v14555_v15 = vld [vmem:[#allocation52_spill] sm:$0xff] }
0x1b27   :  { %10795 = vmatprep.subr.mxu0 %v7881_v50  ;;  %10819 = vmatprep.subr.msk.mxu1 %vm255_vm4, %v8055_v3  ;;  %v8053_v1 = vpop.permute.xlu1 %8052 }
0x1b28   :  { %10820 = vmatpush3.msk.msra.mxu1 %vm255_vm4, %v8055_v3  ;;  %10796 = vmatpush3.msra.mxu0 %v7881_v50  ;;  %v14531_v50 = vld [vmem:[#allocation32_spill] sm:$0xff] }
0x1b29   :  { %10797 = vmatprep.subr.mxu0 %v7879_v21  ;;  %10821 = vmatprep.subr.mxu1 %v8053_v1 }
0x1b2a   :  { %4401 = vrot.lane.b32.xlu0 %v14528_v29, %s11086_s20  ;;  %4399 = vrot.lane.b32.xlu1 %v14529_v24, %s11086_s20  ;;  %v8219_v13 = vpop.permute.xlu0 %8218 }
0x1b2b   :  { %10798 = vmatpush3.msra.mxu0 %v7879_v21  ;;  %10822 = vmatpush3.msra.mxu1 %v8053_v1  ;;  %v8395_v43 = vpop.permute.xlu1 %8394 }
0x1b2c   :  { %10782 = vmatprep.mubr.msk.f32.mxu1 %vm230_vm3, %v14530_v42  ;;  %10799 = vmatprep.subr.mxu0 %v13639_v16 }
0x1b2d   :  { %10823 = vmatprep.subr.mxu1 %v13657_v37  ;;  %10783 = vmatmul.mubr.msk.f32.gmra.mxu1 %vm230_vm3, %v14531_v50 }
0x1b2e   :  { %10824 = vmatpush3.msra.mxu1 %v13657_v37  ;;  %10800 = vmatpush3.msra.mxu0 %v13639_v16  ;;  %v8217_v21 = vpop.permute.xlu0 %8216  ;;  %v14535_v16 = vld [vmem:[#allocation34_spill] sm:$0xff] }
0x1b2f   :  { %10801 = vmatprep.subr.mxu0 %v13651_v19  ;;  %10825 = vmatprep.subr.mxu1 %v13663_v44  ;;  %v8391_v3 = vpop.permute.xlu1 %8390 }
0x1b30   :  { %4405 = vrot.lane.b32.xlu0 %v14532_v47, %s11086_s20  ;;  %4403 = vrot.lane.b32.xlu1 %v14533_v41, %s11086_s20 }
0x1b31   :  { %10802 = vmatpush3.msra.mxu0 %v13651_v19  ;;  %10826 = vmatpush3.msra.mxu1 %v13663_v44  ;;  %v14536_v44 = vld [vmem:[#allocation113_spill] sm:$0xff] }
0x1b32   :  { %10785 = vmatprep.mubr.msk.f32.mxu1 %vm230_vm3, %v14534_v32  ;;  %10803 = vmatprep.subr.mxu0 %v13681_v4  ;;  %v8223_v19 = vpop.permute.xlu0 %8222 }
0x1b33   :  { %10827 = vmatprep.subr.mxu1 %v13645_v45  ;;  %10786 = vmatmul.mubr.msk.f32.gmra.mxu1 %vm230_vm3, %v14535_v16  ;;  %v8389_v37 = vpop.permute.xlu1 %8388 }
0x1b34   :  { %10828 = vmatpush3.msra.mxu1 %v13645_v45  ;;  %10804 = vmatpush3.msra.mxu0 %v13681_v4  ;;  %v14539_v45 = vld [vmem:[#allocation36_spill] sm:$0xff] }
0x1b35   :  { %10805 = vmatprep.subr.mxu0 %v13687_v12  ;;  %10829 = vmatprep.subr.mxu1 %v13689_v36 }
0x1b36   :  { %4409 = vrot.lane.b32.xlu0 %v14536_v44, %s11086_s20  ;;  %4407 = vrot.lane.b32.xlu1 %v14537_v30, %s11086_s20  ;;  %v8215_v4 = vpop.permute.xlu0 %8214 }
0x1b37   :  { %10806 = vmatpush3.msra.mxu0 %v13687_v12  ;;  %10830 = vmatpush3.msra.mxu1 %v13689_v36  ;;  %v8393_v2 = vpop.permute.xlu1 %8392  ;;  %v14547_v36 = vld [vmem:[#allocation44_spill] sm:$0xff] }
0x1b38   :  { %10788 = vmatprep.mubr.msk.f32.mxu1 %vm230_vm3, %v14538_v59  ;;  %10808 = vmatmul.mubr.msk.f32.vlgmr.msra.gmra.mxu0 %vm230_vm3, %v14451_v7 }
0x1b39   :  { %10831 = vmatprep.subr.mxu1 %v13697_v57  ;;  %10847 = vmatprep.subr.msk.mxu0 %vm255_vm4, %v8225_v48 }
0x1b3a   :  { %10789 = vmatmul.mubr.msk.f32.gmra.mxu1 %vm230_vm3, %v14539_v45  ;;  %10848 = vmatpush3.msk.msra.mxu0 %vm255_vm4, %v8225_v48  ;;  %v8213_v12 = vpop.permute.xlu0 %8212 }
0x1b3b   :  { %10832 = vmatpush3.msra.mxu1 %v13697_v57  ;;  %10849 = vmatprep.subr.mxu0 %v8223_v19  ;;  %v8387_v7 = vpop.permute.xlu1 %8386  ;;  %v14551_v57 = vld [vmem:[#allocation48_spill] sm:$0xff] }
0x1b3c   :  { %10833 = vmatprep.subr.mxu1 %v13695_v38  ;;  %10850 = vmatpush3.msra.mxu0 %v8223_v19 }
0x1b3d   :  { %10834 = vmatpush3.msra.mxu1 %v13695_v38  ;;  %10835 = vmatprep.mubr.msk.f32.mxu1 %vm230_vm3, %v14458_v55  ;;  %v14550_v38 = vld [vmem:[#allocation47_spill] sm:$0xff] }
0x1b3e   :  { %10851 = vmatprep.subr.mxu0 %v8221_v39  ;;  %10875 = vmatprep.subr.msk.mxu1 %vm255_vm4, %v8395_v43 }
0x1b3f   :  { %10836 = vmatmul.mubr.msk.f32.vlgmr.msra.gmra.mxu1 %vm230_vm3, %v14459_v26  ;;  %10852 = vmatpush3.msra.mxu0 %v8221_v39  ;;  %v8385_v55 = vpop.permute.xlu1 %8384  ;;  %v8211_v26 = vpop.permute.xlu0 %8210 }
0x1b40   :  { %10876 = vmatpush3.msk.msra.mxu1 %vm255_vm4, %v8395_v43  ;;  %10810 = vmatprep.mubr.msk.f32.mxu0 %vm230_vm3, %v14452_v56 }
0x1b41   :  { %10853 = vmatprep.subr.mxu0 %v8219_v13  ;;  %10877 = vmatprep.subr.mxu1 %v8393_v2 }
0x1b42   :  { %10811 = vmatmul.mubr.msk.f32.gmra.mxu0 %vm230_vm3, %v14453_v60  ;;  %10878 = vmatpush3.msra.mxu1 %v8393_v2 }
0x1b43   :  { %10854 = vmatpush3.msra.mxu0 %v8219_v13  ;;  %10879 = vmatprep.subr.mxu1 %v8391_v3  ;;  %v8383_v56 = vpop.permute.xlu1 %8382  ;;  %v8381_v60 = vpop.permute.xlu0 %8380 }
0x1b44   :  { %10855 = vmatprep.subr.mxu0 %v8217_v21  ;;  %10880 = vmatpush3.msra.mxu1 %v8391_v3 }
0x1b45   :  { %10856 = vmatpush3.msra.mxu0 %v8217_v21  ;;  %10881 = vmatprep.subr.mxu1 %v8389_v37 }
0x1b46   :  { %10857 = vmatprep.subr.mxu0 %v8215_v4  ;;  %10882 = vmatpush3.msra.mxu1 %v8389_v37 }
0x1b47   :  { %10858 = vmatpush3.msra.mxu0 %v8215_v4  ;;  %10883 = vmatprep.subr.mxu1 %v8387_v7  ;;  %v13831_v13 = vpop.permute.xlu0 %3540  ;;  %v13833_v43 = vpop.permute.xlu1 %3538 }
0x1b48   :  { %10859 = vmatprep.subr.mxu0 %v8213_v12  ;;  %10884 = vmatpush3.msra.mxu1 %v8387_v7  ;;  %v3562_v34 = vadd.f32 %v13833_v43, %v14557_v53 }
0x1b49   :  { %10860 = vmatpush3.msra.mxu0 %v8213_v12  ;;  %10813 = vmatprep.mubr.msk.f32.mxu0 %vm230_vm3, %v14454_v58  ;;  %v14540_v58 = vld [vmem:[#allocation37_spill] sm:$0xff] }
0x1b4a   :  { %10861 = vmatprep.subr.mxu0 %v8211_v26  ;;  %10885 = vmatprep.subr.mxu1 %v8385_v55 }
0x1b4b   :  { %10814 = vmatmul.mubr.msk.f32.gmra.mxu0 %vm230_vm3, %v14455_v27  ;;  %10886 = vmatpush3.msra.mxu1 %v8385_v55  ;;  %v14541_v27 = vld [vmem:[#allocation38_spill] sm:$0xff]  ;;  %v13835_v42 = vpop.permute.xlu0 %3544  ;;  %v13837_v50 = vpop.permute.xlu1 %3542 }
0x1b4c   :  { %10862 = vmatpush3.msra.mxu0 %v8211_v26  ;;  %10887 = vmatprep.subr.mxu1 %v8383_v56 }
0x1b4d   :  { %10888 = vmatpush3.msra.mxu1 %v8383_v56  ;;  %10816 = vmatprep.mubr.msk.f32.mxu0 %vm230_vm3, %v14456_v31  ;;  %v14542_v31 = vld [vmem:[#allocation39_spill] sm:$0xff] }
0x1b4e   :  { %10889 = vmatprep.subr.mxu1 %v8381_v60  ;;  %10838 = vmatprep.mubr.msk.f32.mxu1 %vm230_vm3, %v14460_v35  ;;  %v14544_v35 = vld [vmem:[#allocation41_spill] sm:$0xff] }
0x1b4f   :  { %10890 = vmatpush3.msra.mxu1 %v8381_v60  ;;  %10817 = vmatmul.mubr.msk.f32.gmra.mxu0 %vm230_vm3, %v14457_v8  ;;  %v14543_v8 = vld [vmem:[#allocation40_spill] sm:$0xff]  ;;  %v13839_v21 = vpop.permute.xlu0 %3548  ;;  %v13841_v3 = vpop.permute.xlu1 %3546 }
0x1b50   :  { %10863 = vmatprep.mubr.msk.f32.mxu0 %vm230_vm3, %v14540_v58  ;;  %10839 = vmatmul.mubr.msk.f32.gmra.mxu1 %vm230_vm3, %v14461_v6  ;;  %v14545_v6 = vld [vmem:[#allocation42_spill] sm:$0xff] }
0x1b51   :  { %10841 = vmatprep.mubr.msk.f32.mxu1 %vm230_vm3, %v14462_v40  ;;  %v14546_v40 = vld [vmem:[#allocation43_spill] sm:$0xff] }
0x1b53   :  { %10864 = vmatmul.mubr.msk.f32.vlgmr.msra.gmra.mxu0 %vm230_vm3, %v14541_v27  ;;  %v13843_v47 = vpop.permute.xlu0 %3552  ;;  %v13845_v41 = vpop.permute.xlu1 %3550 }
0x1b54   :  { %10866 = vmatprep.mubr.msk.f32.mxu0 %vm230_vm3, %v14542_v31  ;;  %10842 = vmatmul.mubr.msk.f32.gmra.mxu1 %vm230_vm3, %v14463_v5  ;;  %v14548_v5 = vld [vmem:[#allocation45_spill] sm:$0xff] }
0x1b55   :  { %10844 = vmatprep.mubr.msk.f32.mxu1 %vm230_vm3, %v14464_v20  ;;  %v14549_v20 = vld [vmem:[#allocation46_spill] sm:$0xff] }
0x1b57   :  { %10867 = vmatmul.mubr.msk.f32.gmra.mxu0 %vm230_vm3, %v14543_v8  ;;  %v13847_v32 = vpop.permute.xlu0 %3717  ;;  %v13849_v16 = vpop.permute.xlu1 %3715 }
0x1b58   :  { %10869 = vmatprep.mubr.msk.f32.mxu0 %vm230_vm3, %v14544_v35  ;;  %10845 = vmatmul.mubr.msk.f32.gmra.mxu1 %vm230_vm3, %v14465_v23  ;;  %v14552_v23 = vld [vmem:[#allocation49_spill] sm:$0xff]  ;;  %v3739_v25 = vadd.f32 %v13849_v16, %v3562_v34 }
0x1b59   :  { %10891 = vmatprep.mubr.msk.f32.mxu1 %vm230_vm3, %v14545_v6 }
0x1b5b   :  { %10870 = vmatmul.mubr.msk.f32.gmra.mxu0 %vm230_vm3, %v14546_v40  ;;  %v13851_v37 = vpop.permute.xlu0 %3721  ;;  %v13853_v19 = vpop.permute.xlu1 %3719 }
0x1b5c   :  { %10872 = vmatprep.mubr.msk.f32.mxu0 %vm230_vm3, %v14547_v36  ;;  %10892 = vmatmul.mubr.msk.f32.vlgmr.msra.gmra.mxu1 %vm230_vm3, %v14548_v5 }
0x1b5d   :  { %10894 = vmatprep.mubr.msk.f32.mxu1 %vm230_vm3, %v14549_v20 }
0x1b5f   :  { %10873 = vmatmul.mubr.msk.f32.gmra.mxu0 %vm230_vm3, %v14550_v38  ;;  %v13855_v44 = vpop.permute.xlu0 %3725  ;;  %v13857_v30 = vpop.permute.xlu1 %3723 }
0x1b60   :  { %10895 = vmatmul.mubr.msk.f32.gmra.mxu1 %vm230_vm3, %v14551_v57 }
0x1b61   :  { %10897 = vmatprep.mubr.msk.f32.mxu1 %vm230_vm3, %v14552_v23 }
0x1b63   :  { %v13859_v2 = vpop.permute.xlu0 %3729  ;;  %v13861_v59 = vpop.permute.xlu1 %3727 }
0x1b64   :  { %10898 = vmatmul.mubr.msk.f32.gmra.mxu1 %vm230_vm3, %v14553_v18 }
0x1b65   :  { %10900 = vmatprep.mubr.msk.f32.mxu1 %vm230_vm3, %v14554_v9 }
0x1b67   :  { %v3888_v45 = vpop.permute.xlu0 %3887  ;;  %v13863_v4 = vpop.permute.xlu1 %3885 }
0x1b68   :  { %10901 = vmatmul.mubr.msk.f32.gmra.mxu1 %vm230_vm3, %v14555_v15  ;;  %v3909_v43 = vadd.f32 %v13863_v4, %v3739_v25 }
0x1b69   :  { %v10753_v48 = vpop.f32.mrf.mxu0 }
0x1b6a   :  { %7663 = vrot.lane.b32.xlu0 %v10753_v48, %s11086_s20 }
0x1b6b   :  { %v7614_v62 = vpop.f32.mrf.mxu0  ;;  %v13865_v7 = vpop.permute.xlu0 %3891 }
0x1b6c   :  { %7661 = vrot.lane.b32.xlu1 %v7614_v62, %s11086_s20  ;;  %v13867_v12 = vpop.permute.xlu1 %3889 }
0x1b6d   :  { %v10756_v61 = vpop.f32.mrf.mxu0 }
0x1b6e   :  { %7667 = vrot.lane.b32.xlu0 %v10756_v61, %s11086_s20 }
0x1b6f   :  { %v7624_v51 = vpop.f32.mrf.mxu0  ;;  %v13869_v55 = vpop.permute.xlu0 %3895 }
0x1b70   :  { %7665 = vrot.lane.b32.xlu1 %v7624_v51, %s11086_s20  ;;  %v13871_v26 = vpop.permute.xlu1 %3893 }
0x1b71   :  { %v10759_v39 = vpop.f32.mrf.mxu0 }
0x1b72   :  { %7671 = vrot.lane.b32.xlu0 %v10759_v39, %s11086_s20 }
0x1b73   :  { %v7634_v1 = vpop.f32.mrf.mxu0  ;;  %v13873_v56 = vpop.permute.xlu0 %3899 }
0x1b74   :  { %7669 = vrot.lane.b32.xlu1 %v7634_v1, %s11086_s20  ;;  %v13875_v60 = vpop.permute.xlu1 %3897 }
0x1b75   :  { %v10762_v29 = vpop.f32.mrf.mxu0 }
0x1b76   :  { %7675 = vrot.lane.b32.xlu0 %v10762_v29, %s11086_s20 }
0x1b77   :  { %v7644_v24 = vpop.f32.mrf.mxu0  ;;  %v4058_v58 = vpop.permute.xlu0 %4057 }
0x1b78   :  { %7673 = vrot.lane.b32.xlu1 %v7644_v24, %s11086_s20  ;;  %v13877_v27 = vpop.permute.xlu1 %4055 }
0x1b7b   :  { %v13879_v31 = vpop.permute.xlu0 %4061 }
0x1b7c   :  { %v13882_v6 = vpop.permute.xlu1 %4059 }
0x1b7f   :  { %v13885_v40 = vpop.permute.xlu0 %4065 }
0x1b80   :  { %v13887_v36 = vpop.permute.xlu1 %4063 }
0x1b83   :  { %v13889_v5 = vpop.permute.xlu0 %4069 }
0x1b84   :  { %v13891_v20 = vpop.permute.xlu1 %4067 }
0x1b87   :  { %v4228_v38 = vpop.permute.xlu0 %4227 }
0x1b88   :  { %v4226_v9 = vpop.permute.xlu1 %4225 }
0x1b8b   :  { %v13895_v15 = vpop.permute.xlu0 %4231 }
0x1b8c   :  { %v13899_v62 = vpop.permute.xlu1 %4229 }
0x1b8f   :  { %v13901_v51 = vpop.permute.xlu0 %4235 }
0x1b90   :  { %v13905_v29 = vpop.permute.xlu1 %4233 }
0x1be6   :  { %v10781_v8 = vpop.f32.mrf.mxu1 }
0x1be7   :  { %7840 = vrot.lane.b32.xlu0 %v10781_v8, %s11086_s20  ;;  %v13909_v8 = vpop.permute.xlu0 %4239 }
0x1be8   :  { %v7791_v35 = vpop.f32.mrf.mxu1 }
0x1be9   :  { %7838 = vrot.lane.b32.xlu1 %v7791_v35, %s11086_s20 }
0x1beb   :  { %v4398_v14 = vpop.permute.xlu0 %4397 }
0x1bed   :  { %v10784_v18 = vpop.f32.mrf.mxu1 }
0x1bef   :  { %v7801_v48 = vpop.f32.mrf.mxu1 }
0x1bf3   :  { %v10787_v1 = vpop.f32.mrf.mxu1 }
0x1bf5   :  { %v7811_v24 = vpop.f32.mrf.mxu1 }
0x1bf8   :  { %v10809_v57 = vpop.f32.mrf.mxu0 }
0x1bf9   :  { %8010 = vrot.lane.b32.xlu0 %v10809_v57, %s11086_s20 }
0x1bfa   :  { %v7961_v23 = vpop.f32.mrf.mxu0  ;;  %v10790_v57 = vpop.f32.mrf.mxu1 }
0x1bfb   :  { %8008 = vrot.lane.b32.xlu1 %v7961_v23, %s11086_s20  ;;  %v13912_v23 = vpop.permute.xlu1 %4237 }
0x1bfd   :  { %7844 = vrot.lane.b32.xlu0 %v10784_v18, %s11086_s20 }
0x1bff   :  { %7842 = vrot.lane.b32.xlu1 %v7801_v48, %s11086_s20  ;;  %v7821_v48 = vpop.f32.mrf.mxu1 }
0x1c02   :  { %v10812_v61 = vpop.f32.mrf.mxu0 }
0x1c03   :  { %8014 = vrot.lane.b32.xlu0 %v10812_v61, %s11086_s20  ;;  %v14556_v61 = vld [vmem:[#allocation59_spill] sm:$0xff] }
0x1c04   :  { %v7971_v39 = vpop.f32.mrf.mxu0 }
0x1c05   :  { %8012 = vrot.lane.b32.xlu1 %v7971_v39, %s11086_s20  ;;  %v3563_v39 = vadd.f32 %v14556_v61, %v13831_v13  ;;  %v14559_v61 = vld [vmem:[#allocation62_spill] sm:$0xff] }
0x1c06   :  { %v3564_v46 = vadd.f32 %v13837_v50, %v14559_v61  ;;  %v14561_v50 = vld [vmem:[#allocation64_spill] sm:$0xff] }
0x1c07   :  { %7848 = vrot.lane.b32.xlu0 %v10787_v1, %s11086_s20  ;;  %v3740_v22 = vadd.f32 %v13847_v32, %v3563_v39  ;;  %v3566_v25 = vadd.f32 %v13841_v3, %v14561_v50 }
0x1c09   :  { %7846 = vrot.lane.b32.xlu1 %v7811_v24, %s11086_s20  ;;  %v10837_v24 = vpop.f32.mrf.mxu1  ;;  %v3910_v10 = vadd.f32 %v3888_v45, %v3740_v22  ;;  %v3741_v22 = vadd.f32 %v13853_v19, %v3564_v46  ;;  %v4079_v45 = vadd.f32 %v13877_v27, %v3909_v43  ;;  %v14562_v19 = vld [vmem:[#allocation65_spill] sm:$0xff]  ;;  %v3743_v27 = vadd.f32 %v13857_v30, %v3566_v25 }
0x1c0b   :  { %v10815_v35 = vpop.f32.mrf.mxu0  ;;  %v4080_v32 = vadd.f32 %v4058_v58, %v3910_v10  ;;  %v3911_v58 = vadd.f32 %v13867_v12, %v3741_v22 }
0x1c0c   :  { %8018 = vrot.lane.b32.xlu0 %v10815_v35, %s11086_s20  ;;  %v4396_v35 = vpop.permute.xlu1 %4395 }
0x1c0d   :  { %v7981_v18 = vpop.f32.mrf.mxu0  ;;  %v4250_v39 = vadd.f32 %v4228_v38, %v4080_v32 }
0x1c0e   :  { %8016 = vrot.lane.b32.xlu1 %v7981_v18, %s11086_s20  ;;  %v3565_v18 = vadd.f32 %v14558_v33, %v13835_v42  ;;  %v14560_v33 = vld [vmem:[#allocation63_spill] sm:$0xff] }
0x1c0f   :  { %v10818_v1 = vpop.f32.mrf.mxu0  ;;  %v3567_v42 = vadd.f32 %v14560_v33, %v13839_v21  ;;  %v4420_v46 = vadd.f32 %v4398_v14, %v4250_v39 }
0x1c10   :  { %7852 = vrot.lane.b32.xlu0 %v10790_v57, %s11086_s20  ;;  %v8131_v57 = vpop.f32.mrf.mxu1  ;;  %v3742_v53 = vadd.f32 %v13851_v37, %v3565_v18  ;;  %v4400_v37 = vpop.permute.xlu1 %4399 }
0x1c11   :  { %v7991_v13 = vpop.f32.mrf.mxu0  ;;  %v3744_v10 = vadd.f32 %v13855_v44, %v3567_v42  ;;  %v4081_v44 = vadd.f32 %v13882_v6, %v3911_v58  ;;  %v4428_v6 = vsub.f32 0.0, %v4420_v46 }
0x1c12   :  { %7850 = vrot.lane.b32.xlu1 %v7821_v48, %s11086_s20  ;;  %v4402_v48 = vpop.permute.xlu0 %4401  ;;  %v10840_v34 = vpop.f32.mrf.mxu1  ;;  %v3912_v16 = vadd.f32 %v13865_v7, %v3742_v53  ;;  %v3569_v7 = vadd.f32 %v14562_v19, %v13843_v47  ;;  %v3913_v47 = vadd.f32 %v13871_v26, %v3743_v27 }
0x1c13   :  { %v10865_v4 = vpop.f32.mrf.mxu0  ;;  %v3914_v3 = vadd.f32 %v13869_v55, %v3744_v10  ;;  %v4251_v55 = vadd.f32 %v13899_v62, %v4081_v44 }
0x1c14   :  { %8022 = vrot.lane.b32.xlu0 %v10818_v1, %s11086_s20  ;;  %v4082_v21 = vadd.f32 %v13879_v31, %v3912_v16  ;;  %v4249_v1 = vadd.f32 %v4226_v9, %v4079_v45  ;;  %v8141_v38 = vpop.f32.mrf.mxu1  ;;  %v14563_v31 = vld [vmem:[#allocation66_spill] sm:$0xff]  ;;  %v3746_v9 = vadd.f32 %v13859_v2, %v3569_v7  ;;  %v4404_v53 = vpop.permute.xlu1 %4403 }
0x1c15   :  { %v3568_v14 = vadd.f32 %v13845_v41, %v14563_v31  ;;  %v4083_v41 = vadd.f32 %v13887_v36, %v3913_v47  ;;  %v4421_v43 = vadd.f32 %v4400_v37, %v4251_v55 }
0x1c16   :  { %8020 = vrot.lane.b32.xlu1 %v7991_v13, %s11086_s20  ;;  %v4419_v18 = vadd.f32 %v4396_v35, %v4249_v1  ;;  %v4406_v12 = vpop.permute.xlu0 %4405  ;;  %v8301_v13 = vpop.f32.mrf.mxu0  ;;  %v3916_v35 = vadd.f32 %v13873_v56, %v3746_v9 }
0x1c17   :  { %v10843_v30 = vpop.f32.mrf.mxu1  ;;  %v4253_v33 = vadd.f32 %v13905_v29, %v4083_v41  ;;  %v4429_v45 = vsub.f32 0.0, %v4421_v43 }
0x1c18   :  { %8180 = vrot.lane.b32.xlu0 %v10837_v24, %s11086_s20  ;;  %v4252_v24 = vadd.f32 %v13895_v15, %v4082_v21  ;;  %v3745_v15 = vadd.f32 %v13861_v59, %v3568_v14  ;;  %v4427_v26 = vsub.f32 0.0, %v4419_v18  ;;  %v4086_v62 = vadd.f32 %v13889_v5, %v3916_v35  ;;  %v10868_v32 = vpop.f32.mrf.mxu0  ;;  %v4408_v39 = vpop.permute.xlu1 %4407 }
0x1c19   :  { %v4437_v59 = vmul.f32 1.442695, %v4428_v6  ;;  %v4439_v37 = vmul.f32 1.442695, %v4429_v45 }
0x1c1a   :  { %8178 = vrot.lane.b32.xlu1 %v8131_v57, %s11086_s20  ;;  %v4084_v57 = vadd.f32 %v13885_v40, %v3914_v3  ;;  %v4422_v61 = vadd.f32 %v4402_v48, %v4252_v24  ;;  %v3915_v40 = vadd.f32 %v13875_v60, %v3745_v15  ;;  %v8151_v48 = vpop.f32.mrf.mxu1  ;;  %v4256_v16 = vadd.f32 %v13909_v8, %v4086_v62  ;;  %v8311_v29 = vpop.f32.mrf.mxu0 }
0x1c1b   :  { %v4423_v60 = vadd.f32 %v4404_v53, %v4253_v33  ;;  %11013 = vpow2.f32 %v4437_v59 }
0x1c1c   :  { %8350 = vrot.lane.b32.xlu0 %v10865_v4, %s11086_s20  ;;  %v4254_v2 = vadd.f32 %v13901_v51, %v4084_v57  ;;  %v4430_v42 = vsub.f32 0.0, %v4422_v61  ;;  %v4085_v36 = vadd.f32 %v13891_v20, %v3915_v40  ;;  %v4410_v51 = vpop.permute.xlu0 %4409  ;;  %v10846_v22 = vpop.f32.mrf.mxu1 }
0x1c1d   :  { %v4426_v10 = vadd.f32 %v4410_v51, %v4256_v16  ;;  %v4431_v4 = vsub.f32 0.0, %v4423_v60  ;;  %v10871_v58 = vpop.f32.mrf.mxu0  ;;  %v7662_v16 = vpop.permute.xlu1 %7661 }
0x1c1e   :  { %8348 = vrot.lane.b32.xlu1 %v8301_v13, %s11086_s20  ;;  %v4424_v56 = vadd.f32 %v4406_v12, %v4254_v2  ;;  %v4255_v5 = vadd.f32 %v13912_v23, %v4085_v36  ;;  %v4441_v50 = vmul.f32 1.442695, %v4430_v42  ;;  %v8161_v20 = vpop.f32.mrf.mxu1 }
0x1c1f   :  { %v4434_v23 = vsub.f32 0.0, %v4426_v10  ;;  %v4443_v46 = vmul.f32 1.442695, %v4431_v4  ;;  %v8321_v7 = vpop.f32.mrf.mxu0 }
0x1c20   :  { %8184 = vrot.lane.b32.xlu0 %v10840_v34, %s11086_s20  ;;  %v4435_v34 = vmul.f32 1.442695, %v4427_v26  ;;  %v4432_v25 = vsub.f32 0.0, %v4424_v56  ;;  %v4425_v8 = vadd.f32 %v4408_v39, %v4255_v5  ;;  %v10893_v21 = vpop.f32.mrf.mxu1  ;;  %v7664_v51 = vpop.permute.xlu0 %7663 }
0x1c21   :  { %v10874_v44 = vpop.f32.mrf.mxu0  ;;  %v7666_v60 = vpop.permute.xlu1 %7665 }
0x1c22   :  { %8182 = vrot.lane.b32.xlu1 %v8141_v38, %s11086_s20  ;;  %11015 = vpow2.f32 %v4435_v34  ;;  %v4445_v1 = vmul.f32 1.442695, %v4432_v25  ;;  %v4433_v19 = vsub.f32 0.0, %v4425_v8  ;;  %v8471_v27 = vpop.f32.mrf.mxu1  ;;  %v4449_v38 = vmul.f32 1.442695, %v4434_v23 }
0x1c23   :  { %11017 = vpow2.f32 %v4441_v50  ;;  %v8331_v31 = vpop.f32.mrf.mxu0 }
0x1c24   :  { %8354 = vrot.lane.b32.xlu0 %v10868_v32, %s11086_s20  ;;  %11019 = vpow2.f32 %v4439_v37  ;;  %v4447_v3 = vmul.f32 1.442695, %v4433_v19  ;;  %v10896_v24 = vpop.f32.mrf.mxu1  ;;  %v7668_v45 = vpop.permute.xlu0 %7667 }
0x1c25   :  { %11021 = vpow2.f32 %v4445_v1  ;;  %v7670_v39 = vpop.permute.xlu1 %7669 }
0x1c26   :  { %8352 = vrot.lane.b32.xlu1 %v8311_v29, %s11086_s20  ;;  %11023 = vpow2.f32 %v4443_v46  ;;  %v8481_v14 = vpop.f32.mrf.mxu1 }
0x1c27   :  { %11025 = vpow2.f32 %v4449_v38 }
0x1c28   :  { %8188 = vrot.lane.b32.xlu0 %v10843_v30, %s11086_s20  ;;  %v11014_v18 = vpop.eup %11013  ;;  %11027 = vpow2.f32 %v4447_v3  ;;  %v10899_v57 = vpop.f32.mrf.mxu1 }
0x1c29   :  { %v4452_v9 = vadd.f32 1.0, %v11014_v18  ;;  %v7672_v5 = vpop.permute.xlu0 %7671  ;;  %v13987_v50 = vpop.permute.xlu1 %7673 }
0x1c2a   :  { %8186 = vrot.lane.b32.xlu1 %v8151_v48, %s11086_s20  ;;  %v8491_v35 = vpop.f32.mrf.mxu1 }
0x1c2b   :  { %11029 = vrcp.f32 %v4452_v9 }
0x1c2c   :  { %8358 = vrot.lane.b32.xlu0 %v10871_v58, %s11086_s20  ;;  %v10902_v43 = vpop.f32.mrf.mxu1 }
0x1c2d   :  { %v7676_v29 = vpop.permute.xlu0 %7675 }
0x1c2e   :  { %8356 = vrot.lane.b32.xlu1 %v8321_v7, %s11086_s20  ;;  %v8501_v32 = vpop.f32.mrf.mxu1 }
0x1c2f   :  { %v11016_v12 = vpop.eup %11015 }
0x1c30   :  { %8192 = vrot.lane.b32.xlu0 %v10846_v22, %s11086_s20  ;;  %v11018_v47 = vpop.eup %11017  ;;  %v4451_v13 = vadd.f32 1.0, %v11016_v12 }
0x1c31   :  { %v11020_v30 = vpop.eup %11019  ;;  %v4454_v55 = vadd.f32 1.0, %v11018_v47 }
0x1c32   :  { %8190 = vrot.lane.b32.xlu1 %v8161_v20, %s11086_s20  ;;  %v11022_v6 = vpop.eup %11021  ;;  %11031 = vrcp.f32 %v4451_v13  ;;  %v4453_v61 = vadd.f32 1.0, %v11020_v30 }
0x1c33   :  { %v11024_v15 = vpop.eup %11023  ;;  %11033 = vrcp.f32 %v4454_v55  ;;  %v4456_v53 = vadd.f32 1.0, %v11022_v6  ;;  %v7686_v6 = vadd.f32 %v13467_v28, %v7664_v51 }
0x1c34   :  { %8362 = vrot.lane.b32.xlu0 %v10874_v44, %s11086_s20  ;;  %v11026_v41 = vpop.eup %11025  ;;  %11035 = vrcp.f32 %v4453_v61  ;;  %v4455_v2 = vadd.f32 1.0, %v11024_v15  ;;  %v7685_v15 = vadd.f32 %v7662_v16, %v13471_v0  ;;  %v7689_v0 = vadd.f32 %v7670_v39, %v13497_v52 }
0x1c35   :  { %v11028_v26 = vpop.eup %11027  ;;  %11037 = vrcp.f32 %v4456_v53  ;;  %v4458_v40 = vadd.f32 1.0, %v11026_v41  ;;  %v7688_v41 = vadd.f32 %v13475_v54, %v7668_v45 }
0x1c36   :  { %8360 = vrot.lane.b32.xlu1 %v8331_v31, %s11086_s20  ;;  %11039 = vrcp.f32 %v4455_v2  ;;  %v4457_v62 = vadd.f32 1.0, %v11028_v26 }
0x1c37   :  { %11041 = vrcp.f32 %v4458_v40  ;;  %v7687_v40 = vadd.f32 %v7666_v60, %v13481_v11  ;;  %v7692_v11 = vadd.f32 %v13499_v17, %v7676_v29 }
0x1c38   :  { %8520 = vrot.lane.b32.xlu0 %v10893_v21, %s11086_s20  ;;  %v11030_v48 = vpop.eup %11029  ;;  %11043 = vrcp.f32 %v4457_v62 }
0x1c3a   :  { %8518 = vrot.lane.b32.xlu1 %v8471_v27, %s11086_s20 }
0x1c3c   :  { %8524 = vrot.lane.b32.xlu0 %v10896_v24, %s11086_s20 }
0x1c3e   :  { %8522 = vrot.lane.b32.xlu1 %v8481_v14, %s11086_s20 }
0x1c3f   :  { %v11032_v33 = vpop.eup %11031 }
0x1c40   :  { %8528 = vrot.lane.b32.xlu0 %v10899_v57, %s11086_s20  ;;  %v11034_v59 = vpop.eup %11033 }
0x1c41   :  { %v11036_v42 = vpop.eup %11035 }
0x1c42   :  { %8526 = vrot.lane.b32.xlu1 %v8491_v35, %s11086_s20  ;;  %v11038_v56 = vpop.eup %11037 }
0x1c43   :  { %v11040_v36 = vpop.eup %11039 }
0x1c44   :  { %8532 = vrot.lane.b32.xlu0 %v10902_v43, %s11086_s20  ;;  %v11042_v22 = vpop.eup %11041 }
0x1c45   :  { %v11044_v34 = vpop.eup %11043 }
0x1c46   :  { %8530 = vrot.lane.b32.xlu1 %v8501_v32, %s11086_s20 }
0x1c48   :  { %4474 = vperm.xlu0 %10917, %v11030_v48  }
0x1c4a   :  { %4469 = vperm.xlu1 %10918, %v11032_v33   ;;  %v7690_v33 = vadd.f32 %v13487_v49, %v7672_v5 }
0x1c4c   :  { %4484 = vperm.xlu0 %10917, %v11034_v59  }
0x1c4e   :  { %4479 = vperm.xlu1 %10918, %v11036_v42  }
0x1c50   :  { %4494 = vperm.xlu0 %10917, %v11038_v56  }
0x1c52   :  { %4489 = vperm.xlu1 %10918, %v11040_v36  }
0x1c54   :  { %4504 = vperm.xlu0 %10917, %v11042_v22  }
0x1c56   :  { %4499 = vperm.xlu1 %10918, %v11044_v34  }
0x1c59   :  { %v7841_v25 = vpop.permute.xlu0 %7840 }
0x1c5a   :  { %v7863_v35 = vadd.f32 %v7841_v25, %v7686_v6 }
0x1c5b   :  { %v7839_v10 = vpop.permute.xlu1 %7838 }
0x1c5c   :  { %v7862_v2 = vadd.f32 %v7839_v10, %v7685_v15 }
0x1c6b   :  { %v8011_v20 = vpop.permute.xlu0 %8010 }
0x1c6c   :  { %v8033_v26 = vadd.f32 %v8011_v20, %v7863_v35 }
0x1c6d   :  { %v8009_v37 = vpop.permute.xlu1 %8008 }
0x1c6e   :  { %v8032_v62 = vadd.f32 %v8009_v37, %v7862_v2 }
0x1c6f   :  { %v7845_v4 = vpop.permute.xlu0 %7844 }
0x1c70   :  { %v7865_v32 = vadd.f32 %v7845_v4, %v7688_v41  ;;  %v7691_v4 = vadd.f32 %v13987_v50, %v13507_v63 }
0x1c71   :  { %v7843_v8 = vpop.permute.xlu1 %7842 }
0x1c72   :  { %v7864_v42 = vadd.f32 %v7843_v8, %v7687_v40 }
0x1c75   :  { %v8015_v58 = vpop.permute.xlu0 %8014 }
0x1c76   :  { %v8035_v28 = vadd.f32 %v8015_v58, %v7865_v32 }
0x1c77   :  { %v8013_v21 = vpop.permute.xlu1 %8012 }
0x1c78   :  { %v8034_v54 = vadd.f32 %v8013_v21, %v7864_v42 }
0x1c79   :  { %v7849_v1 = vpop.permute.xlu0 %7848 }
0x1c7a   :  { %v7867_v51 = vadd.f32 %v7849_v1, %v7690_v33 }
0x1c7b   :  { %v7847_v23 = vpop.permute.xlu1 %7846 }
0x1c7c   :  { %v7866_v60 = vadd.f32 %v7847_v23, %v7689_v0 }
0x1c7e   :  { %v8019_v46 = vpop.permute.xlu0 %8018 }
0x1c7f   :  { %v8037_v25 = vadd.f32 %v8019_v46, %v7867_v51  ;;  %v14564_v51 = vld [vmem:[#allocation20_spill] sm:$0xff] }
0x1c80   :  { %v8017_v19 = vpop.permute.xlu1 %8016 }
0x1c81   :  { %v8036_v8 = vadd.f32 %v8017_v19, %v7866_v60 }
0x1c82   :  { %v7853_v7 = vpop.permute.xlu0 %7852 }
0x1c83   :  { %v7869_v52 = vadd.f32 %v7853_v7, %v7692_v11 }
0x1c84   :  { %v7851_v27 = vpop.permute.xlu1 %7850 }
0x1c86   :  { %v8023_v38 = vpop.permute.xlu0 %8022 }
0x1c87   :  { %v8039_v17 = vadd.f32 %v8023_v38, %v7869_v52 }
0x1c88   :  { %v13989_v3 = vpop.permute.xlu1 %8020 }
0x1c8a   :  { %v8181_v44 = vpop.permute.xlu0 %8180 }
0x1c8b   :  { %v8203_v48 = vadd.f32 %v8181_v44, %v8033_v26 }
0x1c8c   :  { %v8179_v24 = vpop.permute.xlu1 %8178 }
0x1c8d   :  { %v8202_v56 = vadd.f32 %v8179_v24, %v8032_v62 }
0x1c8e   :  { %v8351_v18 = vpop.permute.xlu0 %8350 }
0x1c8f   :  { %v8373_v36 = vadd.f32 %v8351_v18, %v8203_v48  ;;  %v7868_v18 = vadd.f32 %v7851_v27, %v7691_v4 }
0x1c90   :  { %v8349_v12 = vpop.permute.xlu1 %8348 }
0x1c91   :  { %v8372_v16 = vadd.f32 %v8349_v12, %v8202_v56 }
0x1c92   :  { %v8185_v31 = vpop.permute.xlu0 %8184 }
0x1c93   :  { %v8205_v34 = vadd.f32 %v8185_v31, %v8035_v28 }
0x1c94   :  { %v8183_v14 = vpop.permute.xlu1 %8182 }
0x1c95   :  { %v8204_v20 = vadd.f32 %v8183_v14, %v8034_v54 }
0x1c96   :  { %v8355_v9 = vpop.permute.xlu0 %8354 }
0x1c97   :  { %v8375_v49 = vadd.f32 %v8355_v9, %v8205_v34  ;;  %v8038_v9 = vadd.f32 %v13989_v3, %v7868_v18 }
0x1c98   :  { %v8353_v47 = vpop.permute.xlu1 %8352 }
0x1c99   :  { %v8374_v21 = vadd.f32 %v8353_v47, %v8204_v20  ;;  %v14566_v20 = vld [vmem:[#allocation54_spill] sm:$0xff] }
0x1c9a   :  { %v8189_v13 = vpop.permute.xlu0 %8188 }
0x1c9b   :  { %v8207_v39 = vadd.f32 %v8189_v13, %v8037_v25 }
0x1c9c   :  { %v8187_v30 = vpop.permute.xlu1 %8186 }
0x1c9d   :  { %v8206_v29 = vadd.f32 %v8187_v30, %v8036_v8  ;;  %v14567_v8 = vld [vmem:[#allocation53_spill] sm:$0xff] }
0x1c9e   :  { %v8359_v57 = vpop.permute.xlu0 %8358 }
0x1c9f   :  { %v8377_v23 = vadd.f32 %v8359_v57, %v8207_v39 }
0x1ca0   :  { %v8357_v55 = vpop.permute.xlu1 %8356 }
0x1ca1   :  { %v8376_v63 = vadd.f32 %v8357_v55, %v8206_v29  ;;  %v14569_v29 = vld [vmem:[#allocation55_spill] sm:$0xff] }
0x1ca2   :  { %v8193_v61 = vpop.permute.xlu0 %8192 }
0x1ca3   :  { %v8209_v50 = vadd.f32 %v8193_v61, %v8039_v17 }
0x1ca4   :  { %v8191_v53 = vpop.permute.xlu1 %8190 }
0x1ca5   :  { %v8208_v6 = vadd.f32 %v8191_v53, %v8038_v9 }
0x1ca6   :  { %v8363_v43 = vpop.permute.xlu0 %8362 }
0x1ca7   :  { %v8379_v15 = vadd.f32 %v8363_v43, %v8209_v50  ;;  %v14571_v50 = vld [vmem:[#allocation57_spill] sm:$0xff] }
0x1ca8   :  { %v8361_v59 = vpop.permute.xlu1 %8360 }
0x1ca9   :  { %v8378_v35 = vadd.f32 %v8361_v59, %v8208_v6 }
0x1caa   :  { %v8521_v22 = vpop.permute.xlu0 %8520 }
0x1cab   :  { %v8543_v45 = vadd.f32 %v8521_v22, %v8373_v36 }
0x1cac   :  { %v8519_v10 = vpop.permute.xlu1 %8518 }
0x1cad   :  { %v8551_v5 = vsub.f32 0.0, %v8543_v45  ;;  %v8542_v37 = vadd.f32 %v8519_v10, %v8372_v16  ;;  %v14565_v45 = vld [vmem:[#allocation19_spill] sm:$0xff] }
0x1cae   :  { %v8525_v58 = vpop.permute.xlu0 %8524 }
0x1caf   :  { %v8560_v1 = vmul.f32 1.442695, %v8551_v5  ;;  %v8550_v44 = vsub.f32 0.0, %v8542_v37  ;;  %v8545_v24 = vadd.f32 %v8525_v58, %v8375_v49 }
0x1cb0   :  { %v8523_v46 = vpop.permute.xlu1 %8522 }
0x1cb1   :  { %11045 = vpow2.f32 %v8560_v1  ;;  %v8558_v12 = vmul.f32 1.442695, %v8550_v44  ;;  %v8553_v31 = vsub.f32 0.0, %v8545_v24  ;;  %v8544_v14 = vadd.f32 %v8523_v46, %v8374_v21  ;;  %v14568_v1 = vld [vmem:[#allocation56_spill] sm:$0xff] }
0x1cb2   :  { %v8529_v19 = vpop.permute.xlu0 %8528 }
0x1cb3   :  { %11047 = vpow2.f32 %v8558_v12  ;;  %v8564_v7 = vmul.f32 1.442695, %v8553_v31  ;;  %v8552_v47 = vsub.f32 0.0, %v8544_v14  ;;  %v8547_v13 = vadd.f32 %v8529_v19, %v8377_v23  ;;  %v14570_v31 = vld [vmem:[#allocation58_spill] sm:$0xff] }
0x1cb4   :  { %v8527_v27 = vpop.permute.xlu1 %8526 }
0x1cb5   :  { %11049 = vpow2.f32 %v8564_v7  ;;  %v8562_v38 = vmul.f32 1.442695, %v8552_v47  ;;  %v8555_v30 = vsub.f32 0.0, %v8547_v13  ;;  %v8546_v57 = vadd.f32 %v8527_v27, %v8376_v63 }
0x1cb6   :  { %v8533_v41 = vpop.permute.xlu0 %8532 }
0x1cb7   :  { %11051 = vpow2.f32 %v8562_v38  ;;  %v8568_v2 = vmul.f32 1.442695, %v8555_v30  ;;  %v8554_v26 = vsub.f32 0.0, %v8546_v57  ;;  %v8549_v3 = vadd.f32 %v8533_v41, %v8379_v15  ;;  %v14572_v38 = vld [vmem:[#allocation115_spill] sm:$0xff] }
0x1cb8   :  { %v8531_v55 = vpop.permute.xlu1 %8530 }
0x1cb9   :  { %11053 = vpow2.f32 %v8568_v2  ;;  %v8566_v61 = vmul.f32 1.442695, %v8554_v26  ;;  %v8557_v40 = vsub.f32 0.0, %v8549_v3  ;;  %v8548_v62 = vadd.f32 %v8531_v55, %v8378_v35  ;;  %v14573_v35 = vld [vmem:[#allocation4_spill] sm:$0xff]  ;;  %v14574_v26 = vld [vmem:[#allocation6_spill] sm:$0xff] }
0x1cbb   :  { %11055 = vpow2.f32 %v8566_v61  ;;  %v8572_v32 = vmul.f32 1.442695, %v8557_v40  ;;  %v8556_v53 = vsub.f32 0.0, %v8548_v62  ;;  %v14575_v61 = vld [vmem:[#allocation5_spill] sm:$0xff] }
0x1cbd   :  { %11057 = vpow2.f32 %v8572_v32  ;;  %v8570_v43 = vmul.f32 1.442695, %v8556_v53  ;;  %v14576_v32 = vld [vmem:[#allocation8_spill] sm:$0xff] }
0x1cbe   :  { %v11046_v48 = vpop.eup %11045 }
0x1cbf   :  { %v8575_v33 = vadd.f32 1.0, %v11046_v48  ;;  %11059 = vpow2.f32 %v8570_v43  ;;  %v14577_v48 = vld [vmem:[#allocation7_spill] sm:$0xff] }
0x1cc0   :  { %v11048_v42 = vpop.eup %11047 }
0x1cc1   :  { %11061 = vrcp.f32 %v8575_v33  ;;  %v8574_v59 = vadd.f32 1.0, %v11048_v42 }
0x1cc2   :  { %v11050_v28 = vpop.eup %11049 }
0x1cc3   :  { %11063 = vrcp.f32 %v8574_v59  ;;  %v8577_v56 = vadd.f32 1.0, %v11050_v28  ;;  %v4475_v36 = vpop.permute.xlu0 %4474  ;;  %v14578_v59 = vld [vmem:[#allocation10_spill] sm:$0xff] }
0x1cc4   :  { %v11052_v0 = vpop.eup %11051  ;;  %v4508_v22 = vmul.f32 %v4475_v36, %v14564_v51  ;;  %v14579_v36 = vld [vmem:[#allocation9_spill] sm:$0xff] }
0x1cc5   :  { %11065 = vrcp.f32 %v8577_v56  ;;  %v8576_v54 = vadd.f32 1.0, %v11052_v0  ;;  %v4470_v16 = vpop.permute.xlu1 %4469 }
0x1cc6   :  { %v11054_v34 = vpop.eup %11053  ;;  %4516 = vst.msk [vmem:[%s14092_s11 + $0x8] sm:$0xff] %vm2864_vm2, %v4508_v22  ;;  %v4507_v11 = vmul.f32 %v4470_v16, %v14565_v45 }
0x1cc7   :  { %11067 = vrcp.f32 %v8576_v54  ;;  %v8579_v60 = vadd.f32 1.0, %v11054_v34  ;;  %v4485_v25 = vpop.permute.xlu0 %4484 }
0x1cc8   :  { %v11056_v10 = vpop.eup %11055  ;;  %4515 = vst.msk [vmem:[%s14092_s11] sm:$0xff] %vm2864_vm2, %v4507_v11  ;;  %v4510_v49 = vmul.f32 %v4485_v25, %v14566_v20 }
0x1cc9   :  { %11069 = vrcp.f32 %v8579_v60  ;;  %v8578_v5 = vadd.f32 1.0, %v11056_v10  ;;  %v4480_v37 = vpop.permute.xlu1 %4479 }
0x1cca   :  { %v11058_v4 = vpop.eup %11057  ;;  %4518 = vst.msk [vmem:[%s14092_s11 + $0x18] sm:$0xff] %vm2864_vm2, %v4510_v49  ;;  %v4509_v52 = vmul.f32 %v4480_v37, %v14567_v8 }
0x1ccb   :  { %11071 = vrcp.f32 %v8578_v5  ;;  %v8581_v39 = vadd.f32 1.0, %v11058_v4  ;;  %v4495_v58 = vpop.permute.xlu0 %4494 }
0x1ccc   :  { %v11060_v21 = vpop.eup %11059  ;;  %4517 = vst.msk [vmem:[%s14092_s11 + $0x10] sm:$0xff] %vm2864_vm2, %v4509_v52  ;;  %v4512_v44 = vmul.f32 %v4495_v58, %v14568_v1 }
0x1ccd   :  { %11073 = vrcp.f32 %v8581_v39  ;;  %v8580_v24 = vadd.f32 1.0, %v11060_v21  ;;  %v4490_v18 = vpop.permute.xlu1 %4489 }
0x1cce   :  { %v11062_v17 = vpop.eup %11061  ;;  %4520 = vst.msk [vmem:[%s14092_s11 + $0x28] sm:$0xff] %vm2864_vm2, %v4512_v44  ;;  %v4511_v23 = vmul.f32 %v4490_v18, %v14569_v29 }
0x1ccf   :  { %11075 = vrcp.f32 %v8580_v24  ;;  %8597 = vperm.xlu0 %10917, %v11062_v17   ;;  %v4505_v46 = vpop.permute.xlu0 %4504 }
0x1cd0   :  { %v11064_v12 = vpop.eup %11063  ;;  %4519 = vst.msk [vmem:[%s14092_s11 + $0x20] sm:$0xff] %vm2864_vm2, %v4511_v23  ;;  %v4514_v14 = vmul.f32 %v4505_v46, %v14570_v31 }
0x1cd1   :  { %8592 = vperm.xlu1 %10918, %v11064_v12   ;;  %v4500_v9 = vpop.permute.xlu1 %4499 }
0x1cd2   :  { %v11066_v63 = vpop.eup %11065  ;;  %4522 = vst.msk [vmem:[%s14092_s11 + $0x38] sm:$0xf] %vm2878_vm5, %v4514_v14  ;;  %v4513_v19 = vmul.f32 %v4500_v9, %v14571_v50 }
0x1cd3   :  { %8607 = vperm.xlu0 %10917, %v11066_v63  }
0x1cd4   :  { %v11068_v7 = vpop.eup %11067  ;;  %4521 = vst.msk [vmem:[%s14092_s11 + $0x30] sm:$0xff] %vm2864_vm2, %v4513_v19 }
0x1cd5   :  { %8602 = vperm.xlu1 %10918, %v11068_v7  }
0x1cd6   :  { %v11070_v47 = vpop.eup %11069 }
0x1cd7   :  { %8617 = vperm.xlu0 %10917, %v11070_v47  }
0x1cd8   :  { %v11072_v13 = vpop.eup %11071 }
0x1cd9   :  { %8612 = vperm.xlu1 %10918, %v11072_v13  }
0x1cda   :  { %v11074_v6 = vpop.eup %11073 }
0x1cdb   :  { %8627 = vperm.xlu0 %10917, %v11074_v6  }
0x1cdc   :  { %v11076_v15 = vpop.eup %11075 }
0x1cdd   :  { %8622 = vperm.xlu1 %10918, %v11076_v15  }
0x1d4a   :  { %v8598_v27 = vpop.permute.xlu0 %8597 }
0x1d4b   :  { %v8631_v30 = vmul.f32 %v8598_v27, %v14572_v38 }
0x1d4c   :  { %v8593_v57 = vpop.permute.xlu1 %8592 }
0x1d4d   :  { %9134 = vst.msk [vmem:[%s14092_s11 + $0x48] sm:$0xff] %vm2864_vm2, %v8631_v30  ;;  %v8630_v41 = vmul.f32 %v8593_v57, %v14573_v35 }
0x1d4e   :  { %v8608_v2 = vpop.permute.xlu0 %8607 }
0x1d4f   :  { %9133 = vst.msk [vmem:[%s14092_s11 + $0x40] sm:$0xff] %vm2864_vm2, %v8630_v41  ;;  %v8633_v3 = vmul.f32 %v8608_v2, %v14574_v26 }
0x1d50   :  { %v8603_v55 = vpop.permute.xlu1 %8602 }
0x1d51   :  { %9136 = vst.msk [vmem:[%s14092_s11 + $0x58] sm:$0xff] %vm2864_vm2, %v8633_v3  ;;  %v8632_v40 = vmul.f32 %v8603_v55, %v14575_v61 }
0x1d52   :  { %v8618_v62 = vpop.permute.xlu0 %8617 }
0x1d53   :  { %9135 = vst.msk [vmem:[%s14092_s11 + $0x50] sm:$0xff] %vm2864_vm2, %v8632_v40  ;;  %v8635_v53 = vmul.f32 %v8618_v62, %v14576_v32 }
0x1d54   :  { %v8613_v43 = vpop.permute.xlu1 %8612 }
0x1d55   :  { %9138 = vst.msk [vmem:[%s14092_s11 + $0x68] sm:$0xff] %vm2864_vm2, %v8635_v53  ;;  %v8634_v33 = vmul.f32 %v8613_v43, %v14577_v48 }
0x1d56   :  { %v8628_v42 = vpop.permute.xlu0 %8627 }
0x1d57   :  { %9137 = vst.msk [vmem:[%s14092_s11 + $0x60] sm:$0xff] %vm2864_vm2, %v8634_v33  ;;  %v8637_v28 = vmul.f32 %v8628_v42, %v14578_v59 }
0x1d58   :  { %v8623_v56 = vpop.permute.xlu1 %8622 }
0x1d59   :  { %9140 = vst.msk [vmem:[%s14092_s11 + $0x78] sm:$0xf] %vm2878_vm5, %v8637_v28  ;;  %v8636_v0 = vmul.f32 %v8623_v56, %v14579_v36 }
0x1d5b   :  { %9139 = vst.msk [vmem:[%s14092_s11 + $0x70] sm:$0xff] %vm2864_vm2, %v8636_v0 }

</bundles_post_ra>
